<compile_context>
chip_gen: v7x
topology: tpu7x:2x2x1
jax: 0.10.0
libtpu: 0.0.40
codegen_flags: <defaults>
</compile_context>

<pallas_src>
import jax
import jax.numpy as jnp
from jax.experimental import pallas as pl
from jax.experimental.pallas import tpu as pltpu

# ----------------------------------------------------------------------------
# Fixed geometry (module exercised at 8x8 spatial, as in the reference script)
# ----------------------------------------------------------------------------
H = 8
W = 8
HP, WP = H + 2, W + 2            # zero-padded 10x10 grid for 3x3 convs
PAD_FLAT = 104                   # 10*10 flattened, rounded up to multiple of 8
LPAD = 16                        # halo rows so tap slices stay in-bounds
EXT = LPAD + PAD_FLAT + LPAD     # 136 rows total
TAP_OFFS = tuple((dy - 1) * WP + (dx - 1) for dy in range(3) for dx in range(3))

C1X1_OUT = 512                   # fused 1x1 output channel layout (see header)
B1_LO, B1_HI = 256, 256 + 176    # branch1x1 slice
BP_LO, BP_HI = 432, 432 + 64     # branch_pool slice


# ----------------------------------------------------------------------------
# Kernels
# ----------------------------------------------------------------------------
def _fused_1x1_kernel(x_ref, w_ref, b_ref, m_ref, o_ref):
    # x: (1, EXT, Cin) bf16; w: (Cin, 512) bf16 (BN scale folded); b: (1, 512)
    # f32 (BN shift); m: (EXT, 1) f32 interior mask (zeroes halo + spatial pad).
    acc = jnp.dot(x_ref[0], w_ref[...], preferred_element_type=jnp.float32)
    y = jnp.maximum(acc + b_ref[...], 0.0) * m_ref[...]
    o_ref[0] = y.astype(o_ref.dtype)


def _conv3x3_kernel(x_ref, w_ref, b_ref, m_ref, o_ref):
    # 3x3 conv (stride 1, pad 1) as 9 shifted matmuls over the VMEM tile.
    cout = o_ref.shape[-1]
    acc = jnp.zeros((PAD_FLAT, cout), jnp.float32)
    for t, off in enumerate(TAP_OFFS):
        s = LPAD + off
        acc = acc + jnp.dot(x_ref[0, s:s + PAD_FLAT, :], w_ref[t],
                            preferred_element_type=jnp.float32)
    y = jnp.maximum(acc + b_ref[...], 0.0) * m_ref[LPAD:LPAD + PAD_FLAT, :]
    o_ref[0, 0:LPAD, :] = jnp.zeros((LPAD, cout), o_ref.dtype)
    o_ref[0, LPAD:LPAD + PAD_FLAT, :] = y.astype(o_ref.dtype)
    o_ref[0, LPAD + PAD_FLAT:EXT, :] = jnp.zeros((LPAD, cout), o_ref.dtype)


def _double_conv3x3_kernel(x_ref, w1_ref, b1_ref, w2_ref, b2_ref, m_ref,
                           o_ref, mid_ref):
    # Two chained 3x3 convs; the intermediate stays in VMEM scratch.
    c_mid = w1_ref.shape[-1]
    c_out = o_ref.shape[-1]
    m = m_ref[LPAD:LPAD + PAD_FLAT, :]

    acc1 = jnp.zeros((PAD_FLAT, c_mid), jnp.float32)
    for t, off in enumerate(TAP_OFFS):
        s = LPAD + off
        acc1 = acc1 + jnp.dot(x_ref[0, s:s + PAD_FLAT, :], w1_ref[t],
                              preferred_element_type=jnp.float32)
    y1 = jnp.maximum(acc1 + b1_ref[...], 0.0) * m

    mid_ref[0:LPAD, :] = jnp.zeros((LPAD, c_mid), mid_ref.dtype)
    mid_ref[LPAD:LPAD + PAD_FLAT, :] = y1.astype(mid_ref.dtype)
    mid_ref[LPAD + PAD_FLAT:EXT, :] = jnp.zeros((LPAD, c_mid), mid_ref.dtype)

    acc2 = jnp.zeros((PAD_FLAT, c_out), jnp.float32)
    for t, off in enumerate(TAP_OFFS):
        s = LPAD + off
        acc2 = acc2 + jnp.dot(mid_ref[s:s + PAD_FLAT, :], w2_ref[t],
                              preferred_element_type=jnp.float32)
    y2 = jnp.maximum(acc2 + b2_ref[...], 0.0) * m

    o_ref[0, 0:LPAD, :] = jnp.zeros((LPAD, c_out), o_ref.dtype)
    o_ref[0, LPAD:LPAD + PAD_FLAT, :] = y2.astype(o_ref.dtype)
    o_ref[0, LPAD + PAD_FLAT:EXT, :] = jnp.zeros((LPAD, c_out), o_ref.dtype)


# ----------------------------------------------------------------------------
# pallas_call wrappers
# ----------------------------------------------------------------------------
def _cparams():
    # grid=(N,) -> 2 parallel steps (v7x megacore); VMEM footprint tiny, so no
    # vmem_limit_bytes override (portable to v7x's 64 MiB physical VMEM).
    return pltpu.CompilerParams(dimension_semantics=("parallel",))


def fused_1x1(x, w, shift, mask):
    n, _, cin = x.shape
    cout = w.shape[1]
    ce = pl.CostEstimate(
        flops=int(2 * n * EXT * cin * cout), transcendentals=0,
        bytes_accessed=int(2 * (n * EXT * (cin + cout) + cin * cout)
                           + 4 * (cout + EXT)))
    return pl.pallas_call(
        _fused_1x1_kernel,
        out_shape=jax.ShapeDtypeStruct((n, EXT, cout), x.dtype),
        grid_spec=pltpu.PrefetchScalarGridSpec(
            num_scalar_prefetch=0,
            grid=(n,),
            in_specs=[
                pl.BlockSpec((1, EXT, cin), lambda i: (i, 0, 0)),
                pl.BlockSpec((cin, cout), lambda i: (0, 0)),
                pl.BlockSpec((1, cout), lambda i: (0, 0)),
                pl.BlockSpec((EXT, 1), lambda i: (0, 0)),
            ],
            out_specs=pl.BlockSpec((1, EXT, cout), lambda i: (i, 0, 0)),
        ),
        compiler_params=_cparams(),
        cost_estimate=ce,
    )(x, w, shift.reshape(1, cout), mask)


def conv3x3(x, cblk, w, shift, mask):
    n = x.shape[0]
    _, cin, cout = w.shape
    ce = pl.CostEstimate(
        flops=int(2 * n * 9 * PAD_FLAT * cin * cout), transcendentals=0,
        bytes_accessed=int(2 * (n * EXT * (cin + cout) + 9 * cin * cout)
                           + 4 * (cout + EXT)))
    return pl.pallas_call(
        _conv3x3_kernel,
        out_shape=jax.ShapeDtypeStruct((n, EXT, cout), x.dtype),
        grid_spec=pltpu.PrefetchScalarGridSpec(
            num_scalar_prefetch=0,
            grid=(n,),
            in_specs=[
                # channel-block select (no XLA slice): block cblk of 128 lanes
                pl.BlockSpec((1, EXT, cin), lambda i, _c=cblk: (i, 0, _c)),
                pl.BlockSpec((9, cin, cout), lambda i: (0, 0, 0)),
                pl.BlockSpec((1, cout), lambda i: (0, 0)),
                pl.BlockSpec((EXT, 1), lambda i: (0, 0)),
            ],
            out_specs=pl.BlockSpec((1, EXT, cout), lambda i: (i, 0, 0)),
        ),
        compiler_params=_cparams(),
        cost_estimate=ce,
    )(x, w, shift.reshape(1, cout), mask)


def double_conv3x3(x, cblk, w1, shift1, w2, shift2, mask):
    n = x.shape[0]
    _, cin, cmid = w1.shape
    cout = w2.shape[2]
    ce = pl.CostEstimate(
        flops=int(2 * n * 9 * PAD_FLAT * (cin * cmid + cmid * cout)),
        transcendentals=0,
        bytes_accessed=int(2 * (n * EXT * (cin + cout)
                                + 9 * (cin * cmid + cmid * cout))
                           + 4 * (cmid + cout + EXT)))
    return pl.pallas_call(
        _double_conv3x3_kernel,
        out_shape=jax.ShapeDtypeStruct((n, EXT, cout), x.dtype),
        grid_spec=pltpu.PrefetchScalarGridSpec(
            num_scalar_prefetch=0,
            grid=(n,),
            in_specs=[
                pl.BlockSpec((1, EXT, cin), lambda i, _c=cblk: (i, 0, _c)),
                pl.BlockSpec((9, cin, cmid), lambda i: (0, 0, 0)),
                pl.BlockSpec((1, cmid), lambda i: (0, 0)),
                pl.BlockSpec((9, cmid, cout), lambda i: (0, 0, 0)),
                pl.BlockSpec((1, cout), lambda i: (0, 0)),
                pl.BlockSpec((EXT, 1), lambda i: (0, 0)),
            ],
            out_specs=pl.BlockSpec((1, EXT, cout), lambda i: (i, 0, 0)),
            scratch_shapes=[pltpu.VMEM((EXT, cmid), jnp.bfloat16)],
        ),
        compiler_params=_cparams(),
        cost_estimate=ce,
    )(x, w1, shift1.reshape(1, cmid), w2, shift2.reshape(1, cout), mask)


# ----------------------------------------------------------------------------
# Layout glue (entry / exit only) and the InceptionA / InceptBlock3 forward
# ----------------------------------------------------------------------------
def interior_mask():
    p = jnp.arange(PAD_FLAT)
    yy = p // WP
    xx = p % WP
    inside = (p < HP * WP) & (yy >= 1) & (yy <= H) & (xx >= 1) & (xx <= W)
    m = jnp.zeros((EXT,), jnp.float32).at[LPAD:LPAD + PAD_FLAT].set(
        inside.astype(jnp.float32))
    return m.reshape(EXT, 1)


def to_ext_space(x_nchw, cin_pad):
    n, c, h, w = x_nchw.shape
    assert (h, w) == (H, W)
    x = jnp.transpose(x_nchw, (0, 2, 3, 1))                         # NHWC
    x = jnp.pad(x, ((0, 0), (1, 1), (1, 1), (0, cin_pad - c)))      # 10x10, Cpad
    x = x.reshape(n, HP * WP, cin_pad)
    x = jnp.pad(x, ((0, 0), (LPAD, EXT - LPAD - HP * WP), (0, 0)))  # (N,EXT,Cpad)
    return x.astype(jnp.bfloat16)


def from_ext_space(x_ext):
    n, _, c = x_ext.shape
    x = x_ext[:, LPAD:LPAD + HP * WP, :].reshape(n, HP, WP, c)
    x = x[:, 1:1 + H, 1:1 + W, :]
    return jnp.transpose(x, (0, 3, 1, 2)).astype(jnp.float32)       # NCHW


def inception_a(x_ext, p, mask):
    y1 = fused_1x1(x_ext, p["w1"], p["s1"], mask)                   # (N,EXT,512)
    b5 = conv3x3(y1, 0, p["w5"], p["s5"], mask)                     # (N,EXT,160)
    b3 = double_conv3x3(y1, 1, p["w3a"], p["s3a"],
                        p["w3b"], p["s3b"], mask)                   # (N,EXT,112)
    b1 = y1[:, :, B1_LO:B1_HI]                                      # (N,EXT,176)
    bp = y1[:, :, BP_LO:BP_HI]                                      # (N,EXT, 64)
    # torch.cat([branch1x1, branch5x5, branch3x3dbl, branch_pool], dim=1)
    return jnp.concatenate([b1, b5, b3, bp], axis=-1)               # (N,EXT,512)


def incept_block3(x_nchw, params_a, params_b):
    mask = interior_mask()
    x = to_ext_space(x_nchw, 512)      # pad 502 -> 512 channels, zero spatial pad
    x = inception_a(x, params_a, mask)
    x = inception_a(x, params_b, mask)
    return from_ext_space(x)


# ----------------------------------------------------------------------------
# Parameter construction (deterministic, synthetic, BN folded, fused & padded)
# ----------------------------------------------------------------------------
def _fold_conv_bn(key, cin, cout, ksize):
    k1, k2, k3, k4, k5 = jax.random.split(key, 5)
    w = jax.random.normal(k1, (cout, cin, ksize, ksize), jnp.float32) * 0.05
    gamma = jax.random.uniform(k2, (cout,), jnp.float32, 0.5, 1.5)
    beta = jax.random.normal(k3, (cout,), jnp.float32) * 0.1
    rmean = jax.random.normal(k4, (cout,), jnp.float32) * 0.1
    rvar = jax.random.uniform(k5, (cout,), jnp.float32, 0.5, 1.5)
    eps = 1e-3
    scale = gamma / jnp.sqrt(rvar + eps)
    shift = beta - rmean * scale
    if ksize == 1:
        w2d = w[:, :, 0, 0].T * scale[None, :]                      # (cin, cout)
        return w2d, shift
    # (cout,cin,kh,kw) -> (kh,kw,cin,cout) -> (9,cin,cout); tap-major order.
    w9 = jnp.transpose(w, (2, 3, 1, 0)).reshape(ksize * ksize, cin, cout)
    return w9 * scale[None, None, :], shift


def make_inception_params(key, in_c, b1, b5_1, b5_2, b3_1, b3_2, b3_3, bp,
                          cin_pad=512):
    assert b1 == B1_HI - B1_LO and bp == BP_HI - BP_LO
    assert b5_1 <= 128 and b3_1 <= 128
    keys = jax.random.split(key, 7)
    w_b1, s_b1 = _fold_conv_bn(keys[0], in_c, b1, 1)
    w_51, s_51 = _fold_conv_bn(keys[1], in_c, b5_1, 1)
    w_52, s_52 = _fold_conv_bn(keys[2], b5_1, b5_2, 3)
    w_31, s_31 = _fold_conv_bn(keys[3], in_c, b3_1, 1)
    w_32, s_32 = _fold_conv_bn(keys[4], b3_1, b3_2, 3)
    w_33, s_33 = _fold_conv_bn(keys[5], b3_2, b3_3, 3)
    w_bp, s_bp = _fold_conv_bn(keys[6], in_c, bp, 1)

    # Fused 1x1 weight (cin_pad, 512): [b5_1|0]=128 | [b3_1|0]=128 | b1 | bp | 0
    w1 = jnp.zeros((cin_pad, C1X1_OUT), jnp.float32)
    s1 = jnp.zeros((C1X1_OUT,), jnp.float32)
    w1 = w1.at[:in_c, 0:b5_1].set(w_51);            s1 = s1.at[0:b5_1].set(s_51)
    w1 = w1.at[:in_c, 128:128 + b3_1].set(w_31);    s1 = s1.at[128:128 + b3_1].set(s_31)
    w1 = w1.at[:in_c, B1_LO:B1_HI].set(w_b1);       s1 = s1.at[B1_LO:B1_HI].set(s_b1)
    w1 = w1.at[:in_c, BP_LO:BP_HI].set(w_bp);       s1 = s1.at[BP_LO:BP_HI].set(s_bp)

    # 3x3 weights with K padded to 128 (zero rows for the padded channels).
    w5 = jnp.zeros((9, 128, b5_2), jnp.float32).at[:, :b5_1, :].set(w_52)
    w3a = jnp.zeros((9, 128, b3_2), jnp.float32).at[:, :b3_1, :].set(w_32)

    bf = jnp.bfloat16
    return {
        "w1": w1.astype(bf), "s1": s1,
        "w5": w5.astype(bf), "s5": s_52,
        "w3a": w3a.astype(bf), "s3a": s_32,
        "w3b": w_33.astype(bf), "s3b": s_33,
    }


# ----------------------------------------------------------------------------
if __name__ == "__main__":
    key = jax.random.PRNGKey(0)
    kx, ka, kb = jax.random.split(key, 3)

    # Channels are fixed at 502 by the module; small spatial/batch.
    N, C = 2, 502
    x = jax.random.normal(kx, (N, C, H, W), jnp.float32)

    params_a = make_inception_params(
        ka, in_c=502, b1=176, b5_1=96, b5_2=160, b3_1=80, b3_2=112, b3_3=112, bp=64)
    params_b = make_inception_params(
        kb, in_c=512, b1=176, b5_1=96, b5_2=160, b3_1=96, b3_2=112, b3_3=112, bp=64)

    fwd = jax.jit(incept_block3)
    out = fwd(x, params_a, params_b)
    jax.block_until_ready(out)

    assert out.shape == (N, 512, H, W), out.shape
    assert out.dtype == jnp.float32
    assert bool(jnp.all(out >= 0.0))  # ReLU outputs
    print("KERNEL_OK")
</pallas_src>

<mosaic_0001>
module attributes {stable_mosaic.version = 11 : i64} {
  func.func @_fused_1x1_kernel(%arg0: i32, %arg1: memref<1x136x512xbf16, #tpu.memory_space<vmem>>, %arg2: memref<512x512xbf16, #tpu.memory_space<vmem>>, %arg3: memref<1x512xf32, #tpu.memory_space<vmem>>, %arg4: memref<136x1xf32, #tpu.memory_space<vmem>>, %arg5: memref<1x136x512xbf16, #tpu.memory_space<vmem>>) attributes {dimension_semantics = [#tpu.dimension_semantics<parallel>], iteration_bounds = array<i64: 2>, scalar_prefetch = 0 : i64, scratch_operands = 0 : i64, tpu.core_type = #tpu.core_type<tc>, window_params = [{transform_indices = @transform_0, window_bounds = array<i64: 1, 136, 512>}, {pipeline_mode = #tpu.pipeline_mode<synchronous>, transform_indices = @transform_1, window_bounds = array<i64: 512, 512>}, {pipeline_mode = #tpu.pipeline_mode<synchronous>, transform_indices = @transform_2, window_bounds = array<i64: 1, 512>}, {pipeline_mode = #tpu.pipeline_mode<synchronous>, transform_indices = @transform_3, window_bounds = array<i64: 136, 1>}, {transform_indices = @transform_4, window_bounds = array<i64: 1, 136, 512>}]} {
    %c0 = arith.constant 0 : index
    %c0_0 = arith.constant 0 : index
    %c0_1 = arith.constant 0 : index
    %0 = vector.load %arg1[%c0, %c0_0, %c0_1] : memref<1x136x512xbf16, #tpu.memory_space<vmem>>, vector<1x136x512xbf16>
    %1 = vector.shape_cast %0 : vector<1x136x512xbf16> to vector<136x512xbf16>
    %c0_2 = arith.constant 0 : index
    %c0_3 = arith.constant 0 : index
    %2 = vector.load %arg2[%c0_2, %c0_3] : memref<512x512xbf16, #tpu.memory_space<vmem>>, vector<512x512xbf16>
    %cst = arith.constant dense<0.000000e+00> : vector<136x512xf32>
    %3 = tpu.matmul %1, %2, %cst {dimension_numbers = #tpu.dot_dimension_numbers<[1], [0], [0], [1], [0, 0, 1, 1], [], []>} : vector<136x512xbf16>, vector<512x512xbf16>, vector<136x512xf32> -> vector<136x512xf32>
    %c0_4 = arith.constant 0 : index
    %c0_5 = arith.constant 0 : index
    %4 = vector.load %arg3[%c0_4, %c0_5] : memref<1x512xf32, #tpu.memory_space<vmem>>, vector<1x512xf32>
    %5 = vector.broadcast %4 : vector<1x512xf32> to vector<136x512xf32>
    %6 = arith.addf %3, %5 : vector<136x512xf32>
    %cst_6 = arith.constant 0.000000e+00 : f32
    %7 = vector.broadcast %cst_6 : f32 to vector<136x512xf32>
    %8 = arith.maximumf %6, %7 : vector<136x512xf32>
    %c0_7 = arith.constant 0 : index
    %c0_8 = arith.constant 0 : index
    %9 = vector.load %arg4[%c0_7, %c0_8] : memref<136x1xf32, #tpu.memory_space<vmem>>, vector<136x1xf32>
    %10 = vector.broadcast %9 : vector<136x1xf32> to vector<136x512xf32>
    %11 = arith.mulf %8, %10 : vector<136x512xf32>
    %12 = arith.truncf %11 : vector<136x512xf32> to vector<136x512xbf16>
    %c0_9 = arith.constant 0 : index
    %c0_10 = arith.constant 0 : index
    %c0_11 = arith.constant 0 : index
    %13 = vector.load %arg5[%c0_9, %c0_10, %c0_11] : memref<1x136x512xbf16, #tpu.memory_space<vmem>>, vector<1x136x512xbf16>
    %14 = vector.shape_cast %13 : vector<1x136x512xbf16> to vector<136x512xbf16>
    %15 = vector.shape_cast %12 : vector<136x512xbf16> to vector<1x136x512xbf16>
    tpu.vector_store %arg5[%c0_9, %c0_10, %c0_11], %15 {strides = array<i32>} : memref<1x136x512xbf16, #tpu.memory_space<vmem>>, vector<1x136x512xbf16>,
    return
  }
  func.func @transform_0(%arg0: i32) -> (i32, i32, i32) {
    %c0_i32 = arith.constant 0 : i32
    %c0_i32_0 = arith.constant 0 : i32
    %c0_i32_1 = arith.constant 0 : i32
    return %arg0, %c0_i32, %c0_i32_0 : i32, i32, i32
  }
  func.func @transform_1(%arg0: i32) -> (i32, i32) {
    %c0_i32 = arith.constant 0 : i32
    %c0_i32_0 = arith.constant 0 : i32
    %c0_i32_1 = arith.constant 0 : i32
    return %c0_i32, %c0_i32_0 : i32, i32
  }
  func.func @transform_2(%arg0: i32) -> (i32, i32) {
    %c0_i32 = arith.constant 0 : i32
    %c0_i32_0 = arith.constant 0 : i32
    %c0_i32_1 = arith.constant 0 : i32
    return %c0_i32, %c0_i32_0 : i32, i32
  }
  func.func @transform_3(%arg0: i32) -> (i32, i32) {
    %c0_i32 = arith.constant 0 : i32
    %c0_i32_0 = arith.constant 0 : i32
    %c0_i32_1 = arith.constant 0 : i32
    return %c0_i32, %c0_i32_0 : i32, i32
  }
  func.func @transform_4(%arg0: i32) -> (i32, i32, i32) {
    %c0_i32 = arith.constant 0 : i32
    %c0_i32_0 = arith.constant 0 : i32
    %c0_i32_1 = arith.constant 0 : i32
    return %arg0, %c0_i32, %c0_i32_0 : i32, i32, i32
  }
}

module attributes {stable_mosaic.version = 11 : i64} {
  func.func @_conv3x3_kernel(%arg0: i32, %arg1: memref<1x136x128xbf16, #tpu.memory_space<vmem>>, %arg2: memref<9x128x160xbf16, #tpu.memory_space<vmem>>, %arg3: memref<1x160xf32, #tpu.memory_space<vmem>>, %arg4: memref<136x1xf32, #tpu.memory_space<vmem>>, %arg5: memref<1x136x160xbf16, #tpu.memory_space<vmem>>) attributes {dimension_semantics = [#tpu.dimension_semantics<parallel>], iteration_bounds = array<i64: 2>, scalar_prefetch = 0 : i64, scratch_operands = 0 : i64, tpu.core_type = #tpu.core_type<tc>, window_params = [{transform_indices = @transform_0, window_bounds = array<i64: 1, 136, 128>}, {pipeline_mode = #tpu.pipeline_mode<synchronous>, transform_indices = @transform_1, window_bounds = array<i64: 9, 128, 160>}, {pipeline_mode = #tpu.pipeline_mode<synchronous>, transform_indices = @transform_2, window_bounds = array<i64: 1, 160>}, {pipeline_mode = #tpu.pipeline_mode<synchronous>, transform_indices = @transform_3, window_bounds = array<i64: 136, 1>}, {transform_indices = @transform_4, window_bounds = array<i64: 1, 136, 160>}]} {
    %cst = arith.constant 0.000000e+00 : f32
    %0 = vector.broadcast %cst : f32 to vector<104x160xf32>
    %c0 = arith.constant 0 : index
    %c5 = arith.constant 5 : index
    %c0_0 = arith.constant 0 : index
    %1 = vector.load %arg1[%c0, %c5, %c0_0] : memref<1x136x128xbf16, #tpu.memory_space<vmem>>, vector<1x104x128xbf16>
    %2 = vector.shape_cast %1 : vector<1x104x128xbf16> to vector<104x128xbf16>
    %c0_1 = arith.constant 0 : index
    %c0_2 = arith.constant 0 : index
    %c0_3 = arith.constant 0 : index
    %3 = vector.load %arg2[%c0_1, %c0_2, %c0_3] : memref<9x128x160xbf16, #tpu.memory_space<vmem>>, vector<1x128x160xbf16>
    %4 = vector.shape_cast %3 : vector<1x128x160xbf16> to vector<128x160xbf16>
    %cst_4 = arith.constant dense<0.000000e+00> : vector<104x160xf32>
    %5 = tpu.matmul %2, %4, %cst_4 {dimension_numbers = #tpu.dot_dimension_numbers<[1], [0], [0], [1], [0, 0, 1, 1], [], []>} : vector<104x128xbf16>, vector<128x160xbf16>, vector<104x160xf32> -> vector<104x160xf32>
    %6 = arith.addf %0, %5 : vector<104x160xf32>
    %c0_5 = arith.constant 0 : index
    %c6 = arith.constant 6 : index
    %c0_6 = arith.constant 0 : index
    %7 = vector.load %arg1[%c0_5, %c6, %c0_6] : memref<1x136x128xbf16, #tpu.memory_space<vmem>>, vector<1x104x128xbf16>
    %8 = vector.shape_cast %7 : vector<1x104x128xbf16> to vector<104x128xbf16>
    %c1 = arith.constant 1 : index
    %c0_7 = arith.constant 0 : index
    %c0_8 = arith.constant 0 : index
    %9 = vector.load %arg2[%c1, %c0_7, %c0_8] : memref<9x128x160xbf16, #tpu.memory_space<vmem>>, vector<1x128x160xbf16>
    %10 = vector.shape_cast %9 : vector<1x128x160xbf16> to vector<128x160xbf16>
    %cst_9 = arith.constant dense<0.000000e+00> : vector<104x160xf32>
    %11 = tpu.matmul %8, %10, %cst_9 {dimension_numbers = #tpu.dot_dimension_numbers<[1], [0], [0], [1], [0, 0, 1, 1], [], []>} : vector<104x128xbf16>, vector<128x160xbf16>, vector<104x160xf32> -> vector<104x160xf32>
    %12 = arith.addf %6, %11 : vector<104x160xf32>
    %c0_10 = arith.constant 0 : index
    %c7 = arith.constant 7 : index
    %c0_11 = arith.constant 0 : index
    %13 = vector.load %arg1[%c0_10, %c7, %c0_11] : memref<1x136x128xbf16, #tpu.memory_space<vmem>>, vector<1x104x128xbf16>
    %14 = vector.shape_cast %13 : vector<1x104x128xbf16> to vector<104x128xbf16>
    %c2 = arith.constant 2 : index
    %c0_12 = arith.constant 0 : index
    %c0_13 = arith.constant 0 : index
    %15 = vector.load %arg2[%c2, %c0_12, %c0_13] : memref<9x128x160xbf16, #tpu.memory_space<vmem>>, vector<1x128x160xbf16>
    %16 = vector.shape_cast %15 : vector<1x128x160xbf16> to vector<128x160xbf16>
    %cst_14 = arith.constant dense<0.000000e+00> : vector<104x160xf32>
    %17 = tpu.matmul %14, %16, %cst_14 {dimension_numbers = #tpu.dot_dimension_numbers<[1], [0], [0], [1], [0, 0, 1, 1], [], []>} : vector<104x128xbf16>, vector<128x160xbf16>, vector<104x160xf32> -> vector<104x160xf32>
    %18 = arith.addf %12, %17 : vector<104x160xf32>
    %c0_15 = arith.constant 0 : index
    %c15 = arith.constant 15 : index
    %c0_16 = arith.constant 0 : index
    %19 = vector.load %arg1[%c0_15, %c15, %c0_16] : memref<1x136x128xbf16, #tpu.memory_space<vmem>>, vector<1x104x128xbf16>
    %20 = vector.shape_cast %19 : vector<1x104x128xbf16> to vector<104x128xbf16>
    %c3 = arith.constant 3 : index
    %c0_17 = arith.constant 0 : index
    %c0_18 = arith.constant 0 : index
    %21 = vector.load %arg2[%c3, %c0_17, %c0_18] : memref<9x128x160xbf16, #tpu.memory_space<vmem>>, vector<1x128x160xbf16>
    %22 = vector.shape_cast %21 : vector<1x128x160xbf16> to vector<128x160xbf16>
    %cst_19 = arith.constant dense<0.000000e+00> : vector<104x160xf32>
    %23 = tpu.matmul %20, %22, %cst_19 {dimension_numbers = #tpu.dot_dimension_numbers<[1], [0], [0], [1], [0, 0, 1, 1], [], []>} : vector<104x128xbf16>, vector<128x160xbf16>, vector<104x160xf32> -> vector<104x160xf32>
    %24 = arith.addf %18, %23 : vector<104x160xf32>
    %c0_20 = arith.constant 0 : index
    %c16 = arith.constant 16 : index
    %c0_21 = arith.constant 0 : index
    %25 = vector.load %arg1[%c0_20, %c16, %c0_21] : memref<1x136x128xbf16, #tpu.memory_space<vmem>>, vector<1x104x128xbf16>
    %26 = vector.shape_cast %25 : vector<1x104x128xbf16> to vector<104x128xbf16>
    %c4 = arith.constant 4 : index
    %c0_22 = arith.constant 0 : index
    %c0_23 = arith.constant 0 : index
    %27 = vector.load %arg2[%c4, %c0_22, %c0_23] : memref<9x128x160xbf16, #tpu.memory_space<vmem>>, vector<1x128x160xbf16>
    %28 = vector.shape_cast %27 : vector<1x128x160xbf16> to vector<128x160xbf16>
    %cst_24 = arith.constant dense<0.000000e+00> : vector<104x160xf32>
    %29 = tpu.matmul %26, %28, %cst_24 {dimension_numbers = #tpu.dot_dimension_numbers<[1], [0], [0], [1], [0, 0, 1, 1], [], []>} : vector<104x128xbf16>, vector<128x160xbf16>, vector<104x160xf32> -> vector<104x160xf32>
    %30 = arith.addf %24, %29 : vector<104x160xf32>
    %c0_25 = arith.constant 0 : index
    %c17 = arith.constant 17 : index
    %c0_26 = arith.constant 0 : index
    %31 = vector.load %arg1[%c0_25, %c17, %c0_26] : memref<1x136x128xbf16, #tpu.memory_space<vmem>>, vector<1x104x128xbf16>
    %32 = vector.shape_cast %31 : vector<1x104x128xbf16> to vector<104x128xbf16>
    %c5_27 = arith.constant 5 : index
    %c0_28 = arith.constant 0 : index
    %c0_29 = arith.constant 0 : index
    %33 = vector.load %arg2[%c5_27, %c0_28, %c0_29] : memref<9x128x160xbf16, #tpu.memory_space<vmem>>, vector<1x128x160xbf16>
    %34 = vector.shape_cast %33 : vector<1x128x160xbf16> to vector<128x160xbf16>
    %cst_30 = arith.constant dense<0.000000e+00> : vector<104x160xf32>
    %35 = tpu.matmul %32, %34, %cst_30 {dimension_numbers = #tpu.dot_dimension_numbers<[1], [0], [0], [1], [0, 0, 1, 1], [], []>} : vector<104x128xbf16>, vector<128x160xbf16>, vector<104x160xf32> -> vector<104x160xf32>
    %36 = arith.addf %30, %35 : vector<104x160xf32>
    %c0_31 = arith.constant 0 : index
    %c25 = arith.constant 25 : index
    %c0_32 = arith.constant 0 : index
    %37 = vector.load %arg1[%c0_31, %c25, %c0_32] : memref<1x136x128xbf16, #tpu.memory_space<vmem>>, vector<1x104x128xbf16>
    %38 = vector.shape_cast %37 : vector<1x104x128xbf16> to vector<104x128xbf16>
    %c6_33 = arith.constant 6 : index
    %c0_34 = arith.constant 0 : index
    %c0_35 = arith.constant 0 : index
    %39 = vector.load %arg2[%c6_33, %c0_34, %c0_35] : memref<9x128x160xbf16, #tpu.memory_space<vmem>>, vector<1x128x160xbf16>
    %40 = vector.shape_cast %39 : vector<1x128x160xbf16> to vector<128x160xbf16>
    %cst_36 = arith.constant dense<0.000000e+00> : vector<104x160xf32>
    %41 = tpu.matmul %38, %40, %cst_36 {dimension_numbers = #tpu.dot_dimension_numbers<[1], [0], [0], [1], [0, 0, 1, 1], [], []>} : vector<104x128xbf16>, vector<128x160xbf16>, vector<104x160xf32> -> vector<104x160xf32>
    %42 = arith.addf %36, %41 : vector<104x160xf32>
    %c0_37 = arith.constant 0 : index
    %c26 = arith.constant 26 : index
    %c0_38 = arith.constant 0 : index
    %43 = vector.load %arg1[%c0_37, %c26, %c0_38] : memref<1x136x128xbf16, #tpu.memory_space<vmem>>, vector<1x104x128xbf16>
    %44 = vector.shape_cast %43 : vector<1x104x128xbf16> to vector<104x128xbf16>
    %c7_39 = arith.constant 7 : index
    %c0_40 = arith.constant 0 : index
    %c0_41 = arith.constant 0 : index
    %45 = vector.load %arg2[%c7_39, %c0_40, %c0_41] : memref<9x128x160xbf16, #tpu.memory_space<vmem>>, vector<1x128x160xbf16>
    %46 = vector.shape_cast %45 : vector<1x128x160xbf16> to vector<128x160xbf16>
    %cst_42 = arith.constant dense<0.000000e+00> : vector<104x160xf32>
    %47 = tpu.matmul %44, %46, %cst_42 {dimension_numbers = #tpu.dot_dimension_numbers<[1], [0], [0], [1], [0, 0, 1, 1], [], []>} : vector<104x128xbf16>, vector<128x160xbf16>, vector<104x160xf32> -> vector<104x160xf32>
    %48 = arith.addf %42, %47 : vector<104x160xf32>
    %c0_43 = arith.constant 0 : index
    %c27 = arith.constant 27 : index
    %c0_44 = arith.constant 0 : index
    %49 = vector.load %arg1[%c0_43, %c27, %c0_44] : memref<1x136x128xbf16, #tpu.memory_space<vmem>>, vector<1x104x128xbf16>
    %50 = vector.shape_cast %49 : vector<1x104x128xbf16> to vector<104x128xbf16>
    %c8 = arith.constant 8 : index
    %c0_45 = arith.constant 0 : index
    %c0_46 = arith.constant 0 : index
    %51 = vector.load %arg2[%c8, %c0_45, %c0_46] : memref<9x128x160xbf16, #tpu.memory_space<vmem>>, vector<1x128x160xbf16>
    %52 = vector.shape_cast %51 : vector<1x128x160xbf16> to vector<128x160xbf16>
    %cst_47 = arith.constant dense<0.000000e+00> : vector<104x160xf32>
    %53 = tpu.matmul %50, %52, %cst_47 {dimension_numbers = #tpu.dot_dimension_numbers<[1], [0], [0], [1], [0, 0, 1, 1], [], []>} : vector<104x128xbf16>, vector<128x160xbf16>, vector<104x160xf32> -> vector<104x160xf32>
    %54 = arith.addf %48, %53 : vector<104x160xf32>
    %c0_48 = arith.constant 0 : index
    %c0_49 = arith.constant 0 : index
    %55 = vector.load %arg3[%c0_48, %c0_49] : memref<1x160xf32, #tpu.memory_space<vmem>>, vector<1x160xf32>
    %56 = vector.broadcast %55 : vector<1x160xf32> to vector<104x160xf32>
    %57 = arith.addf %54, %56 : vector<104x160xf32>
    %cst_50 = arith.constant 0.000000e+00 : f32
    %58 = vector.broadcast %cst_50 : f32 to vector<104x160xf32>
    %59 = arith.maximumf %57, %58 : vector<104x160xf32>
    %c16_51 = arith.constant 16 : index
    %c0_52 = arith.constant 0 : index
    %60 = vector.load %arg4[%c16_51, %c0_52] : memref<136x1xf32, #tpu.memory_space<vmem>>, vector<104x1xf32>
    %61 = vector.broadcast %60 : vector<104x1xf32> to vector<104x160xf32>
    %62 = arith.mulf %59, %61 : vector<104x160xf32>
    %cst_53 = arith.constant 0.000000e+00 : bf16
    %63 = vector.broadcast %cst_53 : bf16 to vector<16x160xbf16>
    %c0_54 = arith.constant 0 : index
    %c0_55 = arith.constant 0 : index
    %c0_56 = arith.constant 0 : index
    %64 = vector.load %arg5[%c0_54, %c0_55, %c0_56] : memref<1x136x160xbf16, #tpu.memory_space<vmem>>, vector<1x16x160xbf16>
    %65 = vector.shape_cast %64 : vector<1x16x160xbf16> to vector<16x160xbf16>
    %66 = vector.shape_cast %63 : vector<16x160xbf16> to vector<1x16x160xbf16>
    tpu.vector_store %arg5[%c0_54, %c0_55, %c0_56], %66 {strides = array<i32>} : memref<1x136x160xbf16, #tpu.memory_space<vmem>>, vector<1x16x160xbf16>,
    %67 = arith.truncf %62 : vector<104x160xf32> to vector<104x160xbf16>
    %c0_57 = arith.constant 0 : index
    %c16_58 = arith.constant 16 : index
    %c0_59 = arith.constant 0 : index
    %68 = vector.load %arg5[%c0_57, %c16_58, %c0_59] : memref<1x136x160xbf16, #tpu.memory_space<vmem>>, vector<1x104x160xbf16>
    %69 = vector.shape_cast %68 : vector<1x104x160xbf16> to vector<104x160xbf16>
    %70 = vector.shape_cast %67 : vector<104x160xbf16> to vector<1x104x160xbf16>
    tpu.vector_store %arg5[%c0_57, %c16_58, %c0_59], %70 {strides = array<i32>} : memref<1x136x160xbf16, #tpu.memory_space<vmem>>, vector<1x104x160xbf16>,
    %cst_60 = arith.constant 0.000000e+00 : bf16
    %71 = vector.broadcast %cst_60 : bf16 to vector<16x160xbf16>
    %c0_61 = arith.constant 0 : index
    %c120 = arith.constant 120 : index
    %c0_62 = arith.constant 0 : index
    %72 = vector.load %arg5[%c0_61, %c120, %c0_62] : memref<1x136x160xbf16, #tpu.memory_space<vmem>>, vector<1x16x160xbf16>
    %73 = vector.shape_cast %72 : vector<1x16x160xbf16> to vector<16x160xbf16>
    %74 = vector.shape_cast %71 : vector<16x160xbf16> to vector<1x16x160xbf16>
    tpu.vector_store %arg5[%c0_61, %c120, %c0_62], %74 {strides = array<i32>} : memref<1x136x160xbf16, #tpu.memory_space<vmem>>, vector<1x16x160xbf16>,
    return
  }
  func.func @transform_0(%arg0: i32) -> (i32, i32, i32) {
    %c0_i32 = arith.constant 0 : i32
    %c0_i32_0 = arith.constant 0 : i32
    %c0_i32_1 = arith.constant 0 : i32
    return %arg0, %c0_i32, %c0_i32_0 : i32, i32, i32
  }
  func.func @transform_1(%arg0: i32) -> (i32, i32, i32) {
    %c0_i32 = arith.constant 0 : i32
    %c0_i32_0 = arith.constant 0 : i32
    %c0_i32_1 = arith.constant 0 : i32
    %c0_i32_2 = arith.constant 0 : i32
    return %c0_i32, %c0_i32_0, %c0_i32_1 : i32, i32, i32
  }
  func.func @transform_2(%arg0: i32) -> (i32, i32) {
    %c0_i32 = arith.constant 0 : i32
    %c0_i32_0 = arith.constant 0 : i32
    %c0_i32_1 = arith.constant 0 : i32
    return %c0_i32, %c0_i32_0 : i32, i32
  }
  func.func @transform_3(%arg0: i32) -> (i32, i32) {
    %c0_i32 = arith.constant 0 : i32
    %c0_i32_0 = arith.constant 0 : i32
    %c0_i32_1 = arith.constant 0 : i32
    return %c0_i32, %c0_i32_0 : i32, i32
  }
  func.func @transform_4(%arg0: i32) -> (i32, i32, i32) {
    %c0_i32 = arith.constant 0 : i32
    %c0_i32_0 = arith.constant 0 : i32
    %c0_i32_1 = arith.constant 0 : i32
    return %arg0, %c0_i32, %c0_i32_0 : i32, i32, i32
  }
}

module attributes {stable_mosaic.version = 11 : i64} {
  func.func @_double_conv3x3_kernel(%arg0: i32, %arg1: memref<1x136x128xbf16, #tpu.memory_space<vmem>>, %arg2: memref<9x128x112xbf16, #tpu.memory_space<vmem>>, %arg3: memref<1x112xf32, #tpu.memory_space<vmem>>, %arg4: memref<9x112x112xbf16, #tpu.memory_space<vmem>>, %arg5: memref<1x112xf32, #tpu.memory_space<vmem>>, %arg6: memref<136x1xf32, #tpu.memory_space<vmem>>, %arg7: memref<1x136x112xbf16, #tpu.memory_space<vmem>>, %arg8: memref<136x112xbf16, #tpu.memory_space<vmem>>) attributes {dimension_semantics = [#tpu.dimension_semantics<parallel>], iteration_bounds = array<i64: 2>, scalar_prefetch = 0 : i64, scratch_operands = 1 : i64, tpu.core_type = #tpu.core_type<tc>, window_params = [{transform_indices = @transform_0, window_bounds = array<i64: 1, 136, 128>}, {pipeline_mode = #tpu.pipeline_mode<synchronous>, transform_indices = @transform_1, window_bounds = array<i64: 9, 128, 112>}, {pipeline_mode = #tpu.pipeline_mode<synchronous>, transform_indices = @transform_2, window_bounds = array<i64: 1, 112>}, {pipeline_mode = #tpu.pipeline_mode<synchronous>, transform_indices = @transform_3, window_bounds = array<i64: 9, 112, 112>}, {pipeline_mode = #tpu.pipeline_mode<synchronous>, transform_indices = @transform_4, window_bounds = array<i64: 1, 112>}, {pipeline_mode = #tpu.pipeline_mode<synchronous>, transform_indices = @transform_5, window_bounds = array<i64: 136, 1>}, {transform_indices = @transform_6, window_bounds = array<i64: 1, 136, 112>}]} {
    %c16 = arith.constant 16 : index
    %c0 = arith.constant 0 : index
    %0 = vector.load %arg6[%c16, %c0] : memref<136x1xf32, #tpu.memory_space<vmem>>, vector<104x1xf32>
    %cst = arith.constant 0.000000e+00 : f32
    %1 = vector.broadcast %cst : f32 to vector<104x112xf32>
    %c0_0 = arith.constant 0 : index
    %c5 = arith.constant 5 : index
    %c0_1 = arith.constant 0 : index
    %2 = vector.load %arg1[%c0_0, %c5, %c0_1] : memref<1x136x128xbf16, #tpu.memory_space<vmem>>, vector<1x104x128xbf16>
    %3 = vector.shape_cast %2 : vector<1x104x128xbf16> to vector<104x128xbf16>
    %c0_2 = arith.constant 0 : index
    %c0_3 = arith.constant 0 : index
    %c0_4 = arith.constant 0 : index
    %4 = vector.load %arg2[%c0_2, %c0_3, %c0_4] : memref<9x128x112xbf16, #tpu.memory_space<vmem>>, vector<1x128x112xbf16>
    %5 = vector.shape_cast %4 : vector<1x128x112xbf16> to vector<128x112xbf16>
    %cst_5 = arith.constant dense<0.000000e+00> : vector<104x112xf32>
    %6 = tpu.matmul %3, %5, %cst_5 {dimension_numbers = #tpu.dot_dimension_numbers<[1], [0], [0], [1], [0, 0, 1, 1], [], []>} : vector<104x128xbf16>, vector<128x112xbf16>, vector<104x112xf32> -> vector<104x112xf32>
    %7 = arith.addf %1, %6 : vector<104x112xf32>
    %c0_6 = arith.constant 0 : index
    %c6 = arith.constant 6 : index
    %c0_7 = arith.constant 0 : index
    %8 = vector.load %arg1[%c0_6, %c6, %c0_7] : memref<1x136x128xbf16, #tpu.memory_space<vmem>>, vector<1x104x128xbf16>
    %9 = vector.shape_cast %8 : vector<1x104x128xbf16> to vector<104x128xbf16>
    %c1 = arith.constant 1 : index
    %c0_8 = arith.constant 0 : index
    %c0_9 = arith.constant 0 : index
    %10 = vector.load %arg2[%c1, %c0_8, %c0_9] : memref<9x128x112xbf16, #tpu.memory_space<vmem>>, vector<1x128x112xbf16>
    %11 = vector.shape_cast %10 : vector<1x128x112xbf16> to vector<128x112xbf16>
    %cst_10 = arith.constant dense<0.000000e+00> : vector<104x112xf32>
    %12 = tpu.matmul %9, %11, %cst_10 {dimension_numbers = #tpu.dot_dimension_numbers<[1], [0], [0], [1], [0, 0, 1, 1], [], []>} : vector<104x128xbf16>, vector<128x112xbf16>, vector<104x112xf32> -> vector<104x112xf32>
    %13 = arith.addf %7, %12 : vector<104x112xf32>
    %c0_11 = arith.constant 0 : index
    %c7 = arith.constant 7 : index
    %c0_12 = arith.constant 0 : index
    %14 = vector.load %arg1[%c0_11, %c7, %c0_12] : memref<1x136x128xbf16, #tpu.memory_space<vmem>>, vector<1x104x128xbf16>
    %15 = vector.shape_cast %14 : vector<1x104x128xbf16> to vector<104x128xbf16>
    %c2 = arith.constant 2 : index
    %c0_13 = arith.constant 0 : index
    %c0_14 = arith.constant 0 : index
    %16 = vector.load %arg2[%c2, %c0_13, %c0_14] : memref<9x128x112xbf16, #tpu.memory_space<vmem>>, vector<1x128x112xbf16>
    %17 = vector.shape_cast %16 : vector<1x128x112xbf16> to vector<128x112xbf16>
    %cst_15 = arith.constant dense<0.000000e+00> : vector<104x112xf32>
    %18 = tpu.matmul %15, %17, %cst_15 {dimension_numbers = #tpu.dot_dimension_numbers<[1], [0], [0], [1], [0, 0, 1, 1], [], []>} : vector<104x128xbf16>, vector<128x112xbf16>, vector<104x112xf32> -> vector<104x112xf32>
    %19 = arith.addf %13, %18 : vector<104x112xf32>
    %c0_16 = arith.constant 0 : index
    %c15 = arith.constant 15 : index
    %c0_17 = arith.constant 0 : index
    %20 = vector.load %arg1[%c0_16, %c15, %c0_17] : memref<1x136x128xbf16, #tpu.memory_space<vmem>>, vector<1x104x128xbf16>
    %21 = vector.shape_cast %20 : vector<1x104x128xbf16> to vector<104x128xbf16>
    %c3 = arith.constant 3 : index
    %c0_18 = arith.constant 0 : index
    %c0_19 = arith.constant 0 : index
    %22 = vector.load %arg2[%c3, %c0_18, %c0_19] : memref<9x128x112xbf16, #tpu.memory_space<vmem>>, vector<1x128x112xbf16>
    %23 = vector.shape_cast %22 : vector<1x128x112xbf16> to vector<128x112xbf16>
    %cst_20 = arith.constant dense<0.000000e+00> : vector<104x112xf32>
    %24 = tpu.matmul %21, %23, %cst_20 {dimension_numbers = #tpu.dot_dimension_numbers<[1], [0], [0], [1], [0, 0, 1, 1], [], []>} : vector<104x128xbf16>, vector<128x112xbf16>, vector<104x112xf32> -> vector<104x112xf32>
    %25 = arith.addf %19, %24 : vector<104x112xf32>
    %c0_21 = arith.constant 0 : index
    %c16_22 = arith.constant 16 : index
    %c0_23 = arith.constant 0 : index
    %26 = vector.load %arg1[%c0_21, %c16_22, %c0_23] : memref<1x136x128xbf16, #tpu.memory_space<vmem>>, vector<1x104x128xbf16>
    %27 = vector.shape_cast %26 : vector<1x104x128xbf16> to vector<104x128xbf16>
    %c4 = arith.constant 4 : index
    %c0_24 = arith.constant 0 : index
    %c0_25 = arith.constant 0 : index
    %28 = vector.load %arg2[%c4, %c0_24, %c0_25] : memref<9x128x112xbf16, #tpu.memory_space<vmem>>, vector<1x128x112xbf16>
    %29 = vector.shape_cast %28 : vector<1x128x112xbf16> to vector<128x112xbf16>
    %cst_26 = arith.constant dense<0.000000e+00> : vector<104x112xf32>
    %30 = tpu.matmul %27, %29, %cst_26 {dimension_numbers = #tpu.dot_dimension_numbers<[1], [0], [0], [1], [0, 0, 1, 1], [], []>} : vector<104x128xbf16>, vector<128x112xbf16>, vector<104x112xf32> -> vector<104x112xf32>
    %31 = arith.addf %25, %30 : vector<104x112xf32>
    %c0_27 = arith.constant 0 : index
    %c17 = arith.constant 17 : index
    %c0_28 = arith.constant 0 : index
    %32 = vector.load %arg1[%c0_27, %c17, %c0_28] : memref<1x136x128xbf16, #tpu.memory_space<vmem>>, vector<1x104x128xbf16>
    %33 = vector.shape_cast %32 : vector<1x104x128xbf16> to vector<104x128xbf16>
    %c5_29 = arith.constant 5 : index
    %c0_30 = arith.constant 0 : index
    %c0_31 = arith.constant 0 : index
    %34 = vector.load %arg2[%c5_29, %c0_30, %c0_31] : memref<9x128x112xbf16, #tpu.memory_space<vmem>>, vector<1x128x112xbf16>
    %35 = vector.shape_cast %34 : vector<1x128x112xbf16> to vector<128x112xbf16>
    %cst_32 = arith.constant dense<0.000000e+00> : vector<104x112xf32>
    %36 = tpu.matmul %33, %35, %cst_32 {dimension_numbers = #tpu.dot_dimension_numbers<[1], [0], [0], [1], [0, 0, 1, 1], [], []>} : vector<104x128xbf16>, vector<128x112xbf16>, vector<104x112xf32> -> vector<104x112xf32>
    %37 = arith.addf %31, %36 : vector<104x112xf32>
    %c0_33 = arith.constant 0 : index
    %c25 = arith.constant 25 : index
    %c0_34 = arith.constant 0 : index
    %38 = vector.load %arg1[%c0_33, %c25, %c0_34] : memref<1x136x128xbf16, #tpu.memory_space<vmem>>, vector<1x104x128xbf16>
    %39 = vector.shape_cast %38 : vector<1x104x128xbf16> to vector<104x128xbf16>
    %c6_35 = arith.constant 6 : index
    %c0_36 = arith.constant 0 : index
    %c0_37 = arith.constant 0 : index
    %40 = vector.load %arg2[%c6_35, %c0_36, %c0_37] : memref<9x128x112xbf16, #tpu.memory_space<vmem>>, vector<1x128x112xbf16>
    %41 = vector.shape_cast %40 : vector<1x128x112xbf16> to vector<128x112xbf16>
    %cst_38 = arith.constant dense<0.000000e+00> : vector<104x112xf32>
    %42 = tpu.matmul %39, %41, %cst_38 {dimension_numbers = #tpu.dot_dimension_numbers<[1], [0], [0], [1], [0, 0, 1, 1], [], []>} : vector<104x128xbf16>, vector<128x112xbf16>, vector<104x112xf32> -> vector<104x112xf32>
    %43 = arith.addf %37, %42 : vector<104x112xf32>
    %c0_39 = arith.constant 0 : index
    %c26 = arith.constant 26 : index
    %c0_40 = arith.constant 0 : index
    %44 = vector.load %arg1[%c0_39, %c26, %c0_40] : memref<1x136x128xbf16, #tpu.memory_space<vmem>>, vector<1x104x128xbf16>
    %45 = vector.shape_cast %44 : vector<1x104x128xbf16> to vector<104x128xbf16>
    %c7_41 = arith.constant 7 : index
    %c0_42 = arith.constant 0 : index
    %c0_43 = arith.constant 0 : index
    %46 = vector.load %arg2[%c7_41, %c0_42, %c0_43] : memref<9x128x112xbf16, #tpu.memory_space<vmem>>, vector<1x128x112xbf16>
    %47 = vector.shape_cast %46 : vector<1x128x112xbf16> to vector<128x112xbf16>
    %cst_44 = arith.constant dense<0.000000e+00> : vector<104x112xf32>
    %48 = tpu.matmul %45, %47, %cst_44 {dimension_numbers = #tpu.dot_dimension_numbers<[1], [0], [0], [1], [0, 0, 1, 1], [], []>} : vector<104x128xbf16>, vector<128x112xbf16>, vector<104x112xf32> -> vector<104x112xf32>
    %49 = arith.addf %43, %48 : vector<104x112xf32>
    %c0_45 = arith.constant 0 : index
    %c27 = arith.constant 27 : index
    %c0_46 = arith.constant 0 : index
    %50 = vector.load %arg1[%c0_45, %c27, %c0_46] : memref<1x136x128xbf16, #tpu.memory_space<vmem>>, vector<1x104x128xbf16>
    %51 = vector.shape_cast %50 : vector<1x104x128xbf16> to vector<104x128xbf16>
    %c8 = arith.constant 8 : index
    %c0_47 = arith.constant 0 : index
    %c0_48 = arith.constant 0 : index
    %52 = vector.load %arg2[%c8, %c0_47, %c0_48] : memref<9x128x112xbf16, #tpu.memory_space<vmem>>, vector<1x128x112xbf16>
    %53 = vector.shape_cast %52 : vector<1x128x112xbf16> to vector<128x112xbf16>
    %cst_49 = arith.constant dense<0.000000e+00> : vector<104x112xf32>
    %54 = tpu.matmul %51, %53, %cst_49 {dimension_numbers = #tpu.dot_dimension_numbers<[1], [0], [0], [1], [0, 0, 1, 1], [], []>} : vector<104x128xbf16>, vector<128x112xbf16>, vector<104x112xf32> -> vector<104x112xf32>
    %55 = arith.addf %49, %54 : vector<104x112xf32>
    %c0_50 = arith.constant 0 : index
    %c0_51 = arith.constant 0 : index
    %56 = vector.load %arg3[%c0_50, %c0_51] : memref<1x112xf32, #tpu.memory_space<vmem>>, vector<1x112xf32>
    %57 = vector.broadcast %56 : vector<1x112xf32> to vector<104x112xf32>
    %58 = arith.addf %55, %57 : vector<104x112xf32>
    %cst_52 = arith.constant 0.000000e+00 : f32
    %59 = vector.broadcast %cst_52 : f32 to vector<104x112xf32>
    %60 = arith.maximumf %58, %59 : vector<104x112xf32>
    %61 = vector.broadcast %0 : vector<104x1xf32> to vector<104x112xf32>
    %62 = arith.mulf %60, %61 : vector<104x112xf32>
    %cst_53 = arith.constant 0.000000e+00 : bf16
    %63 = vector.broadcast %cst_53 : bf16 to vector<16x112xbf16>
    %c0_54 = arith.constant 0 : index
    %c0_55 = arith.constant 0 : index
    %64 = vector.load %arg8[%c0_54, %c0_55] : memref<136x112xbf16, #tpu.memory_space<vmem>>, vector<16x112xbf16>
    tpu.vector_store %arg8[%c0_54, %c0_55], %63 {strides = array<i32>} : memref<136x112xbf16, #tpu.memory_space<vmem>>, vector<16x112xbf16>,
    %65 = arith.truncf %62 : vector<104x112xf32> to vector<104x112xbf16>
    %c16_56 = arith.constant 16 : index
    %c0_57 = arith.constant 0 : index
    %66 = vector.load %arg8[%c16_56, %c0_57] : memref<136x112xbf16, #tpu.memory_space<vmem>>, vector<104x112xbf16>
    tpu.vector_store %arg8[%c16_56, %c0_57], %65 {strides = array<i32>} : memref<136x112xbf16, #tpu.memory_space<vmem>>, vector<104x112xbf16>,
    %cst_58 = arith.constant 0.000000e+00 : bf16
    %67 = vector.broadcast %cst_58 : bf16 to vector<16x112xbf16>
    %c120 = arith.constant 120 : index
    %c0_59 = arith.constant 0 : index
    %68 = vector.load %arg8[%c120, %c0_59] : memref<136x112xbf16, #tpu.memory_space<vmem>>, vector<16x112xbf16>
    tpu.vector_store %arg8[%c120, %c0_59], %67 {strides = array<i32>} : memref<136x112xbf16, #tpu.memory_space<vmem>>, vector<16x112xbf16>,
    %cst_60 = arith.constant 0.000000e+00 : f32
    %69 = vector.broadcast %cst_60 : f32 to vector<104x112xf32>
    %c5_61 = arith.constant 5 : index
    %c0_62 = arith.constant 0 : index
    %70 = vector.load %arg8[%c5_61, %c0_62] : memref<136x112xbf16, #tpu.memory_space<vmem>>, vector<104x112xbf16>
    %c0_63 = arith.constant 0 : index
    %c0_64 = arith.constant 0 : index
    %c0_65 = arith.constant 0 : index
    %71 = vector.load %arg4[%c0_63, %c0_64, %c0_65] : memref<9x112x112xbf16, #tpu.memory_space<vmem>>, vector<1x112x112xbf16>
    %72 = vector.shape_cast %71 : vector<1x112x112xbf16> to vector<112x112xbf16>
    %cst_66 = arith.constant dense<0.000000e+00> : vector<104x112xf32>
    %73 = tpu.matmul %70, %72, %cst_66 {dimension_numbers = #tpu.dot_dimension_numbers<[1], [0], [0], [1], [0, 0, 1, 1], [], []>} : vector<104x112xbf16>, vector<112x112xbf16>, vector<104x112xf32> -> vector<104x112xf32>
    %74 = arith.addf %69, %73 : vector<104x112xf32>
    %c6_67 = arith.constant 6 : index
    %c0_68 = arith.constant 0 : index
    %75 = vector.load %arg8[%c6_67, %c0_68] : memref<136x112xbf16, #tpu.memory_space<vmem>>, vector<104x112xbf16>
    %c1_69 = arith.constant 1 : index
    %c0_70 = arith.constant 0 : index
    %c0_71 = arith.constant 0 : index
    %76 = vector.load %arg4[%c1_69, %c0_70, %c0_71] : memref<9x112x112xbf16, #tpu.memory_space<vmem>>, vector<1x112x112xbf16>
    %77 = vector.shape_cast %76 : vector<1x112x112xbf16> to vector<112x112xbf16>
    %cst_72 = arith.constant dense<0.000000e+00> : vector<104x112xf32>
    %78 = tpu.matmul %75, %77, %cst_72 {dimension_numbers = #tpu.dot_dimension_numbers<[1], [0], [0], [1], [0, 0, 1, 1], [], []>} : vector<104x112xbf16>, vector<112x112xbf16>, vector<104x112xf32> -> vector<104x112xf32>
    %79 = arith.addf %74, %78 : vector<104x112xf32>
    %c7_73 = arith.constant 7 : index
    %c0_74 = arith.constant 0 : index
    %80 = vector.load %arg8[%c7_73, %c0_74] : memref<136x112xbf16, #tpu.memory_space<vmem>>, vector<104x112xbf16>
    %c2_75 = arith.constant 2 : index
    %c0_76 = arith.constant 0 : index
    %c0_77 = arith.constant 0 : index
    %81 = vector.load %arg4[%c2_75, %c0_76, %c0_77] : memref<9x112x112xbf16, #tpu.memory_space<vmem>>, vector<1x112x112xbf16>
    %82 = vector.shape_cast %81 : vector<1x112x112xbf16> to vector<112x112xbf16>
    %cst_78 = arith.constant dense<0.000000e+00> : vector<104x112xf32>
    %83 = tpu.matmul %80, %82, %cst_78 {dimension_numbers = #tpu.dot_dimension_numbers<[1], [0], [0], [1], [0, 0, 1, 1], [], []>} : vector<104x112xbf16>, vector<112x112xbf16>, vector<104x112xf32> -> vector<104x112xf32>
    %84 = arith.addf %79, %83 : vector<104x112xf32>
    %c15_79 = arith.constant 15 : index
    %c0_80 = arith.constant 0 : index
    %85 = vector.load %arg8[%c15_79, %c0_80] : memref<136x112xbf16, #tpu.memory_space<vmem>>, vector<104x112xbf16>
    %c3_81 = arith.constant 3 : index
    %c0_82 = arith.constant 0 : index
    %c0_83 = arith.constant 0 : index
    %86 = vector.load %arg4[%c3_81, %c0_82, %c0_83] : memref<9x112x112xbf16, #tpu.memory_space<vmem>>, vector<1x112x112xbf16>
    %87 = vector.shape_cast %86 : vector<1x112x112xbf16> to vector<112x112xbf16>
    %cst_84 = arith.constant dense<0.000000e+00> : vector<104x112xf32>
    %88 = tpu.matmul %85, %87, %cst_84 {dimension_numbers = #tpu.dot_dimension_numbers<[1], [0], [0], [1], [0, 0, 1, 1], [], []>} : vector<104x112xbf16>, vector<112x112xbf16>, vector<104x112xf32> -> vector<104x112xf32>
    %89 = arith.addf %84, %88 : vector<104x112xf32>
    %c16_85 = arith.constant 16 : index
    %c0_86 = arith.constant 0 : index
    %90 = vector.load %arg8[%c16_85, %c0_86] : memref<136x112xbf16, #tpu.memory_space<vmem>>, vector<104x112xbf16>
    %c4_87 = arith.constant 4 : index
    %c0_88 = arith.constant 0 : index
    %c0_89 = arith.constant 0 : index
    %91 = vector.load %arg4[%c4_87, %c0_88, %c0_89] : memref<9x112x112xbf16, #tpu.memory_space<vmem>>, vector<1x112x112xbf16>
    %92 = vector.shape_cast %91 : vector<1x112x112xbf16> to vector<112x112xbf16>
    %cst_90 = arith.constant dense<0.000000e+00> : vector<104x112xf32>
    %93 = tpu.matmul %90, %92, %cst_90 {dimension_numbers = #tpu.dot_dimension_numbers<[1], [0], [0], [1], [0, 0, 1, 1], [], []>} : vector<104x112xbf16>, vector<112x112xbf16>, vector<104x112xf32> -> vector<104x112xf32>
    %94 = arith.addf %89, %93 : vector<104x112xf32>
    %c17_91 = arith.constant 17 : index
    %c0_92 = arith.constant 0 : index
    %95 = vector.load %arg8[%c17_91, %c0_92] : memref<136x112xbf16, #tpu.memory_space<vmem>>, vector<104x112xbf16>
    %c5_93 = arith.constant 5 : index
    %c0_94 = arith.constant 0 : index
    %c0_95 = arith.constant 0 : index
    %96 = vector.load %arg4[%c5_93, %c0_94, %c0_95] : memref<9x112x112xbf16, #tpu.memory_space<vmem>>, vector<1x112x112xbf16>
    %97 = vector.shape_cast %96 : vector<1x112x112xbf16> to vector<112x112xbf16>
    %cst_96 = arith.constant dense<0.000000e+00> : vector<104x112xf32>
    %98 = tpu.matmul %95, %97, %cst_96 {dimension_numbers = #tpu.dot_dimension_numbers<[1], [0], [0], [1], [0, 0, 1, 1], [], []>} : vector<104x112xbf16>, vector<112x112xbf16>, vector<104x112xf32> -> vector<104x112xf32>
    %99 = arith.addf %94, %98 : vector<104x112xf32>
    %c25_97 = arith.constant 25 : index
    %c0_98 = arith.constant 0 : index
    %100 = vector.load %arg8[%c25_97, %c0_98] : memref<136x112xbf16, #tpu.memory_space<vmem>>, vector<104x112xbf16>
    %c6_99 = arith.constant 6 : index
    %c0_100 = arith.constant 0 : index
    %c0_101 = arith.constant 0 : index
    %101 = vector.load %arg4[%c6_99, %c0_100, %c0_101] : memref<9x112x112xbf16, #tpu.memory_space<vmem>>, vector<1x112x112xbf16>
    %102 = vector.shape_cast %101 : vector<1x112x112xbf16> to vector<112x112xbf16>
    %cst_102 = arith.constant dense<0.000000e+00> : vector<104x112xf32>
    %103 = tpu.matmul %100, %102, %cst_102 {dimension_numbers = #tpu.dot_dimension_numbers<[1], [0], [0], [1], [0, 0, 1, 1], [], []>} : vector<104x112xbf16>, vector<112x112xbf16>, vector<104x112xf32> -> vector<104x112xf32>
    %104 = arith.addf %99, %103 : vector<104x112xf32>
    %c26_103 = arith.constant 26 : index
    %c0_104 = arith.constant 0 : index
    %105 = vector.load %arg8[%c26_103, %c0_104] : memref<136x112xbf16, #tpu.memory_space<vmem>>, vector<104x112xbf16>
    %c7_105 = arith.constant 7 : index
    %c0_106 = arith.constant 0 : index
    %c0_107 = arith.constant 0 : index
    %106 = vector.load %arg4[%c7_105, %c0_106, %c0_107] : memref<9x112x112xbf16, #tpu.memory_space<vmem>>, vector<1x112x112xbf16>
    %107 = vector.shape_cast %106 : vector<1x112x112xbf16> to vector<112x112xbf16>
    %cst_108 = arith.constant dense<0.000000e+00> : vector<104x112xf32>
    %108 = tpu.matmul %105, %107, %cst_108 {dimension_numbers = #tpu.dot_dimension_numbers<[1], [0], [0], [1], [0, 0, 1, 1], [], []>} : vector<104x112xbf16>, vector<112x112xbf16>, vector<104x112xf32> -> vector<104x112xf32>
    %109 = arith.addf %104, %108 : vector<104x112xf32>
    %c27_109 = arith.constant 27 : index
    %c0_110 = arith.constant 0 : index
    %110 = vector.load %arg8[%c27_109, %c0_110] : memref<136x112xbf16, #tpu.memory_space<vmem>>, vector<104x112xbf16>
    %c8_111 = arith.constant 8 : index
    %c0_112 = arith.constant 0 : index
    %c0_113 = arith.constant 0 : index
    %111 = vector.load %arg4[%c8_111, %c0_112, %c0_113] : memref<9x112x112xbf16, #tpu.memory_space<vmem>>, vector<1x112x112xbf16>
    %112 = vector.shape_cast %111 : vector<1x112x112xbf16> to vector<112x112xbf16>
    %cst_114 = arith.constant dense<0.000000e+00> : vector<104x112xf32>
    %113 = tpu.matmul %110, %112, %cst_114 {dimension_numbers = #tpu.dot_dimension_numbers<[1], [0], [0], [1], [0, 0, 1, 1], [], []>} : vector<104x112xbf16>, vector<112x112xbf16>, vector<104x112xf32> -> vector<104x112xf32>
    %114 = arith.addf %109, %113 : vector<104x112xf32>
    %c0_115 = arith.constant 0 : index
    %c0_116 = arith.constant 0 : index
    %115 = vector.load %arg5[%c0_115, %c0_116] : memref<1x112xf32, #tpu.memory_space<vmem>>, vector<1x112xf32>
    %116 = vector.broadcast %115 : vector<1x112xf32> to vector<104x112xf32>
    %117 = arith.addf %114, %116 : vector<104x112xf32>
    %cst_117 = arith.constant 0.000000e+00 : f32
    %118 = vector.broadcast %cst_117 : f32 to vector<104x112xf32>
    %119 = arith.maximumf %117, %118 : vector<104x112xf32>
    %120 = vector.broadcast %0 : vector<104x1xf32> to vector<104x112xf32>
    %121 = arith.mulf %119, %120 : vector<104x112xf32>
    %cst_118 = arith.constant 0.000000e+00 : bf16
    %122 = vector.broadcast %cst_118 : bf16 to vector<16x112xbf16>
    %c0_119 = arith.constant 0 : index
    %c0_120 = arith.constant 0 : index
    %c0_121 = arith.constant 0 : index
    %123 = vector.load %arg7[%c0_119, %c0_120, %c0_121] : memref<1x136x112xbf16, #tpu.memory_space<vmem>>, vector<1x16x112xbf16>
    %124 = vector.shape_cast %123 : vector<1x16x112xbf16> to vector<16x112xbf16>
    %125 = vector.shape_cast %122 : vector<16x112xbf16> to vector<1x16x112xbf16>
    tpu.vector_store %arg7[%c0_119, %c0_120, %c0_121], %125 {strides = array<i32>} : memref<1x136x112xbf16, #tpu.memory_space<vmem>>, vector<1x16x112xbf16>,
    %126 = arith.truncf %121 : vector<104x112xf32> to vector<104x112xbf16>
    %c0_122 = arith.constant 0 : index
    %c16_123 = arith.constant 16 : index
    %c0_124 = arith.constant 0 : index
    %127 = vector.load %arg7[%c0_122, %c16_123, %c0_124] : memref<1x136x112xbf16, #tpu.memory_space<vmem>>, vector<1x104x112xbf16>
    %128 = vector.shape_cast %127 : vector<1x104x112xbf16> to vector<104x112xbf16>
    %129 = vector.shape_cast %126 : vector<104x112xbf16> to vector<1x104x112xbf16>
    tpu.vector_store %arg7[%c0_122, %c16_123, %c0_124], %129 {strides = array<i32>} : memref<1x136x112xbf16, #tpu.memory_space<vmem>>, vector<1x104x112xbf16>,
    %cst_125 = arith.constant 0.000000e+00 : bf16
    %130 = vector.broadcast %cst_125 : bf16 to vector<16x112xbf16>
    %c0_126 = arith.constant 0 : index
    %c120_127 = arith.constant 120 : index
    %c0_128 = arith.constant 0 : index
    %131 = vector.load %arg7[%c0_126, %c120_127, %c0_128] : memref<1x136x112xbf16, #tpu.memory_space<vmem>>, vector<1x16x112xbf16>
    %132 = vector.shape_cast %131 : vector<1x16x112xbf16> to vector<16x112xbf16>
    %133 = vector.shape_cast %130 : vector<16x112xbf16> to vector<1x16x112xbf16>
    tpu.vector_store %arg7[%c0_126, %c120_127, %c0_128], %133 {strides = array<i32>} : memref<1x136x112xbf16, #tpu.memory_space<vmem>>, vector<1x16x112xbf16>,
    return
  }
  func.func @transform_0(%arg0: i32) -> (i32, i32, i32) {
    %c0_i32 = arith.constant 0 : i32
    %c1_i32 = arith.constant 1 : i32
    %c0_i32_0 = arith.constant 0 : i32
    return %arg0, %c0_i32, %c1_i32 : i32, i32, i32
  }
  func.func @transform_1(%arg0: i32) -> (i32, i32, i32) {
    %c0_i32 = arith.constant 0 : i32
    %c0_i32_0 = arith.constant 0 : i32
    %c0_i32_1 = arith.constant 0 : i32
    %c0_i32_2 = arith.constant 0 : i32
    return %c0_i32, %c0_i32_0, %c0_i32_1 : i32, i32, i32
  }
  func.func @transform_2(%arg0: i32) -> (i32, i32) {
    %c0_i32 = arith.constant 0 : i32
    %c0_i32_0 = arith.constant 0 : i32
    %c0_i32_1 = arith.constant 0 : i32
    return %c0_i32, %c0_i32_0 : i32, i32
  }
  func.func @transform_3(%arg0: i32) -> (i32, i32, i32) {
    %c0_i32 = arith.constant 0 : i32
    %c0_i32_0 = arith.constant 0 : i32
    %c0_i32_1 = arith.constant 0 : i32
    %c0_i32_2 = arith.constant 0 : i32
    return %c0_i32, %c0_i32_0, %c0_i32_1 : i32, i32, i32
  }
  func.func @transform_4(%arg0: i32) -> (i32, i32) {
    %c0_i32 = arith.constant 0 : i32
    %c0_i32_0 = arith.constant 0 : i32
    %c0_i32_1 = arith.constant 0 : i32
    return %c0_i32, %c0_i32_0 : i32, i32
  }
  func.func @transform_5(%arg0: i32) -> (i32, i32) {
    %c0_i32 = arith.constant 0 : i32
    %c0_i32_0 = arith.constant 0 : i32
    %c0_i32_1 = arith.constant 0 : i32
    return %c0_i32, %c0_i32_0 : i32, i32
  }
  func.func @transform_6(%arg0: i32) -> (i32, i32, i32) {
    %c0_i32 = arith.constant 0 : i32
    %c0_i32_0 = arith.constant 0 : i32
    %c0_i32_1 = arith.constant 0 : i32
    return %arg0, %c0_i32, %c0_i32_0 : i32, i32, i32
  }
}

</mosaic_0001>

<bundles_post_ra>
// kernel: incept_block3.6
= control target key start
LH: loop header
LB: loop body
LE: loop exit
PB: predicated region body
PF: predicated region fallthrough
CT: control target
= control target key end

     0   :  { %s2886_s15 = smov 0   ;;  %s3500_s0 = inlined_call_operand.vmem [shape: bf16[2,136,512], index: 0, kind: input, shape index: {}]   ;;  %s3501_s1 = inlined_call_operand.vmem [shape: bf16[512,512], index: 1, kind: input, shape index: {}]   ;;  %s3502_s2 = inlined_call_operand.vmem [shape: f32[1,512], index: 2, kind: input, shape index: {}]   ;;  %s3503_s3 = inlined_call_operand.vmem [shape: f32[136,1], index: 3, kind: input, shape index: {}]   ;;  %s3504_s4 = inlined_call_operand.vmem [shape: bf16[2,136,512], index: 4, kind: output, shape index: {}]  }
   0x1 LB: > { %s2215_s16 = sadd.s32 4294967295, %s2858_s15   ;;  %p2219_p0 = scmp.ge.s32.totalorder %s2858_s15, 1  ;;  %s2858_s15 = sphi %s2886_s15, %s14_s15  }
   0x2   : > { %p162_p1 = scmp.lt.s32.totalorder %s2858_s15, 3 }
   0x4   : > { %p163_p2 = pnand %p2219_p0, %p162_p1 }
   0x5   : > { %v2608_v0 = vld [vmem:[%s3501_s1 + $0x4] ss:$16 sps:$4 sm:$0xff] (!%p163_p2)   ;;  %v2610_v1 = vld [vmem:[%s3501_s1 + $0xc] ss:$16 sps:$4 sm:$0xff] (!%p163_p2)   ;;  %v2612_v2 = vld [vmem:[%s3501_s1] ss:$16 sps:$4 sm:$0xff] (!%p163_p2)  }
   0x6   : > { %166 = sbr.rel (%p163_p2) target bundleno = 428 (0x1ac), region = 36  ;;  %1196 = vmatprep.subr.bf16.mxu0 (!%p163_p2), %v2608_v0  ;;  %v2613_v3 = vld [vmem:[%s3501_s1 + $0x8] ss:$16 sps:$4 sm:$0xff] (!%p163_p2)   ;;  %1438 = vmatprep.subr.bf16.mxu1 (!%p163_p2), %v2610_v1  ;;  %v2614_v4 = vld [vmem:[%s3501_s1 + $0x24] ss:$16 sps:$4 sm:$0xff] (!%p163_p2)   ;;  %p188_p3 = scmp.lt.s32.totalorder (!%p163_p2), %s2215_s16, 1 }
   0x7   : > { %1197 = vmatpush1.bf16.msra.mxu0 (!%p163_p2), %v2612_v2  ;;  %1439 = vmatpush1.bf16.msra.mxu1 (!%p163_p2), %v2613_v3  ;;  %v2616_v5 = vld [vmem:[%s3501_s1 + $0x2c] ss:$16 sps:$4 sm:$0xff] (!%p163_p2)   ;;  %v2618_v6 = vld [vmem:[%s3501_s1 + $0x20] ss:$16 sps:$4 sm:$0xff] (!%p163_p2)   ;;  %v2619_v7 = vld [vmem:[%s3501_s1 + $0x28] ss:$16 sps:$4 sm:$0xff] (!%p163_p2)  }
   0x8   : > { %1198 = vmatprep.subr.bf16.mxu0 (!%p163_p2), %v2614_v4  ;;  %1440 = vmatprep.subr.bf16.mxu1 (!%p163_p2), %v2616_v5  ;;  %v2620_v8 = vld [vmem:[%s3501_s1 + $0x44] ss:$16 sps:$4 sm:$0xff] (!%p163_p2)   ;;  %v2622_v9 = vld [vmem:[%s3501_s1 + $0x4c] ss:$16 sps:$4 sm:$0xff] (!%p163_p2)   ;;  %v2624_v10 = vld [vmem:[%s3501_s1 + $0x40] ss:$16 sps:$4 sm:$0xff] (!%p163_p2)  }
   0x9   : > { %v2625_v11 = vld [vmem:[%s3501_s1 + $0x48] ss:$16 sps:$4 sm:$0xff] (!%p163_p2)   ;;  %v2626_v12 = vld [vmem:[%s3501_s1 + $0x64] ss:$16 sps:$4 sm:$0xff] (!%p163_p2)   ;;  %v2628_v13 = vld [vmem:[%s3501_s1 + $0x6c] ss:$16 sps:$4 sm:$0xff] (!%p163_p2)  }
   0xa   : > { %v2630_v14 = vld [vmem:[%s3501_s1 + $0x60] ss:$16 sps:$4 sm:$0xff] (!%p163_p2)   ;;  %v2631_v15 = vld [vmem:[%s3501_s1 + $0x68] ss:$16 sps:$4 sm:$0xff] (!%p163_p2)   ;;  %v2632_v16 = vld [vmem:[%s3501_s1 + $0x84] ss:$16 sps:$4 sm:$0xff] (!%p163_p2)  }
   0xb   : > { %1199 = vmatpush1.bf16.msra.mxu0 (!%p163_p2), %v2618_v6  ;;  %1441 = vmatpush1.bf16.msra.mxu1 (!%p163_p2), %v2619_v7  ;;  %v2634_v17 = vld [vmem:[%s3501_s1 + $0x8c] ss:$16 sps:$4 sm:$0xff] (!%p163_p2)   ;;  %v2636_v18 = vld [vmem:[%s3501_s1 + $0x80] ss:$16 sps:$4 sm:$0xff] (!%p163_p2)   ;;  %v2637_v19 = vld [vmem:[%s3501_s1 + $0x88] ss:$16 sps:$4 sm:$0xff] (!%p163_p2)  }
   0xc   : > { %1200 = vmatprep.subr.bf16.mxu0 (!%p163_p2), %v2620_v8  ;;  %1442 = vmatprep.subr.bf16.mxu1 (!%p163_p2), %v2622_v9  ;;  %v2638_v20 = vld [vmem:[%s3501_s1 + $0xa4] ss:$16 sps:$4 sm:$0xff] (!%p163_p2)   ;;  %v2640_v21 = vld [vmem:[%s3501_s1 + $0xac] ss:$16 sps:$4 sm:$0xff] (!%p163_p2)   ;;  %v2642_v22 = vld [vmem:[%s3501_s1 + $0xa0] ss:$16 sps:$4 sm:$0xff] (!%p163_p2)  }
   0xd   : > { %v2643_v23 = vld [vmem:[%s3501_s1 + $0xa8] ss:$16 sps:$4 sm:$0xff]   ;;  %v2644_v24 = vld [vmem:[%s3501_s1 + $0xc4] ss:$16 sps:$4 sm:$0xff]   ;;  %v2646_v25 = vld [vmem:[%s3501_s1 + $0xcc] ss:$16 sps:$4 sm:$0xff]  }
   0xe   : > { %v2648_v26 = vld [vmem:[%s3501_s1 + $0xc0] ss:$16 sps:$4 sm:$0xff]   ;;  %v2649_v27 = vld [vmem:[%s3501_s1 + $0xc8] ss:$16 sps:$4 sm:$0xff]   ;;  %v2650_v28 = vld [vmem:[%s3501_s1 + $0xe4] ss:$16 sps:$4 sm:$0xff]  }
   0xf   : > { %1201 = vmatpush1.bf16.msra.mxu0 %v2624_v10  ;;  %1443 = vmatpush1.bf16.msra.mxu1 %v2625_v11  ;;  %v2652_v29 = vld [vmem:[%s3501_s1 + $0xec] ss:$16 sps:$4 sm:$0xff]   ;;  %v2654_v30 = vld [vmem:[%s3501_s1 + $0xe0] ss:$16 sps:$4 sm:$0xff]   ;;  %v2655_v31 = vld [vmem:[%s3501_s1 + $0xe8] ss:$16 sps:$4 sm:$0xff]  }
  0x10   : > { %1202 = vmatprep.subr.bf16.mxu0 %v2626_v12  ;;  %1444 = vmatprep.subr.bf16.mxu1 %v2628_v13  ;;  %v2656_v32 = vld [vmem:[%s3501_s1 + $0x104] ss:$16 sps:$4 sm:$0xff]   ;;  %v2658_v33 = vld [vmem:[%s3501_s1 + $0x10c] ss:$16 sps:$4 sm:$0xff]   ;;  %v2660_v34 = vld [vmem:[%s3501_s1 + $0x100] ss:$16 sps:$4 sm:$0xff]  }
  0x11   : > { %v2661_v35 = vld [vmem:[%s3501_s1 + $0x108] ss:$16 sps:$4 sm:$0xff]   ;;  %v2662_v36 = vld [vmem:[%s3501_s1 + $0x124] ss:$16 sps:$4 sm:$0xff]   ;;  %s3506_s16 = smov (!%p188_p3, %s2215_s16), 1 }
  0x12   : > { %v2664_v37 = vld [vmem:[%s3501_s1 + $0x12c] ss:$16 sps:$4 sm:$0xff]   ;;  %v2666_v38 = vld [vmem:[%s3501_s1 + $0x120] ss:$16 sps:$4 sm:$0xff]   ;;  %v2667_v39 = vld [vmem:[%s3501_s1 + $0x128] ss:$16 sps:$4 sm:$0xff]  }
  0x13   : > { %1203 = vmatpush1.bf16.msra.mxu0 %v2630_v14  ;;  %1445 = vmatpush1.bf16.msra.mxu1 %v2631_v15  ;;  %v2668_v40 = vld [vmem:[%s3501_s1 + $0x144] ss:$16 sps:$4 sm:$0xff]   ;;  %s2596_s27 = smul.u32 272, %s3506_s16  ;;  %v2670_v41 = vld [vmem:[%s3501_s1 + $0x14c] ss:$16 sps:$4 sm:$0xff]  }
  0x14   : > { %1204 = vmatprep.subr.bf16.mxu0 %v2632_v16  ;;  %1446 = vmatprep.subr.bf16.mxu1 %v2634_v17  ;;  %v2672_v42 = vld [vmem:[%s3501_s1 + $0x140] ss:$16 sps:$4 sm:$0xff]   ;;  %v2673_v43 = vld [vmem:[%s3501_s1 + $0x148] ss:$16 sps:$4 sm:$0xff]   ;;  %v2674_v44 = vld [vmem:[%s3501_s1 + $0x164] ss:$16 sps:$4 sm:$0xff]  }
  0x15   : > { %s3041_s12 = scalar_lea.vmem %s3500_s0, %s2596_s27  ;;  %v2676_v45 = vld [vmem:[%s3501_s1 + $0x16c] ss:$16 sps:$4 sm:$0xff]   ;;  %v2678_v46 = vld [vmem:[%s3501_s1 + $0x160] ss:$16 sps:$4 sm:$0xff]   ;;  %v2679_v47 = vld [vmem:[%s3501_s1 + $0x168] ss:$16 sps:$4 sm:$0xff]   ;;  %s3401_s20 = scalar_lea.vmem %s3504_s4, %s2596_s27 }
  0x16   : > { %v2706_v48 = vld [vmem:[%s3041_s12 + $0x4] ss:$16 sps:$4 sm:$0xff]   ;;  %v2682_v50 = vld [vmem:[%s3501_s1 + $0x18c] ss:$16 sps:$4 sm:$0xff]   ;;  %v2684_v51 = vld [vmem:[%s3501_s1 + $0x180] ss:$16 sps:$4 sm:$0xff]  }
  0x17   : > { %1205 = vmatpush1.bf16.msra.mxu0 %v2636_v18  ;;  %1447 = vmatpush1.bf16.msra.mxu1 %v2637_v19  ;;  %v2680_v49 = vld [vmem:[%s3501_s1 + $0x184] ss:$16 sps:$4 sm:$0xff]   ;;  %v2685_v52 = vld [vmem:[%s3501_s1 + $0x188] ss:$16 sps:$4 sm:$0xff]   ;;  %v2688_v54 = vld [vmem:[%s3501_s1 + $0x1ac] ss:$16 sps:$4 sm:$0xff]  }
  0x18   : > { %1206 = vmatprep.subr.bf16.mxu0 %v2638_v20  ;;  %1448 = vmatprep.subr.bf16.mxu1 %v2640_v21  ;;  %v2686_v53 = vld [vmem:[%s3501_s1 + $0x1a4] ss:$16 sps:$4 sm:$0xff]   ;;  %v2690_v55 = vld [vmem:[%s3501_s1 + $0x1a0] ss:$16 sps:$4 sm:$0xff]   ;;  %v2691_v56 = vld [vmem:[%s3501_s1 + $0x1a8] ss:$16 sps:$4 sm:$0xff]  }
  0x19   : > { %1228 = vmatprep.mubr.bf16.mxu0 %v2706_v48  ;;  %1470 = vmatprep.mubr.bf16.mxu1 %v2706_v48  ;;  %v2692_v57 = vld [vmem:[%s3501_s1 + $0x1c4] ss:$16 sps:$4 sm:$0xff]   ;;  %v2694_v58 = vld [vmem:[%s3501_s1 + $0x1cc] ss:$16 sps:$4 sm:$0xff]   ;;  %v2696_v59 = vld [vmem:[%s3501_s1 + $0x1c0] ss:$16 sps:$4 sm:$0xff]  }
  0x1a   : > { %v2697_v60 = vld [vmem:[%s3501_s1 + $0x1c8] ss:$16 sps:$4 sm:$0xff]   ;;  %v2698_v61 = vld [vmem:[%s3501_s1 + $0x1e4] ss:$16 sps:$4 sm:$0xff]   ;;  %v2700_v62 = vld [vmem:[%s3501_s1 + $0x1ec] ss:$16 sps:$4 sm:$0xff]  }
  0x1b   : > { %1207 = vmatpush1.bf16.msra.mxu0 %v2642_v22  ;;  %1449 = vmatpush1.bf16.msra.mxu1 %v2643_v23  ;;  %v2702_v63 = vld [vmem:[%s3501_s1 + $0x1e0] ss:$16 sps:$4 sm:$0xff]   ;;  %v2703_v0 = vld [vmem:[%s3501_s1 + $0x1e8] ss:$16 sps:$4 sm:$0xff]   ;;  %v2709_v1 = vld [vmem:[%s3501_s1 + $0x204] ss:$16 sps:$4 sm:$0xff]  }
  0x1c   : > { %1208 = vmatprep.subr.bf16.mxu0 %v2644_v24  ;;  %1450 = vmatprep.subr.bf16.mxu1 %v2646_v25  ;;  %v2712_v2 = vld [vmem:[%s3501_s1 + $0x20c] ss:$16 sps:$4 sm:$0xff]   ;;  %v2704_v3 = vld [vmem:[%s3041_s12] ss:$16 sps:$4 sm:$0xff]   ;;  %v2710_v5 = vld [vmem:[%s3501_s1 + $0x208] ss:$16 sps:$4 sm:$0xff]  }
  0x1d   : > { %v2707_v4 = vld [vmem:[%s3501_s1 + $0x200] ss:$16 sps:$4 sm:$0xff]   ;;  %v2715_v6 = vld [vmem:[%s3501_s1 + $0x224] ss:$16 sps:$4 sm:$0xff]   ;;  %v2718_v7 = vld [vmem:[%s3501_s1 + $0x22c] ss:$16 sps:$4 sm:$0xff]  }
  0x1e   : > { %v2719_v8 = vld [vmem:[%s3041_s12 + $0x24] ss:$16 sps:$4 sm:$0xff]   ;;  %v2713_v9 = vld [vmem:[%s3501_s1 + $0x220] ss:$16 sps:$4 sm:$0xff]   ;;  %v2716_v10 = vld [vmem:[%s3501_s1 + $0x228] ss:$16 sps:$4 sm:$0xff]  }
  0x1f   : > { %1209 = vmatpush1.bf16.msra.mxu0 %v2648_v26  ;;  %1451 = vmatpush1.bf16.msra.mxu1 %v2649_v27  ;;  %v2724_v11 = vld [vmem:[%s3501_s1 + $0x244] ss:$16 sps:$4 sm:$0xff]   ;;  %v2727_v12 = vld [vmem:[%s3501_s1 + $0x24c] ss:$16 sps:$4 sm:$0xff]   ;;  %v2721_v13 = vld [vmem:[%s3041_s12 + $0x20] ss:$16 sps:$4 sm:$0xff]  }
  0x20   : > { %1210 = vmatprep.subr.bf16.mxu0 %v2650_v28  ;;  %1452 = vmatprep.subr.bf16.mxu1 %v2652_v29  ;;  %v2722_v14 = vld [vmem:[%s3501_s1 + $0x240] ss:$16 sps:$4 sm:$0xff]   ;;  %v2725_v15 = vld [vmem:[%s3501_s1 + $0x248] ss:$16 sps:$4 sm:$0xff]   ;;  %v2730_v16 = vld [vmem:[%s3501_s1 + $0x264] ss:$16 sps:$4 sm:$0xff]  }
  0x21   : > { %v2733_v17 = vld [vmem:[%s3501_s1 + $0x26c] ss:$16 sps:$4 sm:$0xff]   ;;  %v2734_v18 = vld [vmem:[%s3041_s12 + $0x44] ss:$16 sps:$4 sm:$0xff]   ;;  %v2728_v19 = vld [vmem:[%s3501_s1 + $0x260] ss:$16 sps:$4 sm:$0xff]  }
  0x22   : > { %v2731_v20 = vld [vmem:[%s3501_s1 + $0x268] ss:$16 sps:$4 sm:$0xff]   ;;  %v2739_v21 = vld [vmem:[%s3501_s1 + $0x284] ss:$16 sps:$4 sm:$0xff]   ;;  %v2742_v22 = vld [vmem:[%s3501_s1 + $0x28c] ss:$16 sps:$4 sm:$0xff]  }
  0x23   : > { %1211 = vmatpush1.bf16.msra.mxu0 %v2654_v30  ;;  %1453 = vmatpush1.bf16.msra.mxu1 %v2655_v31  ;;  %v2736_v23 = vld [vmem:[%s3041_s12 + $0x40] ss:$16 sps:$4 sm:$0xff]   ;;  %v2740_v25 = vld [vmem:[%s3501_s1 + $0x288] ss:$16 sps:$4 sm:$0xff]   ;;  %v2860_v26 = vmov 0  }
  0x24   : > { %1212 = vmatprep.subr.bf16.mxu0 %v2656_v32  ;;  %1454 = vmatprep.subr.bf16.mxu1 %v2658_v33  ;;  %v2737_v24 = vld [vmem:[%s3501_s1 + $0x280] ss:$16 sps:$4 sm:$0xff]   ;;  %v2743_v27 = vld [vmem:[%s3041_s12 + $0x64] ss:$16 sps:$4 sm:$0xff]   ;;  %v2750_v29 = vld [vmem:[%s3501_s1 + $0x2ac] ss:$16 sps:$4 sm:$0xff]  }
  0x25   : > { %2606 = vset.pattern.permute.xlu0 %v2860_v26  ;;  %2607 = vset.pattern.permute.xlu1 %v2860_v26  ;;  %v2747_v28 = vld [vmem:[%s3501_s1 + $0x2a4] ss:$16 sps:$4 sm:$0xff]   ;;  %v2745_v30 = vld [vmem:[%s3501_s1 + $0x2a0] ss:$16 sps:$4 sm:$0xff]   ;;  %v2748_v31 = vld [vmem:[%s3501_s1 + $0x2a8] ss:$16 sps:$4 sm:$0xff]  }
  0x26   : > { %v2754_v32 = vld [vmem:[%s3501_s1 + $0x2c4] ss:$16 sps:$4 sm:$0xff]   ;;  %v2757_v33 = vld [vmem:[%s3501_s1 + $0x2cc] ss:$16 sps:$4 sm:$0xff]  }
  0x27   : > { %1213 = vmatpush1.bf16.msra.mxu0 %v2660_v34  ;;  %1455 = vmatpush1.bf16.msra.mxu1 %v2661_v35  ;;  %v2751_v34 = vld [vmem:[%s3041_s12 + $0x60] ss:$16 sps:$4 sm:$0xff]   ;;  %v2778_v48 = vld [vmem:[%s3501_s1 + $0x324] ss:$16 sps:$4 sm:$0xff]   ;;  %v2828_v26 = vld [vmem:[%s3041_s12 + $0xc] ss:$16 sps:$4 sm:$0xff]  }
  0x28   : > { %1214 = vmatprep.subr.bf16.mxu0 %v2662_v36  ;;  %1456 = vmatprep.subr.bf16.mxu1 %v2664_v37  ;;  %v2752_v35 = vld [vmem:[%s3501_s1 + $0x2c0] ss:$16 sps:$4 sm:$0xff]   ;;  %v2755_v36 = vld [vmem:[%s3501_s1 + $0x2c8] ss:$16 sps:$4 sm:$0xff]   ;;  %v2758_v37 = vld [vmem:[%s3041_s12 + $0x84] ss:$16 sps:$4 sm:$0xff]  }
  0x2b   : > { %1215 = vmatpush1.bf16.msra.mxu0 %v2666_v38  ;;  %1457 = vmatpush1.bf16.msra.mxu1 %v2667_v39  ;;  %v2763_v38 = vld [vmem:[%s3501_s1 + $0x2e4] ss:$16 sps:$4 sm:$0xff]   ;;  %v2766_v39 = vld [vmem:[%s3501_s1 + $0x2ec] ss:$16 sps:$4 sm:$0xff]  }
  0x2c   : > { %1216 = vmatprep.subr.bf16.mxu0 %v2668_v40  ;;  %1458 = vmatprep.subr.bf16.mxu1 %v2670_v41  ;;  %v2761_v40 = vld [vmem:[%s3501_s1 + $0x2e0] ss:$16 sps:$4 sm:$0xff]   ;;  %v2764_v41 = vld [vmem:[%s3501_s1 + $0x2e8] ss:$16 sps:$4 sm:$0xff]  }
  0x2f   : > { %1217 = vmatpush1.bf16.msra.mxu0 %v2672_v42  ;;  %1459 = vmatpush1.bf16.msra.mxu1 %v2673_v43  ;;  %v2769_v42 = vld [vmem:[%s3501_s1 + $0x304] ss:$16 sps:$4 sm:$0xff]   ;;  %v2772_v43 = vld [vmem:[%s3501_s1 + $0x30c] ss:$16 sps:$4 sm:$0xff]  }
  0x30   : > { %1218 = vmatprep.subr.bf16.mxu0 %v2674_v44  ;;  %1460 = vmatprep.subr.bf16.mxu1 %v2676_v45  ;;  %v2760_v44 = vld [vmem:[%s3041_s12 + $0x80] ss:$16 sps:$4 sm:$0xff]  }
  0x31   : > { %v2767_v45 = vld [vmem:[%s3501_s1 + $0x300] ss:$16 sps:$4 sm:$0xff]  }
  0x33   : > { %1219 = vmatpush1.bf16.msra.mxu0 %v2678_v46  ;;  %1461 = vmatpush1.bf16.msra.mxu1 %v2679_v47  ;;  %v2770_v46 = vld [vmem:[%s3501_s1 + $0x308] ss:$16 sps:$4 sm:$0xff]   ;;  %v2773_v47 = vld [vmem:[%s3041_s12 + $0xa4] ss:$16 sps:$4 sm:$0xff]  }
  0x34   : > { %1220 = vmatprep.subr.bf16.mxu0 %v2680_v49  ;;  %1462 = vmatprep.subr.bf16.mxu1 %v2682_v50  ;;  %v2781_v49 = vld [vmem:[%s3501_s1 + $0x32c] ss:$16 sps:$4 sm:$0xff]   ;;  %v2776_v50 = vld [vmem:[%s3501_s1 + $0x320] ss:$16 sps:$4 sm:$0xff]  }
  0x37   : > { %1221 = vmatpush1.bf16.msra.mxu0 %v2684_v51  ;;  %1463 = vmatpush1.bf16.msra.mxu1 %v2685_v52  ;;  %v2779_v51 = vld [vmem:[%s3501_s1 + $0x328] ss:$16 sps:$4 sm:$0xff]   ;;  %v2784_v52 = vld [vmem:[%s3501_s1 + $0x344] ss:$16 sps:$4 sm:$0xff]  }
  0x38   : > { %1222 = vmatprep.subr.bf16.mxu0 %v2686_v53  ;;  %1464 = vmatprep.subr.bf16.mxu1 %v2688_v54  ;;  %v2787_v53 = vld [vmem:[%s3501_s1 + $0x34c] ss:$16 sps:$4 sm:$0xff]   ;;  %v2775_v54 = vld [vmem:[%s3041_s12 + $0xa0] ss:$16 sps:$4 sm:$0xff]  }
  0x3b   : > { %1223 = vmatpush1.bf16.msra.mxu0 %v2690_v55  ;;  %1465 = vmatpush1.bf16.msra.mxu1 %v2691_v56  ;;  %v2782_v55 = vld [vmem:[%s3501_s1 + $0x340] ss:$16 sps:$4 sm:$0xff]   ;;  %v2785_v56 = vld [vmem:[%s3501_s1 + $0x348] ss:$16 sps:$4 sm:$0xff]  }
  0x3c   : > { %1224 = vmatprep.subr.bf16.mxu0 %v2692_v57  ;;  %1466 = vmatprep.subr.bf16.mxu1 %v2694_v58  ;;  %v2788_v57 = vld [vmem:[%s3041_s12 + $0xc4] ss:$16 sps:$4 sm:$0xff]  }
  0x3d   : > { %v2793_v58 = vld [vmem:[%s3501_s1 + $0x364] ss:$16 sps:$4 sm:$0xff]  }
  0x3f   : > { %1225 = vmatpush1.bf16.msra.mxu0 %v2696_v59  ;;  %1467 = vmatpush1.bf16.msra.mxu1 %v2697_v60  ;;  %v2796_v59 = vld [vmem:[%s3501_s1 + $0x36c] ss:$16 sps:$4 sm:$0xff]   ;;  %v2791_v60 = vld [vmem:[%s3501_s1 + $0x360] ss:$16 sps:$4 sm:$0xff]  }
  0x40   : > { %1226 = vmatprep.subr.bf16.mxu0 %v2698_v61  ;;  %1468 = vmatprep.subr.bf16.mxu1 %v2700_v62  ;;  %v2794_v61 = vld [vmem:[%s3501_s1 + $0x368] ss:$16 sps:$4 sm:$0xff]   ;;  %v1748_v62 = vld [vmem:[%s3503_s3] sm:$0xff] }
  0x41   : > { %1767 = vperm.xlu0 %2606, %v1748_v62  }
  0x43   : > { %1227 = vmatpush1.bf16.msra.mxu0 %v2702_v63  ;;  %1469 = vmatpush1.bf16.msra.mxu1 %v2703_v0  ;;  %v1750_v63 = vld [vmem:[%s3503_s3 + $0x10] sm:$0xff] }
  0x44   : > { %1317 = vmatprep.subr.bf16.mxu0 %v2709_v1  ;;  %1559 = vmatprep.subr.bf16.mxu1 %v2712_v2  ;;  %v2799_v0 = vld [vmem:[%s3501_s1 + $0x384] ss:$16 sps:$4 sm:$0xff]   ;;  %v2802_v1 = vld [vmem:[%s3501_s1 + $0x38c] ss:$16 sps:$4 sm:$0xff]   ;;  %v2790_v2 = vld [vmem:[%s3041_s12 + $0xc0] ss:$16 sps:$4 sm:$0xff]  }
  0x45   : > { %1777 = vperm.xlu1 %2607, %v1750_v63  }
  0x46   : > { %1229 = vmatmul.mubr.bf16.vlgmr.msra.gmra.mrb[0].mxu0 %v2704_v3  ;;  %1471 = vmatmul.mubr.bf16.vlgmr.msra.gmra.mrb[0].mxu1 %v2704_v3  ;;  %v2797_v3 = vld [vmem:[%s3501_s1 + $0x380] ss:$16 sps:$4 sm:$0xff]  }
  0x47   : > { %1318 = vmatpush1.bf16.msra.mxu0 %v2707_v4  ;;  %1560 = vmatpush1.bf16.msra.mxu1 %v2710_v5  ;;  %v2803_v4 = vld [vmem:[%s3041_s12 + $0xe4] ss:$16 sps:$4 sm:$0xff]   ;;  %v2800_v5 = vld [vmem:[%s3501_s1 + $0x388] ss:$16 sps:$4 sm:$0xff]  }
  0x48   : > { %1319 = vmatprep.subr.bf16.mxu0 %v2715_v6  ;;  %1561 = vmatprep.subr.bf16.mxu1 %v2718_v7  ;;  %v2808_v6 = vld [vmem:[%s3501_s1 + $0x3a4] ss:$16 sps:$4 sm:$0xff]   ;;  %v2811_v7 = vld [vmem:[%s3501_s1 + $0x3ac] ss:$16 sps:$4 sm:$0xff]  }
  0x49   : > { %1238 = vmatprep.mubr.bf16.mxu0 %v2719_v8  ;;  %1480 = vmatprep.mubr.bf16.mxu1 %v2719_v8  ;;  %v2806_v8 = vld [vmem:[%s3501_s1 + $0x3a0] ss:$16 sps:$4 sm:$0xff]  }
  0x4b   : > { %1320 = vmatpush1.bf16.msra.mxu0 %v2713_v9  ;;  %1562 = vmatpush1.bf16.msra.mxu1 %v2716_v10  ;;  %v1749_v9 = vld [vmem:[%s3503_s3 + $0x8] sm:$0xff]  ;;  %v1751_v10 = vld [vmem:[%s3503_s3 + $0x18] sm:$0xff] }
  0x4c   : > { %1321 = vmatprep.subr.bf16.mxu0 %v2724_v11  ;;  %1563 = vmatprep.subr.bf16.mxu1 %v2727_v12  ;;  %v2809_v11 = vld [vmem:[%s3501_s1 + $0x3a8] ss:$16 sps:$4 sm:$0xff]   ;;  %v230_v12 = vld [vmem:[%s3041_s12 + $0x100] sm:$0xff] }
  0x4d   : > { %1772 = vperm.xlu0 %2606, %v1749_v9   ;;  %1782 = vperm.xlu1 %2607, %v1751_v10  }
  0x4e   : > { %1239 = vmatmul.mubr.bf16.gmra.mrb[4].mxu0 %v2721_v13  ;;  %1481 = vmatmul.mubr.bf16.gmra.mrb[4].mxu1 %v2721_v13  ;;  %v2815_v13 = vld [vmem:[%s3501_s1 + $0x3c4] ss:$16 sps:$4 sm:$0xff]  }
  0x4f   : > { %1322 = vmatpush1.bf16.msra.mxu0 %v2722_v14  ;;  %1564 = vmatpush1.bf16.msra.mxu1 %v2725_v15  ;;  %v2818_v14 = vld [vmem:[%s3501_s1 + $0x3cc] ss:$16 sps:$4 sm:$0xff]   ;;  %v2805_v15 = vld [vmem:[%s3041_s12 + $0xe0] ss:$16 sps:$4 sm:$0xff]  }
  0x50   : > { %1323 = vmatprep.subr.bf16.mxu0 %v2730_v16  ;;  %1565 = vmatprep.subr.bf16.mxu1 %v2733_v17  ;;  %v2255_v16 = vcombine.high %v230_v12, %v230_v12  ;;  %v2813_v17 = vld [vmem:[%s3501_s1 + $0x3c0] ss:$16 sps:$4 sm:$0xff]  }
  0x51   : > { %1248 = vmatprep.mubr.bf16.mxu0 %v2734_v18  ;;  %1490 = vmatprep.mubr.bf16.mxu1 %v2734_v18  ;;  %v2816_v18 = vld [vmem:[%s3501_s1 + $0x3c8] ss:$16 sps:$4 sm:$0xff]  }
  0x53   : > { %1324 = vmatpush1.bf16.msra.mxu0 %v2728_v19  ;;  %1566 = vmatpush1.bf16.msra.mxu1 %v2731_v20  ;;  %v2822_v19 = vld [vmem:[%s3501_s1 + $0x3e4] ss:$16 sps:$4 sm:$0xff]   ;;  %v2825_v20 = vld [vmem:[%s3501_s1 + $0x3ec] ss:$16 sps:$4 sm:$0xff]  }
  0x54   : > { %1325 = vmatprep.subr.bf16.mxu0 %v2739_v21  ;;  %1567 = vmatprep.subr.bf16.mxu1 %v2742_v22  ;;  %v1752_v21 = vld [vmem:[%s3503_s3 + $0x20] sm:$0xff]  ;;  %v1753_v22 = vld [vmem:[%s3503_s3 + $0x28] sm:$0xff] }
  0x55   : > { %1787 = vperm.xlu0 %2606, %v1752_v21   ;;  %1792 = vperm.xlu1 %2607, %v1753_v22  }
  0x56   : > { %1249 = vmatmul.mubr.bf16.gmra.mrb[8].mxu0 %v2736_v23  ;;  %1491 = vmatmul.mubr.bf16.gmra.mrb[8].mxu1 %v2736_v23  ;;  %v2820_v23 = vld [vmem:[%s3501_s1 + $0x3e0] ss:$16 sps:$4 sm:$0xff]  }
  0x57   : > { %1326 = vmatpush1.bf16.msra.mxu0 %v2737_v24  ;;  %1568 = vmatpush1.bf16.msra.mxu1 %v2740_v25  ;;  %v2823_v24 = vld [vmem:[%s3501_s1 + $0x3e8] ss:$16 sps:$4 sm:$0xff]   ;;  %v2254_v25 = vcombine.low %v230_v12, %v230_v12 }
  0x58   : > { %1258 = vmatprep.mubr.bf16.mxu0 %v2743_v27  ;;  %1327 = vmatprep.subr.bf16.mxu0 %v2747_v28  ;;  %v1755_v28 = vld [vmem:[%s3503_s3 + $0x38] sm:$0xff] }
  0x59   : > { %1500 = vmatprep.mubr.bf16.mxu1 %v2743_v27  ;;  %1569 = vmatprep.subr.bf16.mxu1 %v2750_v29  ;;  %v1754_v27 = vld [vmem:[%s3503_s3 + $0x30] sm:$0xff]  ;;  %v1756_v29 = vld [vmem:[%s3503_s3 + $0x40] sm:$0xff] }
  0x5a   : > { %1797 = vperm.xlu0 %2606, %v1754_v27   ;;  %1802 = vperm.xlu1 %2607, %v1755_v28  }
  0x5b   : > { %1328 = vmatpush1.bf16.msra.mxu0 %v2745_v30  ;;  %1570 = vmatpush1.bf16.msra.mxu1 %v2748_v31  ;;  %v1757_v30 = vld [vmem:[%s3503_s3 + $0x48] sm:$0xff] }
  0x5c   : > { %1329 = vmatprep.subr.bf16.mxu0 %v2754_v32  ;;  %1571 = vmatprep.subr.bf16.mxu1 %v2757_v33  ;;  %v2826_v31 = vld [vmem:[%s3041_s12 + $0x8] ss:$16 sps:$4 sm:$0xff]   ;;  %v2829_v32 = vld [vmem:[%s3041_s12 + $0x2c] ss:$16 sps:$4 sm:$0xff]   ;;  %v1758_v33 = vld [vmem:[%s3503_s3 + $0x50] sm:$0xff] }
  0x5e   : > { %1259 = vmatmul.mubr.bf16.gmra.mrb[12].mxu0 %v2751_v34  ;;  %1501 = vmatmul.mubr.bf16.gmra.mrb[12].mxu1 %v2751_v34  ;;  %v1759_v34 = vld [vmem:[%s3503_s3 + $0x58] sm:$0xff] }
  0x5f   : > { %1330 = vmatpush1.bf16.msra.mxu0 %v2752_v35  ;;  %1572 = vmatpush1.bf16.msra.mxu1 %v2755_v36  ;;  %v1760_v35 = vld [vmem:[%s3503_s3 + $0x60] sm:$0xff]  ;;  %v1761_v36 = vld [vmem:[%s3503_s3 + $0x68] sm:$0xff] }
  0x60   : > { %1268 = vmatprep.mubr.bf16.mxu0 %v2758_v37  ;;  %1510 = vmatprep.mubr.bf16.mxu1 %v2758_v37  ;;  %v2831_v37 = vld [vmem:[%s3041_s12 + $0x28] ss:$16 sps:$4 sm:$0xff]  }
  0x61   : > { %1331 = vmatprep.subr.bf16.mxu0 %v2763_v38  ;;  %1573 = vmatprep.subr.bf16.mxu1 %v2766_v39  ;;  %v2832_v38 = vld [vmem:[%s3041_s12 + $0x4c] ss:$16 sps:$4 sm:$0xff]   ;;  %v1762_v39 = vld [vmem:[%s3503_s3 + $0x70] sm:$0xff] }
  0x62   : > { %1807 = vperm.xlu0 %2606, %v1756_v29   ;;  %1812 = vperm.xlu1 %2607, %v1757_v30  }
  0x63   : > { %1332 = vmatpush1.bf16.msra.mxu0 %v2761_v40  ;;  %1574 = vmatpush1.bf16.msra.mxu1 %v2764_v41  ;;  %v1763_v40 = vld [vmem:[%s3503_s3 + $0x78] sm:$0xff]  ;;  %v1764_v41 = vld [vmem:[%s3503_s3 + $0x80] sm:$0xff] }
  0x64   : > { %1333 = vmatprep.subr.bf16.mxu0 %v2769_v42  ;;  %1575 = vmatprep.subr.bf16.mxu1 %v2772_v43  ;;  %v2834_v42 = vld [vmem:[%s3041_s12 + $0x48] ss:$16 sps:$4 sm:$0xff]   ;;  %v2835_v43 = vld [vmem:[%s3041_s12 + $0x6c] ss:$16 sps:$4 sm:$0xff]  }
  0x66   : > { %1269 = vmatmul.mubr.bf16.gmra.mrb[16].mxu0 %v2760_v44  ;;  %1511 = vmatmul.mubr.bf16.gmra.mrb[16].mxu1 %v2760_v44  ;;  %v2837_v44 = vld [vmem:[%s3041_s12 + $0x68] ss:$16 sps:$4 sm:$0xff]  }
  0x67   : > { %1334 = vmatpush1.bf16.msra.mxu0 %v2767_v45  ;;  %1576 = vmatpush1.bf16.msra.mxu1 %v2770_v46  ;;  %v2838_v45 = vld [vmem:[%s3041_s12 + $0x8c] ss:$16 sps:$4 sm:$0xff]   ;;  %v2840_v46 = vld [vmem:[%s3041_s12 + $0x88] ss:$16 sps:$4 sm:$0xff]  }
  0x68   : > { %1278 = vmatprep.mubr.bf16.mxu0 %v2773_v47  ;;  %1520 = vmatprep.mubr.bf16.mxu1 %v2773_v47  ;;  %v2841_v47 = vld [vmem:[%s3041_s12 + $0xac] ss:$16 sps:$4 sm:$0xff]  }
  0x69   : > { %1335 = vmatprep.subr.bf16.mxu0 %v2778_v48  ;;  %1577 = vmatprep.subr.bf16.mxu1 %v2781_v49  ;;  %v2843_v48 = vld [vmem:[%s3041_s12 + $0xa8] ss:$16 sps:$4 sm:$0xff]   ;;  %v2844_v49 = vld [vmem:[%s3041_s12 + $0xcc] ss:$16 sps:$4 sm:$0xff]  }
  0x6a   : > { %1817 = vperm.xlu0 %2606, %v1758_v33   ;;  %1822 = vperm.xlu1 %2607, %v1759_v34  }
  0x6b   : > { %1336 = vmatpush1.bf16.msra.mxu0 %v2776_v50  ;;  %1578 = vmatpush1.bf16.msra.mxu1 %v2779_v51  ;;  %v2846_v50 = vld [vmem:[%s3041_s12 + $0xc8] ss:$16 sps:$4 sm:$0xff]   ;;  %v2847_v51 = vld [vmem:[%s3041_s12 + $0xec] ss:$16 sps:$4 sm:$0xff]  }
  0x6c   : > { %1337 = vmatprep.subr.bf16.mxu0 %v2784_v52  ;;  %1579 = vmatprep.subr.bf16.mxu1 %v2787_v53  ;;  %v231_v52 = vld [vmem:[%s3041_s12 + $0x108] sm:$0xff] }
  0x6d   : > { %v2849_v53 = vld [vmem:[%s3041_s12 + $0xe8] ss:$16 sps:$4 sm:$0xff]  }
  0x6e   : > { %1279 = vmatmul.mubr.bf16.gmra.mrb[20].mxu0 %v2775_v54  ;;  %1521 = vmatmul.mubr.bf16.gmra.mrb[20].mxu1 %v2775_v54  ;;  %v2257_v54 = vcombine.high %v231_v52, %v231_v52 }
  0x6f   : > { %1338 = vmatpush1.bf16.msra.mxu0 %v2782_v55  ;;  %1580 = vmatpush1.bf16.msra.mxu1 %v2785_v56  ;;  %v2256_v55 = vcombine.low %v231_v52, %v231_v52  ;;  %v362_v56 = vlaneseq }
  0x70   : > { %1288 = vmatprep.mubr.bf16.mxu0 %v2788_v57  ;;  %1530 = vmatprep.mubr.bf16.mxu1 %v2788_v57 }
  0x71   : > { %1339 = vmatprep.subr.bf16.mxu0 %v2793_v58  ;;  %1581 = vmatprep.subr.bf16.mxu1 %v2796_v59  ;;  %v363_v57 = vshrl.u32 %v362_v56, 7 }
  0x72   : > { %1827 = vperm.xlu0 %2606, %v1760_v35   ;;  %1832 = vperm.xlu1 %2607, %v1761_v36  }
  0x73   : > { %1340 = vmatpush1.bf16.msra.mxu0 %v2791_v60  ;;  %1582 = vmatpush1.bf16.msra.mxu1 %v2794_v61  ;;  %v364_v58 = vsub.s32 0, %v363_v57  ;;  %v372_v59 = vsub.s32 2, %v363_v57  ;;  %v360_v60 = vld [vmem:[%s3502_s2] sm:$0xf]  ;;  %v368_v61 = vsub.s32 1, %v363_v57  ;;  %v376_v62 = vsub.s32 3, %v363_v57 }
  0x74   : > { %1341 = vmatprep.subr.bf16.mxu0 %v2799_v0  ;;  %1583 = vmatprep.subr.bf16.mxu1 %v2802_v1 }
  0x75   : > { %v3380_v63 = vrot.slane %v360_v60, %v364_v58  ;;  %v3382_v0 = vrot.slane %v360_v60, %v372_v59  ;;  %v3384_v1 = vrot.slane %v360_v60, %v368_v61 }
  0x76   : > { %1289 = vmatmul.mubr.bf16.gmra.mrb[24].mxu0 %v2790_v2  ;;  %1531 = vmatmul.mubr.bf16.gmra.mrb[24].mxu1 %v2790_v2  ;;  %v3386_v2 = vrot.slane %v360_v60, %v376_v62 }
  0x77   : > { %1298 = vmatprep.mubr.bf16.mxu0 %v2803_v4  ;;  %1342 = vmatpush1.bf16.msra.mxu0 %v2797_v3 }
  0x78   : > { %1540 = vmatprep.mubr.bf16.mxu1 %v2803_v4  ;;  %1584 = vmatpush1.bf16.msra.mxu1 %v2800_v5 }
  0x79   : > { %1343 = vmatprep.subr.bf16.mxu0 %v2808_v6  ;;  %1585 = vmatprep.subr.bf16.mxu1 %v2811_v7 }
  0x7a   : > { %1837 = vperm.xlu0 %2606, %v1762_v39   ;;  %1842 = vperm.xlu1 %2607, %v1763_v40  }
  0x7b   : > { %1344 = vmatpush1.bf16.msra.mxu0 %v2806_v8 }
  0x7c   : > { %1586 = vmatpush1.bf16.msra.mxu1 %v2809_v11  ;;  %1345 = vmatprep.subr.bf16.mxu0 %v2815_v13 }
  0x7d   : > { %1587 = vmatprep.subr.bf16.mxu1 %v2818_v14 }
  0x7e   : > { %1299 = vmatmul.mubr.bf16.gmra.mrb[28].mxu0 %v2805_v15  ;;  %1541 = vmatmul.mubr.bf16.gmra.mrb[28].mxu1 %v2805_v15 }
  0x7f   : > { %1308 = vmatprep.mubr.bf16.mxu0 %v2255_v16  ;;  %1550 = vmatprep.mubr.bf16.mxu1 %v2255_v16 }
  0x80   : > { %1346 = vmatpush1.bf16.msra.mxu0 %v2813_v17  ;;  %1588 = vmatpush1.bf16.msra.mxu1 %v2816_v18 }
  0x81   : > { %1347 = vmatprep.subr.bf16.mxu0 %v2822_v19  ;;  %1589 = vmatprep.subr.bf16.mxu1 %v2825_v20 }
  0x82   : > { %1847 = vperm.xlu0 %2606, %v1764_v41  }
  0x84   : > { %1348 = vmatpush1.bf16.msra.mxu0 %v2820_v23  ;;  %1590 = vmatpush1.bf16.msra.mxu1 %v2823_v24 }
  0x86   : > { %1309 = vmatmul.mubr.bf16.gmra.mrb[32].mxu0 %v2254_v25  ;;  %1551 = vmatmul.mubr.bf16.gmra.mrb[32].mxu1 %v2254_v25 }
  0x87   : > { %1349 = vmatprep.mubr.bf16.mxu0 %v2828_v26  ;;  %1591 = vmatprep.mubr.bf16.mxu1 %v2828_v26 }
  0x8e   : > { %1350 = vmatmul.mubr.bf16.vlgmr.msra.gmra.mrb[0].mxu0 %v2826_v31  ;;  %1592 = vmatmul.mubr.bf16.vlgmr.msra.gmra.mrb[0].mxu1 %v2826_v31 }
  0x8f   : > { %1359 = vmatprep.mubr.bf16.mxu0 %v2829_v32  ;;  %1601 = vmatprep.mubr.bf16.mxu1 %v2829_v32 }
  0x96   : > { %1360 = vmatmul.mubr.bf16.gmra.mrb[4].mxu0 %v2831_v37  ;;  %1602 = vmatmul.mubr.bf16.gmra.mrb[4].mxu1 %v2831_v37 }
  0x97   : > { %1369 = vmatprep.mubr.bf16.mxu0 %v2832_v38  ;;  %1611 = vmatprep.mubr.bf16.mxu1 %v2832_v38 }
  0x9e   : > { %1370 = vmatmul.mubr.bf16.gmra.mrb[8].mxu0 %v2834_v42  ;;  %1612 = vmatmul.mubr.bf16.gmra.mrb[8].mxu1 %v2834_v42 }
  0x9f   : > { %1379 = vmatprep.mubr.bf16.mxu0 %v2835_v43  ;;  %1621 = vmatprep.mubr.bf16.mxu1 %v2835_v43 }
  0xa6   : > { %1380 = vmatmul.mubr.bf16.gmra.mrb[12].mxu0 %v2837_v44  ;;  %1622 = vmatmul.mubr.bf16.gmra.mrb[12].mxu1 %v2837_v44 }
  0xa7   : > { %1389 = vmatprep.mubr.bf16.mxu0 %v2838_v45  ;;  %1631 = vmatprep.mubr.bf16.mxu1 %v2838_v45 }
  0xae   : > { %1390 = vmatmul.mubr.bf16.gmra.mrb[16].mxu0 %v2840_v46  ;;  %1632 = vmatmul.mubr.bf16.gmra.mrb[16].mxu1 %v2840_v46 }
  0xaf   : > { %1399 = vmatprep.mubr.bf16.mxu0 %v2841_v47  ;;  %1641 = vmatprep.mubr.bf16.mxu1 %v2841_v47 }
  0xb6   : > { %1400 = vmatmul.mubr.bf16.gmra.mrb[20].mxu0 %v2843_v48  ;;  %1642 = vmatmul.mubr.bf16.gmra.mrb[20].mxu1 %v2843_v48 }
  0xb7   : > { %1409 = vmatprep.mubr.bf16.mxu0 %v2844_v49  ;;  %1651 = vmatprep.mubr.bf16.mxu1 %v2844_v49 }
  0xbe   : > { %1410 = vmatmul.mubr.bf16.gmra.mrb[24].mxu0 %v2846_v50  ;;  %1652 = vmatmul.mubr.bf16.gmra.mrb[24].mxu1 %v2846_v50 }
  0xbf   : > { %1419 = vmatprep.mubr.bf16.mxu0 %v2847_v51  ;;  %1661 = vmatprep.mubr.bf16.mxu1 %v2847_v51 }
  0xc0   : > { %v1768_v3 = vpop.permute.xlu0 %1767 }
  0xc4   : > { %v1778_v33 = vpop.permute.xlu1 %1777 }
  0xc6   : > { %1420 = vmatmul.mubr.bf16.gmra.mrb[28].mxu0 %v2849_v53  ;;  %1662 = vmatmul.mubr.bf16.gmra.mrb[28].mxu1 %v2849_v53 }
  0xc7   : > { %1429 = vmatprep.mubr.bf16.mxu0 %v2257_v54  ;;  %1671 = vmatprep.mubr.bf16.mxu1 %v2257_v54 }
  0xcc   : > { %v1773_v24 = vpop.permute.xlu0 %1772  ;;  %v1783_v62 = vpop.permute.xlu1 %1782 }
  0xce   : > { %1430 = vmatmul.mubr.bf16.gmra.mrb[32].mxu0 %v2256_v55  ;;  %1672 = vmatmul.mubr.bf16.gmra.mrb[32].mxu1 %v2256_v55 }
 0x161   : > { %v1351_v4 = vpop.f32.mrb[0].mxu0  ;;  %v1593_v5 = vpop.f32.mrb[0].mxu1 }
 0x162   : > { %v2456_v6 = vadd.f32 %v1351_v4, %v3380_v63  ;;  %v2490_v7 = vadd.f32 %v1593_v5, %v3382_v0  ;;  %v1353_v8 = vpop.f32.mrb[1].mxu0  ;;  %v1595_v9 = vpop.f32.mrb[1].mxu1 }
 0x163   : > { %v2457_v10 = vadd.f32 %v1353_v8, %v3384_v1  ;;  %v2491_v11 = vadd.f32 %v1595_v9, %v3386_v2  ;;  %v1355_v12 = vpop.f32.mrb[2].mxu0  ;;  %v1597_v13 = vpop.f32.mrb[2].mxu1 }
 0x164   : > { %v1680_v14 = vmax.f32 %v2456_v6, 0.0  ;;  %v1682_v15 = vmax.f32 %v2490_v7, 0.0  ;;  %v2458_v16 = vadd.f32 %v1355_v12, %v3380_v63  ;;  %v2492_v17 = vadd.f32 %v1597_v13, %v3382_v0  ;;  %v1357_v18 = vpop.f32.mrb[3].mxu0  ;;  %v1599_v19 = vpop.f32.mrb[3].mxu1 }
 0x165   : > { %v1681_v20 = vmax.f32 %v2457_v10, 0.0  ;;  %v1683_v21 = vmax.f32 %v2491_v11, 0.0  ;;  %v2459_v22 = vadd.f32 %v1357_v18, %v3384_v1  ;;  %v2493_v23 = vadd.f32 %v1599_v19, %v3386_v2 }
 0x166   : > { %v1850_v25 = vmul.f32 %v1768_v3, %v1680_v14  ;;  %v1852_v26 = vmul.f32 %v1768_v3, %v1682_v15  ;;  %v1684_v27 = vmax.f32 %v2458_v16, 0.0  ;;  %v1686_v28 = vmax.f32 %v2492_v17, 0.0 }
 0x167   : > { %v1851_v29 = vmul.f32 %v1768_v3, %v1681_v20  ;;  %v1853_v30 = vmul.f32 %v1768_v3, %v1683_v21  ;;  %v1685_v31 = vmax.f32 %v2459_v22, 0.0  ;;  %v1687_v32 = vmax.f32 %v2493_v23, 0.0 }
 0x168   : > { %v1854_v34 = vmul.f32 %v1773_v24, %v1684_v27  ;;  %v1856_v35 = vmul.f32 %v1773_v24, %v1686_v28 }
 0x169   : > { %v2422_v36 = vpack.c.bf16 %v1851_v29, %v1850_v25  ;;  %v2423_v37 = vpack.c.bf16 %v1853_v30, %v1852_v26  ;;  %v1855_v38 = vmul.f32 %v1773_v24, %v1685_v31  ;;  %v1857_v39 = vmul.f32 %v1773_v24, %v1687_v32  ;;  %v1361_v40 = vpop.f32.mrb[4].mxu0  ;;  %v1603_v41 = vpop.f32.mrb[4].mxu1 }
 0x16a   : > { %v2460_v42 = vadd.f32 %v1361_v40, %v3380_v63  ;;  %v2494_v43 = vadd.f32 %v1603_v41, %v3382_v0  ;;  %v1363_v44 = vpop.f32.mrb[5].mxu0  ;;  %v1605_v45 = vpop.f32.mrb[5].mxu1 }
 0x16b   : > { %2126 = vst [vmem:[%s3401_s20] sm:$0xff] %v2422_v36  ;;  %2127 = vst [vmem:[%s3401_s20 + $0x8] sm:$0xff] %v2423_v37  ;;  %v2424_v46 = vpack.c.bf16 %v1855_v38, %v1854_v34  ;;  %v2425_v47 = vpack.c.bf16 %v1857_v39, %v1856_v35  ;;  %v2461_v48 = vadd.f32 %v1363_v44, %v3384_v1  ;;  %v1365_v50 = vpop.f32.mrb[6].mxu0  ;;  %v1607_v51 = vpop.f32.mrb[6].mxu1 }
 0x16c   : > { %v2495_v49 = vadd.f32 %v1605_v45, %v3386_v2  ;;  %v1688_v52 = vmax.f32 %v2460_v42, 0.0  ;;  %v1690_v53 = vmax.f32 %v2494_v43, 0.0  ;;  %v2462_v54 = vadd.f32 %v1365_v50, %v3380_v63  ;;  %v1367_v56 = vpop.f32.mrb[7].mxu0  ;;  %v1609_v57 = vpop.f32.mrb[7].mxu1 }
 0x16d   : > { %v2496_v55 = vadd.f32 %v1607_v51, %v3382_v0  ;;  %2128 = vst [vmem:[%s3401_s20 + $0x10] sm:$0xff] %v2424_v46  ;;  %2129 = vst [vmem:[%s3401_s20 + $0x18] sm:$0xff] %v2425_v47  ;;  %v1689_v58 = vmax.f32 %v2461_v48, 0.0  ;;  %v2463_v60 = vadd.f32 %v1367_v56, %v3384_v1  ;;  %v2497_v61 = vadd.f32 %v1609_v57, %v3386_v2  ;;  %v1788_v35 = vpop.permute.xlu0 %1787  ;;  %v1793_v40 = vpop.permute.xlu1 %1792 }
 0x16e   : > { %v1691_v59 = vmax.f32 %v2495_v49, 0.0  ;;  %v1858_v3 = vmul.f32 %v1778_v33, %v1688_v52  ;;  %v1860_v4 = vmul.f32 %v1778_v33, %v1690_v53  ;;  %v1692_v5 = vmax.f32 %v2462_v54, 0.0 }
 0x16f   : > { %v1694_v6 = vmax.f32 %v2496_v55, 0.0  ;;  %v1859_v7 = vmul.f32 %v1778_v33, %v1689_v58  ;;  %v1693_v9 = vmax.f32 %v2463_v60, 0.0  ;;  %v1695_v10 = vmax.f32 %v2497_v61, 0.0 }
 0x170   : > { %v1861_v8 = vmul.f32 %v1778_v33, %v1691_v59  ;;  %v1862_v11 = vmul.f32 %v1783_v62, %v1692_v5 }
 0x171   : > { %v1864_v12 = vmul.f32 %v1783_v62, %v1694_v6  ;;  %v2426_v13 = vpack.c.bf16 %v1859_v7, %v1858_v3  ;;  %v1863_v15 = vmul.f32 %v1783_v62, %v1693_v9  ;;  %v1865_v16 = vmul.f32 %v1783_v62, %v1695_v10  ;;  %v1371_v17 = vpop.f32.mrb[8].mxu0  ;;  %v1613_v18 = vpop.f32.mrb[8].mxu1 }
 0x172   : > { %v2427_v14 = vpack.c.bf16 %v1861_v8, %v1860_v4  ;;  %v2464_v19 = vadd.f32 %v1371_v17, %v3380_v63  ;;  %v2498_v20 = vadd.f32 %v1613_v18, %v3382_v0  ;;  %v1373_v21 = vpop.f32.mrb[9].mxu0  ;;  %v1615_v22 = vpop.f32.mrb[9].mxu1 }
 0x173   : > { %2130 = vst [vmem:[%s3401_s20 + $0x20] sm:$0xff] %v2426_v13  ;;  %v2428_v23 = vpack.c.bf16 %v1863_v15, %v1862_v11  ;;  %v2429_v24 = vpack.c.bf16 %v1865_v16, %v1864_v12  ;;  %v2465_v25 = vadd.f32 %v1373_v21, %v3384_v1  ;;  %v2499_v26 = vadd.f32 %v1615_v22, %v3386_v2  ;;  %v1375_v27 = vpop.f32.mrb[10].mxu0  ;;  %v1617_v28 = vpop.f32.mrb[10].mxu1 }
 0x174   : > { %2131 = vst [vmem:[%s3401_s20 + $0x28] sm:$0xff] %v2427_v14  ;;  %v1696_v29 = vmax.f32 %v2464_v19, 0.0  ;;  %v1698_v30 = vmax.f32 %v2498_v20, 0.0  ;;  %v2466_v31 = vadd.f32 %v1375_v27, %v3380_v63  ;;  %v2500_v32 = vadd.f32 %v1617_v28, %v3382_v0  ;;  %v1377_v33 = vpop.f32.mrb[11].mxu0  ;;  %v1619_v34 = vpop.f32.mrb[11].mxu1 }
 0x175   : > { %2132 = vst [vmem:[%s3401_s20 + $0x30] sm:$0xff] %v2428_v23  ;;  %2133 = vst [vmem:[%s3401_s20 + $0x38] sm:$0xff] %v2429_v24  ;;  %v1697_v36 = vmax.f32 %v2465_v25, 0.0  ;;  %v1699_v37 = vmax.f32 %v2499_v26, 0.0  ;;  %v2467_v38 = vadd.f32 %v1377_v33, %v3384_v1  ;;  %v2501_v39 = vadd.f32 %v1619_v34, %v3386_v2  ;;  %v1798_v13 = vpop.permute.xlu0 %1797  ;;  %v1803_v24 = vpop.permute.xlu1 %1802 }
 0x176   : > { %v1866_v41 = vmul.f32 %v1788_v35, %v1696_v29  ;;  %v1868_v42 = vmul.f32 %v1788_v35, %v1698_v30  ;;  %v1700_v43 = vmax.f32 %v2466_v31, 0.0  ;;  %v1702_v44 = vmax.f32 %v2500_v32, 0.0 }
 0x177   : > { %v1867_v45 = vmul.f32 %v1788_v35, %v1697_v36  ;;  %v1869_v46 = vmul.f32 %v1788_v35, %v1699_v37  ;;  %v1701_v47 = vmax.f32 %v2467_v38, 0.0  ;;  %v1703_v48 = vmax.f32 %v2501_v39, 0.0 }
 0x178   : > { %v1870_v49 = vmul.f32 %v1793_v40, %v1700_v43  ;;  %v1872_v50 = vmul.f32 %v1793_v40, %v1702_v44 }
 0x179   : > { %v2430_v51 = vpack.c.bf16 %v1867_v45, %v1866_v41  ;;  %v2431_v52 = vpack.c.bf16 %v1869_v46, %v1868_v42  ;;  %v1871_v53 = vmul.f32 %v1793_v40, %v1701_v47  ;;  %v1873_v54 = vmul.f32 %v1793_v40, %v1703_v48  ;;  %v1381_v55 = vpop.f32.mrb[12].mxu0  ;;  %v1623_v56 = vpop.f32.mrb[12].mxu1 }
 0x17a   : > { %v2468_v57 = vadd.f32 %v1381_v55, %v3380_v63  ;;  %v2502_v58 = vadd.f32 %v1623_v56, %v3382_v0  ;;  %v1383_v59 = vpop.f32.mrb[13].mxu0  ;;  %v1625_v60 = vpop.f32.mrb[13].mxu1 }
 0x17b   : > { %2134 = vst [vmem:[%s3401_s20 + $0x40] sm:$0xff] %v2430_v51  ;;  %2135 = vst [vmem:[%s3401_s20 + $0x48] sm:$0xff] %v2431_v52  ;;  %v2432_v61 = vpack.c.bf16 %v1871_v53, %v1870_v49  ;;  %v2433_v62 = vpack.c.bf16 %v1873_v54, %v1872_v50  ;;  %v2469_v3 = vadd.f32 %v1383_v59, %v3384_v1  ;;  %v1385_v5 = vpop.f32.mrb[14].mxu0  ;;  %v1627_v6 = vpop.f32.mrb[14].mxu1 }
 0x17c   : > { %v2503_v4 = vadd.f32 %v1625_v60, %v3386_v2  ;;  %v1704_v7 = vmax.f32 %v2468_v57, 0.0  ;;  %v1706_v8 = vmax.f32 %v2502_v58, 0.0  ;;  %v2470_v9 = vadd.f32 %v1385_v5, %v3380_v63  ;;  %v1387_v11 = vpop.f32.mrb[15].mxu0  ;;  %v1629_v12 = vpop.f32.mrb[15].mxu1 }
 0x17d   : > { %v2504_v10 = vadd.f32 %v1627_v6, %v3382_v0  ;;  %2136 = vst [vmem:[%s3401_s20 + $0x50] sm:$0xff] %v2432_v61  ;;  %2137 = vst [vmem:[%s3401_s20 + $0x58] sm:$0xff] %v2433_v62  ;;  %v1705_v14 = vmax.f32 %v2469_v3, 0.0  ;;  %v2471_v16 = vadd.f32 %v1387_v11, %v3384_v1  ;;  %v2505_v17 = vadd.f32 %v1629_v12, %v3386_v2  ;;  %v1808_v51 = vpop.permute.xlu0 %1807  ;;  %v1813_v60 = vpop.permute.xlu1 %1812 }
 0x17e   : > { %v1707_v15 = vmax.f32 %v2503_v4, 0.0  ;;  %v1874_v18 = vmul.f32 %v1798_v13, %v1704_v7  ;;  %v1876_v19 = vmul.f32 %v1798_v13, %v1706_v8  ;;  %v1708_v20 = vmax.f32 %v2470_v9, 0.0 }
 0x17f   : > { %v1710_v21 = vmax.f32 %v2504_v10, 0.0  ;;  %v1875_v22 = vmul.f32 %v1798_v13, %v1705_v14  ;;  %v1709_v25 = vmax.f32 %v2471_v16, 0.0  ;;  %v1711_v26 = vmax.f32 %v2505_v17, 0.0 }
 0x180   : > { %v1877_v23 = vmul.f32 %v1798_v13, %v1707_v15  ;;  %v1878_v27 = vmul.f32 %v1803_v24, %v1708_v20 }
 0x181   : > { %v1880_v28 = vmul.f32 %v1803_v24, %v1710_v21  ;;  %v2434_v29 = vpack.c.bf16 %v1875_v22, %v1874_v18  ;;  %v1879_v31 = vmul.f32 %v1803_v24, %v1709_v25  ;;  %v1881_v32 = vmul.f32 %v1803_v24, %v1711_v26  ;;  %v1391_v33 = vpop.f32.mrb[16].mxu0  ;;  %v1633_v34 = vpop.f32.mrb[16].mxu1 }
 0x182   : > { %v2435_v30 = vpack.c.bf16 %v1877_v23, %v1876_v19  ;;  %v2472_v35 = vadd.f32 %v1391_v33, %v3380_v63  ;;  %v2506_v36 = vadd.f32 %v1633_v34, %v3382_v0  ;;  %v1393_v37 = vpop.f32.mrb[17].mxu0  ;;  %v1635_v38 = vpop.f32.mrb[17].mxu1 }
 0x183   : > { %2138 = vst [vmem:[%s3401_s20 + $0x60] sm:$0xff] %v2434_v29  ;;  %v2436_v39 = vpack.c.bf16 %v1879_v31, %v1878_v27  ;;  %v2437_v40 = vpack.c.bf16 %v1881_v32, %v1880_v28  ;;  %v2473_v41 = vadd.f32 %v1393_v37, %v3384_v1  ;;  %v2507_v42 = vadd.f32 %v1635_v38, %v3386_v2  ;;  %v1395_v43 = vpop.f32.mrb[18].mxu0  ;;  %v1637_v44 = vpop.f32.mrb[18].mxu1 }
 0x184   : > { %2139 = vst [vmem:[%s3401_s20 + $0x68] sm:$0xff] %v2435_v30  ;;  %v1712_v45 = vmax.f32 %v2472_v35, 0.0  ;;  %v1714_v46 = vmax.f32 %v2506_v36, 0.0  ;;  %v2474_v47 = vadd.f32 %v1395_v43, %v3380_v63  ;;  %v2508_v48 = vadd.f32 %v1637_v44, %v3382_v0  ;;  %v1397_v49 = vpop.f32.mrb[19].mxu0  ;;  %v1639_v50 = vpop.f32.mrb[19].mxu1 }
 0x185   : > { %2140 = vst [vmem:[%s3401_s20 + $0x70] sm:$0xff] %v2436_v39  ;;  %2141 = vst [vmem:[%s3401_s20 + $0x78] sm:$0xff] %v2437_v40  ;;  %v1713_v52 = vmax.f32 %v2473_v41, 0.0  ;;  %v1715_v53 = vmax.f32 %v2507_v42, 0.0  ;;  %v2475_v54 = vadd.f32 %v1397_v49, %v3384_v1  ;;  %v2509_v55 = vadd.f32 %v1639_v50, %v3386_v2  ;;  %v1818_v29 = vpop.permute.xlu0 %1817  ;;  %v1823_v38 = vpop.permute.xlu1 %1822 }
 0x186   : > { %v1882_v56 = vmul.f32 %v1808_v51, %v1712_v45  ;;  %v1884_v57 = vmul.f32 %v1808_v51, %v1714_v46  ;;  %v1716_v58 = vmax.f32 %v2474_v47, 0.0  ;;  %v1718_v59 = vmax.f32 %v2508_v48, 0.0 }
 0x187   : > { %v1883_v61 = vmul.f32 %v1808_v51, %v1713_v52  ;;  %v1885_v62 = vmul.f32 %v1808_v51, %v1715_v53  ;;  %v1717_v3 = vmax.f32 %v2475_v54, 0.0  ;;  %v1719_v4 = vmax.f32 %v2509_v55, 0.0 }
 0x188   : > { %v1886_v5 = vmul.f32 %v1813_v60, %v1716_v58  ;;  %v1888_v6 = vmul.f32 %v1813_v60, %v1718_v59 }
 0x189   : > { %v2438_v7 = vpack.c.bf16 %v1883_v61, %v1882_v56  ;;  %v2439_v8 = vpack.c.bf16 %v1885_v62, %v1884_v57  ;;  %v1887_v9 = vmul.f32 %v1813_v60, %v1717_v3  ;;  %v1889_v10 = vmul.f32 %v1813_v60, %v1719_v4  ;;  %v1401_v11 = vpop.f32.mrb[20].mxu0  ;;  %v1643_v12 = vpop.f32.mrb[20].mxu1 }
 0x18a   : > { %v2476_v13 = vadd.f32 %v1401_v11, %v3380_v63  ;;  %v2510_v14 = vadd.f32 %v1643_v12, %v3382_v0  ;;  %v1403_v15 = vpop.f32.mrb[21].mxu0  ;;  %v1645_v16 = vpop.f32.mrb[21].mxu1 }
 0x18b   : > { %2142 = vst [vmem:[%s3401_s20 + $0x80] sm:$0xff] %v2438_v7  ;;  %2143 = vst [vmem:[%s3401_s20 + $0x88] sm:$0xff] %v2439_v8  ;;  %v2440_v17 = vpack.c.bf16 %v1887_v9, %v1886_v5  ;;  %v2441_v18 = vpack.c.bf16 %v1889_v10, %v1888_v6  ;;  %v2477_v19 = vadd.f32 %v1403_v15, %v3384_v1  ;;  %v1405_v21 = vpop.f32.mrb[22].mxu0  ;;  %v1647_v22 = vpop.f32.mrb[22].mxu1 }
 0x18c   : > { %v2511_v20 = vadd.f32 %v1645_v16, %v3386_v2  ;;  %v1720_v23 = vmax.f32 %v2476_v13, 0.0  ;;  %v1722_v24 = vmax.f32 %v2510_v14, 0.0  ;;  %v2478_v25 = vadd.f32 %v1405_v21, %v3380_v63  ;;  %v1407_v27 = vpop.f32.mrb[23].mxu0  ;;  %v1649_v28 = vpop.f32.mrb[23].mxu1 }
 0x18d   : > { %v2512_v26 = vadd.f32 %v1647_v22, %v3382_v0  ;;  %2144 = vst [vmem:[%s3401_s20 + $0x90] sm:$0xff] %v2440_v17  ;;  %2145 = vst [vmem:[%s3401_s20 + $0x98] sm:$0xff] %v2441_v18  ;;  %v1721_v30 = vmax.f32 %v2477_v19, 0.0  ;;  %v2479_v32 = vadd.f32 %v1407_v27, %v3384_v1  ;;  %v2513_v33 = vadd.f32 %v1649_v28, %v3386_v2  ;;  %v1828_v7 = vpop.permute.xlu0 %1827  ;;  %v1833_v16 = vpop.permute.xlu1 %1832 }
 0x18e   : > { %v1723_v31 = vmax.f32 %v2511_v20, 0.0  ;;  %v1890_v34 = vmul.f32 %v1818_v29, %v1720_v23  ;;  %v1892_v35 = vmul.f32 %v1818_v29, %v1722_v24  ;;  %v1724_v36 = vmax.f32 %v2478_v25, 0.0 }
 0x18f   : > { %v1726_v37 = vmax.f32 %v2512_v26, 0.0  ;;  %v1891_v39 = vmul.f32 %v1818_v29, %v1721_v30  ;;  %v1725_v41 = vmax.f32 %v2479_v32, 0.0  ;;  %v1727_v42 = vmax.f32 %v2513_v33, 0.0 }
 0x190   : > { %v1893_v40 = vmul.f32 %v1818_v29, %v1723_v31  ;;  %v1894_v43 = vmul.f32 %v1823_v38, %v1724_v36 }
 0x191   : > { %v1896_v44 = vmul.f32 %v1823_v38, %v1726_v37  ;;  %v2442_v45 = vpack.c.bf16 %v1891_v39, %v1890_v34  ;;  %v1895_v47 = vmul.f32 %v1823_v38, %v1725_v41  ;;  %v1897_v48 = vmul.f32 %v1823_v38, %v1727_v42  ;;  %v1411_v49 = vpop.f32.mrb[24].mxu0  ;;  %v1653_v50 = vpop.f32.mrb[24].mxu1 }
 0x192   : > { %v2443_v46 = vpack.c.bf16 %v1893_v40, %v1892_v35  ;;  %v2480_v51 = vadd.f32 %v1411_v49, %v3380_v63  ;;  %v2514_v52 = vadd.f32 %v1653_v50, %v3382_v0  ;;  %v1413_v53 = vpop.f32.mrb[25].mxu0  ;;  %v1655_v54 = vpop.f32.mrb[25].mxu1 }
 0x193   : > { %2146 = vst [vmem:[%s3401_s20 + $0xa0] sm:$0xff] %v2442_v45  ;;  %v2444_v55 = vpack.c.bf16 %v1895_v47, %v1894_v43  ;;  %v2445_v56 = vpack.c.bf16 %v1897_v48, %v1896_v44  ;;  %v2481_v57 = vadd.f32 %v1413_v53, %v3384_v1  ;;  %v2515_v58 = vadd.f32 %v1655_v54, %v3386_v2  ;;  %v1415_v59 = vpop.f32.mrb[26].mxu0  ;;  %v1657_v60 = vpop.f32.mrb[26].mxu1 }
 0x194   : > { %2147 = vst [vmem:[%s3401_s20 + $0xa8] sm:$0xff] %v2443_v46  ;;  %v1728_v61 = vmax.f32 %v2480_v51, 0.0  ;;  %v1730_v62 = vmax.f32 %v2514_v52, 0.0  ;;  %v2482_v3 = vadd.f32 %v1415_v59, %v3380_v63  ;;  %v2516_v4 = vadd.f32 %v1657_v60, %v3382_v0  ;;  %v1417_v5 = vpop.f32.mrb[27].mxu0  ;;  %v1659_v6 = vpop.f32.mrb[27].mxu1 }
 0x195   : > { %2148 = vst [vmem:[%s3401_s20 + $0xb0] sm:$0xff] %v2444_v55  ;;  %2149 = vst [vmem:[%s3401_s20 + $0xb8] sm:$0xff] %v2445_v56  ;;  %v1729_v8 = vmax.f32 %v2481_v57, 0.0  ;;  %v1731_v9 = vmax.f32 %v2515_v58, 0.0  ;;  %v2483_v10 = vadd.f32 %v1417_v5, %v3384_v1  ;;  %v2517_v11 = vadd.f32 %v1659_v6, %v3386_v2  ;;  %v1838_v45 = vpop.permute.xlu0 %1837  ;;  %v1843_v54 = vpop.permute.xlu1 %1842 }
 0x196   : > { %v1898_v12 = vmul.f32 %v1828_v7, %v1728_v61  ;;  %v1900_v13 = vmul.f32 %v1828_v7, %v1730_v62  ;;  %v1732_v14 = vmax.f32 %v2482_v3, 0.0  ;;  %v1734_v15 = vmax.f32 %v2516_v4, 0.0 }
 0x197   : > { %v1899_v17 = vmul.f32 %v1828_v7, %v1729_v8  ;;  %v1901_v18 = vmul.f32 %v1828_v7, %v1731_v9  ;;  %v1733_v19 = vmax.f32 %v2483_v10, 0.0  ;;  %v1735_v20 = vmax.f32 %v2517_v11, 0.0 }
 0x198   : > { %v1902_v21 = vmul.f32 %v1833_v16, %v1732_v14  ;;  %v1904_v22 = vmul.f32 %v1833_v16, %v1734_v15 }
 0x199   : > { %v2446_v23 = vpack.c.bf16 %v1899_v17, %v1898_v12  ;;  %v2447_v24 = vpack.c.bf16 %v1901_v18, %v1900_v13  ;;  %v1903_v25 = vmul.f32 %v1833_v16, %v1733_v19  ;;  %v1905_v26 = vmul.f32 %v1833_v16, %v1735_v20  ;;  %v1421_v27 = vpop.f32.mrb[28].mxu0  ;;  %v1663_v28 = vpop.f32.mrb[28].mxu1 }
 0x19a   : > { %v2484_v29 = vadd.f32 %v1421_v27, %v3380_v63  ;;  %v2518_v30 = vadd.f32 %v1663_v28, %v3382_v0  ;;  %v1423_v31 = vpop.f32.mrb[29].mxu0  ;;  %v1665_v32 = vpop.f32.mrb[29].mxu1 }
 0x19b   : > { %2150 = vst [vmem:[%s3401_s20 + $0xc0] sm:$0xff] %v2446_v23  ;;  %2151 = vst [vmem:[%s3401_s20 + $0xc8] sm:$0xff] %v2447_v24  ;;  %v2448_v33 = vpack.c.bf16 %v1903_v25, %v1902_v21  ;;  %v2449_v34 = vpack.c.bf16 %v1905_v26, %v1904_v22  ;;  %v2485_v35 = vadd.f32 %v1423_v31, %v3384_v1  ;;  %v1425_v37 = vpop.f32.mrb[30].mxu0  ;;  %v1667_v38 = vpop.f32.mrb[30].mxu1 }
 0x19c   : > { %v2519_v36 = vadd.f32 %v1665_v32, %v3386_v2  ;;  %v1736_v39 = vmax.f32 %v2484_v29, 0.0  ;;  %v1738_v40 = vmax.f32 %v2518_v30, 0.0  ;;  %v2486_v41 = vadd.f32 %v1425_v37, %v3380_v63  ;;  %v1427_v43 = vpop.f32.mrb[31].mxu0  ;;  %v1669_v44 = vpop.f32.mrb[31].mxu1 }
 0x19d   : > { %v2520_v42 = vadd.f32 %v1667_v38, %v3382_v0  ;;  %2152 = vst [vmem:[%s3401_s20 + $0xd0] sm:$0xff] %v2448_v33  ;;  %2153 = vst [vmem:[%s3401_s20 + $0xd8] sm:$0xff] %v2449_v34  ;;  %v1737_v46 = vmax.f32 %v2485_v35, 0.0  ;;  %v2487_v48 = vadd.f32 %v1427_v43, %v3384_v1  ;;  %v2521_v49 = vadd.f32 %v1669_v44, %v3386_v2  ;;  %v1848_v19 = vpop.permute.xlu0 %1847 }
 0x19e   : > { %v1739_v47 = vmax.f32 %v2519_v36, 0.0  ;;  %v1906_v50 = vmul.f32 %v1838_v45, %v1736_v39  ;;  %v1908_v51 = vmul.f32 %v1838_v45, %v1738_v40  ;;  %v1740_v52 = vmax.f32 %v2486_v41, 0.0 }
 0x19f   : > { %v1742_v53 = vmax.f32 %v2520_v42, 0.0  ;;  %v1907_v55 = vmul.f32 %v1838_v45, %v1737_v46  ;;  %v1741_v57 = vmax.f32 %v2487_v48, 0.0  ;;  %v1743_v58 = vmax.f32 %v2521_v49, 0.0 }
 0x1a0   : > { %v1909_v56 = vmul.f32 %v1838_v45, %v1739_v47  ;;  %v1910_v59 = vmul.f32 %v1843_v54, %v1740_v52 }
 0x1a1   : > { %v1912_v60 = vmul.f32 %v1843_v54, %v1742_v53  ;;  %v2450_v61 = vpack.c.bf16 %v1907_v55, %v1906_v50  ;;  %v1911_v3 = vmul.f32 %v1843_v54, %v1741_v57  ;;  %v1913_v4 = vmul.f32 %v1843_v54, %v1743_v58  ;;  %v1431_v5 = vpop.f32.mrb[32].mxu0  ;;  %v1673_v6 = vpop.f32.mrb[32].mxu1 }
 0x1a2   : > { %v2451_v62 = vpack.c.bf16 %v1909_v56, %v1908_v51  ;;  %v2488_v7 = vadd.f32 %v1431_v5, %v3380_v63  ;;  %v2522_v8 = vadd.f32 %v1673_v6, %v3382_v0  ;;  %v1433_v9 = vpop.f32.mrb[33].mxu0  ;;  %v1675_v10 = vpop.f32.mrb[33].mxu1 }
 0x1a3   : > { %2154 = vst [vmem:[%s3401_s20 + $0xe0] sm:$0xff] %v2450_v61  ;;  %v2452_v11 = vpack.c.bf16 %v1911_v3, %v1910_v59  ;;  %v2453_v12 = vpack.c.bf16 %v1913_v4, %v1912_v60  ;;  %v2489_v13 = vadd.f32 %v1433_v9, %v3384_v1  ;;  %v2523_v14 = vadd.f32 %v1675_v10, %v3386_v2  ;;  %v1435_v15 = vpop.f32.mrb[34].mxu0  ;;  %v1677_v16 = vpop.f32.mrb[34].mxu1 }
 0x1a4   : > { %2155 = vst [vmem:[%s3401_s20 + $0xe8] sm:$0xff] %v2451_v62  ;;  %v1744_v17 = vmax.f32 %v2488_v7, 0.0  ;;  %v1746_v63 = vmax.f32 %v2522_v8, 0.0  ;;  %v1436_v18 = vpop.f32.mrb[35].mxu0  ;;  %v1678_v0 = vpop.f32.mrb[35].mxu1 }
 0x1a5   : > { %2156 = vst [vmem:[%s3401_s20 + $0xf0] sm:$0xff] %v2452_v11  ;;  %2157 = vst [vmem:[%s3401_s20 + $0xf8] sm:$0xff] %v2453_v12  ;;  %v1745_v20 = vmax.f32 %v2489_v13, 0.0  ;;  %v1747_v21 = vmax.f32 %v2523_v14, 0.0 }
 0x1a6   : > { %v1914_v22 = vmul.f32 %v1848_v19, %v1744_v17  ;;  %v1916_v23 = vmul.f32 %v1848_v19, %v1746_v63 }
 0x1a7   : > { %v1915_v24 = vmul.f32 %v1848_v19, %v1745_v20  ;;  %v1917_v25 = vmul.f32 %v1848_v19, %v1747_v21 }
 0x1a9   : > { %v2454_v1 = vpack.c.bf16 %v1915_v24, %v1914_v22  ;;  %v2455_v26 = vpack.c.bf16 %v1917_v25, %v1916_v23 }
 0x1ab   : > { %2158 = vst [vmem:[%s3401_s20 + $0x100] sm:$0xff] %v2454_v1  ;;  %2159 = vst [vmem:[%s3401_s20 + $0x108] sm:$0xff] %v2455_v26 }
 0x1ac PF: > { %s14_s15 = sadd.s32 1, %s2858_s15  }
 0x1ad   : > { %p11_p4 = scmp.ge.s32.totalorder %s14_s15, 4  }
 0x1af   :  { %13 = sbr.rel (!%p11_p4) target bundleno = 1 (0x1), region = 66 }

// kernel: incept_block3.7
= control target key start
LH: loop header
LB: loop body
LE: loop exit
PB: predicated region body
PF: predicated region fallthrough
CT: control target
= control target key end

     0   :  { %s4125_s15 = smov 0   ;;  %s4127_s16 = smov 0   ;;  %s5266_s0 = inlined_call_operand.vmem [shape: bf16[2,136,512], index: 0, kind: input, shape index: {}]   ;;  %s5267_s1 = inlined_call_operand.vmem [shape: bf16[9,128,160], index: 1, kind: input, shape index: {}]   ;;  %s5268_s2 = inlined_call_operand.vmem [shape: f32[1,160], index: 2, kind: input, shape index: {}]   ;;  %s5269_s3 = inlined_call_operand.vmem [shape: f32[136,1], index: 3, kind: input, shape index: {}]   ;;  %s5270_s4 = inlined_call_operand.vmem [shape: bf16[2,136,160], index: 4, kind: output, shape index: {}]  }
   0x1   :  { %s4129_s17 = smov 0  }
   0x2 LB: > { %s3219_s18 = sadd.s32 4294967295, %s4097_s17   ;;  %s4142_s19 = sadd.s32 1, %s4097_s17   ;;  %s4097_s17 = sphi %s4129_s17, %s5275_s17   ;;  %s4093_s16 = sphi %s4127_s16, %s5274_s16   ;;  %s4089_s15 = sphi %s4125_s15, %s5273_s15  }
   0x3   : > { %s18_s20 = ssub.s32 %s4097_s17, %s4142_s19  ;;  %s21_s21 = sadd.s32 1, %s4093_s16 }
   0x4   : > { %p19_p0 = scmp.eq.s32.totalorder %s18_s20, 0  ;;  %p28_p1 = scmp.ne.s32.totalorder %s4093_s16, %s4089_s15 }
   0x5   : > { %p29_p2 = scmp.eq.s32.totalorder %s4097_s17, 0  ;;  %p3222_p4 = scmp.ge.s32.totalorder %s4097_s17, 2 }
   0x6   : > { %s4151_s22 = scalar_select %p19_p0, %s4093_s16, %s21_s21  }
   0x7   : > { %p30_p3 = por %p29_p2, %p28_p1  ;;  %152 = sbr.rel (%p3222_p4) target bundleno = 30 (0x1e), region = 28 }
   0xe   : > { %155 = sbr.rel (!%p30_p3) target bundleno = 30 (0x1e), region = 32  ;;  %s157_s23 = sand.u32 (%p30_p3), 1, %s4093_s16  }
   0xf   : > { %s3774_s24 = smul.u32 (%p30_p3), 272, %s4097_s17 }
  0x10   : > { %s3773_s25 = smul.u32 (%p30_p3), 68, %s157_s23 }
  0x11   : > { %s4159_s28 = scalar_lea.vmem (%p30_p3), %s5266_s0, %s3774_s24 }
  0x12   : > { %v178_v0 = vld [vmem:[%s4159_s28] sm:$0xf] (%p30_p3)  ;;  %v180_v1 = vld [vmem:[%s4159_s28 + $0x10] sm:$0xf] (%p30_p3)  ;;  %s4163_s29 = scalar_lea.vmem (%p30_p3), [#allocation2], %s3773_s25 }
  0x13   : > { %179 = vst [vmem:[%s4163_s29] sm:$0xf] (%p30_p3), %v178_v0  ;;  %181 = vst [vmem:[%s4163_s29 + $0x4] sm:$0xf] (%p30_p3), %v180_v1  ;;  %v182_v2 = vld [vmem:[%s4159_s28 + $0x20] sm:$0xf] (%p30_p3) }
  0x14   : > { %v184_v3 = vld [vmem:[%s4159_s28 + $0x30] sm:$0xf] (%p30_p3)  ;;  %v186_v4 = vld [vmem:[%s4159_s28 + $0x40] sm:$0xf] (%p30_p3)  ;;  %183 = vst [vmem:[%s4163_s29 + $0x8] sm:$0xf] (%p30_p3), %v182_v2 }
  0x15   : > { %185 = vst [vmem:[%s4163_s29 + $0xc] sm:$0xf] %v184_v3  ;;  %187 = vst [vmem:[%s4163_s29 + $0x10] sm:$0xf] %v186_v4  ;;  %v188_v5 = vld [vmem:[%s4159_s28 + $0x50] sm:$0xf] }
  0x16   : > { %v190_v6 = vld [vmem:[%s4159_s28 + $0x60] sm:$0xf]  ;;  %v192_v7 = vld [vmem:[%s4159_s28 + $0x70] sm:$0xf]  ;;  %189 = vst [vmem:[%s4163_s29 + $0x14] sm:$0xf] %v188_v5 }
  0x17   : > { %191 = vst [vmem:[%s4163_s29 + $0x18] sm:$0xf] %v190_v6  ;;  %193 = vst [vmem:[%s4163_s29 + $0x1c] sm:$0xf] %v192_v7  ;;  %v194_v8 = vld [vmem:[%s4159_s28 + $0x80] sm:$0xf] }
  0x18   : > { %v196_v9 = vld [vmem:[%s4159_s28 + $0x90] sm:$0xf]  ;;  %v198_v10 = vld [vmem:[%s4159_s28 + $0xa0] sm:$0xf]  ;;  %195 = vst [vmem:[%s4163_s29 + $0x20] sm:$0xf] %v194_v8 }
  0x19   : > { %197 = vst [vmem:[%s4163_s29 + $0x24] sm:$0xf] %v196_v9  ;;  %199 = vst [vmem:[%s4163_s29 + $0x28] sm:$0xf] %v198_v10  ;;  %v200_v11 = vld [vmem:[%s4159_s28 + $0xb0] sm:$0xf] }
  0x1a   : > { %v202_v12 = vld [vmem:[%s4159_s28 + $0xc0] sm:$0xf]  ;;  %v204_v13 = vld [vmem:[%s4159_s28 + $0xd0] sm:$0xf]  ;;  %201 = vst [vmem:[%s4163_s29 + $0x2c] sm:$0xf] %v200_v11 }
  0x1b   : > { %203 = vst [vmem:[%s4163_s29 + $0x30] sm:$0xf] %v202_v12  ;;  %205 = vst [vmem:[%s4163_s29 + $0x34] sm:$0xf] %v204_v13  ;;  %v206_v14 = vld [vmem:[%s4159_s28 + $0xe0] sm:$0xf] }
  0x1c   : > { %v208_v15 = vld [vmem:[%s4159_s28 + $0xf0] sm:$0xf]  ;;  %v210_v16 = vld [vmem:[%s4159_s28 + $0x100] sm:$0xf]  ;;  %207 = vst [vmem:[%s4163_s29 + $0x38] sm:$0xf] %v206_v14 }
  0x1d   : > { %209 = vst [vmem:[%s4163_s29 + $0x3c] sm:$0xf] %v208_v15  ;;  %211 = vst [vmem:[%s4163_s29 + $0x40] sm:$0xf] %v210_v16 }
  0x1e PF: > { %p3224_p5 = scmp.ge.s32.totalorder %s4097_s17, 1  ;;  %p267_p6 = scmp.lt.s32.totalorder %s4097_s17, 3 }
  0x20   : > { %p268_p7 = pnand %p3224_p5, %p267_p6 }
  0x21   : > { %v3804_v17 = vld [vmem:[%s5267_s1 + $0x84] ss:$8 sps:$4 sm:$0xff] (!%p268_p7)   ;;  %v4099_v19 = vmov (!%p268_p7), 0   ;;  %v3808_v20 = vld [vmem:[%s5267_s1 + $0x80] ss:$8 sps:$4 sm:$0xff] (!%p268_p7)   ;;  %s274_s14 = sand.u32 (!%p268_p7), 1, %s4089_s15  }
  0x22   : > { %271 = sbr.rel (%p268_p7) target bundleno = 540 (0x21c), region = 73  ;;  %v3806_v18 = vld [vmem:[%s5267_s1 + $0x204] ss:$8 sps:$4 sm:$0xff] (!%p268_p7)   ;;  %521 = vmatprep.mubr.bf16.mxu1 (!%p268_p7), %v4099_v19  ;;  %1602 = vmatprep.mubr.bf16.mxu0 (!%p268_p7), %v4099_v19  ;;  %v3809_v21 = vld [vmem:[%s5267_s1 + $0x200] ss:$8 sps:$4 sm:$0xff] (!%p268_p7)   ;;  %vm388_vm0 = vcmask (!%p268_p7), 1044480  }
  0x23   : > { %489 = vmatprep.subr.bf16.mxu1 (!%p268_p7), %v3804_v17  ;;  %3802 = vset.pattern.permute.xlu0 (!%p268_p7), %v4099_v19  ;;  %v3810_v22 = vld [vmem:[%s5267_s1 + $0x94] ss:$8 sps:$4 sm:$0xff] (!%p268_p7)   ;;  %v3814_v24 = vld [vmem:[%s5267_s1 + $0x90] ss:$8 sps:$4 sm:$0xff] (!%p268_p7)   ;;  %v3816_v26 = vld [vmem:[%s5267_s1 + $0xa4] ss:$8 sps:$4 sm:$0xff] (!%p268_p7)  }
  0x24   : > { %1570 = vmatprep.subr.bf16.mxu0 (!%p268_p7), %v3806_v18  ;;  %3803 = vset.pattern.permute.xlu1 (!%p268_p7), %v4099_v19  ;;  %v3812_v23 = vld [vmem:[%s5267_s1 + $0x214] ss:$8 sps:$4 sm:$0xff] (!%p268_p7)   ;;  %v3815_v25 = vld [vmem:[%s5267_s1 + $0x210] ss:$8 sps:$4 sm:$0xff] (!%p268_p7)   ;;  %v3818_v27 = vld [vmem:[%s5267_s1 + $0x224] ss:$8 sps:$4 sm:$0xff] (!%p268_p7)  }
  0x25   : > { %490 = vmatpush1.bf16.msra.mxu1 (!%p268_p7), %v3808_v20  ;;  %1571 = vmatpush1.bf16.msra.mxu0 (!%p268_p7), %v3809_v21  ;;  %v3820_v28 = vld [vmem:[%s5267_s1 + $0xa0] ss:$8 sps:$4 sm:$0xff] (!%p268_p7)   ;;  %v3822_v30 = vld [vmem:[%s5267_s1 + $0xb4] ss:$8 sps:$4 sm:$0xff] (!%p268_p7)   ;;  %v3826_v32 = vld [vmem:[%s5267_s1 + $0xb0] ss:$8 sps:$4 sm:$0xff] (!%p268_p7)  }
  0x26   : > { %491 = vmatprep.subr.bf16.mxu1 (!%p268_p7), %v3810_v22  ;;  %1572 = vmatprep.subr.bf16.mxu0 (!%p268_p7), %v3812_v23  ;;  %v3821_v29 = vld [vmem:[%s5267_s1 + $0x220] ss:$8 sps:$4 sm:$0xff] (!%p268_p7)   ;;  %v3824_v31 = vld [vmem:[%s5267_s1 + $0x234] ss:$8 sps:$4 sm:$0xff] (!%p268_p7)   ;;  %v3827_v33 = vld [vmem:[%s5267_s1 + $0x230] ss:$8 sps:$4 sm:$0xff] (!%p268_p7)  }
  0x27   : > { %v3828_v34 = vld [vmem:[%s5267_s1 + $0xc4] ss:$8 sps:$4 sm:$0xff] (!%p268_p7)   ;;  %s3775_s27 = smul.u32 (!%p268_p7), 68, %s274_s14  ;;  %v3832_v36 = vld [vmem:[%s5267_s1 + $0xc0] ss:$8 sps:$4 sm:$0xff] (!%p268_p7)   ;;  %vm2389_vm5 = vcmask (!%p268_p7), 1046528  }
  0x28   : > { %v3830_v35 = vld [vmem:[%s5267_s1 + $0x244] ss:$8 sps:$4 sm:$0xff] (!%p268_p7)   ;;  %v3833_v37 = vld [vmem:[%s5267_s1 + $0x240] ss:$8 sps:$4 sm:$0xff] (!%p268_p7)   ;;  %v3834_v38 = vld [vmem:[%s5267_s1 + $0xd4] ss:$8 sps:$4 sm:$0xff] (!%p268_p7)  }
  0x29   : > { %492 = vmatpush1.bf16.msra.mxu1 %v3814_v24  ;;  %1573 = vmatpush1.bf16.msra.mxu0 %v3815_v25  ;;  %v3836_v39 = vld [vmem:[%s5267_s1 + $0x254] ss:$8 sps:$4 sm:$0xff]   ;;  %v3838_v40 = vld [vmem:[%s5267_s1 + $0xd0] ss:$8 sps:$4 sm:$0xff]   ;;  %v3840_v42 = vld [vmem:[%s5267_s1 + $0xe4] ss:$8 sps:$4 sm:$0xff]  }
  0x2a   : > { %493 = vmatprep.subr.bf16.mxu1 %v3816_v26  ;;  %1574 = vmatprep.subr.bf16.mxu0 %v3818_v27  ;;  %v3839_v41 = vld [vmem:[%s5267_s1 + $0x250] ss:$8 sps:$4 sm:$0xff]   ;;  %v3842_v43 = vld [vmem:[%s5267_s1 + $0x264] ss:$8 sps:$4 sm:$0xff]   ;;  %s4282_s23 = scalar_lea.vmem [#allocation2], %s3775_s27  ;;  %p299_p8 = scmp.lt.s32.totalorder %s3219_s18, 1 }
  0x2b   : > { %v4285_v44 = vld [vmem:[%s4282_s23 + $0x4] sm:$0xf]  ;;  %v335_v45 = vld [vmem:[%s4282_s23] sm:$0x8]  ;;  %v4298_v49 = vld [vmem:[%s4282_s23 + $0x8] sm:$0xff]   ;;  %vm3058_vm6 = vcmask 1043456  }
  0x2c   : > { %v3844_v46 = vld [vmem:[%s5267_s1 + $0xe0] ss:$8 sps:$4 sm:$0xff]   ;;  %v4295_v48 = vcombine.low %v335_v45, %v4285_v44  ;;  %v3846_v50 = vld [vmem:[%s5267_s1 + $0xf4] ss:$8 sps:$4 sm:$0xff]   ;;  %v3850_v52 = vld [vmem:[%s5267_s1 + $0xf0] ss:$8 sps:$4 sm:$0xff]  }
  0x2d   : > { %494 = vmatpush1.bf16.msra.mxu1 %v3820_v28  ;;  %1575 = vmatpush1.bf16.msra.mxu0 %v3821_v29  ;;  %v3845_v47 = vld [vmem:[%s5267_s1 + $0x260] ss:$8 sps:$4 sm:$0xff]   ;;  %v3848_v51 = vld [vmem:[%s5267_s1 + $0x274] ss:$8 sps:$4 sm:$0xff]   ;;  %v3851_v53 = vld [vmem:[%s5267_s1 + $0x270] ss:$8 sps:$4 sm:$0xff]  }
  0x2e   : > { %495 = vmatprep.subr.bf16.mxu1 %v3822_v30  ;;  %1576 = vmatprep.subr.bf16.mxu0 %v3824_v31  ;;  %v3857_v54 = vld [vmem:[%s5267_s1 + $0x4] ss:$8 sps:$4 sm:$0xff]   ;;  %v389_v55 = vrot.slane %v4295_v48, 3  ;;  %v390_v56 = vrot.slane %v4298_v49, 3  ;;  %v3855_v60 = vld [vmem:[%s5267_s1] ss:$8 sps:$4 sm:$0xff]  }
  0x2f   : > { %v4318_v57 = vld [vmem:[%s4282_s23 + $0x8] sm:$0xf]  ;;  %v1119_v58 = vld [vmem:[%s4282_s23 + $0xc] sm:$0xf]  ;;  %v1120_v63 = vld [vmem:[%s4282_s23 + $0x10] sm:$0xf] }
  0x30   : > { %v3862_v59 = vld [vmem:[%s5267_s1 + $0x284] ss:$8 sps:$4 sm:$0xff]   ;;  %v3370_v61 = vcombine.low %v4318_v57, %v1119_v58  ;;  %v3860_v62 = vld [vmem:[%s5267_s1 + $0x280] ss:$8 sps:$4 sm:$0xff]   ;;  %v391_v0 = vsel %vm388_vm0, %v389_v55, %v390_v56  ;;  %v4334_v1 = vld [vmem:[%s4282_s23 + $0x10] sm:$0xff]   ;;  %v4336_v2 = vcombine.low %v1119_v58, %v1120_v63  ;;  %s5277_s18 = smov (!%p299_p8, %s3219_s18), 1 }
  0x31   : > { %496 = vmatpush1.bf16.msra.mxu1 %v3826_v32  ;;  %1577 = vmatpush1.bf16.msra.mxu0 %v3827_v33  ;;  %v3865_v3 = vld [vmem:[%s5267_s1 + $0x294] ss:$8 sps:$4 sm:$0xff]   ;;  %v3863_v4 = vld [vmem:[%s5267_s1 + $0x290] ss:$8 sps:$4 sm:$0xff]   ;;  %v392_v8 = vrot.slane %v4334_v1, 3  ;;  %v4404_v33 = vld [vmem:[%s4282_s23 + $0x20] sm:$0xff]  }
  0x32   : > { %497 = vmatprep.subr.bf16.mxu1 %v3828_v34  ;;  %1578 = vmatprep.subr.bf16.mxu0 %v3830_v35  ;;  %v3868_v5 = vld [vmem:[%s5267_s1 + $0x14] ss:$8 sps:$4 sm:$0xff]   ;;  %v3866_v6 = vld [vmem:[%s5267_s1 + $0x10] ss:$8 sps:$4 sm:$0xff]   ;;  %v3874_v9 = vld [vmem:[%s5267_s1 + $0x2a4] ss:$8 sps:$4 sm:$0xff]  }
  0x33   : > { %v1121_v7 = vld [vmem:[%s4282_s23 + $0x14] sm:$0xf]  ;;  %v3880_v10 = vld [vmem:[%s5267_s1 + $0x24] ss:$8 sps:$4 sm:$0xff]   ;;  %v1122_v11 = vld [vmem:[%s4282_s23 + $0x18] sm:$0xf]  ;;  %v393_v15 = vsel %vm388_vm0, %v390_v56, %v392_v8 }
  0x34   : > { %v4361_v12 = vcombine.low %v1121_v7, %v1122_v11  ;;  %v3371_v13 = vcombine.low %v1120_v63, %v1121_v7  ;;  %v3872_v14 = vld [vmem:[%s5267_s1 + $0x2a0] ss:$8 sps:$4 sm:$0xff]   ;;  %v3877_v17 = vld [vmem:[%s5267_s1 + $0x2b4] ss:$8 sps:$4 sm:$0xff]   ;;  %v3875_v23 = vld [vmem:[%s5267_s1 + $0x2b0] ss:$8 sps:$4 sm:$0xff]  }
  0x35   : > { %498 = vmatpush1.bf16.msra.mxu1 %v3832_v36  ;;  %1579 = vmatpush1.bf16.msra.mxu0 %v3833_v37  ;;  %v4368_v16 = vld [vmem:[%s4282_s23 + $0x18] sm:$0xff]   ;;  %v1124_v22 = vld [vmem:[%s4282_s23 + $0x20] sm:$0xf]  ;;  %v1117_v31 = vld [vmem:[%s4282_s23 + $0x4] sm:$0x8]  ;;  %vm3059_vm7 = vcmask 261124  }
  0x36   : > { %499 = vmatprep.subr.bf16.mxu1 %v3834_v38  ;;  %1580 = vmatprep.subr.bf16.mxu0 %v3836_v39  ;;  %v3878_v18 = vld [vmem:[%s5267_s1 + $0x20] ss:$8 sps:$4 sm:$0xff]   ;;  %v3892_v20 = vld [vmem:[%s5267_s1 + $0x34] ss:$8 sps:$4 sm:$0xff]   ;;  %v394_v24 = vrot.slane %v4368_v16, 3  ;;  %v396_v39 = vrot.slane %v4404_v33, 3  ;;  %vm5109_vm8 = vmor %vm3059_vm7, %vm3058_vm6 }
  0x37   : > { %v1123_v21 = vld [vmem:[%s4282_s23 + $0x1c] sm:$0xf]  ;;  %v3886_v25 = vld [vmem:[%s5267_s1 + $0x2c4] ss:$8 sps:$4 sm:$0xff]   ;;  %v3890_v27 = vld [vmem:[%s5267_s1 + $0x30] ss:$8 sps:$4 sm:$0xff]  }
  0x38   : > { %v4389_v26 = vcombine.low %v1123_v21, %v1124_v22  ;;  %v3372_v28 = vcombine.low %v1122_v11, %v1123_v21  ;;  %v3884_v29 = vld [vmem:[%s5267_s1 + $0x2c0] ss:$8 sps:$4 sm:$0xff]   ;;  %v3904_v30 = vld [vmem:[%s5267_s1 + $0x44] ss:$8 sps:$4 sm:$0xff]   ;;  %v395_v32 = vsel %vm388_vm0, %v392_v8, %v394_v24  ;;  %v3889_v34 = vld [vmem:[%s5267_s1 + $0x2d4] ss:$8 sps:$4 sm:$0xff]  }
  0x39   : > { %500 = vmatpush1.bf16.msra.mxu1 %v3838_v40  ;;  %1581 = vmatpush1.bf16.msra.mxu0 %v3839_v41  ;;  %v3887_v35 = vld [vmem:[%s5267_s1 + $0x2d0] ss:$8 sps:$4 sm:$0xff]   ;;  %v4413_v36 = vld [vmem:[%s4282_s23 + $0x24] sm:$0xf]  ;;  %v3331_v41 = vcombine.low %v1117_v31, %v4318_v57  ;;  %vm1763_vm1 = vsmask.f32 7424 }
  0x3a   : > { %501 = vmatprep.subr.bf16.mxu1 %v3840_v42  ;;  %1582 = vmatprep.subr.bf16.mxu0 %v3842_v43  ;;  %v3902_v37 = vld [vmem:[%s5267_s1 + $0x40] ss:$8 sps:$4 sm:$0xff]   ;;  %v4422_v40 = vld [vmem:[%s4282_s23 + $0x10] sm:$0xff]   ;;  %v3901_v42 = vld [vmem:[%s5267_s1 + $0x2e4] ss:$8 sps:$4 sm:$0xff]   ;;  %s3776_s10 = smul.u32 136, %s5277_s18 }
  0x3b   : > { %v3909_v38 = vld [vmem:[%s4282_s23 + $0x8] sm:$0xff]   ;;  %v1772_v55 = vshll.u32 %v4422_v40, 16  ;;  %v1184_v56 = vshrl.u32 %v3331_v41, 16  ;;  %v3907_v57 = vld [vmem:[%s5267_s1 + $0x2f4] ss:$8 sps:$4 sm:$0xff]   ;;  %v1187_v58 = vshll.u32 %v3331_v41, 16 }
  0x3c   : > { %v1767_v43 = vshll.u32 %v3909_v38, 16  ;;  %v3914_v45 = vld [vmem:[%s5267_s1 + $0x50] ss:$8 sps:$4 sm:$0xff]   ;;  %v3922_v63 = vld [vmem:[%s5267_s1 + $0x60] ss:$8 sps:$4 sm:$0xff]   ;;  %s5116_s13 = scalar_lea.vmem %s5270_s4, %s3776_s10 }
  0x3d   : > { %502 = vmatpush1.bf16.msra.mxu1 %v3844_v46  ;;  %1583 = vmatpush1.bf16.msra.mxu0 %v3845_v47  ;;  %v3373_v46 = vcombine.low %v1124_v22, %v4413_v36  ;;  %v3916_v47 = vld [vmem:[%s5267_s1 + $0x54] ss:$8 sps:$4 sm:$0xff]   ;;  %v1186_v8 = vrot.slane %v1184_v56, 3  ;;  %v3928_v31 = vld [vmem:[%s4282_s23 + $0x20] sm:$0xff]   ;;  %vm865_vm2 = vsmask.f32 4352 }
  0x3e   : > { %503 = vmatprep.subr.bf16.mxu1 %v3846_v50  ;;  %1584 = vmatprep.subr.bf16.mxu0 %v3848_v51  ;;  %v397_v50 = vsel %vm388_vm0, %v394_v24, %v396_v39  ;;  %v3899_v51 = vld [vmem:[%s5267_s1 + $0x2e0] ss:$8 sps:$4 sm:$0xff]   ;;  %v318_v7 = vld [vmem:[%s4282_s23 + $0x34] sm:$0x7]  ;;  %v3941_v56 = vld [vmem:[%s5267_s1 + $0x344] ss:$8 sps:$4 sm:$0xff]  }
  0x3f   : > { %v3919_v22 = vld [vmem:[%s5267_s1 + $0x314] ss:$8 sps:$4 sm:$0xff]   ;;  %v3917_v24 = vld [vmem:[%s5267_s1 + $0x310] ss:$8 sps:$4 sm:$0xff]   ;;  %vm593_vm3 = vsmask.f32 5376 }
  0x40   : > { %vm2638_vm4 = vsmask.f32 6400  ;;  %3061 = vst.msk [vmem:[%s5116_s13] sm:$0xff] %vm5109_vm8, %v4099_v19  ;;  %3062 = vst.msk [vmem:[%s5116_s13 + $0x8] sm:$0xff] %vm5109_vm8, %v4099_v19 }
  0x41   : > { %504 = vmatpush1.bf16.msra.mxu1 %v3850_v52  ;;  %1585 = vmatpush1.bf16.msra.mxu0 %v3851_v53  ;;  %v4441_v52 = vld [vmem:[%s4282_s23 + $0x28] sm:$0xff]   ;;  %v1765_v53 = vshrl.u32 %v3909_v38, 16  ;;  %3156 = vst.msk [vmem:[%s5116_s13 + $0x78] sm:$0xff] %vm5109_vm8, %v4099_v19  ;;  %3157 = vst.msk [vmem:[%s5116_s13 + $0x80] sm:$0xff] %vm5109_vm8, %v4099_v19 }
  0x42   : > { %743 = vmatprep.subr.bf16.mxu1 %v3857_v54  ;;  %1906 = vmatprep.subr.bf16.mxu0 %v3862_v59  ;;  %v1769_v54 = vrot.slane %v1767_v43, 1  ;;  %v1192_v59 = vshrl.u32 %v4336_v2, 16  ;;  %v3925_v43 = vld [vmem:[%s5267_s1 + $0x320] ss:$8 sps:$4 sm:$0xff]  }
  0x44   : > { %522 = vmatmul.mubr.bf16.vlgmr.msra.gmra.mrb[0].mxu1 %v391_v0  ;;  %1603 = vmatmul.mubr.bf16.vlgmr.msra.gmra.mrb[0].mxu0 %v3370_v61  ;;  %v1195_v61 = vshll.u32 %v4336_v2, 16  ;;  %v3924_v0 = vld [vmem:[%s5267_s1 + $0x64] ss:$8 sps:$4 sm:$0xff]   ;;  %v1770_v2 = vor.u32 %v1769_v54, %v1765_v53 }
  0x45   : > { %744 = vmatpush1.bf16.msra.mxu1 %v3855_v60  ;;  %1907 = vmatpush1.bf16.msra.mxu0 %v3860_v62  ;;  %v3905_v60 = vld [vmem:[%s5267_s1 + $0x2f0] ss:$8 sps:$4 sm:$0xff]   ;;  %v3913_v62 = vld [vmem:[%s5267_s1 + $0x304] ss:$8 sps:$4 sm:$0xff]  }
  0x46   : > { %1908 = vmatprep.subr.bf16.mxu0 %v3865_v3  ;;  %531 = vmatprep.mubr.bf16.mxu1 %v4099_v19  ;;  %v398_v3 = vrot.slane %v4441_v52, 3  ;;  %v1197_v11 = vrot.slane %v1195_v61, 4  ;;  %v3938_v54 = vld [vmem:[%s4282_s23 + $0x28] sm:$0xff]  }
  0x47   : > { %745 = vmatprep.subr.bf16.mxu1 %v3868_v5  ;;  %1612 = vmatprep.mubr.bf16.mxu0 %v4099_v19  ;;  %v4464_v5 = vld [vmem:[%s4282_s23 + $0x30] sm:$0xf] }
  0x49   : > { %1909 = vmatpush1.bf16.msra.mxu0 %v3863_v4  ;;  %746 = vmatpush1.bf16.msra.mxu1 %v3866_v6  ;;  %v1774_v4 = vrot.slane %v1772_v55, 1  ;;  %v3921_v6 = vld [vmem:[%s4282_s23 + $0x18] sm:$0xff]  }
  0x4a   : > { %1910 = vmatprep.subr.bf16.mxu0 %v3874_v9  ;;  %747 = vmatprep.subr.bf16.mxu1 %v3880_v10  ;;  %v1189_v9 = vrot.slane %v1187_v58, 4  ;;  %v1194_v10 = vrot.slane %v1192_v59, 3  ;;  %v1780_v21 = vshll.u32 %v3921_v6, 16  ;;  %v1784_v41 = vshrl.u32 %v3921_v6, 16  ;;  %v3932_v55 = vld [vmem:[%s5267_s1 + $0x330] ss:$8 sps:$4 sm:$0xff]  }
  0x4c   : > { %532 = vmatmul.mubr.bf16.gmra.mrb[4].mxu1 %v393_v15  ;;  %1613 = vmatmul.mubr.bf16.gmra.mrb[4].mxu0 %v3371_v13  ;;  %v1776_v13 = vshrl.u32 %v4422_v40, 16  ;;  %v399_v15 = vsel %vm388_vm0, %v396_v39, %v398_v3 }
  0x4d   : > { %1911 = vmatpush1.bf16.msra.mxu0 %v3872_v14  ;;  %541 = vmatprep.mubr.bf16.mxu1 %v4099_v19  ;;  %v3931_v14 = vld [vmem:[%s5267_s1 + $0x74] ss:$8 sps:$4 sm:$0xff]  }
  0x4e   : > { %1912 = vmatprep.subr.bf16.mxu0 %v3877_v17  ;;  %748 = vmatpush1.bf16.msra.mxu1 %v3878_v18  ;;  %v1775_v17 = vsel %vm1763_vm1, %v1770_v2, %v1774_v4  ;;  %v3911_v18 = vld [vmem:[%s5267_s1 + $0x300] ss:$8 sps:$4 sm:$0xff]   ;;  %v612_v2 = vshrl.u32 %v4334_v1, 16 }
  0x4f   : > { %1622 = vmatprep.mubr.bf16.mxu0 %v4099_v19  ;;  %749 = vmatprep.subr.bf16.mxu1 %v3892_v20  ;;  %v4479_v20 = vcombine.low %v4464_v5, %v318_v7 }
  0x51   : > { %1913 = vmatpush1.bf16.msra.mxu0 %v3875_v23  ;;  %v305_v23 = vld [vmem:[%s4282_s23] sm:$0xc] }
  0x52   : > { %1914 = vmatprep.subr.bf16.mxu0 %v3886_v25  ;;  %750 = vmatpush1.bf16.msra.mxu1 %v3890_v27  ;;  %v3929_v25 = vld [vmem:[%s5267_s1 + $0x70] ss:$8 sps:$4 sm:$0xff]   ;;  %v1778_v27 = vor.u32 %v1776_v13, %v1774_v4  ;;  %v3265_v38 = vcombine.low %v305_v23, %v4285_v44  ;;  %v615_v4 = vshll.u32 %v4334_v1, 16  ;;  %v3955_v13 = vld [vmem:[%s5267_s1 + $0x364] ss:$8 sps:$4 sm:$0xff]  }
  0x53   : > { %751 = vmatprep.subr.bf16.mxu1 %v3904_v30  ;;  %v1782_v30 = vrot.slane %v1780_v21, 1  ;;  %v4016_v1 = vld [vmem:[%s5267_s1 + $0x3f4] ss:$8 sps:$4 sm:$0xff]  }
  0x54   : > { %542 = vmatmul.mubr.bf16.gmra.mrb[8].mxu1 %v395_v32  ;;  %1623 = vmatmul.mubr.bf16.gmra.mrb[8].mxu0 %v3372_v28  ;;  %v3937_v28 = vld [vmem:[%s5267_s1 + $0x104] ss:$8 sps:$4 sm:$0xff]   ;;  %v1190_v32 = vor.u32 %v1189_v9, %v1186_v8  ;;  %v595_v44 = vshrl.u32 %v3265_v38, 16 }
  0x55   : > { %1915 = vmatpush1.bf16.msra.mxu0 %v3884_v29  ;;  %551 = vmatprep.mubr.bf16.mxu1 %v4099_v19  ;;  %v400_v29 = vrot.slane %v4479_v20, 3  ;;  %v1783_v40 = vsel %vm1763_vm1, %v1778_v27, %v1782_v30  ;;  %v3953_v27 = vld [vmem:[%s5267_s1 + $0x360] ss:$8 sps:$4 sm:$0xff]  }
  0x56   : > { %1916 = vmatprep.subr.bf16.mxu0 %v3889_v34  ;;  %1632 = vmatprep.mubr.bf16.mxu0 %v4099_v19  ;;  %v4497_v34 = vor.u32 %v1197_v11, %v1194_v10  ;;  %v4543_v10 = vld [vmem:[%s4282_s23 + $0x30] sm:$0xff]  }
  0x57   : > { %752 = vmatpush1.bf16.msra.mxu1 %v3902_v37  ;;  %v401_v39 = vsel %vm388_vm0, %v398_v3, %v400_v29  ;;  %v3948_v3 = vld [vmem:[%s5267_s1 + $0x354] ss:$8 sps:$4 sm:$0xff]   ;;  %v3946_v11 = vld [vmem:[%s5267_s1 + $0x350] ss:$8 sps:$4 sm:$0xff]   ;;  %v1804_v23 = vshll.u32 %v4543_v10, 16 }
  0x58   : > { %753 = vmatprep.subr.bf16.mxu1 %v3916_v47  ;;  %v4505_v37 = vsel %vm865_vm2, %v1190_v32, %v4497_v34  ;;  %v603_v47 = vshrl.u32 %v4298_v49, 16 }
  0x59   : > { %1917 = vmatpush1.bf16.msra.mxu0 %v3887_v35  ;;  %v3927_v35 = vld [vmem:[%s5267_s1 + $0x324] ss:$8 sps:$4 sm:$0xff]  }
  0x5a   : > { %1918 = vmatprep.subr.bf16.mxu0 %v3901_v42  ;;  %v1788_v42 = vshll.u32 %v3928_v31, 16  ;;  %v605_v59 = vrot.slane %v603_v47, 2 }
  0x5b   : > { %754 = vmatpush1.bf16.msra.mxu1 %v3914_v45  ;;  %v3934_v45 = vld [vmem:[%s5267_s1 + $0x334] ss:$8 sps:$4 sm:$0xff]  }
  0x5c   : > { %552 = vmatmul.mubr.bf16.gmra.mrb[12].mxu1 %v397_v50  ;;  %1633 = vmatmul.mubr.bf16.gmra.mrb[12].mxu0 %v3373_v46  ;;  %v598_v46 = vshll.u32 %v3265_v38, 16  ;;  %v606_v50 = vshll.u32 %v4298_v49, 16  ;;  %v1790_v53 = vrot.slane %v1788_v42, 1  ;;  %v4577_v38 = vld [vmem:[%s4282_s23 + $0x38] sm:$0x1f]  }
  0x5d   : > { %1919 = vmatpush1.bf16.msra.mxu0 %v3899_v51  ;;  %561 = vmatprep.mubr.bf16.mxu1 %v4099_v19  ;;  %v1786_v51 = vor.u32 %v1784_v41, %v1782_v30  ;;  %v3961_v30 = vld [vmem:[%s5267_s1 + $0x374] ss:$8 sps:$4 sm:$0xff]   ;;  %v1204_v41 = vshll.u32 %v4361_v12, 16  ;;  %v4586_v42 = vld [vmem:[%s4282_s23 + $0x28] sm:$0xf] }
  0x5e   : > { %1920 = vmatprep.subr.bf16.mxu0 %v3907_v57  ;;  %1938 = vmatprep.mubr.bf16.mxu0 %v4099_v19  ;;  %v597_v57 = vrot.slane %v595_v44, 2  ;;  %v600_v58 = vrot.slane %v598_v46, 3 }
  0x5f   : > { %755 = vmatprep.subr.bf16.mxu1 %v3924_v0  ;;  %v1791_v61 = vsel %vm1763_vm1, %v1786_v51, %v1790_v53  ;;  %v3939_v0 = vld [vmem:[%s5267_s1 + $0x340] ss:$8 sps:$4 sm:$0xff]  }
  0x60   : > { %756 = vmatpush1.bf16.msra.mxu1 %v3922_v63  ;;  %v1796_v63 = vshll.u32 %v3938_v54, 16  ;;  %v601_v6 = vor.u32 %v600_v58, %v597_v57  ;;  %v3958_v57 = vld [vmem:[%s5267_s1 + $0x134] ss:$8 sps:$4 sm:$0xff]   ;;  %v630_v58 = vshrl.u32 %v4404_v33, 16 }
  0x61   : > { %1921 = vmatpush1.bf16.msra.mxu0 %v3905_v60  ;;  %757 = vmatprep.subr.bf16.mxu1 %v3931_v14  ;;  %v608_v60 = vrot.slane %v606_v50, 3  ;;  %v614_v14 = vrot.slane %v612_v2, 2 }
  0x62   : > { %2241 = vmatprep.subr.bf16.mxu0 %v3913_v62  ;;  %v1792_v62 = vshrl.u32 %v3928_v31, 16  ;;  %v1798_v9 = vrot.slane %v1796_v63, 1  ;;  %v1206_v63 = vrot.slane %v1204_v41, 4  ;;  %v4657_v41 = vld [vmem:[%s4282_s23 + $0x14] sm:$0xff]  }
  0x63   : > { %v609_v7 = vor.u32 %v608_v60, %v605_v59  ;;  %v633_v59 = vshll.u32 %v4404_v33, 16  ;;  %v3969_v60 = vld [vmem:[%s5267_s1 + $0x384] ss:$8 sps:$4 sm:$0xff]  }
  0x64   : > { %562 = vmatmul.mubr.bf16.gmra.mrb[16].mxu1 %v399_v15  ;;  %1939 = vmatmul.mubr.bf16.vlgmr.msra.gmra.mrb[0].mxu0 %v1775_v17  ;;  %v1794_v8 = vor.u32 %v1792_v62, %v1790_v53  ;;  %v617_v15 = vrot.slane %v615_v4, 3  ;;  %v1808_v53 = vshrl.u32 %v4543_v10, 16  ;;  %v2368_v33 = vld [vmem:[%s4282_s23 + $0xc] sm:$0xe] }
  0x65   : > { %2242 = vmatpush1.bf16.msra.mxu0 %v3911_v18  ;;  %571 = vmatprep.mubr.bf16.mxu1 %v4099_v19  ;;  %v610_v17 = vsel %vm593_vm3, %v601_v6, %v609_v7  ;;  %v3935_v18 = vld [vmem:[%s5267_s1 + $0x100] ss:$8 sps:$4 sm:$0xff]  }
  0x66   : > { %1948 = vmatprep.mubr.bf16.mxu0 %v4099_v19  ;;  %2243 = vmatprep.subr.bf16.mxu0 %v3919_v22  ;;  %v1799_v21 = vsel %vm1763_vm1, %v1794_v8, %v1798_v9  ;;  %v1800_v22 = vshrl.u32 %v3938_v54, 16  ;;  %v618_v31 = vor.u32 %v617_v15, %v614_v14  ;;  %v1812_v54 = vshll.u32 %v4577_v38, 16  ;;  %v2033_v8 = vld [vmem:[%s4282_s23 + $0xc] sm:$0xf] }
  0x67   : > { %758 = vmatpush1.bf16.msra.mxu1 %v3929_v25  ;;  %v621_v25 = vshrl.u32 %v4368_v16, 16  ;;  %v635_v14 = vrot.slane %v633_v59, 3 }
  0x68   : > { %990 = vmatprep.subr.bf16.mxu1 %v3937_v28  ;;  %v3942_v28 = vld [vmem:[%s5267_s1 + $0x110] ss:$8 sps:$4 sm:$0xff]   ;;  %v1802_v32 = vor.u32 %v1800_v22, %v1798_v9  ;;  %v619_v46 = vsel %vm593_vm3, %v609_v7, %v618_v31  ;;  %v1814_v6 = vrot.slane %v1812_v54, 1  ;;  %v3979_v54 = vld [vmem:[%s5267_s1 + $0x164] ss:$8 sps:$4 sm:$0xff]  }
  0x69   : > { %2244 = vmatpush1.bf16.msra.mxu0 %v3917_v24  ;;  %v3944_v24 = vld [vmem:[%s5267_s1 + $0x114] ss:$8 sps:$4 sm:$0xff]   ;;  %v3956_v7 = vld [vmem:[%s5267_s1 + $0x130] ss:$8 sps:$4 sm:$0xff]  }
  0x6a   : > { %2245 = vmatprep.subr.bf16.mxu0 %v3927_v35  ;;  %v1806_v35 = vrot.slane %v1804_v23, 1  ;;  %v4627_v9 = vld [vmem:[%s4282_s23 + $0x10] sm:$0xf] }
  0x6b   : > { %v3448_v23 = vcombine.low %v2033_v8, %v4627_v9  ;;  %v3986_v8 = vld [vmem:[%s5267_s1 + $0x174] ss:$8 sps:$4 sm:$0xff]  }
  0x6c   : > { %572 = vmatmul.mubr.bf16.gmra.mrb[20].mxu1 %v401_v39  ;;  %1949 = vmatmul.mubr.bf16.gmra.mrb[4].mxu0 %v1783_v40  ;;  %v1201_v39 = vshrl.u32 %v4361_v12, 16  ;;  %v3951_v40 = vld [vmem:[%s5267_s1 + $0x124] ss:$8 sps:$4 sm:$0xff]   ;;  %v1807_v51 = vsel %vm1763_vm1, %v1802_v32, %v1806_v35  ;;  %v3949_v12 = vld [vmem:[%s5267_s1 + $0x120] ss:$8 sps:$4 sm:$0xff]  }
  0x6d   : > { %581 = vmatprep.mubr.bf16.mxu1 %v4099_v19  ;;  %1958 = vmatprep.mubr.bf16.mxu0 %v4099_v19  ;;  %v3972_v32 = vld [vmem:[%s5267_s1 + $0x154] ss:$8 sps:$4 sm:$0xff]  }
  0x6e   : > { %2246 = vmatpush1.bf16.msra.mxu0 %v3925_v43  ;;  %v623_v43 = vrot.slane %v621_v25, 2  ;;  %v1203_v62 = vrot.slane %v1201_v39, 3  ;;  %v1816_v39 = vshrl.u32 %v4577_v38, 16 }
  0x6f   : > { %2247 = vmatprep.subr.bf16.mxu0 %v3934_v45  ;;  %v3959_v45 = vld [vmem:[%s5267_s1 + $0x370] ss:$8 sps:$4 sm:$0xff]  }
  0x70   : > { %v1207_v10 = vor.u32 %v1206_v63, %v1203_v62 }
  0x72   : > { %2248 = vmatpush1.bf16.msra.mxu0 %v3932_v55  ;;  %v1210_v55 = vshrl.u32 %v4389_v26, 16 }
  0x73   : > { %2249 = vmatprep.subr.bf16.mxu0 %v3941_v56  ;;  %v1213_v56 = vshll.u32 %v4389_v26, 16 }
  0x74   : > { %582 = vmatmul.mubr.bf16.gmra.mrb[24].mxu1 %v400_v29  ;;  %1959 = vmatmul.mubr.bf16.gmra.mrb[8].mxu0 %v1791_v61  ;;  %v624_v29 = vshll.u32 %v4368_v16, 16  ;;  %v3335_v61 = vcombine.low %v4413_v36, %v4586_v42  ;;  %v3964_v36 = vld [vmem:[%s5267_s1 + $0x144] ss:$8 sps:$4 sm:$0xff]  }
  0x75   : > { %775 = vmatprep.mubr.bf16.mxu1 %v4099_v19  ;;  %1968 = vmatprep.mubr.bf16.mxu0 %v4099_v19 }
  0x76   : > { %2250 = vmatpush1.bf16.msra.mxu0 %v3939_v0  ;;  %v626_v44 = vrot.slane %v624_v29, 3  ;;  %v4615_v0 = vld [vmem:[%s4282_s23 + $0x2c] sm:$0xf]  ;;  %v1219_v15 = vshrl.u32 %v3335_v61, 16 }
  0x77   : > { %2251 = vmatprep.subr.bf16.mxu0 %v3948_v3  ;;  %v1810_v3 = vor.u32 %v1808_v53, %v1806_v35 }
  0x78   : > { %v627_v26 = vor.u32 %v626_v44, %v623_v43  ;;  %v2102_v43 = vshll.u32 %v3448_v23, 16  ;;  %v1221_v44 = vrot.slane %v1219_v15, 3  ;;  %v2111_v15 = vshrl.u32 %v4657_v41, 16 }
  0x79   : > { %v1815_v22 = vsel %vm1763_vm1, %v1810_v3, %v1814_v6 }
  0x7a   : > { %2252 = vmatpush1.bf16.msra.mxu0 %v3946_v11  ;;  %v4630_v11 = vld [vmem:[%s4282_s23 + $0x30] sm:$0xf]  ;;  %v2104_v63 = vrot.slane %v2102_v43, 1 }
  0x7b   : > { %2253 = vmatprep.subr.bf16.mxu0 %v3955_v13  ;;  %v632_v13 = vrot.slane %v630_v58, 2 }
  0x7c   : > { %776 = vmatmul.mubr.bf16.vlgmr.msra.gmra.mrb[0].mxu1 %v610_v17  ;;  %1969 = vmatmul.mubr.bf16.gmra.mrb[12].mxu0 %v1799_v21  ;;  %v1222_v17 = vshll.u32 %v3335_v61, 16  ;;  %v4639_v21 = vsel %vm865_vm2, %v4497_v34, %v1207_v10  ;;  %v639_v34 = vshrl.u32 %v4441_v52, 16  ;;  %v2100_v61 = vshrl.u32 %v3448_v23, 16  ;;  %v4694_v23 = vld [vmem:[%s4282_s23 + $0x24] sm:$0xff]  }
  0x7d   : > { %991 = vmatpush1.bf16.msra.mxu1 %v3935_v18  ;;  %785 = vmatprep.mubr.bf16.mxu1 %v4099_v19  ;;  %v628_v18 = vsel %vm593_vm3, %v618_v31, %v627_v26  ;;  %v636_v31 = vor.u32 %v635_v14, %v632_v13  ;;  %v651_v13 = vshll.u32 %v4479_v20, 16  ;;  %v4688_v14 = vld [vmem:[%s4282_s23 + $0x1c] sm:$0xff]  }
  0x7e   : > { %992 = vmatprep.subr.bf16.mxu1 %v3944_v24  ;;  %1978 = vmatprep.mubr.bf16.mxu0 %v4099_v19  ;;  %v1212_v24 = vrot.slane %v1210_v55, 3  ;;  %v641_v53 = vrot.slane %v639_v34, 2 }
  0x7f   : > { %2254 = vmatpush1.bf16.msra.mxu0 %v3953_v27  ;;  %v1215_v27 = vrot.slane %v1213_v56, 4 }
  0x80   : > { %2255 = vmatprep.subr.bf16.mxu0 %v3961_v30  ;;  %v3962_v30 = vld [vmem:[%s5267_s1 + $0x140] ss:$8 sps:$4 sm:$0xff]  }
  0x81   : > { %993 = vmatpush1.bf16.msra.mxu1 %v3942_v28  ;;  %v3336_v28 = vcombine.low %v4615_v0, %v4630_v11  ;;  %v1216_v35 = vor.u32 %v1215_v27, %v1212_v24  ;;  %v2647_v27 = vrot.slane %v2111_v15, 1 }
  0x82   : > { %994 = vmatprep.subr.bf16.mxu1 %v3951_v40  ;;  %v642_v40 = vshll.u32 %v4441_v52, 16  ;;  %v4039_v52 = vld [vmem:[%s5267_s1 + $0x1f4] ss:$8 sps:$4 sm:$0xff]  }
  0x83   : > { %2256 = vmatpush1.bf16.msra.mxu0 %v3959_v45  ;;  %v4660_v45 = vsel %vm865_vm2, %v1207_v10, %v1216_v35  ;;  %v1228_v38 = vshrl.u32 %v3336_v28, 16  ;;  %v1231_v56 = vshll.u32 %v3336_v28, 16  ;;  %v3984_v28 = vld [vmem:[%s5267_s1 + $0x170] ss:$8 sps:$4 sm:$0xff]  }
  0x84   : > { %786 = vmatmul.mubr.bf16.gmra.mrb[4].mxu1 %v619_v46  ;;  %1979 = vmatmul.mubr.bf16.gmra.mrb[16].mxu0 %v1807_v51  ;;  %v1224_v46 = vrot.slane %v1222_v17, 4  ;;  %v3970_v51 = vld [vmem:[%s5267_s1 + $0x150] ss:$8 sps:$4 sm:$0xff]  }
  0x85   : > { %795 = vmatprep.mubr.bf16.mxu1 %v4099_v19  ;;  %995 = vmatpush1.bf16.msra.mxu1 %v3949_v12  ;;  %v637_v12 = vsel %vm593_vm3, %v627_v26, %v636_v31  ;;  %v1230_v62 = vrot.slane %v1228_v38, 3  ;;  %v2107_v26 = vshll.u32 %v4657_v41, 16  ;;  %v3967_v38 = vld [vmem:[%s5267_s1 + $0x380] ss:$8 sps:$4 sm:$0xff]  }
  0x86   : > { %1988 = vmatprep.mubr.bf16.mxu0 %v4099_v19  ;;  %996 = vmatprep.subr.bf16.mxu1 %v3958_v57  ;;  %v1225_v55 = vor.u32 %v1224_v46, %v1221_v44  ;;  %v1818_v57 = vor.u32 %v1816_v39, %v1814_v6  ;;  %v648_v6 = vshrl.u32 %v4479_v20, 16  ;;  %v2119_v20 = vshrl.u32 %v4688_v14, 16 }
  0x87   : > { %2490 = vmatprep.subr.bf16.mxu0 %v3969_v60  ;;  %v644_v60 = vrot.slane %v642_v40, 3  ;;  %v2115_v39 = vshll.u32 %v4688_v14, 16  ;;  %v2648_v43 = vrot.slane %v2107_v26, 2 }
  0x88   : > { %v4675_v3 = vsel %vm865_vm2, %v1216_v35, %v1225_v55  ;;  %v653_v35 = vrot.slane %v651_v13, 3  ;;  %v2651_v44 = vrot.slane %v2119_v20, 1 }
  0x89   : > { %997 = vmatpush1.bf16.msra.mxu1 %v3956_v7  ;;  %v1233_v7 = vrot.slane %v1231_v56, 4  ;;  %v645_v17 = vor.u32 %v644_v60, %v641_v53  ;;  %v2127_v53 = vshrl.u32 %v4694_v23, 16  ;;  %v4721_v56 = vor.u32 %v2648_v43, %v2647_v27  ;;  %v3989_v43 = vld [vmem:[%s5267_s1 + $0x3b4] ss:$8 sps:$4 sm:$0xff]  }
  0x8a   : > { %998 = vmatprep.subr.bf16.mxu1 %v3964_v36  ;;  %v3977_v36 = vld [vmem:[%s5267_s1 + $0x160] ss:$8 sps:$4 sm:$0xff]  }
  0x8b   : > { %v4684_v10 = vor.u32 %v1233_v7, %v1230_v62  ;;  %v646_v46 = vsel %vm593_vm3, %v636_v31, %v645_v17  ;;  %v2652_v31 = vrot.slane %v2115_v39, 2  ;;  %v2117_v7 = vrot.slane %v2115_v39, 1 }
  0x8c   : > { %796 = vmatmul.mubr.bf16.gmra.mrb[8].mxu1 %v628_v18  ;;  %1989 = vmatmul.mubr.bf16.gmra.mrb[20].mxu0 %v1815_v22  ;;  %v2105_v18 = vor.u32 %v2104_v63, %v2100_v61  ;;  %v2109_v22 = vrot.slane %v2107_v26, 1  ;;  %v3973_v26 = vld [vmem:[%s5267_s1 + $0x390] ss:$8 sps:$4 sm:$0xff]  }
  0x8d   : > { %805 = vmatprep.mubr.bf16.mxu1 %v4099_v19  ;;  %1998 = vmatprep.mubr.bf16.mxu0 %v4099_v19  ;;  %v4698_v24 = vsel %vm865_vm2, %v1225_v55, %v4684_v10  ;;  %v4719_v55 = vld [vmem:[%s4282_s23 + $0x2c] sm:$0xff]   ;;  %v2653_v63 = vor.u32 %v2652_v31, %v2651_v44  ;;  %v867_v44 = vshrl.u32 %v4295_v48, 16 }
  0x8e   : > { %999 = vmatpush1.bf16.msra.mxu1 %v3962_v30  ;;  %v650_v30 = vrot.slane %v648_v6, 2  ;;  %v2113_v62 = vor.u32 %v2111_v15, %v2109_v22  ;;  %v2131_v13 = vshll.u32 %v4719_v55, 16 }
  0x8f   : > { %1000 = vmatprep.subr.bf16.mxu1 %v3972_v32  ;;  %v3992_v32 = vld [vmem:[%s5267_s1 + $0x184] ss:$8 sps:$4 sm:$0xff]   ;;  %v4737_v15 = vsel %vm2638_vm4, %v4721_v56, %v2653_v63 }
  0x90   : > { %v654_v61 = vor.u32 %v653_v35, %v650_v30  ;;  %v2660_v27 = vrot.slane %v2131_v13, 2  ;;  %v2118_v30 = vsel %vm1763_vm1, %v2113_v62, %v2117_v7  ;;  %v3980_v35 = vld [vmem:[%s5267_s1 + $0x3a0] ss:$8 sps:$4 sm:$0xff]  }
  0x92   : > { %1001 = vmatpush1.bf16.msra.mxu1 %v3970_v51  ;;  %v2110_v51 = vsel %vm1763_vm1, %v2105_v18, %v2109_v22 }
  0x93   : > { %1002 = vmatprep.subr.bf16.mxu1 %v3979_v54  ;;  %v3975_v54 = vld [vmem:[%s5267_s1 + $0x394] ss:$8 sps:$4 sm:$0xff]  }
  0x94   : > { %806 = vmatmul.mubr.bf16.gmra.mrb[12].mxu1 %v637_v12  ;;  %1999 = vmatmul.mubr.bf16.gmra.mrb[24].mxu0 %v1818_v57  ;;  %v2123_v12 = vshll.u32 %v4694_v23, 16  ;;  %v2655_v57 = vrot.slane %v2127_v53, 1 }
  0x95   : > { %815 = vmatprep.mubr.bf16.mxu1 %v4099_v19  ;;  %2273 = vmatprep.mubr.bf16.mxu0 %v4099_v19 }
  0x96   : > { %1003 = vmatpush1.bf16.msra.mxu1 %v3977_v36  ;;  %v2656_v60 = vrot.slane %v2123_v12, 2  ;;  %v2135_v36 = vshrl.u32 %v4719_v55, 16 }
  0x97   : > { %1004 = vmatprep.subr.bf16.mxu1 %v3986_v8  ;;  %v3982_v8 = vld [vmem:[%s5267_s1 + $0x3a4] ss:$8 sps:$4 sm:$0xff]  }
  0x98   : > { %v2657_v6 = vor.u32 %v2656_v60, %v2655_v57  ;;  %v2659_v22 = vrot.slane %v2135_v36, 1  ;;  %v3996_v57 = vld [vmem:[%s5267_s1 + $0x3c4] ss:$8 sps:$4 sm:$0xff]   ;;  %v869_v60 = vrot.slane %v867_v44, 3 }
  0x9a   : > { %1005 = vmatpush1.bf16.msra.mxu1 %v3984_v28  ;;  %v4740_v18 = vsel %vm2638_vm4, %v2653_v63, %v2657_v6  ;;  %v655_v28 = vsel %vm593_vm3, %v645_v17, %v654_v61  ;;  %v2661_v39 = vor.u32 %v2660_v27, %v2659_v22  ;;  %v870_v17 = vshll.u32 %v4295_v48, 16  ;;  %v3987_v48 = vld [vmem:[%s5267_s1 + $0x3b0] ss:$8 sps:$4 sm:$0xff]   ;;  %v2045_v22 = vld [vmem:[%s4282_s23 + $0x3c] sm:$0xf] }
  0x9b   : > { %1332 = vmatprep.subr.bf16.mxu1 %v3992_v32  ;;  %v4747_v32 = vld [vmem:[%s4282_s23 + $0x34] sm:$0xff]   ;;  %v874_v63 = vrot.slane %v603_v47, 3  ;;  %v2617_v27 = vld [vmem:[%s4282_s23 + $0x40] sm:$0x3] }
  0x9c   : > { %816 = vmatmul.mubr.bf16.gmra.mrb[16].mxu1 %v646_v46  ;;  %2274 = vmatmul.mubr.bf16.vlgmr.msra.gmra.mrb[0].mxu0 %v2110_v51  ;;  %v4758_v46 = vsel %vm2638_vm4, %v2657_v6, %v2661_v39  ;;  %v2121_v51 = vor.u32 %v2119_v20, %v2117_v7  ;;  %v2143_v31 = vshrl.u32 %v4747_v32, 16  ;;  %v872_v62 = vrot.slane %v870_v17, 4 }
  0x9d   : > { %2491 = vmatpush1.bf16.msra.mxu0 %v3967_v38  ;;  %825 = vmatprep.mubr.bf16.mxu1 %v4099_v19  ;;  %v2125_v38 = vrot.slane %v2123_v12, 1  ;;  %v3520_v49 = vcombine.low %v2045_v22, %v2617_v27  ;;  %v4006_v27 = vld [vmem:[%s5267_s1 + $0x1a4] ss:$8 sps:$4 sm:$0xff]  }
  0x9e   : > { %2283 = vmatprep.mubr.bf16.mxu0 %v4099_v19  ;;  %2492 = vmatprep.subr.bf16.mxu0 %v3975_v54  ;;  %v2139_v54 = vshll.u32 %v4747_v32, 16  ;;  %v2663_v20 = vrot.slane %v2143_v31, 1 }
  0x9f   : > { %v2126_v7 = vsel %vm1763_vm1, %v2121_v51, %v2125_v38  ;;  %v2668_v44 = vshrl.u32 %v3520_v49, 16  ;;  %v2671_v17 = vshll.u32 %v3520_v49, 16  ;;  %v882_v49 = vrot.slane %v621_v25, 3  ;;  %v4013_v25 = vld [vmem:[%s5267_s1 + $0x1b4] ss:$8 sps:$4 sm:$0xff]  }
  0xa0   : > { %v2664_v12 = vrot.slane %v2139_v54, 2 }
  0xa1   : > { %2493 = vmatpush1.bf16.msra.mxu0 %v3973_v26  ;;  %v875_v26 = vrot.slane %v606_v50, 4  ;;  %v873_v50 = vor.u32 %v872_v62, %v869_v60  ;;  %v2670_v51 = vrot.slane %v2668_v44, 1  ;;  %v3999_v60 = vld [vmem:[%s5267_s1 + $0x194] ss:$8 sps:$4 sm:$0xff]   ;;  %v2046_v62 = vld [vmem:[%s4282_s23 + $0x40] sm:$0x1] }
  0xa2   : > { %2494 = vmatprep.subr.bf16.mxu0 %v3982_v8  ;;  %v2665_v6 = vor.u32 %v2664_v12, %v2663_v20  ;;  %v3994_v8 = vld [vmem:[%s5267_s1 + $0x3c0] ss:$8 sps:$4 sm:$0xff]   ;;  %v879_v20 = vrot.slane %v615_v4, 4  ;;  %v3997_v4 = vld [vmem:[%s5267_s1 + $0x190] ss:$8 sps:$4 sm:$0xff]  }
  0xa3   : > { %v4011_v44 = vld [vmem:[%s5267_s1 + $0x1b0] ss:$8 sps:$4 sm:$0xff]  }
  0xa4   : > { %826 = vmatmul.mubr.bf16.gmra.mrb[20].mxu1 %v655_v28  ;;  %2284 = vmatmul.mubr.bf16.gmra.mrb[4].mxu0 %v2118_v30  ;;  %v4003_v28 = vld [vmem:[%s5267_s1 + $0x3d4] ss:$8 sps:$4 sm:$0xff]   ;;  %v4786_v47 = vsel %vm2638_vm4, %v2661_v39, %v2665_v6  ;;  %v876_v30 = vor.u32 %v875_v26, %v874_v63  ;;  %v4001_v39 = vld [vmem:[%s5267_s1 + $0x3d0] ss:$8 sps:$4 sm:$0xff]  }
  0xa5   : > { %835 = vmatprep.mubr.bf16.mxu1 %v4099_v19  ;;  %2293 = vmatprep.mubr.bf16.mxu0 %v4099_v19 }
  0xa6   : > { %2495 = vmatpush1.bf16.msra.mxu0 %v3980_v35  ;;  %v2129_v35 = vor.u32 %v2127_v53, %v2125_v38  ;;  %v877_v53 = vsel %vm865_vm2, %v873_v50, %v876_v30  ;;  %v883_v50 = vrot.slane %v624_v29, 4 }
  0xa7   : > { %2496 = vmatprep.subr.bf16.mxu0 %v3989_v43  ;;  %v2133_v43 = vrot.slane %v2131_v13, 1  ;;  %v3990_v13 = vld [vmem:[%s5267_s1 + $0x180] ss:$8 sps:$4 sm:$0xff]  }
  0xa9   : > { %v2134_v38 = vsel %vm1763_vm1, %v2129_v35, %v2133_v43 }
  0xaa   : > { %2497 = vmatpush1.bf16.msra.mxu0 %v3987_v48  ;;  %v2673_v48 = vrot.slane %v2671_v17, 2  ;;  %v4019_v17 = vld [vmem:[%s5267_s1 + $0x1c4] ss:$8 sps:$4 sm:$0xff]  }
  0xab   : > { %2498 = vmatprep.subr.bf16.mxu0 %v3996_v57  ;;  %v878_v57 = vrot.slane %v612_v2, 3  ;;  %v4008_v2 = vld [vmem:[%s5267_s1 + $0x3e0] ss:$8 sps:$4 sm:$0xff]  }
  0xac   : > { %836 = vmatmul.mubr.bf16.gmra.mrb[28].mxu1 %v654_v61  ;;  %2294 = vmatmul.mubr.bf16.gmra.mrb[8].mxu0 %v2126_v7  ;;  %v4010_v61 = vld [vmem:[%s5267_s1 + $0x3e4] ss:$8 sps:$4 sm:$0xff]   ;;  %v4807_v12 = vor.u32 %v2673_v48, %v2670_v51  ;;  %v2137_v7 = vor.u32 %v2135_v36, %v2133_v43  ;;  %v884_v43 = vor.u32 %v883_v50, %v882_v49  ;;  %v887_v51 = vrot.slane %v633_v59, 4  ;;  %v4017_v48 = vld [vmem:[%s5267_s1 + $0x1c0] ss:$8 sps:$4 sm:$0xff]  }
  0xad   : > { %1022 = vmatprep.mubr.bf16.mxu1 %v4099_v19  ;;  %2303 = vmatprep.mubr.bf16.mxu0 %v4099_v19  ;;  %v880_v26 = vor.u32 %v879_v20, %v878_v57  ;;  %v4026_v57 = vld [vmem:[%s5267_s1 + $0x1d4] ss:$8 sps:$4 sm:$0xff]   ;;  %v4024_v59 = vld [vmem:[%s5267_s1 + $0x1d0] ss:$8 sps:$4 sm:$0xff]   ;;  %v4059_v50 = vld [vmem:[%s5267_s1 + $0x204] ss:$8 sps:$4 sm:$0xff]  }
  0xae   : > { %2499 = vmatpush1.bf16.msra.mxu0 %v3994_v8  ;;  %v4818_v63 = vsel %vm2638_vm4, %v2665_v6, %v4807_v12  ;;  %v2141_v8 = vrot.slane %v2139_v54, 1  ;;  %v4829_v6 = vcombine.low %v2045_v22, %v2046_v62  ;;  %v4004_v22 = vld [vmem:[%s5267_s1 + $0x1a0] ss:$8 sps:$4 sm:$0xff]   ;;  %v891_v62 = vrot.slane %v642_v40, 4 }
  0xaf   : > { %2500 = vmatprep.subr.bf16.mxu0 %v4003_v28  ;;  %v4014_v28 = vld [vmem:[%s5267_s1 + $0x3f0] ss:$8 sps:$4 sm:$0xff]   ;;  %v881_v36 = vsel %vm865_vm2, %v876_v30, %v880_v26  ;;  %v4023_v30 = vld [vmem:[%s5267_s1 + $0x404] ss:$8 sps:$4 sm:$0xff]  }
  0xb0   : > { %v2142_v54 = vsel %vm1763_vm1, %v2137_v7, %v2141_v8  ;;  %v2147_v35 = vshll.u32 %v4829_v6, 16  ;;  %v2145_v16 = vor.u32 %v2143_v31, %v2141_v8  ;;  %v886_v31 = vrot.slane %v630_v58, 3  ;;  %v2954_v7 = vld [vmem:[%s5269_s3 + $0x10] sm:$0xff] }
  0xb1   : > { %2969 = vperm.xlu0 %3802, %v2954_v7   ;;  %v4063_v7 = vld [vmem:[%s5267_s1 + $0x224] ss:$8 sps:$4 sm:$0xff]  }
  0xb2   : > { %2501 = vmatpush1.bf16.msra.mxu0 %v4001_v39  ;;  %v2149_v29 = vrot.slane %v2147_v35, 1  ;;  %v885_v39 = vsel %vm865_vm2, %v880_v26, %v884_v43  ;;  %v888_v58 = vor.u32 %v887_v51, %v886_v31  ;;  %v4031_v26 = vld [vmem:[%s5267_s1 + $0x1e0] ss:$8 sps:$4 sm:$0xff]   ;;  %v4027_v35 = vld [vmem:[%s5267_s1 + $0x410] ss:$8 sps:$4 sm:$0xff]  }
  0xb3   : > { %2502 = vmatprep.subr.bf16.mxu0 %v4010_v61  ;;  %v4043_v51 = vld [vmem:[%s5267_s1 + $0x440] ss:$8 sps:$4 sm:$0xff]  }
  0xb4   : > { %1023 = vmatmul.mubr.bf16.vlgmr.msra.gmra.mrb[0].mxu1 %v877_v53  ;;  %2304 = vmatmul.mubr.bf16.gmra.mrb[12].mxu0 %v2134_v38  ;;  %v2150_v61 = vsel %vm1763_vm1, %v2145_v16, %v2149_v29  ;;  %v2151_v53 = vshrl.u32 %v4829_v6, 16  ;;  %v4033_v38 = vld [vmem:[%s5267_s1 + $0x1e4] ss:$8 sps:$4 sm:$0xff]  }
  0xb5   : > { %1333 = vmatpush1.bf16.msra.mxu1 %v3990_v13  ;;  %1032 = vmatprep.mubr.bf16.mxu1 %v4099_v19  ;;  %v844_v13 = vld [vmem:[%s4282_s23 + $0x34] sm:$0xf] }
  0xb6   : > { %1334 = vmatprep.subr.bf16.mxu1 %v3999_v60  ;;  %2313 = vmatprep.mubr.bf16.mxu0 %v4099_v19  ;;  %v2153_v20 = vor.u32 %v2151_v53, %v2149_v29  ;;  %v890_v60 = vrot.slane %v639_v34, 3  ;;  %v2391_v34 = vrot.slane %v4657_v41, 1  ;;  %v4029_v41 = vld [vmem:[%s5267_s1 + $0x414] ss:$8 sps:$4 sm:$0xff]   ;;  %v4051_v53 = vld [vmem:[%s5267_s1 + $0x464] ss:$8 sps:$4 sm:$0xff]  }
  0xb7   : > { %2503 = vmatpush1.bf16.msra.mxu0 %v4008_v2  ;;  %v889_v2 = vsel %vm865_vm2, %v884_v43, %v888_v58  ;;  %v4036_v43 = vld [vmem:[%s5267_s1 + $0x424] ss:$8 sps:$4 sm:$0xff]  }
  0xb8   : > { %2504 = vmatprep.subr.bf16.mxu0 %v4016_v1  ;;  %v4893_v1 = vcombine.low %v2368_v33, %v4627_v9  ;;  %v892_v9 = vor.u32 %v891_v62, %v890_v60  ;;  %v2399_v60 = vrot.slane %v4747_v32, 1  ;;  %v4061_v62 = vld [vmem:[%s5267_s1 + $0x214] ss:$8 sps:$4 sm:$0xff]  }
  0xb9   : > { %1335 = vmatpush1.bf16.msra.mxu1 %v3997_v4  ;;  %v3298_v4 = vcombine.low %v4464_v5, %v844_v13  ;;  %v4054_v13 = vld [vmem:[%s5267_s1 + $0x474] ss:$8 sps:$4 sm:$0xff]  }
  0xba   : > { %1336 = vmatprep.subr.bf16.mxu1 %v4006_v27  ;;  %v2390_v5 = vrot.slane %v4893_v1, 1  ;;  %v4037_v27 = vld [vmem:[%s5267_s1 + $0x1f0] ss:$8 sps:$4 sm:$0xff]  }
  0xbb   : > { %2505 = vmatpush1.bf16.msra.mxu0 %v4014_v28  ;;  %v895_v40 = vshrl.u32 %v3298_v4, 16  ;;  %v898_v8 = vshll.u32 %v3298_v4, 16  ;;  %v893_v28 = vsel %vm865_vm2, %v888_v58, %v892_v9  ;;  %v2955_v58 = vld [vmem:[%s5269_s3 + $0x18] sm:$0xff] }
  0xbc   : > { %1033 = vmatmul.mubr.bf16.gmra.mrb[4].mxu1 %v881_v36  ;;  %2314 = vmatmul.mubr.bf16.gmra.mrb[16].mxu0 %v2142_v54  ;;  %v2392_v49 = vsel %vm2389_vm5, %v2390_v5, %v2391_v34  ;;  %v4021_v36 = vld [vmem:[%s5267_s1 + $0x400] ss:$8 sps:$4 sm:$0xff]   ;;  %v2959_v32 = vld [vmem:[%s5269_s3 + $0x38] sm:$0xff] }
  0xbd   : > { %1042 = vmatprep.mubr.bf16.mxu1 %v4099_v19  ;;  %1337 = vmatpush1.bf16.msra.mxu1 %v4004_v22  ;;  %v897_v54 = vrot.slane %v895_v40, 3  ;;  %v900_v22 = vrot.slane %v898_v8, 4  ;;  %v4062_v4 = vld [vmem:[%s5267_s1 + $0x210] ss:$8 sps:$4 sm:$0xff]   ;;  %v4064_v5 = vld [vmem:[%s5267_s1 + $0x220] ss:$8 sps:$4 sm:$0xff]  }
  0xbe   : > { %2323 = vmatprep.mubr.bf16.mxu0 %v4099_v19  ;;  %1338 = vmatprep.subr.bf16.mxu1 %v4013_v25  ;;  %v2962_v40 = vld [vmem:[%s5269_s3 + $0x50] sm:$0xff] }
  0xbf   : > { %2763 = vmatprep.subr.bf16.mxu0 %v4023_v30  ;;  %v901_v25 = vor.u32 %v900_v22, %v897_v54  ;;  %v2393_v30 = vrot.slane %v4688_v14, 1  ;;  %v4042_v14 = vld [vmem:[%s5267_s1 + $0x434] ss:$8 sps:$4 sm:$0xff]   ;;  %2974 = vperm.xlu0 %3802, %v2955_v58   ;;  %v4068_v54 = vld [vmem:[%s5267_s1 + $0x240] ss:$8 sps:$4 sm:$0xff]  }
  0xc0   : > { %v1129_v22 = vld [vmem:[%s4282_s23 + $0x34] sm:$0xf] }
  0xc1   : > { %1339 = vmatpush1.bf16.msra.mxu1 %v4011_v44  ;;  %v902_v16 = vsel %vm865_vm2, %v892_v9, %v901_v25  ;;  %v2394_v29 = vsel %vm2389_vm5, %v2391_v34, %v2393_v30  ;;  %v4034_v44 = vld [vmem:[%s5267_s1 + $0x420] ss:$8 sps:$4 sm:$0xff]   ;;  %v2401_v34 = vrot.slane %v4829_v6, 1  ;;  %v4066_v6 = vld [vmem:[%s5267_s1 + $0x230] ss:$8 sps:$4 sm:$0xff]  }
  0xc2   : > { %1340 = vmatprep.subr.bf16.mxu1 %v4019_v17  ;;  %v2395_v17 = vrot.slane %v4694_v23, 1  ;;  %v4048_v23 = vld [vmem:[%s5267_s1 + $0x454] ss:$8 sps:$4 sm:$0xff]   ;;  %v2961_v9 = vld [vmem:[%s5269_s3 + $0x48] sm:$0xff] }
  0xc3   : > { %v2402_v8 = vsel %vm2389_vm5, %v2399_v60, %v2401_v34 }
  0xc4   : > { %1043 = vmatmul.mubr.bf16.gmra.mrb[8].mxu1 %v885_v39  ;;  %2324 = vmatmul.mubr.bf16.gmra.mrb[20].mxu0 %v2150_v61  ;;  %v4040_v39 = vld [vmem:[%s5267_s1 + $0x430] ss:$8 sps:$4 sm:$0xff]   ;;  %v4045_v61 = vld [vmem:[%s5267_s1 + $0x444] ss:$8 sps:$4 sm:$0xff]   ;;  %v2396_v31 = vsel %vm2389_vm5, %v2393_v30, %v2395_v17 }
  0xc5   : > { %1052 = vmatprep.mubr.bf16.mxu1 %v4099_v19  ;;  %2333 = vmatprep.mubr.bf16.mxu0 %v4099_v19 }
  0xc6   : > { %1341 = vmatpush1.bf16.msra.mxu1 %v4017_v48  ;;  %v2397_v48 = vrot.slane %v4719_v55, 1  ;;  %v2956_v55 = vld [vmem:[%s5269_s3 + $0x20] sm:$0xff] }
  0xc7   : > { %1342 = vmatprep.subr.bf16.mxu1 %v4026_v57  ;;  %v4046_v57 = vld [vmem:[%s5267_s1 + $0x450] ss:$8 sps:$4 sm:$0xff]   ;;  %2979 = vperm.xlu1 %3803, %v2956_v55  }
  0xc8   : > { %v2398_v33 = vsel %vm2389_vm5, %v2395_v17, %v2397_v48 }
  0xca   : > { %1343 = vmatpush1.bf16.msra.mxu1 %v4024_v59  ;;  %v4049_v59 = vld [vmem:[%s5267_s1 + $0x460] ss:$8 sps:$4 sm:$0xff]  }
  0xcb   : > { %1344 = vmatprep.subr.bf16.mxu1 %v4033_v38  ;;  %v2957_v38 = vld [vmem:[%s5269_s3 + $0x28] sm:$0xff] }
  0xcc   : > { %1053 = vmatmul.mubr.bf16.gmra.mrb[12].mxu1 %v889_v2  ;;  %2334 = vmatmul.mubr.bf16.gmra.mrb[28].mxu0 %v2153_v20  ;;  %v4060_v20 = vld [vmem:[%s5267_s1 + $0x200] ss:$8 sps:$4 sm:$0xff]   ;;  %v4052_v2 = vld [vmem:[%s5267_s1 + $0x470] ss:$8 sps:$4 sm:$0xff]  }
  0xcd   : > { %1062 = vmatprep.mubr.bf16.mxu1 %v4099_v19  ;;  %2522 = vmatprep.mubr.bf16.mxu0 %v4099_v19 }
  0xce   : > { %1345 = vmatpush1.bf16.msra.mxu1 %v4031_v26  ;;  %2984 = vperm.xlu1 %3803, %v2957_v38   ;;  %v2400_v26 = vsel %vm2389_vm5, %v2397_v48, %v2399_v60 }
  0xcf   : > { %1346 = vmatprep.subr.bf16.mxu1 %v4039_v52  ;;  %v2960_v52 = vld [vmem:[%s5269_s3 + $0x40] sm:$0xff] }
  0xd2   : > { %1347 = vmatpush1.bf16.msra.mxu1 %v4037_v27  ;;  %2994 = vperm.xlu1 %3803, %v2959_v32   ;;  %v4067_v27 = vld [vmem:[%s5267_s1 + $0x244] ss:$8 sps:$4 sm:$0xff]  }
  0xd3   : > { %3565 = vmatprep.subr.bf16.mxu1 %v4059_v50  ;;  %v4069_v50 = vld [vmem:[%s5267_s1 + $0x254] ss:$8 sps:$4 sm:$0xff]  }
  0xd4   : > { %1063 = vmatmul.mubr.bf16.gmra.mrb[16].mxu1 %v893_v28  ;;  %2523 = vmatmul.mubr.bf16.vlgmr.msra.gmra.mrb[0].mxu0 %v2392_v49  ;;  %v2964_v28 = vld [vmem:[%s5269_s3 + $0x60] sm:$0xff]  ;;  %v2640_v49 = vshrl.u32 %v4893_v1, 16 }
  0xd5   : > { %2764 = vmatpush1.bf16.msra.mxu0 %v4021_v36  ;;  %1072 = vmatprep.mubr.bf16.mxu1 %v4099_v19  ;;  %v2643_v36 = vshll.u32 %v4893_v1, 16  ;;  %v2966_v1 = vld [vmem:[%s5269_s3 + $0x70] sm:$0xff] }
  0xd6   : > { %2532 = vmatprep.mubr.bf16.mxu0 %v4099_v19  ;;  %2765 = vmatprep.subr.bf16.mxu0 %v4029_v41  ;;  %v2963_v41 = vld [vmem:[%s5269_s3 + $0x58] sm:$0xff] }
  0xd7   : > { %3004 = vperm.xlu1 %3803, %v2961_v9  }
  0xd9   : > { %2766 = vmatpush1.bf16.msra.mxu0 %v4027_v35  ;;  %v2642_v35 = vrot.slane %v2640_v49, 1 }
  0xda   : > { %2767 = vmatprep.subr.bf16.mxu0 %v4036_v43  ;;  %v4070_v43 = vld [vmem:[%s5267_s1 + $0x250] ss:$8 sps:$4 sm:$0xff]  }
  0xdb   : > { %3014 = vperm.xlu1 %3803, %v2963_v41  }
  0xdc   : > { %1073 = vmatmul.mubr.bf16.gmra.mrb[20].mxu1 %v902_v16  ;;  %2533 = vmatmul.mubr.bf16.gmra.mrb[4].mxu0 %v2394_v29  ;;  %v4071_v16 = vld [vmem:[%s5267_s1 + $0x264] ss:$8 sps:$4 sm:$0xff]  }
  0xdd   : > { %1082 = vmatprep.mubr.bf16.mxu1 %v4099_v19  ;;  %2542 = vmatprep.mubr.bf16.mxu0 %v4099_v19  ;;  %v2965_v29 = vld [vmem:[%s5269_s3 + $0x68] sm:$0xff] }
  0xde   : > { %2768 = vmatpush1.bf16.msra.mxu0 %v4034_v44 }
  0xdf   : > { %2769 = vmatprep.subr.bf16.mxu0 %v4042_v14  ;;  %3024 = vperm.xlu1 %3803, %v2965_v29  }
  0xe2   : > { %2770 = vmatpush1.bf16.msra.mxu0 %v4040_v39  ;;  %v4072_v39 = vld [vmem:[%s5267_s1 + $0x260] ss:$8 sps:$4 sm:$0xff]  }
  0xe3   : > { %2771 = vmatprep.subr.bf16.mxu0 %v4045_v61  ;;  %v4073_v61 = vld [vmem:[%s5267_s1 + $0x274] ss:$8 sps:$4 sm:$0xff]  }
  0xe4   : > { %1083 = vmatmul.mubr.bf16.gmra.mrb[32].mxu1 %v901_v25  ;;  %2543 = vmatmul.mubr.bf16.gmra.mrb[8].mxu0 %v2396_v31  ;;  %v2645_v25 = vrot.slane %v2643_v36, 2  ;;  %v2892_v36 = vlaneseq }
  0xe5   : > { %1364 = vmatprep.mubr.bf16.mxu1 %v4099_v19  ;;  %2552 = vmatprep.mubr.bf16.mxu0 %v4099_v19 }
  0xe6   : > { %2772 = vmatpush1.bf16.msra.mxu0 %v4043_v51  ;;  %v2646_v44 = vor.u32 %v2645_v25, %v2642_v35 }
  0xe7   : > { %2773 = vmatprep.subr.bf16.mxu0 %v4048_v23  ;;  %v4074_v23 = vld [vmem:[%s5267_s1 + $0x270] ss:$8 sps:$4 sm:$0xff]  }
  0xea   : > { %2774 = vmatpush1.bf16.msra.mxu0 %v4046_v57 }
  0xeb   : > { %2775 = vmatprep.subr.bf16.mxu0 %v4051_v53 }
  0xec   : > { %1365 = vmatmul.mubr.bf16.vlgmr.msra.gmra.mrb[0].mxu1 %v4505_v37  ;;  %2553 = vmatmul.mubr.bf16.gmra.mrb[12].mxu0 %v2398_v33  ;;  %v2958_v37 = vld [vmem:[%s5269_s3 + $0x30] sm:$0xff] }
  0xed   : > { %3573 = vmatpush1.bf16.msra.mxu1 %v4060_v20  ;;  %1374 = vmatprep.mubr.bf16.mxu1 %v4099_v19 }
  0xee   : > { %3566 = vmatprep.subr.bf16.mxu1 %v4061_v62  ;;  %2562 = vmatprep.mubr.bf16.mxu0 %v4099_v19 }
  0xef   : > { %2776 = vmatpush1.bf16.msra.mxu0 %v4049_v59  ;;  %2989 = vperm.xlu0 %3802, %v2958_v37  }
  0xf0   : > { %2777 = vmatprep.subr.bf16.mxu0 %v4054_v13 }
  0xf1   : > { %3574 = vmatpush1.bf16.msra.mxu1 %v4062_v4 }
  0xf2   : > { %3567 = vmatprep.subr.bf16.mxu1 %v4063_v7 }
  0xf3   : > { %2778 = vmatpush1.bf16.msra.mxu0 %v4052_v2  ;;  %2999 = vperm.xlu0 %3802, %v2960_v52  }
  0xf4   : > { %1375 = vmatmul.mubr.bf16.gmra.mrb[4].mxu1 %v4639_v21  ;;  %2563 = vmatmul.mubr.bf16.gmra.mrb[16].mxu0 %v2400_v26  ;;  %v4065_v21 = vld [vmem:[%s5267_s1 + $0x234] ss:$8 sps:$4 sm:$0xff]  }
  0xf5   : > { %1384 = vmatprep.mubr.bf16.mxu1 %v4099_v19  ;;  %3575 = vmatpush1.bf16.msra.mxu1 %v4064_v5 }
  0xf6   : > { %2572 = vmatprep.mubr.bf16.mxu0 %v4099_v19  ;;  %3568 = vmatprep.subr.bf16.mxu1 %v4065_v21 }
  0xf7   : > { %3009 = vperm.xlu0 %3802, %v2962_v40  }
  0xf9   : > { %3576 = vmatpush1.bf16.msra.mxu1 %v4066_v6 }
  0xfa   : > { %3569 = vmatprep.subr.bf16.mxu1 %v4067_v27 }
  0xfb   : > { %3019 = vperm.xlu0 %3802, %v2964_v28  }
  0xfc   : > { %1385 = vmatmul.mubr.bf16.gmra.mrb[8].mxu1 %v4660_v45  ;;  %2573 = vmatmul.mubr.bf16.gmra.mrb[20].mxu0 %v2402_v8  ;;  %v1130_v45 = vld [vmem:[%s4282_s23 + $0x38] sm:$0xf] }
  0xfd   : > { %1394 = vmatprep.mubr.bf16.mxu1 %v4099_v19  ;;  %2582 = vmatprep.mubr.bf16.mxu0 %v4099_v19  ;;  %v3337_v30 = vcombine.low %v1129_v22, %v1130_v45 }
  0xfe   : > { %3577 = vmatpush1.bf16.msra.mxu1 %v4068_v54  ;;  %v2893_v54 = vshrl.u32 %v2892_v36, 7 }
  0xff   : > { %3570 = vmatprep.subr.bf16.mxu1 %v4069_v50  ;;  %3029 = vperm.xlu0 %3802, %v2966_v1   ;;  %v1237_v14 = vshrl.u32 %v3337_v30, 16  ;;  %v1240_v17 = vshll.u32 %v3337_v30, 16 }
 0x100   : > { %v2898_v29 = vsub.s32 1, %v2893_v54 }
 0x101   : > { %v1239_v31 = vrot.slane %v1237_v14, 3  ;;  %v1242_v51 = vrot.slane %v1240_v17, 4 }
 0x102   : > { %3578 = vmatpush1.bf16.msra.mxu1 %v4070_v43  ;;  %v2894_v43 = vsub.s32 0, %v2893_v54 }
 0x103   : > { %3571 = vmatprep.subr.bf16.mxu1 %v4071_v16  ;;  %v1243_v48 = vor.u32 %v1242_v51, %v1239_v31  ;;  %v2890_v16 = vld [vmem:[%s5268_s2] sm:$0x3] }
 0x104   : > { %1395 = vmatmul.mubr.bf16.gmra.mrb[12].mxu1 %v4675_v3  ;;  %2583 = vmatmul.mubr.bf16.gmra.mrb[32].mxu0 %v2401_v34  ;;  %v2650_v3 = vsel %vm2638_vm4, %v2646_v44, %v4721_v56  ;;  %v3376_v56 = vcombine.low %v1130_v45, %v1130_v45  ;;  %v5165_v44 = vrot.slane %v2890_v16, %v2894_v43 }
 0x105   : > { %1404 = vmatprep.mubr.bf16.mxu1 %v4099_v19  ;;  %2795 = vmatprep.mubr.bf16.mxu0 %v4099_v19  ;;  %v1244_v57 = vsel %vm865_vm2, %v4684_v10, %v1243_v48  ;;  %v3375_v10 = vcombine.low %v4630_v11, %v1129_v22  ;;  %v5167_v17 = vrot.slane %v2890_v16, %v2898_v29 }
 0x106   : > { %3579 = vmatpush1.bf16.msra.mxu1 %v4072_v39 }
 0x107   : > { %3572 = vmatprep.subr.bf16.mxu1 %v4073_v61 }
 0x10a   : > { %3580 = vmatpush1.bf16.msra.mxu1 %v4074_v23 }
 0x10c   : > { %1405 = vmatmul.mubr.bf16.gmra.mrb[16].mxu1 %v4698_v24  ;;  %2796 = vmatmul.mubr.bf16.vlgmr.msra.gmra.mrb[0].mxu0 %v2650_v3  ;;  %v3374_v24 = vcombine.low %v4586_v42, %v4615_v0 }
 0x10d   : > { %1414 = vmatprep.mubr.bf16.mxu1 %v4099_v19  ;;  %2805 = vmatprep.mubr.bf16.mxu0 %v4099_v19 }
 0x114   : > { %1415 = vmatmul.mubr.bf16.gmra.mrb[20].mxu1 %v1244_v57  ;;  %2806 = vmatmul.mubr.bf16.gmra.mrb[4].mxu0 %v4737_v15 }
 0x115   : > { %1424 = vmatprep.mubr.bf16.mxu1 %v4099_v19  ;;  %2815 = vmatprep.mubr.bf16.mxu0 %v4099_v19 }
 0x11c   : > { %1425 = vmatmul.mubr.bf16.gmra.mrb[36].mxu1 %v1243_v48  ;;  %2816 = vmatmul.mubr.bf16.gmra.mrb[8].mxu0 %v4740_v18 }
 0x11d   : > { %1642 = vmatprep.mubr.bf16.mxu1 %v4099_v19  ;;  %2825 = vmatprep.mubr.bf16.mxu0 %v4099_v19 }
 0x124   : > { %1643 = vmatmul.mubr.bf16.vlgmr.msra.gmra.mrb[16].mxu1 %v3374_v24  ;;  %2826 = vmatmul.mubr.bf16.gmra.mrb[12].mxu0 %v4758_v46 }
 0x125   : > { %1652 = vmatprep.mubr.bf16.mxu1 %v4099_v19  ;;  %2835 = vmatprep.mubr.bf16.mxu0 %v4099_v19 }
 0x12c   : > { %1653 = vmatmul.mubr.bf16.gmra.mrb[20].mxu1 %v3375_v10  ;;  %2836 = vmatmul.mubr.bf16.gmra.mrb[16].mxu0 %v4786_v47 }
 0x12d   : > { %1662 = vmatprep.mubr.bf16.mxu1 %v4099_v19  ;;  %2845 = vmatprep.mubr.bf16.mxu0 %v4099_v19 }
 0x130   : > { %v2970_v39 = vpop.permute.xlu0 %2969 }
 0x134   : > { %1663 = vmatmul.mubr.bf16.gmra.mrb[40].mxu1 %v3376_v56  ;;  %2846 = vmatmul.mubr.bf16.gmra.mrb[20].mxu0 %v4818_v63 }
 0x135   : > { %2855 = vmatprep.mubr.bf16.mxu0 %v4099_v19 }
 0x13c   : > { %2856 = vmatmul.mubr.bf16.gmra.mrb[36].mxu0 %v4807_v12 }
 0x147   : > { %v583_v42 = vpop.f32.mrb[24].mxu1 }
 0x148   : > { %v585_v0 = vpop.f32.mrb[25].mxu1 }
 0x149   : > { %v587_v15 = vpop.f32.mrb[26].mxu1 }
 0x14a   : > { %v588_v18 = vpop.f32.mrb[27].mxu1 }
 0x14b   : > { %v2975_v18 = vpop.permute.xlu0 %2974 }
 0x167   : > { %v5105_v11 = vpop.f32.mrb[24].mxu0 }
 0x168   : > { %v5107_v46 = vpop.f32.mrb[25].mxu0 }
 0x169   : > { %v2004_v47 = vpop.f32.mrb[26].mxu0 }
 0x16a   : > { %v2005_v63 = vpop.f32.mrb[27].mxu0 }
 0x17f   : > { %v837_v12 = vpop.f32.mrb[28].mxu1 }
 0x180   : > { %v838_v58 = vadd.f32 %v837_v12, %v583_v42  ;;  %v839_v33 = vpop.f32.mrb[29].mxu1 }
 0x181   : > { %v840_v55 = vadd.f32 %v839_v33, %v585_v0  ;;  %v841_v59 = vpop.f32.mrb[30].mxu1 }
 0x182   : > { %v842_v13 = vpop.f32.mrb[31].mxu1 }
 0x19f   : > { %v5134_v38 = vpop.f32.mrb[28].mxu0 }
 0x1a0   : > { %v5136_v20 = vpop.f32.mrb[29].mxu0 }
 0x1a1   : > { %v2339_v60 = vpop.f32.mrb[30].mxu0 }
 0x1a2   : > { %v2340_v37 = vpop.f32.mrb[31].mxu0 }
 0x1b7   : > { %v1084_v62 = vpop.f32.mrb[32].mxu1 }
 0x1b8   : > { %v5138_v2 = vadd.f32 %v1084_v62, %v838_v58  ;;  %v1086_v32 = vpop.f32.mrb[33].mxu1 }
 0x1b9   : > { %v5140_v4 = vadd.f32 %v1086_v32, %v840_v55  ;;  %v1088_v26 = vpop.f32.mrb[34].mxu1  ;;  %v2980_v55 = vpop.permute.xlu1 %2979 }
 0x1ba   : > { %v1089_v19 = vpop.f32.mrb[35].mxu1 }
 0x1bf   : > { %v1366_v7 = vpop.f32.mrb[0].mxu1 }
 0x1c0   : > { %v1368_v52 = vpop.f32.mrb[1].mxu1 }
 0x1c1   : > { %v1370_v9 = vpop.f32.mrb[2].mxu1 }
 0x1c2   : > { %v1372_v5 = vpop.f32.mrb[3].mxu1 }
 0x1c7   : > { %v1376_v34 = vpop.f32.mrb[4].mxu1 }
 0x1c8   : > { %v1378_v21 = vpop.f32.mrb[5].mxu1 }
 0x1c9   : > { %v1380_v40 = vpop.f32.mrb[6].mxu1 }
 0x1ca   : > { %v1382_v8 = vpop.f32.mrb[7].mxu1 }
 0x1cf   : > { %v5142_v6 = vpop.f32.mrb[8].mxu1 }
 0x1d0   : > { %v5144_v27 = vpop.f32.mrb[9].mxu1 }
 0x1d1   : > { %v5146_v28 = vpop.f32.mrb[10].mxu1 }
 0x1d2   : > { %v5148_v49 = vpop.f32.mrb[11].mxu1 }
 0x1d7   : > { %v5150_v22 = vpop.f32.mrb[12].mxu1  ;;  %v5152_v45 = vpop.f32.mrb[32].mxu0 }
 0x1d8   : > { %v5154_v41 = vpop.f32.mrb[13].mxu1  ;;  %v5156_v50 = vpop.f32.mrb[33].mxu0 }
 0x1d9   : > { %v5158_v1 = vpop.f32.mrb[14].mxu1  ;;  %v2588_v35 = vpop.f32.mrb[34].mxu0 }
 0x1da   : > { %v5160_v25 = vpop.f32.mrb[15].mxu1  ;;  %v2589_v30 = vpop.f32.mrb[35].mxu0 }
 0x1db   : > { %v2985_v30 = vpop.permute.xlu1 %2984 }
 0x1df   : > { %v2797_v14 = vpop.f32.mrb[0].mxu0 }
 0x1e0   : > { %v3581_v61 = vadd.f32 %v2797_v14, %v1366_v7  ;;  %v2799_v3 = vpop.f32.mrb[1].mxu0 }
 0x1e1   : > { %v3582_v31 = vadd.f32 %v2799_v3, %v1368_v52  ;;  %v2801_v51 = vpop.f32.mrb[2].mxu0 }
 0x1e2   : > { %v2902_v23 = vadd.f32 %v3581_v61, %v5165_v44  ;;  %v3583_v48 = vadd.f32 %v2801_v51, %v1370_v9  ;;  %v2803_v57 = vpop.f32.mrb[3].mxu0 }
 0x1e3   : > { %v2903_v24 = vadd.f32 %v3582_v31, %v5167_v17  ;;  %v3584_v10 = vadd.f32 %v2803_v57, %v1372_v5 }
 0x1e4   : > { %v2928_v56 = vmax.f32 %v2902_v23, 0.0  ;;  %v2904_v42 = vadd.f32 %v3583_v48, %v5165_v44 }
 0x1e5   : > { %v2929_v0 = vmax.f32 %v2903_v24, 0.0  ;;  %v2905_v15 = vadd.f32 %v3584_v10, %v5167_v17 }
 0x1e6   : > { %v2930_v47 = vmax.f32 %v2904_v42, 0.0  ;;  %v3032_v63 = vmul.f32 %v2970_v39, %v2928_v56 }
 0x1e7   : > { %v2931_v12 = vmax.f32 %v2905_v15, 0.0  ;;  %v3033_v58 = vmul.f32 %v2970_v39, %v2929_v0  ;;  %v2807_v33 = vpop.f32.mrb[4].mxu0 }
 0x1e8   : > { %v3034_v59 = vmul.f32 %v2975_v18, %v2930_v47  ;;  %v3585_v13 = vadd.f32 %v2807_v33, %v1376_v34  ;;  %v2809_v60 = vpop.f32.mrb[5].mxu0 }
 0x1e9   : > { %v3552_v37 = vpack.c.bf16 %v3033_v58, %v3032_v63  ;;  %v3035_v62 = vmul.f32 %v2975_v18, %v2931_v12  ;;  %v3586_v32 = vadd.f32 %v2809_v60, %v1378_v21  ;;  %v2811_v26 = vpop.f32.mrb[6].mxu0  ;;  %v2995_v58 = vpop.permute.xlu1 %2994 }
 0x1ea   : > { %v2906_v19 = vadd.f32 %v3585_v13, %v5165_v44  ;;  %v3587_v7 = vadd.f32 %v2811_v26, %v1380_v40  ;;  %v2813_v52 = vpop.f32.mrb[7].mxu0 }
 0x1eb   : > { %3143 = vst.msk [vmem:[%s5116_s13 + $0x10] sm:$0xff] %vm5109_vm8, %v3552_v37  ;;  %v3553_v9 = vpack.c.bf16 %v3035_v62, %v3034_v59  ;;  %v2907_v5 = vadd.f32 %v3586_v32, %v5167_v17  ;;  %v3588_v36 = vadd.f32 %v2813_v52, %v1382_v8 }
 0x1ec   : > { %v2932_v54 = vmax.f32 %v2906_v19, 0.0  ;;  %v2908_v35 = vadd.f32 %v3587_v7, %v5165_v44 }
 0x1ed   : > { %3144 = vst.msk [vmem:[%s5116_s13 + $0x18] sm:$0xff] %vm5109_vm8, %v3553_v9  ;;  %v2933_v34 = vmax.f32 %v2907_v5, 0.0  ;;  %v2909_v21 = vadd.f32 %v3588_v36, %v5167_v17 }
 0x1ee   : > { %v2934_v43 = vmax.f32 %v2908_v35, 0.0  ;;  %v3036_v40 = vmul.f32 %v2980_v55, %v2932_v54 }
 0x1ef   : > { %v2935_v16 = vmax.f32 %v2909_v21, 0.0  ;;  %v3037_v29 = vmul.f32 %v2980_v55, %v2933_v34  ;;  %v1426_v14 = vpop.f32.mrb[36].mxu1  ;;  %v2817_v39 = vpop.f32.mrb[8].mxu0 }
 0x1f0   : > { %v3038_v61 = vmul.f32 %v2985_v30, %v2934_v43  ;;  %v5184_v8 = vadd.f32 %v1426_v14, %v5138_v2  ;;  %v3589_v3 = vadd.f32 %v2817_v39, %v5142_v6  ;;  %v1428_v31 = vpop.f32.mrb[37].mxu1  ;;  %v2819_v51 = vpop.f32.mrb[9].mxu0 }
 0x1f1   : > { %v3554_v23 = vpack.c.bf16 %v3037_v29, %v3036_v40  ;;  %v3039_v48 = vmul.f32 %v2985_v30, %v2935_v16  ;;  %v5188_v57 = vadd.f32 %v1428_v31, %v5140_v4  ;;  %v3590_v24 = vadd.f32 %v2819_v51, %v5144_v27  ;;  %v1430_v10 = vpop.f32.mrb[38].mxu1  ;;  %v2821_v56 = vpop.f32.mrb[10].mxu0 }
 0x1f2   : > { %v2910_v42 = vadd.f32 %v3589_v3, %v5165_v44  ;;  %v3591_v0 = vadd.f32 %v2821_v56, %v5146_v28  ;;  %v1431_v2 = vpop.f32.mrb[39].mxu1  ;;  %v2823_v15 = vpop.f32.mrb[11].mxu0 }
 0x1f3   : > { %3145 = vst.msk [vmem:[%s5116_s13 + $0x20] sm:$0xff] %vm5109_vm8, %v3554_v23  ;;  %v3555_v6 = vpack.c.bf16 %v3039_v48, %v3038_v61  ;;  %v2911_v18 = vadd.f32 %v3590_v24, %v5167_v17  ;;  %v3592_v47 = vadd.f32 %v2823_v15, %v5148_v49  ;;  %v2990_v27 = vpop.permute.xlu0 %2989  ;;  %v3005_v39 = vpop.permute.xlu1 %3004 }
 0x1f4   : > { %v2936_v4 = vmax.f32 %v2910_v42, 0.0  ;;  %v2912_v63 = vadd.f32 %v3591_v0, %v5165_v44 }
 0x1f5   : > { %3146 = vst.msk [vmem:[%s5116_s13 + $0x28] sm:$0xff] %vm5109_vm8, %v3555_v6  ;;  %v2937_v12 = vmax.f32 %v2911_v18, 0.0  ;;  %v2913_v28 = vadd.f32 %v3592_v47, %v5167_v17 }
 0x1f6   : > { %v3040_v33 = vmul.f32 %v2990_v27, %v2936_v4  ;;  %v2938_v55 = vmax.f32 %v2912_v63, 0.0 }
 0x1f7   : > { %v3041_v59 = vmul.f32 %v2990_v27, %v2937_v12  ;;  %v2939_v13 = vmax.f32 %v2913_v28, 0.0  ;;  %v1644_v60 = vpop.f32.mrb[16].mxu1  ;;  %v2827_v37 = vpop.f32.mrb[12].mxu0 }
 0x1f8   : > { %v3042_v62 = vmul.f32 %v2995_v58, %v2938_v55  ;;  %v3593_v49 = vadd.f32 %v2827_v37, %v5150_v22  ;;  %v1646_v32 = vpop.f32.mrb[17].mxu1  ;;  %v2829_v26 = vpop.f32.mrb[13].mxu0 }
 0x1f9   : > { %v3556_v19 = vpack.c.bf16 %v3041_v59, %v3040_v33  ;;  %v3043_v7 = vmul.f32 %v2995_v58, %v2939_v13  ;;  %v3594_v52 = vadd.f32 %v2829_v26, %v5154_v41  ;;  %v1648_v9 = vpop.f32.mrb[18].mxu1  ;;  %v2831_v5 = vpop.f32.mrb[14].mxu0 }
 0x1fa   : > { %v2914_v36 = vadd.f32 %v3593_v49, %v5165_v44  ;;  %v3595_v54 = vadd.f32 %v2831_v5, %v5158_v1  ;;  %v1650_v35 = vpop.f32.mrb[19].mxu1  ;;  %v2833_v34 = vpop.f32.mrb[15].mxu0 }
 0x1fb   : > { %3147 = vst.msk [vmem:[%s5116_s13 + $0x30] sm:$0xff] %vm5109_vm8, %v3556_v19  ;;  %v3557_v21 = vpack.c.bf16 %v3043_v7, %v3042_v62  ;;  %v2915_v22 = vadd.f32 %v3594_v52, %v5167_v17  ;;  %v3596_v30 = vadd.f32 %v2833_v34, %v5160_v25  ;;  %v3000_v41 = vpop.permute.xlu0 %2999  ;;  %v3015_v59 = vpop.permute.xlu1 %3014 }
 0x1fc   : > { %v2940_v43 = vmax.f32 %v2914_v36, 0.0  ;;  %v2916_v40 = vadd.f32 %v3595_v54, %v5165_v44 }
 0x1fd   : > { %3148 = vst.msk [vmem:[%s5116_s13 + $0x38] sm:$0xff] %vm5109_vm8, %v3557_v21  ;;  %v2941_v16 = vmax.f32 %v2915_v22, 0.0  ;;  %v2917_v1 = vadd.f32 %v3596_v30, %v5167_v17 }
 0x1fe   : > { %v3044_v29 = vmul.f32 %v3000_v41, %v2940_v43  ;;  %v2942_v14 = vmax.f32 %v2916_v40, 0.0 }
 0x1ff   : > { %v3045_v61 = vmul.f32 %v3000_v41, %v2941_v16  ;;  %v2943_v3 = vmax.f32 %v2917_v1, 0.0  ;;  %v1654_v31 = vpop.f32.mrb[20].mxu1  ;;  %v2837_v51 = vpop.f32.mrb[16].mxu0 }
 0x200   : > { %v3046_v23 = vmul.f32 %v3005_v39, %v2942_v14  ;;  %v3597_v25 = vadd.f32 %v2837_v51, %v1644_v60  ;;  %v1656_v48 = vpop.f32.mrb[21].mxu1  ;;  %v2839_v24 = vpop.f32.mrb[17].mxu0 }
 0x201   : > { %v3558_v10 = vpack.c.bf16 %v3045_v61, %v3044_v29  ;;  %v3047_v56 = vmul.f32 %v3005_v39, %v2943_v3  ;;  %v3598_v42 = vadd.f32 %v2839_v24, %v1646_v32  ;;  %v1658_v0 = vpop.f32.mrb[22].mxu1  ;;  %v2841_v2 = vpop.f32.mrb[18].mxu0 }
 0x202   : > { %v2918_v15 = vadd.f32 %v3597_v25, %v5165_v44  ;;  %v3599_v6 = vadd.f32 %v2841_v2, %v1648_v9  ;;  %v1660_v18 = vpop.f32.mrb[23].mxu1  ;;  %v2843_v47 = vpop.f32.mrb[19].mxu0 }
 0x203   : > { %3149 = vst.msk [vmem:[%s5116_s13 + $0x40] sm:$0xff] %vm5109_vm8, %v3558_v10  ;;  %v3559_v4 = vpack.c.bf16 %v3047_v56, %v3046_v23  ;;  %v2919_v63 = vadd.f32 %v3598_v42, %v5167_v17  ;;  %v3600_v27 = vadd.f32 %v2843_v47, %v1650_v35  ;;  %v3010_v58 = vpop.permute.xlu0 %3009  ;;  %v3025_v25 = vpop.permute.xlu1 %3024 }
 0x204   : > { %v2944_v12 = vmax.f32 %v2918_v15, 0.0  ;;  %v2920_v28 = vadd.f32 %v3599_v6, %v5165_v44 }
 0x205   : > { %3150 = vst.msk [vmem:[%s5116_s13 + $0x48] sm:$0xff] %vm5109_vm8, %v3559_v4  ;;  %v2945_v33 = vmax.f32 %v2919_v63, 0.0  ;;  %v2921_v55 = vadd.f32 %v3600_v27, %v5167_v17 }
 0x206   : > { %v3048_v13 = vmul.f32 %v3010_v58, %v2944_v12  ;;  %v2946_v60 = vmax.f32 %v2920_v28, 0.0 }
 0x207   : > { %v3049_v37 = vmul.f32 %v3010_v58, %v2945_v33  ;;  %v2947_v62 = vmax.f32 %v2921_v55, 0.0  ;;  %v1664_v49 = vpop.f32.mrb[40].mxu1  ;;  %v2847_v32 = vpop.f32.mrb[20].mxu0 }
 0x208   : > { %v3050_v26 = vmul.f32 %v3015_v59, %v2946_v60  ;;  %v1695_v19 = vadd.f32 %v1664_v49, %v5184_v8  ;;  %v3601_v7 = vadd.f32 %v2847_v32, %v1654_v31  ;;  %v1666_v52 = vpop.f32.mrb[41].mxu1  ;;  %v2849_v9 = vpop.f32.mrb[21].mxu0 }
 0x209   : > { %v3560_v5 = vpack.c.bf16 %v3049_v37, %v3048_v13  ;;  %v3051_v36 = vmul.f32 %v3015_v59, %v2947_v62  ;;  %v1696_v54 = vadd.f32 %v1666_v52, %v5188_v57  ;;  %v3602_v35 = vadd.f32 %v2849_v9, %v1656_v48  ;;  %v1668_v34 = vpop.f32.mrb[42].mxu1  ;;  %v2851_v21 = vpop.f32.mrb[22].mxu0 }
 0x20a   : > { %v2031_v22 = vadd.f32 %v5105_v11, %v1695_v19  ;;  %v2922_v30 = vadd.f32 %v3601_v7, %v5165_v44  ;;  %v3603_v43 = vadd.f32 %v2851_v21, %v1658_v0  ;;  %v1669_v40 = vpop.f32.mrb[43].mxu1  ;;  %v2853_v41 = vpop.f32.mrb[23].mxu0 }
 0x20b   : > { %3151 = vst.msk [vmem:[%s5116_s13 + $0x50] sm:$0xff] %vm5109_vm8, %v3560_v5  ;;  %v3561_v8 = vpack.c.bf16 %v3051_v36, %v3050_v26  ;;  %v2032_v16 = vadd.f32 %v5107_v46, %v1696_v54  ;;  %v2923_v1 = vadd.f32 %v3602_v35, %v5167_v17  ;;  %v3604_v57 = vadd.f32 %v2853_v41, %v1660_v18  ;;  %v3020_v11 = vpop.permute.xlu0 %3019 }
 0x20c   : > { %v2948_v29 = vmax.f32 %v2922_v30, 0.0  ;;  %v2924_v14 = vadd.f32 %v3603_v43, %v5165_v44  ;;  %v2366_v39 = vadd.f32 %v5134_v38, %v2031_v22 }
 0x20d   : > { %3152 = vst.msk [vmem:[%s5116_s13 + $0x58] sm:$0xff] %vm5109_vm8, %v3561_v8  ;;  %v2949_v61 = vmax.f32 %v2923_v1, 0.0  ;;  %v2925_v3 = vadd.f32 %v3604_v57, %v5167_v17  ;;  %v2367_v31 = vadd.f32 %v5136_v20, %v2032_v16 }
 0x20e   : > { %v3052_v51 = vmul.f32 %v3020_v11, %v2948_v29  ;;  %v2950_v23 = vmax.f32 %v2924_v14, 0.0  ;;  %v2615_v46 = vadd.f32 %v5152_v45, %v2366_v39 }
 0x20f   : > { %v3053_v48 = vmul.f32 %v3020_v11, %v2949_v61  ;;  %v2951_v24 = vmax.f32 %v2925_v3, 0.0  ;;  %v2857_v10 = vpop.f32.mrb[36].mxu0  ;;  %v2616_v38 = vadd.f32 %v5156_v50, %v2367_v31  ;;  %v3030_v27 = vpop.permute.xlu0 %3029 }
 0x210   : > { %v3054_v56 = vmul.f32 %v3025_v25, %v2950_v23  ;;  %v2888_v42 = vadd.f32 %v2857_v10, %v2615_v46  ;;  %v2859_v0 = vpop.f32.mrb[37].mxu0 }
 0x211   : > { %v3562_v2 = vpack.c.bf16 %v3053_v48, %v3052_v51  ;;  %v3055_v15 = vmul.f32 %v3025_v25, %v2951_v24  ;;  %v2889_v6 = vadd.f32 %v2859_v0, %v2616_v38  ;;  %v2861_v20 = vpop.f32.mrb[38].mxu0 }
 0x212   : > { %v2926_v18 = vadd.f32 %v5165_v44, %v2888_v42  ;;  %v2862_v47 = vpop.f32.mrb[39].mxu0 }
 0x213   : > { %3153 = vst.msk [vmem:[%s5116_s13 + $0x60] sm:$0xff] %vm5109_vm8, %v3562_v2  ;;  %v3563_v45 = vpack.c.bf16 %v3055_v15, %v3054_v56  ;;  %v2927_v4 = vadd.f32 %v5167_v17, %v2889_v6 }
 0x214   : > { %v2952_v63 = vmax.f32 %v2926_v18, 0.0 }
 0x215   : > { %3154 = vst.msk [vmem:[%s5116_s13 + $0x68] sm:$0xff] %vm5109_vm8, %v3563_v45  ;;  %v2953_v50 = vmax.f32 %v2927_v4, 0.0 }
 0x216   : > { %v3056_v12 = vmul.f32 %v3030_v27, %v2952_v63 }
 0x217   : > { %v3057_v28 = vmul.f32 %v3030_v27, %v2953_v50 }
 0x219   : > { %v3564_v58 = vpack.c.bf16 %v3057_v28, %v3056_v12 }
 0x21b   : > { %3155 = vst.msk [vmem:[%s5116_s13 + $0x70] sm:$0xff] %vm5109_vm8, %v3564_v58 }
 0x21c PF: > { %p11_p9 = scmp.ge.s32.totalorder %s4142_s19, 4   ;;  %s5273_s15 = smov %s4093_s16 }
 0x21d   : > { %s5274_s16 = smov %s4151_s22  ;;  %s5275_s17 = smov %s4142_s19 }
 0x21e   :  { %13 = sbr.rel (!%p11_p9) target bundleno = 2 (0x2), region = 120 }

// kernel: incept_block3.8
= control target key start
LH: loop header
LB: loop body
LE: loop exit
PB: predicated region body
PF: predicated region fallthrough
CT: control target
= control target key end

     0   :  { %s6899_s21 = smov 0   ;;  %s6901_s22 = smov 0   ;;  %s8892_s0 = inlined_call_operand.vmem [shape: bf16[2,136,512], index: 0, kind: input, shape index: {}]   ;;  %s8893_s1 = inlined_call_operand.vmem [shape: bf16[9,128,112], index: 1, kind: input, shape index: {}]   ;;  %s8894_s2 = inlined_call_operand.vmem [shape: f32[1,112], index: 2, kind: input, shape index: {}]   ;;  %s8895_s3 = inlined_call_operand.vmem [shape: bf16[9,112,112], index: 3, kind: input, shape index: {}]   ;;  %s8896_s4 = inlined_call_operand.vmem [shape: f32[1,112], index: 4, kind: input, shape index: {}]   ;;  %s8897_s5 = inlined_call_operand.vmem [shape: f32[136,1], index: 5, kind: input, shape index: {}]   ;;  %s8898_s6 = inlined_call_operand.vmem [shape: bf16[2,136,112], index: 6, kind: output, shape index: {}]  }
   0x1   :  { %s6903_s23 = smov 0  }
   0x2 LB: > { %s4961_s24 = sadd.s32 4294967295, %s6859_s23   ;;  %s6916_s25 = sadd.s32 1, %s6859_s23   ;;  %s6859_s23 = sphi %s6903_s23, %s8902_s23   ;;  %s6855_s22 = sphi %s6901_s22, %s8901_s22   ;;  %s6851_s21 = sphi %s6899_s21, %s8900_s21  }
   0x3   : > { %s20_s26 = ssub.s32 %s6859_s23, %s6916_s25  ;;  %s23_s27 = sadd.s32 1, %s6855_s22 }
   0x4   : > { %p21_p0 = scmp.eq.s32.totalorder %s20_s26, 0  ;;  %p30_p1 = scmp.ne.s32.totalorder %s6855_s22, %s6851_s21 }
   0x5   : > { %p31_p2 = scmp.eq.s32.totalorder %s6859_s23, 0  ;;  %p4964_p4 = scmp.ge.s32.totalorder %s6859_s23, 2 }
   0x6   : > { %s6925_s28 = scalar_select %p21_p0, %s6855_s22, %s23_s27  }
   0x7   : > { %p32_p3 = por %p31_p2, %p30_p1  ;;  %202 = sbr.rel (%p4964_p4) target bundleno = 30 (0x1e), region = 36 }
   0xe   : > { %205 = sbr.rel (!%p32_p3) target bundleno = 30 (0x1e), region = 40  ;;  %s207_s29 = sand.u32 (%p32_p3), 1, %s6855_s22  }
   0xf   : > { %s4965_s30 = smul.u32 (%p32_p3), 272, %s6859_s23 }
  0x10   : > { %s6592_s7 = smul.u32 (%p32_p3), 68, %s207_s29 }
  0x11   : > { %s6933_s10 = scalar_lea.vmem (%p32_p3), %s8892_s0, %s4965_s30 }
  0x12   : > { %v4966_v0 = vld [vmem:[%s6933_s10 + $0x4] sm:$0xf] (%p32_p3)  ;;  %v4967_v1 = vld [vmem:[%s6933_s10 + $0x14] sm:$0xf] (%p32_p3)  ;;  %s6937_s11 = scalar_lea.vmem (%p32_p3), [#allocation3], %s6592_s7 }
  0x13   : > { %230 = vst [vmem:[%s6937_s11] sm:$0xf] (%p32_p3), %v4966_v0  ;;  %232 = vst [vmem:[%s6937_s11 + $0x4] sm:$0xf] (%p32_p3), %v4967_v1  ;;  %v4968_v2 = vld [vmem:[%s6933_s10 + $0x24] sm:$0xf] (%p32_p3) }
  0x14   : > { %v4969_v3 = vld [vmem:[%s6933_s10 + $0x34] sm:$0xf] (%p32_p3)  ;;  %v4970_v4 = vld [vmem:[%s6933_s10 + $0x44] sm:$0xf] (%p32_p3)  ;;  %234 = vst [vmem:[%s6937_s11 + $0x8] sm:$0xf] (%p32_p3), %v4968_v2 }
  0x15   : > { %236 = vst [vmem:[%s6937_s11 + $0xc] sm:$0xf] %v4969_v3  ;;  %238 = vst [vmem:[%s6937_s11 + $0x10] sm:$0xf] %v4970_v4  ;;  %v4971_v5 = vld [vmem:[%s6933_s10 + $0x54] sm:$0xf] }
  0x16   : > { %v4972_v6 = vld [vmem:[%s6933_s10 + $0x64] sm:$0xf]  ;;  %v4973_v7 = vld [vmem:[%s6933_s10 + $0x74] sm:$0xf]  ;;  %240 = vst [vmem:[%s6937_s11 + $0x14] sm:$0xf] %v4971_v5 }
  0x17   : > { %242 = vst [vmem:[%s6937_s11 + $0x18] sm:$0xf] %v4972_v6  ;;  %244 = vst [vmem:[%s6937_s11 + $0x1c] sm:$0xf] %v4973_v7  ;;  %v4974_v8 = vld [vmem:[%s6933_s10 + $0x84] sm:$0xf] }
  0x18   : > { %v4975_v9 = vld [vmem:[%s6933_s10 + $0x94] sm:$0xf]  ;;  %v4976_v10 = vld [vmem:[%s6933_s10 + $0xa4] sm:$0xf]  ;;  %246 = vst [vmem:[%s6937_s11 + $0x20] sm:$0xf] %v4974_v8 }
  0x19   : > { %248 = vst [vmem:[%s6937_s11 + $0x24] sm:$0xf] %v4975_v9  ;;  %250 = vst [vmem:[%s6937_s11 + $0x28] sm:$0xf] %v4976_v10  ;;  %v4977_v11 = vld [vmem:[%s6933_s10 + $0xb4] sm:$0xf] }
  0x1a   : > { %v4978_v12 = vld [vmem:[%s6933_s10 + $0xc4] sm:$0xf]  ;;  %v4979_v13 = vld [vmem:[%s6933_s10 + $0xd4] sm:$0xf]  ;;  %252 = vst [vmem:[%s6937_s11 + $0x2c] sm:$0xf] %v4977_v11 }
  0x1b   : > { %254 = vst [vmem:[%s6937_s11 + $0x30] sm:$0xf] %v4978_v12  ;;  %256 = vst [vmem:[%s6937_s11 + $0x34] sm:$0xf] %v4979_v13  ;;  %v4980_v14 = vld [vmem:[%s6933_s10 + $0xe4] sm:$0xf] }
  0x1c   : > { %v4981_v15 = vld [vmem:[%s6933_s10 + $0xf4] sm:$0xf]  ;;  %v4982_v16 = vld [vmem:[%s6933_s10 + $0x104] sm:$0xf]  ;;  %258 = vst [vmem:[%s6937_s11 + $0x38] sm:$0xf] %v4980_v14 }
  0x1d   : > { %260 = vst [vmem:[%s6937_s11 + $0x3c] sm:$0xf] %v4981_v15  ;;  %262 = vst [vmem:[%s6937_s11 + $0x40] sm:$0xf] %v4982_v16 }
  0x1e PF: > { %p4983_p5 = scmp.ge.s32.totalorder %s6859_s23, 1  ;;  %p318_p6 = scmp.lt.s32.totalorder %s6859_s23, 3 }
  0x20   : > { %p319_p7 = pnand %p4983_p5, %p318_p6 }
  0x21   : > { %v6624_v17 = vld [vmem:[%s8893_s1 + $0x40] sm:$0xff] (!%p319_p7)   ;;  %v6861_v18 = vmov (!%p319_p7), 0.0   ;;  %v6626_v20 = vld [vmem:[%s8893_s1 + $0x48] sm:$0xff] (!%p319_p7)   ;;  %vm6862_vm0 = vmmov (!%p319_p7), 0   ;;  %v6628_v22 = vld [vmem:[%s8893_s1 + $0x50] sm:$0xff] (!%p319_p7)   ;;  %s325_s27 = sand.u32 (!%p319_p7), 1, %s6851_s21  }
  0x22   : > { %322 = sbr.rel (%p319_p7) target bundleno = 1022 (0x3fe), region = 81  ;;  %5818 = vmatprep.subr.bf16.mxu0 (!%p319_p7), %v6861_v18  ;;  %5862 = vmatprep.subr.bf16.mxu1 (!%p319_p7), %v6861_v18  ;;  %v6625_v19 = vld [vmem:[%s8893_s1] sm:$0xff] (!%p319_p7)   ;;  %v6627_v21 = vld [vmem:[%s8893_s1 + $0x8] sm:$0xff] (!%p319_p7)   ;;  %v6629_v23 = vld [vmem:[%s8893_s1 + $0x10] sm:$0xff] (!%p319_p7)   ;;  %vm456_vm1 = vcmask (!%p319_p7), 1044480   ;;  %vm2573_vm5 = vcmask (!%p319_p7), 912384  }
  0x23   : > { %5819 = vmatpush3.bf16.msra.mxu0 (!%p319_p7), %v6624_v17  ;;  %5834 = vmatprep.mubr.msk.bf16.mxu0 (!%p319_p7), %vm6862_vm0, %v6861_v18  ;;  %s6593_s7 = smul.u32 (!%p319_p7), 68, %s325_s27  ;;  %v6630_v24 = vld [vmem:[%s8893_s1 + $0x58] sm:$0xff] (!%p319_p7)   ;;  %v6632_v26 = vld [vmem:[%s8893_s1 + $0x60] sm:$0xff] (!%p319_p7)   ;;  %v6634_v29 = vld [vmem:[%s8893_s1 + $0x68] sm:$0xff] (!%p319_p7)   ;;  %vm616_vm2 = vsmask.f32 (!%p319_p7), 5376 }
  0x24   : > { %5863 = vmatpush3.bf16.msra.mxu1 (!%p319_p7), %v6625_v19  ;;  %5820 = vmatprep.subr.bf16.mxu0 (!%p319_p7), %v6861_v18  ;;  %v6631_v25 = vld [vmem:[%s8893_s1 + $0x18] sm:$0xff] (!%p319_p7)   ;;  %v6633_v27 = vld [vmem:[%s8893_s1 + $0x20] sm:$0xff] (!%p319_p7)   ;;  %v6635_v32 = vld [vmem:[%s8893_s1 + $0x28] sm:$0xff] (!%p319_p7)   ;;  %vm843_vm3 = vsmask.f32 (!%p319_p7), 4352  ;;  %p7523_p8 = scmp.lt.s32.totalorder (!%p319_p7), %s4961_s24, 1 }
  0x25   : > { %5864 = vmatprep.subr.bf16.mxu1 (!%p319_p7), %v6861_v18  ;;  %5878 = vmatprep.mubr.msk.bf16.mxu1 (!%p319_p7), %vm6862_vm0, %v6861_v18  ;;  %s7018_s15 = scalar_lea.vmem (!%p319_p7), [#allocation3], %s6593_s7  ;;  %v6636_v39 = vld [vmem:[%s8893_s1 + $0x70] sm:$0xff] (!%p319_p7)   ;;  %v6638_v47 = vld [vmem:[%s8893_s1 + $0x78] sm:$0xff] (!%p319_p7)   ;;  %v6643_v55 = vld [vmem:[%s8893_s1 + $0x80] sm:$0xff] (!%p319_p7)   ;;  %vm1567_vm4 = vsmask.f32 (!%p319_p7), 7424 }
  0x26   : > { %v374_v28 = vld [vmem:[%s7018_s15 + $0x4] sm:$0xf] (!%p319_p7)  ;;  %v7025_v30 = vld [vmem:[%s7018_s15 + $0x8] sm:$0xff] (!%p319_p7)   ;;  %v373_v31 = vld [vmem:[%s7018_s15] sm:$0xc] (!%p319_p7)  ;;  %vm2077_vm6 = vcmask (!%p319_p7), 1046528  }
  0x27   : > { %5821 = vmatpush3.bf16.msra.mxu0 (!%p319_p7), %v6626_v20  ;;  %v5016_v33 = vcombine.low (!%p319_p7), %v373_v31, %v374_v28  ;;  %v403_v34 = vld [vmem:[%s7018_s15] sm:$0x8] (!%p319_p7)  ;;  %v626_v35 = vshrl.u32 (!%p319_p7), %v7025_v30, 16  ;;  %v629_v36 = vshll.u32 (!%p319_p7), %v7025_v30, 16  ;;  %v6637_v40 = vld [vmem:[%s8893_s1 + $0x30] sm:$0xff] (!%p319_p7)   ;;  %v6639_v48 = vld [vmem:[%s8893_s1 + $0x38] sm:$0xff] (!%p319_p7)  }
  0x28   : > { %5865 = vmatpush3.bf16.msra.mxu1 (!%p319_p7), %v6627_v21  ;;  %5822 = vmatprep.subr.bf16.mxu0 (!%p319_p7), %v6861_v18  ;;  %v7042_v41 = vcombine.low (!%p319_p7), %v403_v34, %v374_v28  ;;  %v7045_v42 = vld [vmem:[%s7018_s15 + $0x10] sm:$0xff] (!%p319_p7)   ;;  %v458_v50 = vrot.slane (!%p319_p7), %v7025_v30, 3  ;;  %v7070_v57 = vld [vmem:[%s7018_s15 + $0x18] sm:$0xff] (!%p319_p7)   ;;  %v6645_v63 = vld [vmem:[%s8893_s1 + $0x88] sm:$0xff] (!%p319_p7)   ;;  %vm2268_vm7 = vsmask.f32 (!%p319_p7), 6400 }
  0x29   : > { %5866 = vmatprep.subr.bf16.mxu1 %v6861_v18  ;;  %v618_v37 = vshrl.u32 %v5016_v33, 16  ;;  %v621_v38 = vshll.u32 %v5016_v33, 16  ;;  %v628_v45 = vrot.slane %v626_v35, 2  ;;  %v631_v46 = vrot.slane %v629_v36, 3  ;;  %v6650_v61 = vld [vmem:[%s8893_s1 + $0xc0] sm:$0xff]   ;;  %v6652_v3 = vld [vmem:[%s8893_s1 + $0xc8] sm:$0xff]  }
  0x2a   : > { %v457_v49 = vrot.slane %v7042_v41, 3  ;;  %v635_v53 = vshrl.u32 %v7045_v42, 16  ;;  %v638_v54 = vshll.u32 %v7045_v42, 16  ;;  %v460_v62 = vrot.slane %v7045_v42, 3  ;;  %v6646_v5 = vld [vmem:[%s8893_s1 + $0x90] sm:$0xff]   ;;  %v7106_v8 = vld [vmem:[%s7018_s15 + $0x20] sm:$0xff]  }
  0x2b   : > { %5823 = vmatpush3.bf16.msra.mxu0 %v6628_v22  ;;  %v620_v43 = vrot.slane %v618_v37, 2  ;;  %v623_v44 = vrot.slane %v621_v38, 3  ;;  %v632_v52 = vor.u32 %v631_v46, %v628_v45  ;;  %v644_v0 = vshrl.u32 %v7070_v57, 16  ;;  %v6654_v10 = vld [vmem:[%s8893_s1 + $0xd0] sm:$0xff]   ;;  %v6648_v12 = vld [vmem:[%s8893_s1 + $0x98] sm:$0xff]   ;;  %v6651_v22 = vld [vmem:[%s8893_s1 + $0xa0] sm:$0xff]  }
  0x2c   : > { %5867 = vmatpush3.bf16.msra.mxu1 %v6629_v23  ;;  %5824 = vmatprep.subr.bf16.mxu0 %v6861_v18  ;;  %v459_v56 = vsel %vm456_vm1, %v457_v49, %v458_v50  ;;  %v637_v59 = vrot.slane %v635_v53, 2  ;;  %v640_v60 = vrot.slane %v638_v54, 3  ;;  %v647_v1 = vshll.u32 %v7070_v57, 16  ;;  %v6656_v16 = vld [vmem:[%s8893_s1 + $0xd8] sm:$0xff]   ;;  %v7139_v23 = vld [vmem:[%s7018_s15 + $0x28] sm:$0xff]   ;;  %s8904_s24 = smov (!%p7523_p8, %s4961_s24), 1 }
  0x2d   : > { %5868 = vmatprep.subr.bf16.mxu1 %v6861_v18  ;;  %v624_v51 = vor.u32 %v623_v44, %v620_v43  ;;  %v461_v4 = vsel %vm456_vm1, %v458_v50, %v460_v62  ;;  %v646_v6 = vrot.slane %v644_v0, 2  ;;  %v462_v11 = vrot.slane %v7070_v57, 3  ;;  %v7157_v31 = vld [vmem:[%s7018_s15 + $0x30] sm:$0xf]  ;;  %v6660_v33 = vld [vmem:[%s8893_s1 + $0xe8] sm:$0xff]   ;;  %s6594_s19 = smul.u32 68, %s8904_s24 }
  0x2e   : > { %v641_v2 = vor.u32 %v640_v60, %v637_v59  ;;  %v649_v7 = vrot.slane %v647_v1, 3  ;;  %v653_v14 = vshrl.u32 %v7106_v8, 16  ;;  %v656_v15 = vshll.u32 %v7106_v8, 16  ;;  %v6658_v43 = vld [vmem:[%s8893_s1 + $0xb0] sm:$0xff]   ;;  %v6661_v49 = vld [vmem:[%s8893_s1 + $0xb8] sm:$0xff]  }
  0x2f   : > { %5825 = vmatpush3.bf16.msra.mxu0 %v6630_v24  ;;  %v633_v58 = vsel %vm616_vm2, %v624_v51, %v632_v52  ;;  %v463_v17 = vsel %vm456_vm1, %v460_v62, %v462_v11  ;;  %v6659_v24 = vld [vmem:[%s8893_s1 + $0xe0] sm:$0xff]   ;;  %v665_v28 = vshll.u32 %v7139_v23, 16  ;;  %v6662_v44 = vld [vmem:[%s8893_s1 + $0xf0] sm:$0xff]   ;;  %v466_v45 = vrot.slane %v7139_v23, 3  ;;  %v6663_v50 = vld [vmem:[%s8893_s1 + $0xf8] sm:$0xff]   ;;  %s7562_s24 = scalar_lea.vmem %s8898_s6, %s6594_s19 }
  0x30   : > { %5869 = vmatpush3.bf16.msra.mxu1 %v6631_v25  ;;  %5826 = vmatprep.subr.bf16.mxu0 %v6861_v18  ;;  %v642_v9 = vsel %vm616_vm2, %v632_v52, %v641_v2  ;;  %v650_v13 = vor.u32 %v649_v7, %v646_v6  ;;  %v655_v20 = vrot.slane %v653_v14, 2  ;;  %v658_v21 = vrot.slane %v656_v15, 3  ;;  %v1037_v59 = vld [vmem:[%s7018_s15 + $0x4] sm:$0x8]  ;;  %v7203_v60 = vld [vmem:[%s7018_s15 + $0x8] sm:$0xf] }
  0x31   : > { %5870 = vmatprep.subr.bf16.mxu1 %v6861_v18  ;;  %v464_v25 = vrot.slane %v7106_v8, 3  ;;  %v7212_v62 = vld [vmem:[%s7018_s15 + $0x10] sm:$0xf]  ;;  %v845_v6 = vshrl.u32 %v7042_v41, 16  ;;  %v848_v7 = vshll.u32 %v7042_v41, 16  ;;  %v852_v41 = vrot.slane %v626_v35, 3 }
  0x32   : > { %v651_v19 = vsel %vm616_vm2, %v641_v2, %v650_v13  ;;  %v5066_v2 = vcombine.low %v1037_v59, %v7203_v60  ;;  %v6683_v8 = vld [vmem:[%s8893_s1 + $0x160] sm:$0xff]   ;;  %vm2778_vm8 = vcmask 916480  }
  0x33   : > { %5827 = vmatpush3.bf16.msra.mxu0 %v6632_v26  ;;  %v659_v26 = vor.u32 %v658_v21, %v655_v20  ;;  %v465_v34 = vsel %vm456_vm1, %v462_v11, %v464_v25  ;;  %v467_v51 = vsel %vm456_vm1, %v464_v25, %v466_v45  ;;  %v853_v20 = vrot.slane %v629_v36, 4 }
  0x34   : > { %5871 = vmatpush3.bf16.msra.mxu1 %v6633_v27  ;;  %5828 = vmatprep.subr.bf16.mxu0 %v6861_v18  ;;  %v662_v27 = vshrl.u32 %v7139_v23, 16  ;;  %v1107_v11 = vshll.u32 %v5066_v2, 16  ;;  %v6682_v23 = vld [vmem:[%s8893_s1 + $0x130] sm:$0xff]  }
  0x35   : > { %5872 = vmatprep.subr.bf16.mxu1 %v6861_v18  ;;  %v660_v37 = vsel %vm616_vm2, %v650_v13, %v659_v26 }
  0x36   : > { %v664_v38 = vrot.slane %v662_v27, 2 }
  0x37   : > { %5829 = vmatpush3.bf16.msra.mxu0 %v6634_v29  ;;  %v6655_v29 = vld [vmem:[%s8893_s1 + $0xa8] sm:$0xff]  }
  0x38   : > { %5873 = vmatpush3.bf16.msra.mxu1 %v6635_v32  ;;  %5830 = vmatprep.subr.bf16.mxu0 %v6861_v18  ;;  %v386_v32 = vld [vmem:[%s7018_s15 + $0x34] sm:$0x7] }
  0x39   : > { %5874 = vmatprep.subr.bf16.mxu1 %v6861_v18 }
  0x3b   : > { %5831 = vmatpush3.bf16.msra.mxu0 %v6636_v39  ;;  %v667_v39 = vrot.slane %v665_v28, 3 }
  0x3c   : > { %5875 = vmatpush3.bf16.msra.mxu1 %v6637_v40  ;;  %5832 = vmatprep.subr.bf16.mxu0 %v6861_v18  ;;  %v7172_v40 = vcombine.low %v7157_v31, %v386_v32 }
  0x3d   : > { %5876 = vmatprep.subr.bf16.mxu1 %v6861_v18  ;;  %v668_v46 = vor.u32 %v667_v39, %v664_v38  ;;  %v856_v38 = vrot.slane %v635_v53, 3  ;;  %v6667_v53 = vld [vmem:[%s8893_s1 + $0x108] sm:$0xff]  }
  0x3f   : > { %5833 = vmatpush3.bf16.msra.mxu0 %v6638_v47  ;;  %v671_v47 = vshrl.u32 %v7172_v40, 16  ;;  %v669_v52 = vsel %vm616_vm2, %v659_v26, %v668_v46 }
  0x40   : > { %5877 = vmatpush3.bf16.msra.mxu1 %v6639_v48  ;;  %5906 = vmatprep.subr.bf16.mxu0 %v6861_v18  ;;  %v674_v48 = vshll.u32 %v7172_v40, 16 }
  0x41   : > { %5950 = vmatprep.subr.bf16.mxu1 %v6861_v18 }
  0x42   : > { %5835 = vmatmul.mubr.bf16.vlgmr.msra.gmra.mrb[0].mxu0 %v459_v56  ;;  %v673_v56 = vrot.slane %v671_v47, 2 }
  0x43   : > { %5879 = vmatmul.mubr.bf16.vlgmr.msra.gmra.mrb[0].mxu1 %v633_v58  ;;  %5907 = vmatpush3.bf16.msra.mxu0 %v6643_v55  ;;  %v468_v55 = vrot.slane %v7172_v40, 3  ;;  %v676_v58 = vrot.slane %v674_v48, 3  ;;  %v6664_v40 = vld [vmem:[%s8893_s1 + $0x100] sm:$0xff]  }
  0x44   : > { %5838 = vmatprep.mubr.msk.bf16.mxu0 %vm6862_vm0, %v6861_v18  ;;  %5882 = vmatprep.mubr.msk.bf16.mxu1 %vm6862_vm0, %v6861_v18  ;;  %v6673_v48 = vld [vmem:[%s8893_s1 + $0x140] sm:$0xff]  }
  0x45   : > { %5908 = vmatprep.subr.bf16.mxu0 %v6861_v18  ;;  %5951 = vmatpush3.bf16.msra.mxu1 %v6650_v61  ;;  %v7209_v61 = vld [vmem:[%s7018_s15 + $0xc] sm:$0xf] }
  0x46   : > { %5952 = vmatprep.subr.bf16.mxu1 %v6861_v18 }
  0x47   : > { %5909 = vmatpush3.bf16.msra.mxu0 %v6645_v63  ;;  %v677_v63 = vor.u32 %v676_v58, %v673_v56  ;;  %v860_v56 = vrot.slane %v644_v0, 3  ;;  %v861_v58 = vrot.slane %v647_v1, 4  ;;  %v7294_v1 = vld [vmem:[%s7018_s15 + $0x2c] sm:$0xf] }
  0x48   : > { %5910 = vmatprep.subr.bf16.mxu0 %v6861_v18 }
  0x49   : > { %5953 = vmatpush3.bf16.msra.mxu1 %v6652_v3  ;;  %v469_v3 = vsel %vm456_vm1, %v466_v45, %v468_v55 }
  0x4a   : > { %5839 = vmatmul.mubr.bf16.gmra.mrb[4].mxu0 %v461_v4  ;;  %5954 = vmatprep.subr.bf16.mxu1 %v6861_v18  ;;  %v5067_v4 = vcombine.low %v7209_v61, %v7212_v62 }
  0x4b   : > { %5883 = vmatmul.mubr.bf16.gmra.mrb[4].mxu1 %v642_v9  ;;  %5842 = vmatprep.mubr.msk.bf16.mxu0 %vm6862_vm0, %v6861_v18  ;;  %v7224_v9 = vld [vmem:[%s7018_s15 + $0x14] sm:$0xf] }
  0x4c   : > { %5886 = vmatprep.mubr.msk.bf16.mxu1 %vm6862_vm0, %v6861_v18  ;;  %5911 = vmatpush3.bf16.msra.mxu0 %v6646_v5  ;;  %v678_v5 = vsel %vm616_vm2, %v668_v46, %v677_v63  ;;  %v1112_v13 = vshrl.u32 %v5067_v4, 16 }
  0x4d   : > { %5912 = vmatprep.subr.bf16.mxu0 %v6861_v18  ;;  %5955 = vmatpush3.bf16.msra.mxu1 %v6654_v10  ;;  %v1104_v10 = vshrl.u32 %v5066_v2, 16 }
  0x4e   : > { %5956 = vmatprep.subr.bf16.mxu1 %v6861_v18  ;;  %v1114_v25 = vrot.slane %v1112_v13, 3 }
  0x50   : > { %5913 = vmatpush3.bf16.msra.mxu0 %v6648_v12  ;;  %v7227_v12 = vld [vmem:[%s7018_s15 + $0x18] sm:$0xf] }
  0x51   : > { %5914 = vmatprep.subr.bf16.mxu0 %v6861_v18  ;;  %5957 = vmatpush3.bf16.msra.mxu1 %v6656_v16  ;;  %v1115_v16 = vshll.u32 %v5067_v4, 16  ;;  %v5068_v21 = vcombine.low %v7224_v9, %v7227_v12  ;;  %v7297_v4 = vld [vmem:[%s7018_s15 + $0x30] sm:$0xf] }
  0x52   : > { %5843 = vmatmul.mubr.bf16.gmra.mrb[8].mxu0 %v463_v17  ;;  %5958 = vmatprep.subr.bf16.mxu1 %v6861_v18  ;;  %v847_v17 = vrot.slane %v845_v6, 3  ;;  %v862_v6 = vor.u32 %v861_v58, %v860_v56  ;;  %v6687_v56 = vld [vmem:[%s8893_s1 + $0x178] sm:$0xff]  }
  0x53   : > { %5887 = vmatmul.mubr.bf16.gmra.mrb[8].mxu1 %v651_v19  ;;  %5846 = vmatprep.mubr.msk.bf16.mxu0 %vm6862_vm0, %v6861_v18  ;;  %v850_v19 = vrot.slane %v848_v7, 4  ;;  %v1117_v26 = vrot.slane %v1115_v16, 4  ;;  %v1121_v32 = vshrl.u32 %v5068_v21, 16  ;;  %v1124_v30 = vshll.u32 %v5068_v21, 16  ;;  %v6671_v7 = vld [vmem:[%s8893_s1 + $0x118] sm:$0xff]  }
  0x54   : > { %5890 = vmatprep.mubr.msk.bf16.mxu1 %vm6862_vm0, %v6861_v18  ;;  %5915 = vmatpush3.bf16.msra.mxu0 %v6651_v22  ;;  %v1106_v22 = vrot.slane %v1104_v10, 3  ;;  %v864_v10 = vrot.slane %v653_v14, 3  ;;  %v6679_v16 = vld [vmem:[%s8893_s1 + $0x158] sm:$0xff]  }
  0x55   : > { %5916 = vmatprep.subr.bf16.mxu0 %v6861_v18  ;;  %5959 = vmatpush3.bf16.msra.mxu1 %v6659_v24  ;;  %v1109_v24 = vrot.slane %v1107_v11, 4  ;;  %v851_v35 = vor.u32 %v850_v19, %v847_v17  ;;  %v1126_v45 = vrot.slane %v1124_v30, 4  ;;  %v822_v17 = vld [vmem:[%s7018_s15 + $0x34] sm:$0xf]  ;;  %v5071_v19 = vcombine.low %v7294_v1, %v7297_v4  ;;  %v7323_v14 = vld [vmem:[%s7018_s15 + $0x38] sm:$0xf] }
  0x56   : > { %5960 = vmatprep.subr.bf16.mxu1 %v6861_v18 }
  0x57   : > { %v1110_v36 = vor.u32 %v1109_v24, %v1106_v22  ;;  %v865_v22 = vrot.slane %v656_v15, 4  ;;  %v1151_v30 = vshll.u32 %v5071_v19, 16  ;;  %v868_v15 = vrot.slane %v662_v27, 3  ;;  %v6678_v27 = vld [vmem:[%s8893_s1 + $0x128] sm:$0xff]  }
  0x58   : > { %5917 = vmatpush3.bf16.msra.mxu0 %v6655_v29  ;;  %v854_v29 = vor.u32 %v853_v20, %v852_v41  ;;  %v7320_v20 = vld [vmem:[%s7018_s15 + $0x34] sm:$0xf] }
  0x59   : > { %5918 = vmatprep.subr.bf16.mxu0 %v6861_v18  ;;  %5961 = vmatpush3.bf16.msra.mxu1 %v6660_v33  ;;  %v1118_v33 = vor.u32 %v1117_v26, %v1114_v25  ;;  %v6674_v26 = vld [vmem:[%s8893_s1 + $0x120] sm:$0xff]  }
  0x5a   : > { %5847 = vmatmul.mubr.bf16.gmra.mrb[12].mxu0 %v465_v34  ;;  %5962 = vmatprep.subr.bf16.mxu1 %v6861_v18  ;;  %v7244_v34 = vld [vmem:[%s7018_s15 + $0x1c] sm:$0xf]  ;;  %v855_v39 = vsel %vm843_vm3, %v851_v35, %v854_v29  ;;  %v5041_v35 = vcombine.low %v7157_v31, %v822_v17  ;;  %v866_v31 = vor.u32 %v865_v22, %v864_v10 }
  0x5b   : > { %5891 = vmatmul.mubr.bf16.gmra.mrb[12].mxu1 %v660_v37  ;;  %5850 = vmatprep.mubr.msk.bf16.mxu0 %vm6862_vm0, %v6861_v18  ;;  %v7247_v37 = vld [vmem:[%s7018_s15 + $0x20] sm:$0xf]  ;;  %v1119_v46 = vsel %vm843_vm3, %v1110_v36, %v1118_v33  ;;  %v5072_v36 = vcombine.low %v7320_v20, %v7323_v14  ;;  %v6694_v17 = vld [vmem:[%s7018_s15 + $0x18] sm:$0xff]  }
  0x5c   : > { %5894 = vmatprep.mubr.msk.bf16.mxu1 %vm6862_vm0, %v6861_v18  ;;  %5919 = vmatpush3.bf16.msra.mxu0 %v6658_v43  ;;  %v857_v43 = vrot.slane %v638_v54, 4  ;;  %v5069_v47 = vcombine.low %v7244_v34, %v7247_v37  ;;  %v7270_v54 = vld [vmem:[%s7018_s15 + $0x28] sm:$0xf]  ;;  %v6689_v22 = vld [vmem:[%s8893_s1 + $0x180] sm:$0xff]  }
  0x5d   : > { %5920 = vmatprep.subr.bf16.mxu0 %v6861_v18  ;;  %5963 = vmatpush3.bf16.msra.mxu1 %v6662_v44  ;;  %v1123_v44 = vrot.slane %v1121_v32, 3  ;;  %v1148_v32 = vshrl.u32 %v5071_v19, 16  ;;  %v1584_v19 = vshll.u32 %v6694_v17, 16 }
  0x5e   : > { %5964 = vmatprep.subr.bf16.mxu1 %v6861_v18  ;;  %v858_v42 = vor.u32 %v857_v43, %v856_v38  ;;  %v869_v38 = vrot.slane %v665_v28, 4  ;;  %v1153_v43 = vrot.slane %v1151_v30, 4  ;;  %v867_v28 = vsel %vm843_vm3, %v862_v6, %v866_v31  ;;  %v6693_v30 = vld [vmem:[%s8893_s1 + $0x188] sm:$0xff]  }
  0x60   : > { %5921 = vmatpush3.bf16.msra.mxu0 %v6661_v49  ;;  %v7267_v49 = vld [vmem:[%s7018_s15 + $0x24] sm:$0xf]  ;;  %v859_v59 = vsel %vm843_vm3, %v854_v29, %v858_v42  ;;  %v863_v21 = vsel %vm843_vm3, %v858_v42, %v862_v6 }
  0x61   : > { %5965 = vmatpush3.bf16.msra.mxu1 %v6663_v50  ;;  %5994 = vmatprep.subr.bf16.mxu0 %v6861_v18  ;;  %v1127_v50 = vor.u32 %v1126_v45, %v1123_v44  ;;  %v5070_v2 = vcombine.low %v7267_v49, %v7270_v54  ;;  %v876_v44 = vshll.u32 %v5041_v35, 16  ;;  %v1157_v45 = vshrl.u32 %v5072_v36, 16 }
  0x62   : > { %5851 = vmatmul.mubr.bf16.gmra.mrb[16].mxu0 %v467_v51  ;;  %6038 = vmatprep.subr.bf16.mxu1 %v6861_v18  ;;  %v1130_v51 = vshrl.u32 %v5069_v47, 16 }
  0x63   : > { %5895 = vmatmul.mubr.bf16.gmra.mrb[16].mxu1 %v669_v52  ;;  %5854 = vmatprep.mubr.msk.bf16.mxu0 %vm6862_vm0, %v6861_v18  ;;  %v1133_v52 = vshll.u32 %v5069_v47, 16  ;;  %v1139_v11 = vshrl.u32 %v5070_v2, 16  ;;  %v1142_v13 = vshll.u32 %v5070_v2, 16  ;;  %v878_v42 = vrot.slane %v876_v44, 4  ;;  %v6690_v2 = vld [vmem:[%s7018_s15 + $0x8] sm:$0xff]  }
  0x64   : > { %5898 = vmatprep.mubr.msk.bf16.mxu1 %vm6862_vm0, %v6861_v18  ;;  %v1132_v0 = vrot.slane %v1130_v51, 3  ;;  %v1159_v51 = vrot.slane %v1157_v45, 3  ;;  %v1571_v6 = vshll.u32 %v6690_v2, 16 }
  0x65   : > { %v1135_v57 = vrot.slane %v1133_v52, 4  ;;  %v1141_v24 = vrot.slane %v1139_v11, 3  ;;  %v1144_v25 = vrot.slane %v1142_v13, 4  ;;  %v6685_v52 = vld [vmem:[%s8893_s1 + $0x138] sm:$0xff]  }
  0x67   : > { %v1136_v41 = vor.u32 %v1135_v57, %v1132_v0  ;;  %v6691_v0 = vld [vmem:[%s7018_s15 + $0x10] sm:$0xff]  }
  0x68   : > { %v1576_v10 = vshll.u32 %v6691_v0, 16 }
  0x69   : > { %v1137_v29 = vsel %vm843_vm3, %v1127_v50, %v1136_v41 }
  0x6a   : > { %5855 = vmatmul.mubr.bf16.gmra.mrb[20].mxu0 %v469_v3  ;;  %v1128_v3 = vsel %vm843_vm3, %v1118_v33, %v1127_v50  ;;  %v1145_v33 = vor.u32 %v1144_v25, %v1141_v24  ;;  %v6686_v50 = vld [vmem:[%s8893_s1 + $0x170] sm:$0xff]   ;;  %v5097_v24 = vcombine.low %v7203_v60, %v7209_v61  ;;  %v1580_v25 = vshrl.u32 %v6691_v0, 16  ;;  %v6703_v60 = vld [vmem:[%s8893_s1 + $0x1c8] sm:$0xff]  }
  0x6b   : > { %5899 = vmatmul.mubr.bf16.gmra.mrb[20].mxu1 %v678_v5  ;;  %5858 = vmatprep.mubr.msk.bf16.mxu0 %vm6862_vm0, %v6861_v18  ;;  %v6677_v5 = vld [vmem:[%s8893_s1 + $0x150] sm:$0xff]  }
  0x6c   : > { %5902 = vmatprep.mubr.msk.bf16.mxu1 %vm6862_vm0, %v6861_v18 }
  0x72   : > { %5859 = vmatmul.mubr.bf16.gmra.mrb[24].mxu0 %v468_v55  ;;  %v6675_v55 = vld [vmem:[%s8893_s1 + $0x148] sm:$0xff]  }
  0x73   : > { %5903 = vmatmul.mubr.bf16.gmra.mrb[24].mxu1 %v677_v63  ;;  %5922 = vmatprep.mubr.msk.bf16.mxu0 %vm6862_vm0, %v6861_v18  ;;  %v6669_v63 = vld [vmem:[%s8893_s1 + $0x110] sm:$0xff]  }
  0x74   : > { %5966 = vmatprep.mubr.msk.bf16.mxu1 %vm6862_vm0, %v6861_v18 }
  0x7a   : > { %5923 = vmatmul.mubr.bf16.vlgmr.msra.gmra.mrb[28].mxu0 %v855_v39  ;;  %v873_v39 = vshrl.u32 %v5041_v35, 16  ;;  %v6701_v35 = vld [vmem:[%s8893_s1 + $0x1c0] sm:$0xff]  }
  0x7b   : > { %5995 = vmatpush3.bf16.msra.mxu0 %v6664_v40  ;;  %5967 = vmatmul.mubr.bf16.vlgmr.msra.gmra.mrb[28].mxu1 %v1119_v46  ;;  %v1150_v40 = vrot.slane %v1148_v32, 3  ;;  %v6684_v46 = vld [vmem:[%s8893_s1 + $0x168] sm:$0xff]  }
  0x7c   : > { %5926 = vmatprep.mubr.msk.bf16.mxu0 %vm6862_vm0, %v6861_v18  ;;  %5996 = vmatprep.subr.bf16.mxu0 %v6861_v18  ;;  %v875_v47 = vrot.slane %v873_v39, 3  ;;  %v6697_v32 = vld [vmem:[%s7018_s15 + $0x20] sm:$0xff]   ;;  %v6698_v39 = vld [vmem:[%s8893_s1 + $0x198] sm:$0xff]  }
  0x7d   : > { %5970 = vmatprep.mubr.msk.bf16.mxu1 %vm6862_vm0, %v6861_v18  ;;  %6039 = vmatpush3.bf16.msra.mxu1 %v6673_v48  ;;  %v1146_v48 = vsel %vm843_vm3, %v1136_v41, %v1145_v33  ;;  %v1154_v58 = vor.u32 %v1153_v43, %v1150_v40  ;;  %v1578_v41 = vrot.slane %v1576_v10, 1  ;;  %v6700_v40 = vld [vmem:[%s7018_s15 + $0x28] sm:$0xff]   ;;  %v6708_v43 = vld [vmem:[%s8893_s1 + $0x1d8] sm:$0xff]   ;;  %v1596_v45 = vshrl.u32 %v6697_v32, 16 }
  0x7e   : > { %6040 = vmatprep.subr.bf16.mxu1 %v6861_v18  ;;  %v879_v57 = vor.u32 %v878_v42, %v875_v47  ;;  %v6705_v47 = vld [vmem:[%s7018_s15 + $0x30] sm:$0xff]   ;;  %v5100_v42 = vcombine.low %v7247_v37, %v7267_v49 }
  0x7f   : > { %5997 = vmatpush3.bf16.msra.mxu0 %v6667_v53  ;;  %v1160_v53 = vshll.u32 %v5072_v36, 16  ;;  %v1582_v61 = vor.u32 %v1580_v25, %v1578_v41  ;;  %v5098_v36 = vcombine.low %v7212_v62, %v7224_v9  ;;  %v1612_v0 = vshrl.u32 %v6705_v47, 16 }
  0x80   : > { %5998 = vmatprep.subr.bf16.mxu0 %v6861_v18 }
  0x81   : > { %6041 = vmatpush3.bf16.msra.mxu1 %v6675_v55  ;;  %v870_v55 = vor.u32 %v869_v38, %v868_v15  ;;  %v1588_v15 = vshrl.u32 %v6694_v17, 16 }
  0x82   : > { %5927 = vmatmul.mubr.bf16.gmra.mrb[32].mxu0 %v859_v59  ;;  %6042 = vmatprep.subr.bf16.mxu1 %v6861_v18 }
  0x83   : > { %5971 = vmatmul.mubr.bf16.gmra.mrb[32].mxu1 %v1128_v3  ;;  %5930 = vmatprep.mubr.msk.bf16.mxu0 %vm6862_vm0, %v6861_v18  ;;  %v871_v59 = vsel %vm843_vm3, %v866_v31, %v870_v55  ;;  %v1155_v3 = vsel %vm843_vm3, %v1145_v33, %v1154_v58  ;;  %v880_v11 = vsel %vm843_vm3, %v870_v55, %v879_v57  ;;  %v1592_v31 = vshll.u32 %v6697_v32, 16  ;;  %v6706_v33 = vld [vmem:[%s8893_s1 + $0x1d0] sm:$0xff]  }
  0x84   : > { %5999 = vmatpush3.bf16.msra.mxu0 %v6669_v63  ;;  %5974 = vmatprep.mubr.msk.bf16.mxu1 %vm6862_vm0, %v6861_v18  ;;  %v1162_v63 = vrot.slane %v1160_v53, 4  ;;  %v6707_v53 = vld [vmem:[%s8893_s1 + $0x1a8] sm:$0xff]   ;;  %v6711_v55 = vld [vmem:[%s8893_s1 + $0x1b0] sm:$0xff]  }
  0x85   : > { %6000 = vmatprep.subr.bf16.mxu0 %v6861_v18  ;;  %6043 = vmatpush3.bf16.msra.mxu1 %v6677_v5  ;;  %v1594_v9 = vrot.slane %v1592_v31, 1 }
  0x86   : > { %6044 = vmatprep.subr.bf16.mxu1 %v6861_v18  ;;  %v1163_v5 = vor.u32 %v1162_v63, %v1159_v51  ;;  %v1604_v51 = vshrl.u32 %v6700_v40, 16  ;;  %v6717_v63 = vld [vmem:[%s8893_s1 + $0x1f8] sm:$0xff]  }
  0x88   : > { %6001 = vmatpush3.bf16.msra.mxu0 %v6671_v7  ;;  %v1569_v7 = vshrl.u32 %v6690_v2, 16  ;;  %v1164_v13 = vsel %vm843_vm3, %v1154_v58, %v1163_v5  ;;  %v6710_v58 = vld [vmem:[%s7018_s15 + $0x38] sm:$0x1f]   ;;  %v5101_v2 = vcombine.low %v7270_v54, %v7294_v1 }
  0x89   : > { %6002 = vmatprep.subr.bf16.mxu0 %v6861_v18  ;;  %6045 = vmatpush3.bf16.msra.mxu1 %v6679_v16  ;;  %v1573_v16 = vrot.slane %v1571_v6, 1  ;;  %v1780_v6 = vld [vmem:[%s7018_s15 + $0x10] sm:$0xf] }
  0x8a   : > { %5931 = vmatmul.mubr.bf16.gmra.mrb[36].mxu0 %v863_v21  ;;  %6046 = vmatprep.subr.bf16.mxu1 %v6861_v18 }
  0x8b   : > { %5975 = vmatmul.mubr.bf16.gmra.mrb[36].mxu1 %v1137_v29  ;;  %5934 = vmatprep.mubr.msk.bf16.mxu0 %vm6862_vm0, %v6861_v18  ;;  %v1574_v21 = vor.u32 %v1573_v16, %v1569_v7  ;;  %v5102_v7 = vcombine.low %v7297_v4, %v7320_v20  ;;  %v7511_v16 = vld [vmem:[%s7018_s15 + $0x14] sm:$0xff]   ;;  %v5103_v4 = vcombine.low %v7323_v14, %v7323_v14  ;;  %v360_v14 = vld [vmem:[%s8897_s5 + $0x10] sm:$0xff] }
  0x8c   : > { %5978 = vmatprep.mubr.msk.bf16.mxu1 %vm6862_vm0, %v6861_v18  ;;  %6003 = vmatpush3.bf16.msra.mxu0 %v6674_v26  ;;  %v1586_v26 = vrot.slane %v1584_v19, 1 }
  0x8d   : > { %6004 = vmatprep.subr.bf16.mxu0 %v6861_v18  ;;  %6047 = vmatpush3.bf16.msra.mxu1 %v6683_v8  ;;  %v1579_v29 = vsel %vm1567_vm4, %v1574_v21, %v1578_v41  ;;  %v6695_v8 = vld [vmem:[%s8893_s1 + $0x190] sm:$0xff]  }
  0x8e   : > { %6048 = vmatprep.subr.bf16.mxu1 %v6861_v18  ;;  %v1587_v38 = vsel %vm1567_vm4, %v1582_v61, %v1586_v26  ;;  %v1590_v62 = vor.u32 %v1588_v15, %v1586_v26  ;;  %v2056_v41 = vld [vmem:[%s7018_s15 + $0xc] sm:$0xe] }
  0x90   : > { %6005 = vmatpush3.bf16.msra.mxu0 %v6678_v27  ;;  %v5099_v27 = vcombine.low %v7227_v12, %v7244_v34  ;;  %v1595_v44 = vsel %vm1567_vm4, %v1590_v62, %v1594_v9  ;;  %v1598_v12 = vor.u32 %v1596_v45, %v1594_v9  ;;  %v6723_v9 = vld [vmem:[%s8893_s1 + $0x208] sm:$0xff]  }
  0x91   : > { %6006 = vmatprep.subr.bf16.mxu0 %v6861_v18  ;;  %6049 = vmatpush3.bf16.msra.mxu1 %v6684_v46  ;;  %v1600_v46 = vshll.u32 %v6700_v40, 16 }
  0x92   : > { %5935 = vmatmul.mubr.bf16.gmra.mrb[40].mxu0 %v867_v28  ;;  %6050 = vmatprep.subr.bf16.mxu1 %v6861_v18  ;;  %v6712_v28 = vld [vmem:[%s8893_s1 + $0x1e0] sm:$0xff]  }
  0x93   : > { %5979 = vmatmul.mubr.bf16.gmra.mrb[40].mxu1 %v1146_v48  ;;  %5938 = vmatprep.mubr.msk.bf16.mxu0 %vm6862_vm0, %v6861_v18  ;;  %v1602_v34 = vrot.slane %v1600_v46, 1  ;;  %v6713_v48 = vld [vmem:[%s8893_s1 + $0x1e8] sm:$0xff]  }
  0x94   : > { %5982 = vmatprep.mubr.msk.bf16.mxu1 %vm6862_vm0, %v6861_v18  ;;  %6007 = vmatpush3.bf16.msra.mxu0 %v6682_v23  ;;  %v6702_v23 = vld [vmem:[%s8893_s1 + $0x1a0] sm:$0xff]  }
  0x95   : > { %6008 = vmatprep.subr.bf16.mxu0 %v6861_v18  ;;  %6051 = vmatpush3.bf16.msra.mxu1 %v6686_v50  ;;  %v1603_v50 = vsel %vm1567_vm4, %v1598_v12, %v1602_v34  ;;  %v1606_v37 = vor.u32 %v1604_v51, %v1602_v34  ;;  %v363_v12 = vld [vmem:[%s8897_s5 + $0x28] sm:$0xff]  ;;  %v365_v51 = vld [vmem:[%s8897_s5 + $0x38] sm:$0xff] }
  0x96   : > { %6052 = vmatprep.subr.bf16.mxu1 %v6861_v18 }
  0x98   : > { %6009 = vmatpush3.bf16.msra.mxu0 %v6685_v52  ;;  %v1608_v52 = vshll.u32 %v6705_v47, 16 }
  0x99   : > { %6053 = vmatpush3.bf16.msra.mxu1 %v6687_v56  ;;  %6082 = vmatprep.subr.bf16.mxu0 %v6861_v18  ;;  %v6716_v56 = vld [vmem:[%s8893_s1 + $0x1f0] sm:$0xff]  }
  0x9a   : > { %5939 = vmatmul.mubr.bf16.gmra.mrb[44].mxu0 %v871_v59  ;;  %6126 = vmatprep.subr.bf16.mxu1 %v6861_v18  ;;  %v1610_v49 = vrot.slane %v1608_v52, 1  ;;  %v6715_v59 = vld [vmem:[%s8893_s1 + $0x1b8] sm:$0xff]  }
  0x9b   : > { %5983 = vmatmul.mubr.bf16.gmra.mrb[44].mxu1 %v1155_v3  ;;  %5942 = vmatprep.mubr.msk.bf16.mxu0 %vm6862_vm0, %v6861_v18 }
  0x9c   : > { %5986 = vmatprep.mubr.msk.bf16.mxu1 %vm6862_vm0, %v6861_v18  ;;  %v1611_v3 = vsel %vm1567_vm4, %v1606_v37, %v1610_v49  ;;  %v1614_v54 = vor.u32 %v1612_v0, %v1610_v49  ;;  %v370_v37 = vld [vmem:[%s8897_s5 + $0x60] sm:$0xff]  ;;  %v372_v0 = vld [vmem:[%s8897_s5 + $0x70] sm:$0xff] }
  0xa2   : > { %5943 = vmatmul.mubr.bf16.gmra.mrb[48].mxu0 %v880_v11 }
  0xa3   : > { %5987 = vmatmul.mubr.bf16.gmra.mrb[48].mxu1 %v1164_v13  ;;  %5946 = vmatprep.mubr.msk.bf16.mxu0 %vm6862_vm0, %v6861_v18  ;;  %v1620_v13 = vshrl.u32 %v6710_v58, 16 }
  0xa4   : > { %5990 = vmatprep.mubr.msk.bf16.mxu1 %vm6862_vm0, %v6861_v18 }
  0xaa   : > { %5947 = vmatmul.mubr.bf16.gmra.mrb[52].mxu0 %v879_v57  ;;  %v1616_v57 = vshll.u32 %v6710_v58, 16  ;;  %v6728_v58 = vld [vmem:[%s8893_s1 + $0x220] sm:$0xff]  }
  0xab   : > { %5991 = vmatmul.mubr.bf16.gmra.mrb[52].mxu1 %v1163_v5  ;;  %6010 = vmatprep.mubr.msk.bf16.mxu0 %vm6862_vm0, %v6861_v18  ;;  %v1779_v5 = vld [vmem:[%s7018_s15 + $0xc] sm:$0xf] }
  0xac   : > { %6054 = vmatprep.mubr.msk.bf16.mxu1 %vm6862_vm0, %v6861_v18  ;;  %v1618_v1 = vrot.slane %v1616_v57, 1  ;;  %v5159_v10 = vcombine.low %v1779_v5, %v1780_v6 }
  0xae   : > { %v1619_v11 = vsel %vm1567_vm4, %v1614_v54, %v1618_v1  ;;  %v1848_v17 = vshll.u32 %v5159_v10, 16  ;;  %v1622_v20 = vor.u32 %v1620_v13, %v1618_v1  ;;  %v1846_v19 = vshrl.u32 %v5159_v10, 16  ;;  %v6730_v54 = vld [vmem:[%s8893_s1 + $0x228] sm:$0xff]   ;;  %v369_v1 = vld [vmem:[%s8897_s5 + $0x58] sm:$0xff] }
  0xaf   : > { %v1792_v13 = vld [vmem:[%s7018_s15 + $0x40] sm:$0x1] }
  0xb0   : > { %v1850_v21 = vrot.slane %v1848_v17, 1  ;;  %v6732_v17 = vld [vmem:[%s8893_s1 + $0x230] sm:$0xff]  }
  0xb2   : > { %6011 = vmatmul.mubr.bf16.vlgmr.msra.gmra.mrb[56].mxu0 %v5097_v24  ;;  %v7519_v24 = vcombine.low %v2056_v41, %v1780_v6  ;;  %v1851_v25 = vor.u32 %v1850_v21, %v1846_v19  ;;  %v371_v41 = vld [vmem:[%s8897_s5 + $0x68] sm:$0xff] }
  0xb3   : > { %6083 = vmatpush3.bf16.msra.mxu0 %v6689_v22  ;;  %6055 = vmatmul.mubr.bf16.vlgmr.msra.gmra.mrb[56].mxu1 %v1579_v29  ;;  %v1853_v22 = vshll.u32 %v7511_v16, 16  ;;  %v6863_v29 = vmov 0  }
  0xb4   : > { %6014 = vmatprep.mubr.msk.bf16.mxu0 %vm6862_vm0, %v6861_v18  ;;  %6084 = vmatprep.subr.bf16.mxu0 %v6861_v18  ;;  %2574 = vst.msk [vmem:[#allocation2] sm:$0xf] %vm2573_vm5, %v6863_v29  ;;  %2575 = vst.msk [vmem:[#allocation2 + $0x4] sm:$0xf] %vm2573_vm5, %v6863_v29  ;;  %v2078_v32 = vrot.slane %v7519_v24, 1 }
  0xb5   : > { %6058 = vmatprep.mubr.msk.bf16.mxu1 %vm6862_vm0, %v6861_v18  ;;  %6127 = vmatpush3.bf16.msra.mxu1 %v6701_v35  ;;  %v1855_v26 = vrot.slane %v1853_v22, 1  ;;  %v7535_v35 = vld [vmem:[%s7018_s15 + $0x1c] sm:$0xff]   ;;  %2642 = vst.msk [vmem:[#allocation2 + $0x3c] sm:$0xf] %vm2573_vm5, %v6863_v29  ;;  %2643 = vst.msk [vmem:[#allocation2 + $0x40] sm:$0xf] %vm2573_vm5, %v6863_v29 }
  0xb6   : > { %6128 = vmatprep.subr.bf16.mxu1 %v6861_v18  ;;  %6622 = vset.pattern.permute.xlu0 %v6863_v29  ;;  %v1861_v15 = vshll.u32 %v7535_v35, 16  ;;  %4828 = vst.msk [vmem:[%s7562_s24] sm:$0xf] %vm2573_vm5, %v6863_v29  ;;  %4829 = vst.msk [vmem:[%s7562_s24 + $0x4] sm:$0xf] %vm2573_vm5, %v6863_v29  ;;  %v2081_v40 = vrot.slane %v7535_v35, 1 }
  0xb7   : > { %6085 = vmatpush3.bf16.msra.mxu0 %v6693_v30  ;;  %v2079_v30 = vrot.slane %v7511_v16, 1  ;;  %2497 = vperm.xlu0 %6622, %v360_v14   ;;  %v1856_v61 = vsel %vm1567_vm4, %v1851_v25, %v1855_v26  ;;  %4896 = vst.msk [vmem:[%s7562_s24 + $0x3c] sm:$0xf] %vm2573_vm5, %v6863_v29  ;;  %4897 = vst.msk [vmem:[%s7562_s24 + $0x40] sm:$0xf] %vm2573_vm5, %v6863_v29  ;;  %v1865_v45 = vshrl.u32 %v7535_v35, 16 }
  0xb8   : > { %6086 = vmatprep.subr.bf16.mxu0 %v6861_v18  ;;  %6623 = vset.pattern.permute.xlu1 %v6863_v29  ;;  %v1863_v62 = vrot.slane %v1861_v15, 1  ;;  %v6733_v14 = vld [vmem:[%s8893_s1 + $0x238] sm:$0xff]  }
  0xb9   : > { %6129 = vmatpush3.bf16.msra.mxu1 %v6703_v60  ;;  %v361_v60 = vld [vmem:[%s8897_s5 + $0x18] sm:$0xff]  ;;  %v2080_v31 = vsel %vm2077_vm6, %v2078_v32, %v2079_v30 }
  0xba   : > { %6015 = vmatmul.mubr.bf16.gmra.mrb[60].mxu0 %v5098_v36  ;;  %6130 = vmatprep.subr.bf16.mxu1 %v6861_v18  ;;  %v6720_v36 = vld [vmem:[%s8893_s1 + $0x200] sm:$0xff]   ;;  %v1867_v34 = vor.u32 %v1865_v45, %v1863_v62 }
  0xbb   : > { %6059 = vmatmul.mubr.bf16.gmra.mrb[60].mxu1 %v1587_v38  ;;  %6018 = vmatprep.mubr.msk.bf16.mxu0 %vm6862_vm0, %v6861_v18 }
  0xbc   : > { %6087 = vmatpush3.bf16.msra.mxu0 %v6695_v8  ;;  %6062 = vmatprep.mubr.msk.bf16.mxu1 %vm6862_vm0, %v6861_v18  ;;  %v1857_v8 = vshrl.u32 %v7511_v16, 16 }
  0xbd   : > { %6088 = vmatprep.subr.bf16.mxu0 %v6861_v18  ;;  %6131 = vmatpush3.bf16.msra.mxu1 %v6706_v33  ;;  %v364_v33 = vld [vmem:[%s8897_s5 + $0x30] sm:$0xff] }
  0xbe   : > { %6132 = vmatprep.subr.bf16.mxu1 %v6861_v18  ;;  %2502 = vperm.xlu0 %6622, %v361_v60   ;;  %v1859_v38 = vor.u32 %v1857_v8, %v1855_v26 }
  0xc0   : > { %6089 = vmatpush3.bf16.msra.mxu0 %v6698_v39  ;;  %v7583_v39 = vld [vmem:[%s7018_s15 + $0x24] sm:$0xff]  }
  0xc1   : > { %6090 = vmatprep.subr.bf16.mxu0 %v6861_v18  ;;  %6133 = vmatpush3.bf16.msra.mxu1 %v6708_v43  ;;  %v362_v43 = vld [vmem:[%s8897_s5 + $0x20] sm:$0xff]  ;;  %v1869_v46 = vshll.u32 %v7583_v39, 16 }
  0xc2   : > { %6019 = vmatmul.mubr.bf16.gmra.mrb[64].mxu0 %v5099_v27  ;;  %6134 = vmatprep.subr.bf16.mxu1 %v6861_v18  ;;  %v366_v27 = vld [vmem:[%s8897_s5 + $0x40] sm:$0xff] }
  0xc3   : > { %6063 = vmatmul.mubr.bf16.gmra.mrb[64].mxu1 %v1595_v44  ;;  %6022 = vmatprep.mubr.msk.bf16.mxu0 %vm6862_vm0, %v6861_v18  ;;  %v1864_v44 = vsel %vm1567_vm4, %v1859_v38, %v1863_v62  ;;  %v1871_v47 = vrot.slane %v1869_v46, 1  ;;  %v2270_v38 = vshrl.u32 %v7519_v24, 16  ;;  %v2273_v62 = vshll.u32 %v7519_v24, 16 }
  0xc4   : > { %6066 = vmatprep.mubr.msk.bf16.mxu1 %vm6862_vm0, %v6861_v18  ;;  %6091 = vmatpush3.bf16.msra.mxu0 %v6702_v23  ;;  %v2082_v23 = vsel %vm2077_vm6, %v2079_v30, %v2081_v40 }
  0xc5   : > { %6092 = vmatprep.subr.bf16.mxu0 %v6861_v18  ;;  %6135 = vmatpush3.bf16.msra.mxu1 %v6712_v28  ;;  %v6724_v28 = vld [vmem:[%s8893_s1 + $0x210] sm:$0xff]   ;;  %v1872_v52 = vsel %vm1567_vm4, %v1867_v34, %v1871_v47  ;;  %v2272_v34 = vrot.slane %v2270_v38, 1 }
  0xc6   : > { %6136 = vmatprep.subr.bf16.mxu1 %v6861_v18  ;;  %2517 = vperm.xlu0 %6622, %v364_v33  }
  0xc7   : > { %2507 = vperm.xlu1 %6623, %v362_v43  }
  0xc8   : > { %6093 = vmatpush3.bf16.msra.mxu0 %v6707_v53  ;;  %v7615_v53 = vld [vmem:[%s7018_s15 + $0x2c] sm:$0xff]  }
  0xc9   : > { %6094 = vmatprep.subr.bf16.mxu0 %v6861_v18  ;;  %6137 = vmatpush3.bf16.msra.mxu1 %v6713_v48  ;;  %v368_v48 = vld [vmem:[%s8897_s5 + $0x50] sm:$0xff]  ;;  %v2085_v57 = vrot.slane %v7615_v53, 1  ;;  %v1881_v6 = vshrl.u32 %v7615_v53, 16 }
  0xca   : > { %6023 = vmatmul.mubr.bf16.gmra.mrb[68].mxu0 %v5100_v42  ;;  %6138 = vmatprep.subr.bf16.mxu1 %v6861_v18  ;;  %v2083_v42 = vrot.slane %v7583_v39, 1 }
  0xcb   : > { %6067 = vmatmul.mubr.bf16.gmra.mrb[68].mxu1 %v1603_v50  ;;  %6026 = vmatprep.mubr.msk.bf16.mxu0 %vm6862_vm0, %v6861_v18  ;;  %v6726_v50 = vld [vmem:[%s8893_s1 + $0x218] sm:$0xff]  }
  0xcc   : > { %6070 = vmatprep.mubr.msk.bf16.mxu1 %vm6862_vm0, %v6861_v18  ;;  %6095 = vmatpush3.bf16.msra.mxu0 %v6711_v55  ;;  %v1873_v55 = vshrl.u32 %v7583_v39, 16  ;;  %v2084_v49 = vsel %vm2077_vm6, %v2081_v40, %v2083_v42  ;;  %v2086_v10 = vsel %vm2077_vm6, %v2083_v42, %v2085_v57  ;;  %v2277_v40 = vrot.slane %v1857_v8, 1 }
  0xcd   : > { %6096 = vmatprep.subr.bf16.mxu0 %v6861_v18  ;;  %6139 = vmatpush3.bf16.msra.mxu1 %v6716_v56  ;;  %v1877_v56 = vshll.u32 %v7615_v53, 16 }
  0xce   : > { %6140 = vmatprep.subr.bf16.mxu1 %v6861_v18  ;;  %2527 = vperm.xlu0 %6622, %v366_v27  }
  0xcf   : > { %2512 = vperm.xlu1 %6623, %v363_v12   ;;  %v2290_v39 = vrot.slane %v1877_v56, 2 }
  0xd0   : > { %6097 = vmatpush3.bf16.msra.mxu0 %v6715_v59  ;;  %v367_v59 = vld [vmem:[%s8897_s5 + $0x48] sm:$0xff] }
  0xd1   : > { %6141 = vmatpush3.bf16.msra.mxu1 %v6717_v63  ;;  %6170 = vmatprep.subr.bf16.mxu0 %v6861_v18  ;;  %v1875_v63 = vor.u32 %v1873_v55, %v1871_v47  ;;  %v2275_v47 = vrot.slane %v2273_v62, 2 }
  0xd2   : > { %6027 = vmatmul.mubr.bf16.gmra.mrb[72].mxu0 %v5101_v2  ;;  %6214 = vmatprep.subr.bf16.mxu1 %v6861_v18  ;;  %v1879_v2 = vrot.slane %v1877_v56, 1 }
  0xd3   : > { %6071 = vmatmul.mubr.bf16.gmra.mrb[72].mxu1 %v1611_v3  ;;  %6030 = vmatprep.mubr.msk.bf16.mxu0 %vm6862_vm0, %v6861_v18  ;;  %v7651_v3 = vld [vmem:[%s7018_s15 + $0x34] sm:$0xff]   ;;  %v2276_v8 = vor.u32 %v2275_v47, %v2272_v34 }
  0xd4   : > { %6074 = vmatprep.mubr.msk.bf16.mxu1 %vm6862_vm0, %v6861_v18  ;;  %2537 = vperm.xlu0 %6622, %v368_v48   ;;  %v1880_v5 = vsel %vm1567_vm4, %v1875_v63, %v1879_v2  ;;  %v2087_v21 = vrot.slane %v7651_v3, 1  ;;  %v1889_v26 = vshrl.u32 %v7651_v3, 16  ;;  %v2278_v48 = vrot.slane %v1853_v22, 2 }
  0xd5   : > { %2522 = vperm.xlu1 %6623, %v365_v51  }
  0xd6   : > { %v2088_v32 = vsel %vm2077_vm6, %v2085_v57, %v2087_v21  ;;  %v2293_v47 = vrot.slane %v1889_v26, 1 }
  0xd8   : > { %2547 = vperm.xlu0 %6622, %v370_v37  }
  0xd9   : > { %2532 = vperm.xlu1 %6623, %v367_v59  }
  0xda   : > { %6031 = vmatmul.mubr.bf16.gmra.mrb[76].mxu0 %v5102_v7  ;;  %v1885_v7 = vshll.u32 %v7651_v3, 16 }
  0xdb   : > { %6075 = vmatmul.mubr.bf16.gmra.mrb[76].mxu1 %v1619_v11  ;;  %6034 = vmatprep.mubr.msk.bf16.mxu0 %vm6862_vm0, %v6861_v18  ;;  %v7671_v11 = vld [vmem:[%s7018_s15 + $0x3c] sm:$0xf] }
  0xdc   : > { %6078 = vmatprep.mubr.msk.bf16.mxu1 %vm6862_vm0, %v6861_v18  ;;  %2557 = vperm.xlu0 %6622, %v372_v0   ;;  %v5165_v19 = vcombine.low %v7671_v11, %v1792_v13  ;;  %v2282_v0 = vrot.slane %v1861_v15, 2  ;;  %v2285_v15 = vrot.slane %v1873_v55, 1  ;;  %v2289_v55 = vrot.slane %v1881_v6, 1 }
  0xdd   : > { %2542 = vperm.xlu1 %6623, %v369_v1  }
  0xde   : > { %v1893_v29 = vshll.u32 %v5165_v19, 16  ;;  %v1897_v33 = vshrl.u32 %v5165_v19, 16 }
  0xe0   : > { %v1895_v60 = vrot.slane %v1893_v29, 1 }
  0xe1   : > { %2552 = vperm.xlu1 %6623, %v371_v41  }
  0xe2   : > { %6035 = vmatmul.mubr.bf16.gmra.mrb[80].mxu0 %v5103_v4  ;;  %v1883_v4 = vor.u32 %v1881_v6, %v1879_v2  ;;  %v2281_v2 = vrot.slane %v1865_v45, 1  ;;  %v2247_v6 = vld [vmem:[%s7018_s15 + $0x40] sm:$0x3] }
  0xe3   : > { %6079 = vmatmul.mubr.bf16.gmra.mrb[80].mxu1 %v1622_v20  ;;  %6098 = vmatprep.mubr.msk.bf16.mxu0 %vm6862_vm0, %v6861_v18  ;;  %v1887_v20 = vrot.slane %v1885_v7, 1 }
  0xe4   : > { %6142 = vmatprep.mubr.msk.bf16.mxu1 %vm6862_vm0, %v6861_v18 }
  0xe5   : > { %v1888_v25 = vsel %vm1567_vm4, %v1883_v4, %v1887_v20  ;;  %v1891_v30 = vor.u32 %v1889_v26, %v1887_v20 }
  0xea   : > { %6099 = vmatmul.mubr.bf16.vlgmr.msra.gmra.mrb[84].mxu0 %v1856_v61  ;;  %v2089_v61 = vrot.slane %v5165_v19, 1  ;;  %v2286_v19 = vrot.slane %v1869_v46, 2 }
  0xeb   : > { %6171 = vmatpush3.bf16.msra.mxu0 %v6720_v36  ;;  %6143 = vmatmul.mubr.bf16.vlgmr.msra.gmra.mrb[84].mxu1 %v2080_v31  ;;  %v1896_v36 = vsel %vm1567_vm4, %v1891_v30, %v1895_v60 }
  0xec   : > { %6102 = vmatprep.mubr.msk.bf16.mxu0 %vm6862_vm0, %v6861_v18  ;;  %6172 = vmatprep.subr.bf16.mxu0 %v6861_v18  ;;  %v2090_v31 = vsel %vm2077_vm6, %v2087_v21, %v2089_v61 }
  0xed   : > { %6146 = vmatprep.mubr.msk.bf16.mxu1 %vm6862_vm0, %v6861_v18 }
  0xef   : > { %6173 = vmatpush3.bf16.msra.mxu0 %v6723_v9 }
  0xf0   : > { %6174 = vmatprep.subr.bf16.mxu0 %v6861_v18 }
  0xf2   : > { %6103 = vmatmul.mubr.bf16.gmra.mrb[88].mxu0 %v1864_v44  ;;  %v1899_v44 = vor.u32 %v1897_v33, %v1895_v60 }
  0xf3   : > { %6147 = vmatmul.mubr.bf16.gmra.mrb[88].mxu1 %v2082_v23  ;;  %6106 = vmatprep.mubr.msk.bf16.mxu0 %vm6862_vm0, %v6861_v18 }
  0xf4   : > { %6175 = vmatpush3.bf16.msra.mxu0 %v6724_v28  ;;  %6150 = vmatprep.mubr.msk.bf16.mxu1 %vm6862_vm0, %v6861_v18 }
  0xf5   : > { %6176 = vmatprep.subr.bf16.mxu0 %v6861_v18 }
  0xf8   : > { %6177 = vmatpush3.bf16.msra.mxu0 %v6726_v50 }
  0xf9   : > { %6178 = vmatprep.subr.bf16.mxu0 %v6861_v18 }
  0xfa   : > { %6107 = vmatmul.mubr.bf16.gmra.mrb[92].mxu0 %v1872_v52  ;;  %v2279_v52 = vor.u32 %v2278_v48, %v2277_v40  ;;  %v2294_v48 = vrot.slane %v1885_v7, 2 }
  0xfb   : > { %6151 = vmatmul.mubr.bf16.gmra.mrb[92].mxu1 %v2084_v49  ;;  %6110 = vmatprep.mubr.msk.bf16.mxu0 %vm6862_vm0, %v6861_v18 }
  0xfc   : > { %6154 = vmatprep.mubr.msk.bf16.mxu1 %vm6862_vm0, %v6861_v18  ;;  %6179 = vmatpush3.bf16.msra.mxu0 %v6728_v58  ;;  %v2280_v63 = vsel %vm2268_vm7, %v2276_v8, %v2279_v52 }
  0xfd   : > { %6180 = vmatprep.subr.bf16.mxu0 %v6861_v18 }
 0x100   : > { %6181 = vmatpush3.bf16.msra.mxu0 %v6730_v54 }
 0x101   : > { %6182 = vmatprep.subr.bf16.mxu0 %v6861_v18 }
 0x102   : > { %6111 = vmatmul.mubr.bf16.gmra.mrb[96].mxu0 %v1880_v5 }
 0x103   : > { %6155 = vmatmul.mubr.bf16.gmra.mrb[96].mxu1 %v2086_v10  ;;  %6114 = vmatprep.mubr.msk.bf16.mxu0 %vm6862_vm0, %v6861_v18  ;;  %v2283_v10 = vor.u32 %v2282_v0, %v2281_v2 }
 0x104   : > { %6158 = vmatprep.mubr.msk.bf16.mxu1 %vm6862_vm0, %v6861_v18  ;;  %6183 = vmatpush3.bf16.msra.mxu0 %v6732_v17 }
 0x105   : > { %6184 = vmatprep.subr.bf16.mxu0 %v6861_v18  ;;  %v2284_v35 = vsel %vm2268_vm7, %v2279_v52, %v2283_v10 }
 0x108   : > { %6185 = vmatpush3.bf16.msra.mxu0 %v6733_v14 }
 0x109   : > { %6256 = vmatprep.subr.bf16.mxu0 %v6861_v18 }
 0x10a   : > { %6115 = vmatmul.mubr.bf16.gmra.mrb[100].mxu0 %v1888_v25 }
 0x10b   : > { %6159 = vmatmul.mubr.bf16.gmra.mrb[100].mxu1 %v2088_v32  ;;  %6118 = vmatprep.mubr.msk.bf16.mxu0 %vm6862_vm0, %v6861_v18  ;;  %v2287_v32 = vor.u32 %v2286_v19, %v2285_v15 }
 0x10c   : > { %6162 = vmatprep.mubr.msk.bf16.mxu1 %vm6862_vm0, %v6861_v18 }
 0x10d   : > { %v2288_v33 = vsel %vm2268_vm7, %v2283_v10, %v2287_v32 }
 0x112   : > { %6119 = vmatmul.mubr.bf16.gmra.mrb[104].mxu0 %v1896_v36 }
 0x113   : > { %6163 = vmatmul.mubr.bf16.gmra.mrb[104].mxu1 %v2090_v31  ;;  %6122 = vmatprep.mubr.msk.bf16.mxu0 %vm6862_vm0, %v6861_v18 }
 0x114   : > { %6166 = vmatprep.mubr.msk.bf16.mxu1 %vm6862_vm0, %v6861_v18 }
 0x115   : > { %v559_v9 = vpop.f32.mrb[0].mxu0 }
 0x116   : > { %v768_v43 = vpop.f32.mrb[0].mxu1  ;;  %v5836_v27 = vpop.f32.mrb[1].mxu0 }
 0x117   : > { %v7715_v23 = vadd.f32 %v768_v43, %v559_v9  ;;  %v5880_v28 = vpop.f32.mrb[1].mxu1  ;;  %v562_v12 = vpop.f32.mrb[2].mxu0  ;;  %v2291_v43 = vor.u32 %v2290_v39, %v2289_v55 }
 0x118   : > { %v771_v24 = vpop.f32.mrb[2].mxu1  ;;  %v5837_v42 = vpop.f32.mrb[3].mxu0 }
 0x119   : > { %v7719_v50 = vadd.f32 %v771_v24, %v562_v12  ;;  %v5881_v51 = vpop.f32.mrb[3].mxu1  ;;  %v5215_v24 = vcombine.low %v7671_v11, %v2247_v6 }
 0x11a   : > { %6123 = vmatmul.mubr.bf16.gmra.mrb[108].mxu0 %v1899_v44  ;;  %v2292_v44 = vsel %vm2268_vm7, %v2287_v32, %v2291_v43 }
 0x11b   : > { %6167 = vmatmul.mubr.bf16.gmra.mrb[108].mxu1 %v2089_v61  ;;  %6186 = vmatprep.mubr.msk.bf16.mxu0 %vm6862_vm0, %v6861_v18 }
 0x11c   : > { %6228 = vmatprep.mubr.msk.bf16.mxu1 %vm6862_vm0, %v6861_v18 }
 0x11d   : > { %v567_v37 = vpop.f32.mrb[4].mxu0 }
 0x11e   : > { %v776_v49 = vpop.f32.mrb[4].mxu1  ;;  %v5840_v16 = vpop.f32.mrb[5].mxu0 }
 0x11f   : > { %v7725_v22 = vadd.f32 %v776_v49, %v567_v37  ;;  %v5884_v58 = vpop.f32.mrb[5].mxu1  ;;  %v570_v59 = vpop.f32.mrb[6].mxu0  ;;  %v2295_v37 = vor.u32 %v2294_v48, %v2293_v47  ;;  %v2298_v49 = vshrl.u32 %v5215_v24, 16  ;;  %v2301_v16 = vshll.u32 %v5215_v24, 16  ;;  %v6735_v47 = vld [vmem:[%s8895_s3 + $0x38] sm:$0xff]  }
 0x120   : > { %v779_v57 = vpop.f32.mrb[6].mxu1  ;;  %v5841_v54 = vpop.f32.mrb[7].mxu0  ;;  %6215 = vmatpush3.bf16.msra.mxu1 %v6735_v47 }
 0x121   : > { %v7732_v1 = vadd.f32 %v779_v57, %v570_v59  ;;  %v5885_v5 = vpop.f32.mrb[7].mxu1  ;;  %v2296_v11 = vsel %vm2268_vm7, %v2291_v43, %v2295_v37  ;;  %v2300_v2 = vrot.slane %v2298_v49, 1  ;;  %v2303_v0 = vrot.slane %v2301_v16, 2  ;;  %6216 = vmatprep.subr.bf16.mxu1 %v6861_v18 }
 0x122   : > { %6187 = vmatmul.mubr.bf16.vlgmr.msra.gmra.mrb[112].mxu0 %v2280_v63 }
 0x123   : > { %6190 = vmatprep.mubr.msk.bf16.mxu0 %vm6862_vm0, %v6861_v18 }
 0x125   : > { %v575_v13 = vpop.f32.mrb[8].mxu0 }
 0x126   : > { %v784_v17 = vpop.f32.mrb[8].mxu1  ;;  %v5844_v41 = vpop.f32.mrb[9].mxu0 }
 0x127   : > { %v7736_v4 = vadd.f32 %v784_v17, %v575_v13  ;;  %v5888_v20 = vpop.f32.mrb[9].mxu1  ;;  %v578_v45 = vpop.f32.mrb[10].mxu0  ;;  %v2304_v13 = vor.u32 %v2303_v0, %v2300_v2 }
 0x128   : > { %v787_v21 = vpop.f32.mrb[10].mxu1  ;;  %v5845_v14 = vpop.f32.mrb[11].mxu0 }
 0x129   : > { %v7743_v25 = vadd.f32 %v787_v21, %v578_v45  ;;  %v5889_v29 = vpop.f32.mrb[11].mxu1  ;;  %v2305_v15 = vsel %vm2268_vm7, %v2295_v37, %v2304_v13 }
 0x12a   : > { %6191 = vmatmul.mubr.bf16.gmra.mrb[116].mxu0 %v2284_v35 }
 0x12b   : > { %6194 = vmatprep.mubr.msk.bf16.mxu0 %vm6862_vm0, %v6861_v18 }
 0x12d   : > { %v583_v30 = vpop.f32.mrb[12].mxu0 }
 0x12e   : > { %v792_v60 = vpop.f32.mrb[12].mxu1  ;;  %v5848_v61 = vpop.f32.mrb[13].mxu0 }
 0x12f   : > { %v7751_v46 = vadd.f32 %v792_v60, %v583_v30  ;;  %v5892_v36 = vpop.f32.mrb[13].mxu1  ;;  %v586_v31 = vpop.f32.mrb[14].mxu0 }
 0x130   : > { %v795_v38 = vpop.f32.mrb[14].mxu1  ;;  %v5849_v62 = vpop.f32.mrb[15].mxu0 }
 0x131   : > { %v7754_v9 = vadd.f32 %v795_v38, %v586_v31  ;;  %v5893_v40 = vpop.f32.mrb[15].mxu1 }
 0x132   : > { %6195 = vmatmul.mubr.bf16.gmra.mrb[120].mxu0 %v2288_v33 }
 0x133   : > { %6198 = vmatprep.mubr.msk.bf16.mxu0 %vm6862_vm0, %v6861_v18 }
 0x135   : > { %v591_v27 = vpop.f32.mrb[16].mxu0 }
 0x136   : > { %v800_v53 = vpop.f32.mrb[16].mxu1  ;;  %v5852_v56 = vpop.f32.mrb[17].mxu0 }
 0x137   : > { %v7760_v28 = vadd.f32 %v800_v53, %v591_v27  ;;  %v5896_v12 = vpop.f32.mrb[17].mxu1  ;;  %v594_v34 = vpop.f32.mrb[18].mxu0 }
 0x138   : > { %v803_v42 = vpop.f32.mrb[18].mxu1  ;;  %v5853_v51 = vpop.f32.mrb[19].mxu0 }
 0x139   : > { %v7767_v8 = vadd.f32 %v803_v42, %v594_v34  ;;  %v5897_v52 = vpop.f32.mrb[19].mxu1 }
 0x13a   : > { %6199 = vmatmul.mubr.bf16.gmra.mrb[124].mxu0 %v2292_v44 }
 0x13b   : > { %6202 = vmatprep.mubr.msk.bf16.mxu0 %vm6862_vm0, %v6861_v18 }
 0x13d   : > { %v599_v58 = vpop.f32.mrb[20].mxu0 }
 0x13e   : > { %v808_v59 = vpop.f32.mrb[20].mxu1  ;;  %v5856_v26 = vpop.f32.mrb[21].mxu0 }
 0x13f   : > { %v7771_v63 = vadd.f32 %v808_v59, %v599_v58  ;;  %v5900_v3 = vpop.f32.mrb[21].mxu1  ;;  %v602_v7 = vpop.f32.mrb[22].mxu0  ;;  %v6736_v26 = vld [vmem:[%s8895_s3 + $0x40] sm:$0xff]  }
 0x140   : > { %v811_v57 = vpop.f32.mrb[22].mxu1  ;;  %v5857_v54 = vpop.f32.mrb[23].mxu0  ;;  %6217 = vmatpush3.bf16.msra.mxu1 %v6736_v26 }
 0x141   : > { %v7774_v5 = vadd.f32 %v811_v57, %v602_v7  ;;  %v5901_v10 = vpop.f32.mrb[23].mxu1  ;;  %6218 = vmatprep.subr.bf16.mxu1 %v6861_v18 }
 0x142   : > { %6203 = vmatmul.mubr.bf16.gmra.mrb[128].mxu0 %v2296_v11 }
 0x143   : > { %6206 = vmatprep.mubr.msk.bf16.mxu0 %vm6862_vm0, %v6861_v18 }
 0x145   : > { %v607_v17 = vpop.f32.mrb[24].mxu0 }
 0x146   : > { %v5860_v41 = vpop.f32.mrb[25].mxu0  ;;  %v816_v20 = vpop.f32.mrb[24].mxu1 }
 0x147   : > { %v7778_v45 = vadd.f32 %v816_v20, %v607_v17  ;;  %v610_v35 = vpop.f32.mrb[26].mxu0  ;;  %v5904_v19 = vpop.f32.mrb[25].mxu1  ;;  %v6737_v41 = vld [vmem:[%s8895_s3 + $0x48] sm:$0xff]  }
 0x148   : > { %v5861_v21 = vpop.f32.mrb[27].mxu0  ;;  %v819_v14 = vpop.f32.mrb[26].mxu1  ;;  %6219 = vmatpush3.bf16.msra.mxu1 %v6737_v41  ;;  %v6745_v41 = vld [vmem:[%s8895_s3 + $0x68] sm:$0xff]  }
 0x149   : > { %v5905_v29 = vpop.f32.mrb[27].mxu1  ;;  %6220 = vmatprep.subr.bf16.mxu1 %v6861_v18 }
 0x14a   : > { %6207 = vmatmul.mubr.bf16.gmra.mrb[132].mxu0 %v2305_v15 }
 0x14b   : > { %6210 = vmatprep.mubr.msk.bf16.mxu0 %vm6862_vm0, %v6861_v18 }
 0x14d   : > { %v970_v32 = vpop.f32.mrb[28].mxu0 }
 0x14e   : > { %v1024_v30 = vadd.f32 %v970_v32, %v7715_v23  ;;  %v5924_v60 = vpop.f32.mrb[29].mxu0  ;;  %v1254_v61 = vpop.f32.mrb[28].mxu1 }
 0x14f   : > { %v973_v55 = vpop.f32.mrb[30].mxu0  ;;  %v5968_v39 = vpop.f32.mrb[29].mxu1 }
 0x150   : > { %v1025_v36 = vadd.f32 %v973_v55, %v7719_v50  ;;  %v7785_v31 = vadd.f32 %v1254_v61, %v1024_v30  ;;  %v5925_v33 = vpop.f32.mrb[31].mxu0  ;;  %v1257_v38 = vpop.f32.mrb[30].mxu1  ;;  %v6738_v61 = vld [vmem:[%s8895_s3 + $0x50] sm:$0xff]  }
 0x151   : > { %v5969_v62 = vpop.f32.mrb[31].mxu1  ;;  %6221 = vmatpush3.bf16.msra.mxu1 %v6738_v61 }
 0x152   : > { %v7787_v40 = vadd.f32 %v1257_v38, %v1025_v36  ;;  %6211 = vmatmul.mubr.bf16.gmra.mrb[136].mxu0 %v2304_v13  ;;  %6222 = vmatprep.subr.bf16.mxu1 %v6861_v18 }
 0x153   : > { %6270 = vmatprep.mubr.msk.bf16.mxu0 %vm6862_vm0, %v6861_v18 }
 0x155   : > { %v978_v43 = vpop.f32.mrb[32].mxu0 }
 0x156   : > { %v1026_v23 = vadd.f32 %v978_v43, %v7725_v22  ;;  %v5928_v6 = vpop.f32.mrb[33].mxu0  ;;  %v1262_v27 = vpop.f32.mrb[32].mxu1 }
 0x157   : > { %v981_v53 = vpop.f32.mrb[34].mxu0  ;;  %v5972_v56 = vpop.f32.mrb[33].mxu1 }
 0x158   : > { %v1027_v50 = vadd.f32 %v981_v53, %v7732_v1  ;;  %v7793_v44 = vadd.f32 %v1262_v27, %v1026_v23  ;;  %v5929_v12 = vpop.f32.mrb[35].mxu0  ;;  %v1265_v34 = vpop.f32.mrb[34].mxu1 }
 0x159   : > { %v5973_v48 = vpop.f32.mrb[35].mxu1 }
 0x15a   : > { %v7798_v24 = vadd.f32 %v1265_v34, %v1027_v50  ;;  %v6743_v48 = vld [vmem:[%s8895_s3 + $0x10] sm:$0xff]  }
 0x15d   : > { %v986_v22 = vpop.f32.mrb[36].mxu0 }
 0x15e   : > { %v1028_v42 = vadd.f32 %v986_v22, %v7736_v4  ;;  %v5932_v51 = vpop.f32.mrb[37].mxu0  ;;  %v1270_v52 = vpop.f32.mrb[36].mxu1 }
 0x15f   : > { %v989_v1 = vpop.f32.mrb[38].mxu0  ;;  %v5976_v37 = vpop.f32.mrb[37].mxu1 }
 0x160   : > { %v1029_v49 = vadd.f32 %v989_v1, %v7743_v25  ;;  %v7803_v16 = vadd.f32 %v1270_v52, %v1028_v42  ;;  %v5933_v58 = vpop.f32.mrb[39].mxu0  ;;  %v1273_v59 = vpop.f32.mrb[38].mxu1 }
 0x161   : > { %v5977_v3 = vpop.f32.mrb[39].mxu1 }
 0x162   : > { %v7808_v7 = vadd.f32 %v1273_v59, %v1029_v49  ;;  %v6744_v49 = vld [vmem:[%s8895_s3 + $0x18] sm:$0xff]  }
 0x165   : > { %v994_v4 = vpop.f32.mrb[40].mxu0 }
 0x166   : > { %v1030_v11 = vadd.f32 %v994_v4, %v7751_v46  ;;  %v5936_v2 = vpop.f32.mrb[41].mxu0  ;;  %v1278_v0 = vpop.f32.mrb[40].mxu1  ;;  %v6742_v4 = vld [vmem:[%s8895_s3 + $0x60] sm:$0xff]  }
 0x167   : > { %v997_v25 = vpop.f32.mrb[42].mxu0  ;;  %v5980_v57 = vpop.f32.mrb[41].mxu1 }
 0x168   : > { %v1031_v54 = vadd.f32 %v997_v25, %v7754_v9  ;;  %v7813_v10 = vadd.f32 %v1278_v0, %v1030_v11  ;;  %v5937_v13 = vpop.f32.mrb[43].mxu0  ;;  %v1281_v17 = vpop.f32.mrb[42].mxu1  ;;  %v6746_v11 = vld [vmem:[%s8895_s3 + $0x20] sm:$0xff]  }
 0x169   : > { %v5981_v20 = vpop.f32.mrb[43].mxu1 }
 0x16a   : > { %v7818_v35 = vadd.f32 %v1281_v17, %v1031_v54 }
 0x16d   : > { %v1002_v46 = vpop.f32.mrb[44].mxu0 }
 0x16e   : > { %v1032_v15 = vadd.f32 %v1002_v46, %v7760_v28  ;;  %v5940_v19 = vpop.f32.mrb[45].mxu0  ;;  %v1286_v21 = vpop.f32.mrb[44].mxu1 }
 0x16f   : > { %v1005_v9 = vpop.f32.mrb[46].mxu0  ;;  %v5984_v14 = vpop.f32.mrb[45].mxu1 }
 0x170   : > { %v1033_v29 = vadd.f32 %v1005_v9, %v7767_v8  ;;  %v7823_v32 = vadd.f32 %v1286_v21, %v1032_v15  ;;  %v5941_v30 = vpop.f32.mrb[47].mxu0  ;;  %v1289_v60 = vpop.f32.mrb[46].mxu1  ;;  %v6740_v8 = vld [vmem:[%s8895_s3] sm:$0xff]   ;;  %v6750_v21 = vld [vmem:[%s8895_s3 + $0x30] sm:$0xff]  }
 0x171   : > { %v5985_v55 = vpop.f32.mrb[47].mxu1  ;;  %6257 = vmatpush3.bf16.msra.mxu0 %v6740_v8 }
 0x172   : > { %v7828_v39 = vadd.f32 %v1289_v60, %v1033_v29  ;;  %6258 = vmatprep.subr.bf16.mxu0 %v6861_v18 }
 0x175   : > { %v1010_v28 = vpop.f32.mrb[48].mxu0 }
 0x176   : > { %v1034_v36 = vadd.f32 %v1010_v28, %v7771_v63  ;;  %v5944_v33 = vpop.f32.mrb[49].mxu0  ;;  %v1294_v38 = vpop.f32.mrb[48].mxu1  ;;  %v6741_v63 = vld [vmem:[%s8895_s3 + $0x8] sm:$0xff]  }
 0x177   : > { %v1013_v62 = vpop.f32.mrb[50].mxu0  ;;  %v5988_v43 = vpop.f32.mrb[49].mxu1  ;;  %6259 = vmatpush3.bf16.msra.mxu0 %v6741_v63 }
 0x178   : > { %v1035_v23 = vadd.f32 %v1013_v62, %v7774_v5  ;;  %v7836_v6 = vadd.f32 %v1294_v38, %v1034_v36  ;;  %v5945_v27 = vpop.f32.mrb[51].mxu0  ;;  %v1297_v53 = vpop.f32.mrb[50].mxu1  ;;  %6260 = vmatprep.subr.bf16.mxu0 %v6861_v18 }
 0x179   : > { %v5989_v56 = vpop.f32.mrb[51].mxu1 }
 0x17a   : > { %v7839_v50 = vadd.f32 %v1297_v53, %v1035_v23 }
 0x17b   : > { %6261 = vmatpush3.bf16.msra.mxu0 %v6743_v48 }
 0x17c   : > { %6262 = vmatprep.subr.bf16.mxu0 %v6861_v18 }
 0x17d   : > { %v1018_v12 = vpop.f32.mrb[52].mxu0 }
 0x17e   : > { %v1036_v5 = vadd.f32 %v1018_v12, %v7778_v45  ;;  %v5948_v34 = vpop.f32.mrb[53].mxu0  ;;  %v1302_v47 = vpop.f32.mrb[52].mxu1  ;;  %v6739_v45 = vld [vmem:[%s8895_s3 + $0x58] sm:$0xff]  }
 0x17f   : > { %v1021_v22 = vpop.f32.mrb[54].mxu0  ;;  %v5992_v42 = vpop.f32.mrb[53].mxu1  ;;  %6223 = vmatpush3.bf16.msra.mxu1 %v6739_v45  ;;  %6263 = vmatpush3.bf16.msra.mxu0 %v6744_v49 }
 0x180   : > { %v7849_v51 = vadd.f32 %v1302_v47, %v1036_v5  ;;  %v5949_v52 = vpop.f32.mrb[55].mxu0  ;;  %v1305_v1 = vpop.f32.mrb[54].mxu1  ;;  %6224 = vmatprep.subr.bf16.mxu1 %v6861_v18  ;;  %6264 = vmatprep.subr.bf16.mxu0 %v6861_v18 }
 0x181   : > { %v5993_v37 = vpop.f32.mrb[55].mxu1 }
 0x183   : > { %6225 = vmatpush3.bf16.msra.mxu1 %v6742_v4  ;;  %6265 = vmatpush3.bf16.msra.mxu0 %v6746_v11 }
 0x184   : > { %6226 = vmatprep.subr.bf16.mxu1 %v6861_v18  ;;  %6266 = vmatprep.subr.bf16.mxu0 %v6861_v18 }
 0x185   : > { %v1434_v58 = vpop.f32.mrb[56].mxu0 }
 0x186   : > { %v1488_v59 = vadd.f32 %v1434_v58, %v7785_v31  ;;  %v6012_v26 = vpop.f32.mrb[57].mxu0  ;;  %v1712_v3 = vpop.f32.mrb[56].mxu1 }
 0x187   : > { %v1437_v2 = vpop.f32.mrb[58].mxu0  ;;  %v6056_v0 = vpop.f32.mrb[57].mxu1  ;;  %6227 = vmatpush3.bf16.msra.mxu1 %v6745_v41 }
 0x188   : > { %v1489_v25 = vadd.f32 %v1437_v2, %v7787_v40  ;;  %v7868_v57 = vadd.f32 %v1712_v3, %v1488_v59  ;;  %v6013_v54 = vpop.f32.mrb[59].mxu0  ;;  %v1715_v13 = vpop.f32.mrb[58].mxu1  ;;  %v6747_v40 = vld [vmem:[%s8895_s3 + $0x28] sm:$0xff]   ;;  %6298 = vmatprep.subr.bf16.mxu1 %v6861_v18 }
 0x189   : > { %v6057_v31 = vpop.f32.mrb[59].mxu1  ;;  %6267 = vmatpush3.bf16.msra.mxu0 %v6747_v40 }
 0x18a   : > { %v7872_v17 = vadd.f32 %v1715_v13, %v1489_v25  ;;  %6268 = vmatprep.subr.bf16.mxu0 %v6861_v18 }
 0x18d   : > { %v1442_v20 = vpop.f32.mrb[60].mxu0  ;;  %6269 = vmatpush3.bf16.msra.mxu0 %v6750_v21 }
 0x18e   : > { %v1490_v46 = vadd.f32 %v1442_v20, %v7793_v44  ;;  %v6016_v15 = vpop.f32.mrb[61].mxu0  ;;  %v1720_v19 = vpop.f32.mrb[60].mxu1  ;;  %6340 = vmatprep.subr.bf16.mxu0 %v6861_v18 }
 0x18f   : > { %v1445_v9 = vpop.f32.mrb[62].mxu0  ;;  %v6060_v14 = vpop.f32.mrb[61].mxu1 }
 0x190   : > { %v1491_v29 = vadd.f32 %v1445_v9, %v7798_v24  ;;  %v7887_v30 = vadd.f32 %v1720_v19, %v1490_v46  ;;  %v6017_v60 = vpop.f32.mrb[63].mxu0  ;;  %v1723_v61 = vpop.f32.mrb[62].mxu1 }
 0x191   : > { %v6061_v55 = vpop.f32.mrb[63].mxu1 }
 0x192   : > { %v7890_v28 = vadd.f32 %v1723_v61, %v1491_v29 }
 0x195   : > { %v1450_v44 = vpop.f32.mrb[64].mxu0 }
 0x196   : > { %v1492_v36 = vadd.f32 %v1450_v44, %v7803_v16  ;;  %v6020_v33 = vpop.f32.mrb[65].mxu0  ;;  %v1728_v38 = vpop.f32.mrb[64].mxu1 }
 0x197   : > { %v1453_v8 = vpop.f32.mrb[66].mxu0  ;;  %v6064_v62 = vpop.f32.mrb[65].mxu1 }
 0x198   : > { %v1493_v43 = vadd.f32 %v1453_v8, %v7808_v7  ;;  %v7894_v24 = vadd.f32 %v1728_v38, %v1492_v36  ;;  %v6021_v23 = vpop.f32.mrb[67].mxu0  ;;  %v1731_v27 = vpop.f32.mrb[66].mxu1 }
 0x199   : > { %v6065_v53 = vpop.f32.mrb[67].mxu1 }
 0x19a   : > { %v7896_v56 = vadd.f32 %v1731_v27, %v1493_v43 }
 0x19d   : > { %v1458_v63 = vpop.f32.mrb[68].mxu0 }
 0x19e   : > { %v1494_v12 = vadd.f32 %v1458_v63, %v7813_v10  ;;  %v6024_v5 = vpop.f32.mrb[69].mxu0  ;;  %v1736_v34 = vpop.f32.mrb[68].mxu1 }
 0x19f   : > { %v1461_v47 = vpop.f32.mrb[70].mxu0  ;;  %v6068_v16 = vpop.f32.mrb[69].mxu1 }
 0x1a0   : > { %v1495_v48 = vadd.f32 %v1461_v47, %v7818_v35  ;;  %v7900_v22 = vadd.f32 %v1736_v34, %v1494_v12  ;;  %v6025_v42 = vpop.f32.mrb[71].mxu0  ;;  %v1739_v7 = vpop.f32.mrb[70].mxu1 }
 0x1a1   : > { %v6069_v52 = vpop.f32.mrb[71].mxu1 }
 0x1a2   : > { %v7902_v1 = vadd.f32 %v1739_v7, %v1495_v48 }
 0x1a5   : > { %v1466_v37 = vpop.f32.mrb[72].mxu0 }
 0x1a6   : > { %v1496_v45 = vadd.f32 %v1466_v37, %v7823_v32  ;;  %v6028_v49 = vpop.f32.mrb[73].mxu0  ;;  %v1744_v58 = vpop.f32.mrb[72].mxu1 }
 0x1a7   : > { %v1469_v59 = vpop.f32.mrb[74].mxu0  ;;  %v6072_v10 = vpop.f32.mrb[73].mxu1 }
 0x1a8   : > { %v1497_v26 = vadd.f32 %v1469_v59, %v7828_v39  ;;  %v7906_v3 = vadd.f32 %v1744_v58, %v1496_v45  ;;  %v6029_v4 = vpop.f32.mrb[75].mxu0  ;;  %v1747_v35 = vpop.f32.mrb[74].mxu1 }
 0x1a9   : > { %v6073_v11 = vpop.f32.mrb[75].mxu1 }
 0x1aa   : > { %v7908_v2 = vadd.f32 %v1747_v35, %v1497_v26 }
 0x1ad   : > { %v1474_v0 = vpop.f32.mrb[76].mxu0 }
 0x1ae   : > { %v1498_v25 = vadd.f32 %v1474_v0, %v7836_v6  ;;  %v6032_v54 = vpop.f32.mrb[77].mxu0  ;;  %v1752_v13 = vpop.f32.mrb[76].mxu1 }
 0x1af   : > { %v1477_v31 = vpop.f32.mrb[78].mxu0  ;;  %v6076_v32 = vpop.f32.mrb[77].mxu1 }
 0x1b0   : > { %v1499_v41 = vadd.f32 %v1477_v31, %v7839_v50  ;;  %v7912_v40 = vadd.f32 %v1752_v13, %v1498_v25  ;;  %v6033_v20 = vpop.f32.mrb[79].mxu0  ;;  %v1755_v39 = vpop.f32.mrb[78].mxu1 }
 0x1b1   : > { %v6077_v46 = vpop.f32.mrb[79].mxu1 }
 0x1b2   : > { %v7914_v15 = vadd.f32 %v1755_v39, %v1499_v41 }
 0x1b5   : > { %v1482_v19 = vpop.f32.mrb[80].mxu0 }
 0x1b6   : > { %v1500_v21 = vadd.f32 %v1482_v19, %v7849_v51  ;;  %v6036_v9 = vpop.f32.mrb[81].mxu0  ;;  %v1760_v14 = vpop.f32.mrb[80].mxu1 }
 0x1b7   : > { %v1485_v29 = vpop.f32.mrb[82].mxu0  ;;  %v6080_v6 = vpop.f32.mrb[81].mxu1 }
 0x1b8   : > { %v7917_v60 = vadd.f32 %v1760_v14, %v1500_v21  ;;  %v6037_v61 = vpop.f32.mrb[83].mxu0  ;;  %v1763_v55 = vpop.f32.mrb[82].mxu1 }
 0x1b9   : > { %v6081_v44 = vpop.f32.mrb[83].mxu1 }
 0x1bd   : > { %v1989_v50 = vpop.f32.mrb[84].mxu0 }
 0x1be   : > { %v2043_v36 = vadd.f32 %v1989_v50, %v7868_v57  ;;  %v6100_v33 = vpop.f32.mrb[85].mxu0  ;;  %v2180_v38 = vpop.f32.mrb[84].mxu1 }
 0x1bf   : > { %v1992_v8 = vpop.f32.mrb[86].mxu0  ;;  %v6144_v62 = vpop.f32.mrb[85].mxu1 }
 0x1c0   : > { %v2044_v43 = vadd.f32 %v1992_v8, %v7872_v17  ;;  %v7921_v23 = vadd.f32 %v2180_v38, %v2043_v36  ;;  %v6101_v51 = vpop.f32.mrb[87].mxu0  ;;  %v2183_v27 = vpop.f32.mrb[86].mxu1 }
 0x1c1   : > { %v6145_v53 = vpop.f32.mrb[87].mxu1 }
 0x1c2   : > { %v7923_v63 = vadd.f32 %v2183_v27, %v2044_v43 }
 0x1c5   : > { %v1997_v12 = vpop.f32.mrb[88].mxu0 }
 0x1c6   : > { %v2045_v5 = vadd.f32 %v1997_v12, %v7887_v30  ;;  %v6104_v34 = vpop.f32.mrb[89].mxu0  ;;  %v2188_v47 = vpop.f32.mrb[88].mxu1 }
 0x1c7   : > { %v2000_v16 = vpop.f32.mrb[90].mxu0  ;;  %v6148_v57 = vpop.f32.mrb[89].mxu1 }
 0x1c8   : > { %v2046_v48 = vadd.f32 %v2000_v16, %v7890_v28  ;;  %v7927_v42 = vadd.f32 %v2188_v47, %v2045_v5  ;;  %v6105_v7 = vpop.f32.mrb[91].mxu0  ;;  %v2191_v17 = vpop.f32.mrb[90].mxu1 }
 0x1c9   : > { %v6149_v52 = vpop.f32.mrb[91].mxu1 }
 0x1ca   : > { %v7929_v37 = vadd.f32 %v2191_v17, %v2046_v48 }
 0x1cd   : > { %v2005_v45 = vpop.f32.mrb[92].mxu0 }
 0x1ce   : > { %v2047_v49 = vadd.f32 %v2005_v45, %v7894_v24  ;;  %v6108_v58 = vpop.f32.mrb[93].mxu0  ;;  %v2196_v59 = vpop.f32.mrb[92].mxu1 }
 0x1cf   : > { %v2008_v10 = vpop.f32.mrb[94].mxu0  ;;  %v6152_v30 = vpop.f32.mrb[93].mxu1 }
 0x1d0   : > { %v2048_v26 = vadd.f32 %v2008_v10, %v7896_v56  ;;  %v7933_v4 = vadd.f32 %v2196_v59, %v2047_v49  ;;  %v6109_v35 = vpop.f32.mrb[95].mxu0  ;;  %v2199_v28 = vpop.f32.mrb[94].mxu1  ;;  %v7961_v49 = vld [vmem:[%s8894_s2] ss:$0 sm:$0xff] }
 0x1d1   : > { %v6153_v11 = vpop.f32.mrb[95].mxu1  ;;  %v7964_v10 = vpop.permute.xlu0 %2497 }
 0x1d2   : > { %v7935_v0 = vadd.f32 %v2199_v28, %v2048_v26 }
 0x1d5   : > { %v2013_v25 = vpop.f32.mrb[96].mxu0 }
 0x1d6   : > { %v2049_v54 = vadd.f32 %v2013_v25, %v7900_v22  ;;  %v6112_v13 = vpop.f32.mrb[97].mxu0  ;;  %v2204_v31 = vpop.f32.mrb[96].mxu1 }
 0x1d7   : > { %v2016_v32 = vpop.f32.mrb[98].mxu0  ;;  %v6156_v24 = vpop.f32.mrb[97].mxu1 }
 0x1d8   : > { %v2050_v41 = vadd.f32 %v2016_v32, %v7902_v1  ;;  %v7939_v20 = vadd.f32 %v2204_v31, %v2049_v54  ;;  %v6113_v39 = vpop.f32.mrb[99].mxu0  ;;  %v2207_v56 = vpop.f32.mrb[98].mxu1 }
 0x1d9   : > { %v6157_v46 = vpop.f32.mrb[99].mxu1  ;;  %v7970_v13 = vpop.permute.xlu0 %2502  ;;  %v2645_v39 = vld [vmem:[#allocation2 + $0x4] sm:$0xf] }
 0x1da   : > { %v7941_v19 = vadd.f32 %v2207_v56, %v2050_v41  ;;  %v2644_v56 = vld [vmem:[#allocation2] sm:$0xc]  ;;  %v7974_v46 = vpop.permute.xlu1 %2507 }
 0x1dd   : > { %v2021_v21 = vpop.f32.mrb[100].mxu0 }
 0x1de   : > { %v2051_v9 = vadd.f32 %v2021_v21, %v7906_v3  ;;  %v6116_v14 = vpop.f32.mrb[101].mxu0  ;;  %v2212_v29 = vpop.f32.mrb[100].mxu1 }
 0x1df   : > { %v2024_v6 = vpop.f32.mrb[102].mxu0  ;;  %v6160_v22 = vpop.f32.mrb[101].mxu1 }
 0x1e0   : > { %v2052_v61 = vadd.f32 %v2024_v6, %v7908_v2  ;;  %v7945_v55 = vadd.f32 %v2212_v29, %v2051_v9  ;;  %v6117_v44 = vpop.f32.mrb[103].mxu0  ;;  %v2215_v1 = vpop.f32.mrb[102].mxu1  ;;  %v5273_v6 = vcombine.low %v2644_v56, %v2645_v39 }
 0x1e1   : > { %v6161_v50 = vpop.f32.mrb[103].mxu1 }
 0x1e2   : > { %v7947_v36 = vadd.f32 %v2215_v1, %v2052_v61  ;;  %v2672_v61 = vld [vmem:[#allocation2] sm:$0x8]  ;;  %v7982_v50 = vpop.permute.xlu1 %2512 }
 0x1e5   : > { %v2029_v33 = vpop.f32.mrb[104].mxu0 }
 0x1e6   : > { %v2053_v38 = vadd.f32 %v2029_v33, %v7912_v40  ;;  %v6120_v8 = vpop.f32.mrb[105].mxu0  ;;  %v2220_v62 = vpop.f32.mrb[104].mxu1 }
 0x1e7   : > { %v2032_v43 = vpop.f32.mrb[106].mxu0  ;;  %v6164_v3 = vpop.f32.mrb[105].mxu1  ;;  %v2892_v8 = vshrl.u32 %v5273_v6, 16 }
 0x1e8   : > { %v2054_v51 = vadd.f32 %v2032_v43, %v7914_v15  ;;  %v7951_v27 = vadd.f32 %v2220_v62, %v2053_v38  ;;  %v6121_v53 = vpop.f32.mrb[107].mxu0  ;;  %v2223_v2 = vpop.f32.mrb[106].mxu1  ;;  %v7984_v38 = vcombine.low %v2672_v61, %v2645_v39  ;;  %v2895_v62 = vshll.u32 %v5273_v6, 16  ;;  %v6754_v39 = vld [vmem:[%s8895_s3 + $0x78] sm:$0xff]  }
 0x1e9   : > { %v6165_v12 = vpop.f32.mrb[107].mxu1 }
 0x1ea   : > { %v7953_v5 = vadd.f32 %v2223_v2, %v2054_v51 }
 0x1ed   : > { %v2037_v34 = vpop.f32.mrb[108].mxu0 }
 0x1ee   : > { %v2055_v47 = vadd.f32 %v2037_v34, %v7917_v60  ;;  %v6124_v16 = vpop.f32.mrb[109].mxu0  ;;  %v2228_v57 = vpop.f32.mrb[108].mxu1 }
 0x1ef   : > { %v2040_v48 = vpop.f32.mrb[110].mxu0  ;;  %v6168_v40 = vpop.f32.mrb[109].mxu1 }
 0x1f0   : > { %v7956_v7 = vadd.f32 %v2228_v57, %v2055_v47  ;;  %v6125_v17 = vpop.f32.mrb[111].mxu0  ;;  %v2231_v52 = vpop.f32.mrb[110].mxu1  ;;  %v2723_v57 = vrot.slane %v7984_v38, 3  ;;  %v2894_v48 = vrot.slane %v2892_v8, 2  ;;  %v2897_v40 = vrot.slane %v2895_v62, 3  ;;  %v6762_v62 = vld [vmem:[%s8895_s3 + $0xb0] sm:$0xff]  }
 0x1f1   : > { %v6169_v45 = vpop.f32.mrb[111].mxu1  ;;  %v7996_v52 = vpop.permute.xlu0 %2517 }
 0x1f5   : > { %v2395_v15 = vpop.f32.mrb[112].mxu0 }
 0x1f6   : > { %v2449_v58 = vadd.f32 %v2395_v15, %v7921_v23  ;;  %v6188_v59 = vpop.f32.mrb[113].mxu0 }
 0x1f7   : > { %v2398_v60 = vpop.f32.mrb[114].mxu0 }
 0x1f8   : > { %v2469_v30 = vadd.f32 %v7961_v49, %v2449_v58  ;;  %v2450_v26 = vadd.f32 %v2398_v60, %v7923_v63  ;;  %v6189_v35 = vpop.f32.mrb[115].mxu0 }
 0x1fa   : > { %v2482_v28 = vmax.f32 %v2469_v30, 0.0  ;;  %v2470_v11 = vadd.f32 %v7961_v49, %v2450_v26  ;;  %v8005_v30 = vpop.permute.xlu1 %2522 }
 0x1fc   : > { %v2560_v25 = vmul.f32 %v7964_v10, %v2482_v28  ;;  %v2483_v54 = vmax.f32 %v2470_v11, 0.0  ;;  %v2898_v28 = vor.u32 %v2897_v40, %v2894_v48  ;;  %v6758_v40 = vld [vmem:[%s8895_s3 + $0x88] sm:$0xff]  }
 0x1fd   : > { %v2403_v31 = vpop.f32.mrb[116].mxu0 }
 0x1fe   : > { %v5531_v32 = vpack.c.bf16 %v2560_v25, %v2560_v25  ;;  %v2561_v23 = vmul.f32 %v7970_v13, %v2483_v54  ;;  %v2451_v24 = vadd.f32 %v2403_v31, %v7927_v42  ;;  %v6192_v41 = vpop.f32.mrb[117].mxu0 }
 0x1ff   : > { %v2406_v63 = vpop.f32.mrb[118].mxu0 }
 0x200   : > { %2629 = vst.msk [vmem:[#allocation2 + $0x8] sm:$0xf] %vm2573_vm5, %v5531_v32  ;;  %v5532_v21 = vpack.c.bf16 %v2561_v23, %v2561_v23  ;;  %v2471_v9 = vadd.f32 %v7961_v49, %v2451_v24  ;;  %v2452_v14 = vadd.f32 %v2406_v63, %v7929_v37  ;;  %v6193_v29 = vpop.f32.mrb[119].mxu0 }
 0x202   : > { %2630 = vst.msk [vmem:[#allocation2 + $0xc] sm:$0xf] %vm2573_vm5, %v5532_v21  ;;  %v2484_v22 = vmax.f32 %v2471_v9, 0.0  ;;  %v2472_v42 = vadd.f32 %v7961_v49, %v2452_v14  ;;  %v6761_v9 = vld [vmem:[%s8895_s3 + $0xa8] sm:$0xff]  }
 0x204   : > { %v2562_v44 = vmul.f32 %v7974_v46, %v2484_v22  ;;  %v2485_v1 = vmax.f32 %v2472_v42, 0.0  ;;  %v8033_v42 = vpop.permute.xlu0 %2527 }
 0x205   : > { %v2411_v33 = vpop.f32.mrb[120].mxu0 }
 0x206   : > { %v5533_v43 = vpack.c.bf16 %v2562_v44, %v2562_v44  ;;  %v2563_v37 = vmul.f32 %v7982_v50, %v2485_v1  ;;  %v2453_v3 = vadd.f32 %v2411_v33, %v7933_v4  ;;  %v6196_v51 = vpop.f32.mrb[121].mxu0  ;;  %v6756_v1 = vld [vmem:[%s8895_s3 + $0x80] sm:$0xff]  }
 0x207   : > { %v2414_v53 = vpop.f32.mrb[122].mxu0 }
 0x208   : > { %2631 = vst.msk [vmem:[#allocation2 + $0x10] sm:$0xf] %vm2573_vm5, %v5533_v43  ;;  %v5534_v2 = vpack.c.bf16 %v2563_v37, %v2563_v37  ;;  %v2473_v12 = vadd.f32 %v7961_v49, %v2453_v3  ;;  %v2454_v34 = vadd.f32 %v2414_v53, %v7935_v0  ;;  %v6197_v47 = vpop.f32.mrb[123].mxu0  ;;  %v6751_v0 = vld [vmem:[%s8895_s3 + $0x70] sm:$0xff]   ;;  %v8048_v43 = vpop.permute.xlu1 %2532 }
 0x209   : > { %v7991_v16 = vld [vmem:[#allocation2 + $0x8] sm:$0xff]  }
 0x20a   : > { %2632 = vst.msk [vmem:[#allocation2 + $0x14] sm:$0xf] %vm2573_vm5, %v5534_v2  ;;  %v2486_v17 = vmax.f32 %v2473_v12, 0.0  ;;  %v2474_v4 = vadd.f32 %v7961_v49, %v2454_v34  ;;  %v2724_v45 = vrot.slane %v7991_v16, 3  ;;  %v2900_v15 = vshrl.u32 %v7991_v16, 16 }
 0x20b   : > { %v2903_v58 = vshll.u32 %v7991_v16, 16 }
 0x20c   : > { %v2564_v59 = vmul.f32 %v7996_v52, %v2486_v17  ;;  %v2487_v60 = vmax.f32 %v2474_v4, 0.0  ;;  %v2725_v35 = vsel %vm456_vm1, %v2723_v57, %v2724_v45  ;;  %v2902_v11 = vrot.slane %v2900_v15, 2 }
 0x20d   : > { %v2419_v26 = vpop.f32.mrb[124].mxu0  ;;  %v2905_v25 = vrot.slane %v2903_v58, 3  ;;  %6229 = vmatmul.mubr.msk.bf16.vlgmr.msra.gmra.mrb[112].mxu1 %vm2778_vm8, %v2725_v35 }
 0x20e   : > { %v5535_v54 = vpack.c.bf16 %v2564_v59, %v2564_v59  ;;  %v2565_v31 = vmul.f32 %v8005_v30, %v2487_v60  ;;  %v2455_v32 = vadd.f32 %v2419_v26, %v7939_v20  ;;  %v6200_v23 = vpop.f32.mrb[125].mxu0  ;;  %6299 = vmatpush3.bf16.msra.mxu1 %v6751_v0  ;;  %6232 = vmatprep.mubr.msk.bf16.mxu1 %vm6862_vm0, %v6861_v18  ;;  %v6765_v0 = vld [vmem:[%s8895_s3 + $0xb8] sm:$0xff]  }
 0x20f   : > { %v2422_v24 = vpop.f32.mrb[126].mxu0  ;;  %v2906_v41 = vor.u32 %v2905_v25, %v2902_v11  ;;  %6300 = vmatprep.subr.bf16.mxu1 %v6861_v18  ;;  %v6766_v23 = vld [vmem:[%s8895_s3 + $0xc0] sm:$0xff]  }
 0x210   : > { %2633 = vst.msk [vmem:[#allocation2 + $0x18] sm:$0xf] %vm2573_vm5, %v5535_v54  ;;  %v5536_v56 = vpack.c.bf16 %v2565_v31, %v2565_v31  ;;  %v2475_v63 = vadd.f32 %v7961_v49, %v2455_v32  ;;  %v2456_v20 = vadd.f32 %v2422_v24, %v7941_v19  ;;  %v6201_v21 = vpop.f32.mrb[127].mxu0  ;;  %v6760_v54 = vld [vmem:[%s8895_s3 + $0x90] sm:$0xff]   ;;  %v8093_v24 = vpop.permute.xlu1 %2542 }
 0x211   : > { %v2907_v14 = vsel %vm616_vm2, %v2898_v28, %v2906_v41  ;;  %v8028_v29 = vld [vmem:[#allocation2 + $0x10] sm:$0xff]  }
 0x212   : > { %2634 = vst.msk [vmem:[#allocation2 + $0x1c] sm:$0xf] %vm2573_vm5, %v5536_v56  ;;  %v2488_v6 = vmax.f32 %v2475_v63, 0.0  ;;  %v2476_v22 = vadd.f32 %v7961_v49, %v2456_v20  ;;  %6271 = vmatmul.mubr.msk.bf16.vlgmr.msra.gmra.mrb[140].mxu0 %vm2778_vm8, %v2907_v14  ;;  %v2726_v19 = vrot.slane %v8028_v29, 3  ;;  %6301 = vmatpush3.bf16.msra.mxu1 %v6754_v39  ;;  %v2909_v61 = vshrl.u32 %v8028_v29, 16 }
 0x213   : > { %6274 = vmatprep.mubr.msk.bf16.mxu0 %vm6862_vm0, %v6861_v18  ;;  %v2912_v44 = vshll.u32 %v8028_v29, 16  ;;  %6302 = vmatprep.subr.bf16.mxu1 %v6861_v18 }
 0x214   : > { %v2566_v33 = vmul.f32 %v8033_v42, %v2488_v6  ;;  %v2489_v8 = vmax.f32 %v2476_v22, 0.0  ;;  %6341 = vmatpush3.bf16.msra.mxu0 %v6761_v9  ;;  %v2727_v3 = vsel %vm456_vm1, %v2724_v45, %v2726_v19  ;;  %v2911_v51 = vrot.slane %v2909_v61, 2 }
 0x215   : > { %v2427_v37 = vpop.f32.mrb[128].mxu0  ;;  %v2914_v53 = vrot.slane %v2912_v44, 3  ;;  %6342 = vmatprep.subr.bf16.mxu0 %v6861_v18  ;;  %6233 = vmatmul.mubr.msk.bf16.gmra.mrb[116].mxu1 %vm2778_vm8, %v2727_v3 }
 0x216   : > { %v5537_v2 = vpack.c.bf16 %v2566_v33, %v2566_v33  ;;  %v2567_v12 = vmul.f32 %v8048_v43, %v2489_v8  ;;  %v2457_v34 = vadd.f32 %v2427_v37, %v7945_v55  ;;  %v6204_v47 = vpop.f32.mrb[129].mxu0  ;;  %6236 = vmatprep.mubr.msk.bf16.mxu1 %vm6862_vm0, %v6861_v18  ;;  %6303 = vmatpush3.bf16.msra.mxu1 %v6756_v1 }
 0x217   : > { %v2430_v57 = vpop.f32.mrb[130].mxu0  ;;  %v2915_v48 = vor.u32 %v2914_v53, %v2911_v51  ;;  %6304 = vmatprep.subr.bf16.mxu1 %v6861_v18  ;;  %v6767_v47 = vld [vmem:[%s8895_s3 + $0xa0] sm:$0xff]  }
 0x218   : > { %2635 = vst.msk [vmem:[#allocation2 + $0x20] sm:$0xf] %vm2573_vm5, %v5537_v2  ;;  %v5538_v17 = vpack.c.bf16 %v2567_v12, %v2567_v12  ;;  %v2477_v4 = vadd.f32 %v7961_v49, %v2457_v34  ;;  %v2458_v55 = vadd.f32 %v2430_v57, %v7947_v36  ;;  %v6205_v45 = vpop.f32.mrb[131].mxu0  ;;  %6343 = vmatpush3.bf16.msra.mxu0 %v6762_v62  ;;  %v8078_v36 = vpop.permute.xlu0 %2537  ;;  %v6768_v62 = vld [vmem:[%s8895_s3 + $0xc8] sm:$0xff]  }
 0x219   : > { %v2916_v59 = vsel %vm616_vm2, %v2906_v41, %v2915_v48  ;;  %v8072_v60 = vld [vmem:[#allocation2 + $0x18] sm:$0xff]   ;;  %6344 = vmatprep.subr.bf16.mxu0 %v6861_v18 }
 0x21a   : > { %2636 = vst.msk [vmem:[#allocation2 + $0x24] sm:$0xf] %vm2573_vm5, %v5538_v17  ;;  %v2490_v26 = vmax.f32 %v2477_v4, 0.0  ;;  %v2478_v35 = vadd.f32 %v7961_v49, %v2458_v55  ;;  %6275 = vmatmul.mubr.msk.bf16.gmra.mrb[144].mxu0 %vm2778_vm8, %v2916_v59  ;;  %v2728_v28 = vrot.slane %v8072_v60, 3  ;;  %v2918_v11 = vshrl.u32 %v8072_v60, 16  ;;  %6305 = vmatpush3.bf16.msra.mxu1 %v6758_v40  ;;  %v6769_v40 = vld [vmem:[%s8895_s3 + $0xd0] sm:$0xff]   ;;  %v8138_v17 = vpop.permute.xlu1 %2552 }
 0x21b   : > { %6278 = vmatprep.mubr.msk.bf16.mxu0 %vm6862_vm0, %v6861_v18  ;;  %v2921_v25 = vshll.u32 %v8072_v60, 16  ;;  %6306 = vmatprep.subr.bf16.mxu1 %v6861_v18  ;;  %v6778_v60 = vld [vmem:[%s8895_s3 + $0xf8] sm:$0xff]  }
 0x21c   : > { %v2568_v31 = vmul.f32 %v8078_v36, %v2490_v26  ;;  %v2491_v32 = vmax.f32 %v2478_v35, 0.0  ;;  %6345 = vmatpush3.bf16.msra.mxu0 %v6765_v0  ;;  %v2729_v39 = vsel %vm456_vm1, %v2726_v19, %v2728_v28  ;;  %v2920_v56 = vrot.slane %v2918_v11, 2  ;;  %v6764_v19 = vld [vmem:[%s8895_s3 + $0x98] sm:$0xff]  }
 0x21d   : > { %v2435_v41 = vpop.f32.mrb[132].mxu0  ;;  %v2923_v63 = vrot.slane %v2921_v25, 3  ;;  %6346 = vmatprep.subr.bf16.mxu0 %v6861_v18  ;;  %6237 = vmatmul.mubr.msk.bf16.gmra.mrb[120].mxu1 %vm2778_vm8, %v2729_v39 }
 0x21e   : > { %v5539_v20 = vpack.c.bf16 %v2568_v31, %v2568_v31  ;;  %v2569_v21 = vmul.f32 %v8093_v24, %v2491_v32  ;;  %v2459_v9 = vadd.f32 %v2435_v41, %v7951_v27  ;;  %v6208_v14 = vpop.f32.mrb[133].mxu0  ;;  %6240 = vmatprep.mubr.msk.bf16.mxu1 %vm6862_vm0, %v6861_v18  ;;  %6307 = vmatpush3.bf16.msra.mxu1 %v6760_v54 }
 0x21f   : > { %v2438_v6 = vpop.f32.mrb[134].mxu0  ;;  %v2924_v22 = vor.u32 %v2923_v63, %v2920_v56  ;;  %6308 = vmatprep.subr.bf16.mxu1 %v6861_v18 }
 0x220   : > { %2637 = vst.msk [vmem:[#allocation2 + $0x28] sm:$0xf] %vm2573_vm5, %v5539_v20  ;;  %v5540_v1 = vpack.c.bf16 %v2569_v21, %v2569_v21  ;;  %v2479_v33 = vadd.f32 %v7961_v49, %v2459_v9  ;;  %v2460_v27 = vadd.f32 %v2438_v6, %v7953_v5  ;;  %v6209_v8 = vpop.f32.mrb[135].mxu0  ;;  %6347 = vmatpush3.bf16.msra.mxu0 %v6766_v23  ;;  %v8123_v5 = vpop.permute.xlu0 %2547 }
 0x221   : > { %v2925_v37 = vsel %vm616_vm2, %v2915_v48, %v2924_v22  ;;  %v8117_v3 = vld [vmem:[#allocation2 + $0x20] sm:$0xff]   ;;  %6348 = vmatprep.subr.bf16.mxu0 %v6861_v18 }
 0x222   : > { %2638 = vst.msk [vmem:[#allocation2 + $0x2c] sm:$0xf] %vm2573_vm5, %v5540_v1  ;;  %v2492_v51 = vmax.f32 %v2479_v33, 0.0  ;;  %v2480_v53 = vadd.f32 %v7961_v49, %v2460_v27  ;;  %6279 = vmatmul.mubr.msk.bf16.gmra.mrb[148].mxu0 %vm2778_vm8, %v2925_v37  ;;  %v2730_v2 = vrot.slane %v8117_v3, 3  ;;  %v2927_v12 = vshrl.u32 %v8117_v3, 16  ;;  %6309 = vmatpush3.bf16.msra.mxu1 %v6764_v19 }
 0x223   : > { %6282 = vmatprep.mubr.msk.bf16.mxu0 %vm6862_vm0, %v6861_v18  ;;  %v2930_v34 = vshll.u32 %v8117_v3, 16  ;;  %6310 = vmatprep.subr.bf16.mxu1 %v6861_v18 }
 0x224   : > { %v2570_v57 = vmul.f32 %v8123_v5, %v2492_v51  ;;  %v2493_v48 = vmax.f32 %v2480_v53, 0.0  ;;  %6349 = vmatpush3.bf16.msra.mxu0 %v6768_v62  ;;  %v2731_v55 = vsel %vm456_vm1, %v2728_v28, %v2730_v2  ;;  %v2929_v45 = vrot.slane %v2927_v12, 2 }
 0x225   : > { %v2443_v4 = vpop.f32.mrb[136].mxu0  ;;  %v2932_v0 = vrot.slane %v2930_v34, 3  ;;  %6350 = vmatprep.subr.bf16.mxu0 %v6861_v18  ;;  %6241 = vmatmul.mubr.msk.bf16.gmra.mrb[124].mxu1 %vm2778_vm8, %v2731_v55  ;;  %v3124_v55 = vshrl.u32 %v7984_v38, 16 }
 0x226   : > { %v5541_v59 = vpack.c.bf16 %v2570_v57, %v2570_v57  ;;  %v2571_v26 = vmul.f32 %v8138_v17, %v2493_v48  ;;  %v2461_v35 = vadd.f32 %v2443_v4, %v7956_v7  ;;  %v6212_v54 = vpop.f32.mrb[137].mxu0  ;;  %6244 = vmatprep.mubr.msk.bf16.mxu1 %vm6862_vm0, %v6861_v18  ;;  %6311 = vmatpush3.bf16.msra.mxu1 %v6767_v47  ;;  %v6770_v7 = vld [vmem:[%s8895_s3 + $0xd8] sm:$0xff]  }
 0x227   : > { %v2933_v31 = vor.u32 %v2932_v0, %v2929_v45  ;;  %v2446_v28 = vpop.f32.mrb[138].mxu0  ;;  %6382 = vmatprep.subr.bf16.mxu1 %v6861_v18  ;;  %v3127_v45 = vshll.u32 %v7984_v38, 16  ;;  %v3324_v0 = vld [vmem:[#allocation2 + $0x4] sm:$0x8]  ;;  %v3131_v38 = vrot.slane %v2900_v15, 3 }
 0x228   : > { %2639 = vst.msk [vmem:[#allocation2 + $0x30] sm:$0xf] %vm2573_vm5, %v5541_v59  ;;  %v5542_v32 = vpack.c.bf16 %v2571_v26, %v2571_v26  ;;  %v2481_v23 = vadd.f32 %v7961_v49, %v2461_v35  ;;  %6351 = vmatpush3.bf16.msra.mxu0 %v6769_v40  ;;  %v6213_v41 = vpop.f32.mrb[139].mxu0  ;;  %v8163_v49 = vpop.permute.xlu0 %2557  ;;  %v8190_v40 = vld [vmem:[#allocation2 + $0x10] sm:$0xf]  ;;  %v3126_v28 = vrot.slane %v3124_v55, 3 }
 0x229   : > { %v2934_v39 = vsel %vm616_vm2, %v2924_v22, %v2933_v31  ;;  %v8158_v56 = vld [vmem:[#allocation2 + $0x28] sm:$0xff]   ;;  %6352 = vmatprep.subr.bf16.mxu0 %v6861_v18 }
 0x22a   : > { %2640 = vst.msk [vmem:[#allocation2 + $0x34] sm:$0xf] %vm2573_vm5, %v5542_v32  ;;  %v2494_v63 = vmax.f32 %v2481_v23, 0.0  ;;  %6283 = vmatmul.mubr.msk.bf16.gmra.mrb[152].mxu0 %vm2778_vm8, %v2934_v39  ;;  %v2732_v20 = vrot.slane %v8158_v56, 3  ;;  %v2936_v21 = vshrl.u32 %v8158_v56, 16  ;;  %v2939_v9 = vshll.u32 %v8158_v56, 16 }
 0x22b   : > { %6286 = vmatprep.mubr.msk.bf16.mxu0 %vm6862_vm0, %v6861_v18  ;;  %v8196_v59 = vld [vmem:[#allocation2 + $0x8] sm:$0xf]  ;;  %v8198_v26 = vld [vmem:[#allocation2 + $0xc] sm:$0xf]  ;;  %v3129_v32 = vrot.slane %v3127_v45, 4  ;;  %v3132_v23 = vrot.slane %v2903_v58, 4 }
 0x22c   : > { %v2572_v14 = vmul.f32 %v8163_v49, %v2494_v63  ;;  %6353 = vmatpush3.bf16.msra.mxu0 %v6770_v7  ;;  %v2733_v6 = vsel %vm456_vm1, %v2730_v2, %v2732_v20  ;;  %v2938_v22 = vrot.slane %v2936_v21, 2  ;;  %v2941_v19 = vrot.slane %v2939_v9, 3  ;;  %v8212_v39 = vld [vmem:[#allocation2 + $0x18] sm:$0xf]  ;;  %v6771_v58 = vld [vmem:[%s8895_s3 + $0xe0] sm:$0xff]  }
 0x22d   : > { %6424 = vmatprep.subr.bf16.mxu0 %v6861_v18  ;;  %6245 = vmatmul.mubr.msk.bf16.gmra.mrb[128].mxu1 %vm2778_vm8, %v2733_v6  ;;  %v5332_v54 = vcombine.low %v8198_v26, %v8190_v40  ;;  %v8216_v6 = vld [vmem:[#allocation2 + $0x14] sm:$0xf] }
 0x22e   : > { %v5543_v1 = vpack.c.bf16 %v2572_v14, %v2572_v14  ;;  %v2942_v33 = vor.u32 %v2941_v19, %v2938_v22  ;;  %6248 = vmatprep.mubr.msk.bf16.mxu1 %vm6862_vm0, %v6861_v18  ;;  %v3130_v14 = vor.u32 %v3129_v32, %v3126_v28  ;;  %v3133_v22 = vor.u32 %v3132_v23, %v3131_v38  ;;  %v6783_v28 = vld [vmem:[%s8895_s3 + $0x120] sm:$0xff]  }
 0x22f   : > { %v8182_v8 = vld [vmem:[#allocation2 + $0x30] sm:$0xf]  ;;  %v3397_v7 = vshrl.u32 %v5332_v54, 16  ;;  %v3400_v41 = vshll.u32 %v5332_v54, 16  ;;  %v5333_v16 = vcombine.low %v8216_v6, %v8212_v39  ;;  %v3139_v54 = vrot.slane %v2918_v11, 3 }
 0x230   : > { %2641 = vst.msk [vmem:[#allocation2 + $0x38] sm:$0xf] %vm2573_vm5, %v5543_v1  ;;  %v2943_v27 = vsel %vm616_vm2, %v2933_v31, %v2942_v33  ;;  %v5331_v31 = vcombine.low %v3324_v0, %v8196_v59  ;;  %v8265_v11 = vld [vmem:[#allocation2 + $0x28] sm:$0xf] }
 0x231   : > { %v2657_v62 = vld [vmem:[#allocation2 + $0x34] sm:$0x7]  ;;  %v3399_v19 = vrot.slane %v3397_v7, 3  ;;  %v3402_v15 = vrot.slane %v3400_v41, 4  ;;  %v8273_v41 = vld [vmem:[#allocation2 + $0x24] sm:$0xf] }
 0x232   : > { %6287 = vmatmul.mubr.msk.bf16.gmra.mrb[156].mxu0 %vm2778_vm8, %v2943_v27  ;;  %v5258_v37 = vcombine.low %v8182_v8, %v2657_v62  ;;  %v3389_v63 = vshrl.u32 %v5331_v31, 16  ;;  %v3135_v27 = vrot.slane %v2909_v61, 3  ;;  %v3136_v62 = vrot.slane %v2912_v44, 4  ;;  %v6774_v61 = vld [vmem:[%s8895_s3 + $0xe8] sm:$0xff]   ;;  %v8240_v44 = vld [vmem:[#allocation2 + $0x1c] sm:$0xf] }
 0x233   : > { %6290 = vmatprep.mubr.msk.bf16.mxu0 %vm6862_vm0, %v6861_v18 }
 0x234   : > { %v2734_v51 = vrot.slane %v5258_v37, 3  ;;  %v2945_v53 = vshrl.u32 %v5258_v37, 16  ;;  %v2948_v2 = vshll.u32 %v5258_v37, 16  ;;  %v3391_v1 = vrot.slane %v3389_v63, 3  ;;  %v6786_v63 = vld [vmem:[%s8895_s3 + $0x128] sm:$0xff]  }
 0x235   : > { %v3134_v37 = vsel %vm843_vm3, %v3130_v14, %v3133_v22  ;;  %v3137_v29 = vor.u32 %v3136_v62, %v3135_v27  ;;  %v3144_v27 = vrot.slane %v2930_v34, 4  ;;  %v6790_v34 = vld [vmem:[%s8895_s3 + $0x138] sm:$0xff]  }
 0x236   : > { %v2735_v47 = vsel %vm456_vm1, %v2732_v20, %v2734_v51  ;;  %v2947_v57 = vrot.slane %v2945_v53, 2  ;;  %v2950_v48 = vrot.slane %v2948_v2, 3  ;;  %v3392_v20 = vshll.u32 %v5331_v31, 16 }
 0x237   : > { %6249 = vmatmul.mubr.msk.bf16.gmra.mrb[132].mxu1 %vm2778_vm8, %v2735_v47  ;;  %v3406_v53 = vshrl.u32 %v5333_v16, 16  ;;  %v3409_v2 = vshll.u32 %v5333_v16, 16  ;;  %v8232_v47 = vld [vmem:[#allocation2 + $0x20] sm:$0xf]  ;;  %v3140_v31 = vrot.slane %v2921_v25, 4  ;;  %v3138_v32 = vsel %vm843_vm3, %v3133_v22, %v3137_v29 }
 0x238   : > { %v2951_v4 = vor.u32 %v2950_v48, %v2947_v57  ;;  %6252 = vmatprep.mubr.msk.bf16.mxu1 %vm6862_vm0, %v6861_v18  ;;  %v6781_v48 = vld [vmem:[%s8895_s3 + $0x118] sm:$0xff]   ;;  %v5334_v0 = vcombine.low %v8240_v44, %v8232_v47 }
 0x239   : > { %v3408_v55 = vrot.slane %v3406_v53, 3  ;;  %v3411_v45 = vrot.slane %v3409_v2, 4  ;;  %v3141_v25 = vor.u32 %v3140_v31, %v3139_v54  ;;  %v6785_v53 = vld [vmem:[%s8895_s3 + $0x108] sm:$0xff]   ;;  %v6791_v54 = vld [vmem:[%s8895_s3 + $0x140] sm:$0xff]   ;;  %v8334_v56 = vld [vmem:[#allocation2 + $0x38] sm:$0xf] }
 0x23a   : > { %v2952_v35 = vsel %vm616_vm2, %v2942_v33, %v2951_v4  ;;  %v3394_v33 = vrot.slane %v3392_v20, 4  ;;  %v3415_v23 = vshrl.u32 %v5334_v0, 16  ;;  %v3418_v7 = vshll.u32 %v5334_v0, 16 }
 0x23b   : > { %6291 = vmatmul.mubr.msk.bf16.gmra.mrb[160].mxu0 %vm2778_vm8, %v2952_v35  ;;  %v6776_v35 = vld [vmem:[%s8895_s3 + $0xf0] sm:$0xff]   ;;  %v3412_v38 = vor.u32 %v3411_v45, %v3408_v55  ;;  %v3142_v16 = vsel %vm843_vm3, %v3137_v29, %v3141_v25  ;;  %v3147_v55 = vrot.slane %v2936_v21, 3  ;;  %v3148_v45 = vrot.slane %v2939_v9, 4 }
 0x23c   : > { %6294 = vmatprep.mubr.msk.bf16.mxu0 %vm6862_vm0, %v6861_v18  ;;  %v3395_v57 = vor.u32 %v3394_v33, %v3391_v1  ;;  %v3417_v14 = vrot.slane %v3415_v23, 3  ;;  %v3420_v22 = vrot.slane %v3418_v7, 4  ;;  %v6788_v1 = vld [vmem:[%s8895_s3 + $0x130] sm:$0xff]  }
 0x23d   : > { %v3149_v21 = vor.u32 %v3148_v45, %v3147_v55  ;;  %v8338_v23 = vld [vmem:[#allocation2 + $0x34] sm:$0xf]  ;;  %v6799_v45 = vld [vmem:[#allocation2 + $0x18] sm:$0xff]  }
 0x23e   : > { %v3421_v33 = vor.u32 %v3420_v22, %v3417_v14 }
 0x23f   : > { %6253 = vmatmul.mubr.msk.bf16.gmra.mrb[136].mxu1 %vm2778_vm8, %v2734_v51  ;;  %v3403_v51 = vor.u32 %v3402_v15, %v3399_v19  ;;  %v5335_v19 = vcombine.low %v8273_v41, %v8265_v11  ;;  %v6780_v15 = vld [vmem:[%s8895_s3 + $0x100] sm:$0xff]  }
 0x240   : > { %6312 = vmatprep.mubr.msk.bf16.mxu1 %vm6862_vm0, %v6861_v18  ;;  %v3422_v2 = vsel %vm843_vm3, %v3412_v38, %v3421_v33 }
 0x241   : > { %v3413_v20 = vsel %vm843_vm3, %v3403_v51, %v3412_v38  ;;  %v3424_v62 = vshrl.u32 %v5335_v19, 16 }
 0x243   : > { %6295 = vmatmul.mubr.msk.bf16.gmra.mrb[164].mxu0 %vm2778_vm8, %v2951_v4  ;;  %v3404_v4 = vsel %vm843_vm3, %v3395_v57, %v3403_v51  ;;  %v8297_v51 = vld [vmem:[#allocation2 + $0x30] sm:$0xf] }
 0x244   : > { %6354 = vmatprep.mubr.msk.bf16.mxu0 %vm6862_vm0, %v6861_v18 }
 0x247   : > { %6313 = vmatmul.mubr.msk.bf16.vlgmr.msra.gmra.mrb[140].mxu1 %vm2778_vm8, %v3134_v37  ;;  %v3427_v37 = vshll.u32 %v5335_v19, 16 }
 0x248   : > { %6383 = vmatpush3.bf16.msra.mxu1 %v6771_v58  ;;  %6316 = vmatprep.mubr.msk.bf16.mxu1 %vm6862_vm0, %v6861_v18  ;;  %v3143_v58 = vrot.slane %v2927_v12, 3  ;;  %v8303_v12 = vld [vmem:[#allocation2 + $0x2c] sm:$0xf] }
 0x249   : > { %6384 = vmatprep.subr.bf16.mxu1 %v6861_v18  ;;  %v5336_v3 = vcombine.low %v8303_v12, %v8297_v51  ;;  %v3429_v29 = vrot.slane %v3427_v37, 4 }
 0x24a   : > { %v3145_v57 = vor.u32 %v3144_v27, %v3143_v58 }
 0x24b   : > { %6355 = vmatmul.mubr.msk.bf16.vlgmr.msra.gmra.mrb[168].mxu0 %vm2778_vm8, %v3404_v4  ;;  %v6789_v4 = vld [vmem:[%s8895_s3 + $0x110] sm:$0xff]   ;;  %v3433_v0 = vshrl.u32 %v5336_v3, 16 }
 0x24c   : > { %6385 = vmatpush3.bf16.msra.mxu1 %v6774_v61  ;;  %6358 = vmatprep.mubr.msk.bf16.mxu0 %vm6862_vm0, %v6861_v18  ;;  %v3426_v61 = vrot.slane %v3424_v62, 3  ;;  %v3146_v31 = vsel %vm843_vm3, %v3141_v25, %v3145_v57 }
 0x24d   : > { %6386 = vmatprep.subr.bf16.mxu1 %v6861_v18  ;;  %6425 = vmatpush3.bf16.msra.mxu0 %v6781_v48  ;;  %v3104_v48 = vld [vmem:[#allocation2 + $0x34] sm:$0xf]  ;;  %v3435_v9 = vrot.slane %v3433_v0, 3 }
 0x24e   : > { %6426 = vmatprep.subr.bf16.mxu0 %v6861_v18 }
 0x24f   : > { %6317 = vmatmul.mubr.msk.bf16.gmra.mrb[144].mxu1 %vm2778_vm8, %v3138_v32  ;;  %v5302_v32 = vcombine.low %v8182_v8, %v3104_v48  ;;  %v6793_v8 = vld [vmem:[%s8895_s3 + $0x148] sm:$0xff]   ;;  %v5366_v48 = vcombine.low %v8196_v59, %v8198_v26 }
 0x250   : > { %6320 = vmatprep.mubr.msk.bf16.mxu1 %vm6862_vm0, %v6861_v18  ;;  %6387 = vmatpush3.bf16.msra.mxu1 %v6776_v35  ;;  %v3436_v35 = vshll.u32 %v5336_v3, 16  ;;  %v6795_v3 = vld [vmem:[#allocation2 + $0x8] sm:$0xff]  }
 0x251   : > { %6388 = vmatprep.subr.bf16.mxu1 %v6861_v18  ;;  %6427 = vmatpush3.bf16.msra.mxu0 %v6783_v28  ;;  %v3430_v28 = vor.u32 %v3429_v29, %v3426_v61  ;;  %v3155_v25 = vshll.u32 %v5302_v32, 16  ;;  %v6794_v61 = vld [vmem:[%s8895_s3 + $0x150] sm:$0xff]   ;;  %v6808_v59 = vld [vmem:[%s8895_s3 + $0x188] sm:$0xff]  }
 0x252   : > { %6428 = vmatprep.subr.bf16.mxu0 %v6861_v18  ;;  %v3438_v38 = vrot.slane %v3436_v35, 4  ;;  %v6798_v35 = vld [vmem:[%s8895_s3 + $0x158] sm:$0xff]  }
 0x253   : > { %6359 = vmatmul.mubr.msk.bf16.gmra.mrb[172].mxu0 %vm2778_vm8, %v3413_v20  ;;  %v3431_v7 = vsel %vm843_vm3, %v3421_v33, %v3430_v28  ;;  %v3150_v20 = vsel %vm843_vm3, %v3145_v57, %v3149_v21  ;;  %v3157_v19 = vrot.slane %v3155_v25, 4  ;;  %v6807_v25 = vld [vmem:[%s8895_s3 + $0x170] sm:$0xff]  }
 0x254   : > { %6362 = vmatprep.mubr.msk.bf16.mxu0 %vm6862_vm0, %v6861_v18  ;;  %6389 = vmatpush3.bf16.msra.mxu1 %v6778_v60  ;;  %v3152_v60 = vshrl.u32 %v5302_v32, 16  ;;  %v3439_v14 = vor.u32 %v3438_v38, %v3435_v9  ;;  %v6810_v32 = vld [vmem:[%s8895_s3 + $0x190] sm:$0xff]   ;;  %v6802_v38 = vld [vmem:[#allocation2 + $0x20] sm:$0xff]  }
 0x255   : > { %6390 = vmatprep.subr.bf16.mxu1 %v6861_v18  ;;  %6429 = vmatpush3.bf16.msra.mxu0 %v6786_v63  ;;  %v5337_v63 = vcombine.low %v8338_v23, %v8334_v56 }
 0x256   : > { %6430 = vmatprep.subr.bf16.mxu0 %v6861_v18  ;;  %v3154_v22 = vrot.slane %v3152_v60, 3  ;;  %v3440_v58 = vsel %vm843_vm3, %v3430_v28, %v3439_v14  ;;  %v5367_v28 = vcombine.low %v8190_v40, %v8216_v6  ;;  %v6804_v40 = vld [vmem:[%s8895_s3 + $0x168] sm:$0xff]   ;;  %v6813_v6 = vld [vmem:[%s8895_s3 + $0x198] sm:$0xff]   ;;  %v3888_v60 = vshll.u32 %v6802_v38, 16 }
 0x257   : > { %6321 = vmatmul.mubr.msk.bf16.gmra.mrb[148].mxu1 %vm2778_vm8, %v3142_v16  ;;  %v3445_v16 = vshll.u32 %v5337_v63, 16 }
 0x258   : > { %6324 = vmatprep.mubr.msk.bf16.mxu1 %vm6862_vm0, %v6861_v18  ;;  %6391 = vmatpush3.bf16.msra.mxu1 %v6780_v15  ;;  %v3442_v15 = vshrl.u32 %v5337_v63, 16  ;;  %v5368_v63 = vcombine.low %v8212_v39, %v8240_v44  ;;  %v6812_v39 = vld [vmem:[%s8895_s3 + $0x178] sm:$0xff]   ;;  %v6818_v44 = vld [vmem:[%s8895_s3 + $0x1a8] sm:$0xff]  }
 0x259   : > { %6392 = vmatprep.subr.bf16.mxu1 %v6861_v18  ;;  %6431 = vmatpush3.bf16.msra.mxu0 %v6788_v1  ;;  %v3158_v1 = vor.u32 %v3157_v19, %v3154_v22  ;;  %v3447_v27 = vrot.slane %v3445_v16, 4  ;;  %v3890_v22 = vrot.slane %v3888_v60, 1  ;;  %v6805_v19 = vld [vmem:[#allocation2 + $0x28] sm:$0xff]  }
 0x25a   : > { %6432 = vmatprep.subr.bf16.mxu0 %v6861_v18  ;;  %v3444_v33 = vrot.slane %v3442_v15, 3 }
 0x25b   : > { %6363 = vmatmul.mubr.msk.bf16.gmra.mrb[176].mxu0 %vm2778_vm8, %v3422_v2  ;;  %v3159_v62 = vsel %vm843_vm3, %v3149_v21, %v3158_v1  ;;  %v3867_v2 = vshll.u32 %v6795_v3, 16 }
 0x25c   : > { %6366 = vmatprep.mubr.msk.bf16.mxu0 %vm6862_vm0, %v6861_v18  ;;  %6393 = vmatpush3.bf16.msra.mxu1 %v6785_v53  ;;  %v3448_v37 = vor.u32 %v3447_v27, %v3444_v33  ;;  %v5369_v33 = vcombine.low %v8232_v47, %v8273_v41  ;;  %v6819_v27 = vld [vmem:[%s8895_s3 + $0x1b0] sm:$0xff]   ;;  %v6822_v47 = vld [vmem:[%s8895_s3 + $0x1b8] sm:$0xff]  }
 0x25d   : > { %6394 = vmatprep.subr.bf16.mxu1 %v6861_v18  ;;  %6433 = vmatpush3.bf16.msra.mxu0 %v6790_v34  ;;  %v6796_v34 = vld [vmem:[#allocation2 + $0x10] sm:$0xff]   ;;  %v3869_v29 = vrot.slane %v3867_v2, 1  ;;  %v5370_v2 = vcombine.low %v8265_v11, %v8303_v12  ;;  %v5371_v11 = vcombine.low %v8297_v51, %v8338_v23  ;;  %v5372_v23 = vcombine.low %v8334_v56, %v8334_v56 }
 0x25e   : > { %6434 = vmatprep.subr.bf16.mxu0 %v6861_v18  ;;  %v3449_v53 = vsel %vm843_vm3, %v3439_v14, %v3448_v37  ;;  %v3872_v57 = vshll.u32 %v6796_v34, 16  ;;  %v3876_v21 = vshrl.u32 %v6796_v34, 16  ;;  %v3884_v14 = vshrl.u32 %v6799_v45, 16  ;;  %v4084_v12 = vld [vmem:[#allocation2 + $0x10] sm:$0xf] }
 0x25f   : > { %6325 = vmatmul.mubr.msk.bf16.gmra.mrb[152].mxu1 %vm2778_vm8, %v3146_v31  ;;  %v6801_v31 = vld [vmem:[%s8895_s3 + $0x160] sm:$0xff]  }
 0x260   : > { %6328 = vmatprep.mubr.msk.bf16.mxu1 %vm6862_vm0, %v6861_v18  ;;  %6395 = vmatpush3.bf16.msra.mxu1 %v6789_v4  ;;  %v3865_v4 = vshrl.u32 %v6795_v3, 16  ;;  %v3874_v55 = vrot.slane %v3872_v57, 1  ;;  %v3900_v57 = vshrl.u32 %v6805_v19, 16 }
 0x261   : > { %6435 = vmatpush3.bf16.msra.mxu0 %v6791_v54  ;;  %6466 = vmatprep.subr.bf16.mxu1 %v6861_v18  ;;  %v3880_v54 = vshll.u32 %v6799_v45, 16 }
 0x262   : > { %6436 = vmatprep.subr.bf16.mxu0 %v6861_v18  ;;  %v3870_v0 = vor.u32 %v3869_v29, %v3865_v4  ;;  %v6814_v29 = vld [vmem:[#allocation2 + $0x38] sm:$0x1f]  }
 0x263   : > { %6367 = vmatmul.mubr.msk.bf16.gmra.mrb[180].mxu0 %vm2778_vm8, %v3431_v7  ;;  %v3882_v9 = vrot.slane %v3880_v54, 1 }
 0x264   : > { %6370 = vmatprep.mubr.msk.bf16.mxu0 %vm6862_vm0, %v6861_v18  ;;  %v3875_v26 = vsel %vm1567_vm4, %v3870_v0, %v3874_v55 }
 0x265   : > { %6437 = vmatpush3.bf16.msra.mxu0 %v6793_v8  ;;  %v3878_v8 = vor.u32 %v3876_v21, %v3874_v55  ;;  %v3886_v15 = vor.u32 %v3884_v14, %v3882_v9  ;;  %v3912_v55 = vshll.u32 %v6814_v29, 16 }
 0x266   : > { %6508 = vmatprep.subr.bf16.mxu0 %v6861_v18 }
 0x267   : > { %6329 = vmatmul.mubr.msk.bf16.gmra.mrb[156].mxu1 %vm2778_vm8, %v3150_v20  ;;  %v3883_v7 = vsel %vm1567_vm4, %v3878_v8, %v3882_v9  ;;  %v6815_v20 = vld [vmem:[%s8895_s3 + $0x1a0] sm:$0xff]   ;;  %v3891_v16 = vsel %vm1567_vm4, %v3886_v15, %v3890_v22  ;;  %v3914_v0 = vrot.slane %v3912_v55, 1 }
 0x268   : > { %6332 = vmatprep.mubr.msk.bf16.mxu1 %vm6862_vm0, %v6861_v18 }
 0x26b   : > { %6371 = vmatmul.mubr.msk.bf16.gmra.mrb[184].mxu0 %vm2778_vm8, %v3440_v58  ;;  %v3896_v58 = vshll.u32 %v6805_v19, 16 }
 0x26c   : > { %6374 = vmatprep.mubr.msk.bf16.mxu0 %vm6862_vm0, %v6861_v18 }
 0x26f   : > { %6333 = vmatmul.mubr.msk.bf16.gmra.mrb[160].mxu1 %vm2778_vm8, %v3159_v62  ;;  %v3892_v62 = vshrl.u32 %v6802_v38, 16 }
 0x270   : > { %6336 = vmatprep.mubr.msk.bf16.mxu1 %vm6862_vm0, %v6861_v18 }
 0x271   : > { %v3894_v3 = vor.u32 %v3892_v62, %v3890_v22  ;;  %v6826_v22 = vld [vmem:[%s8895_s3 + $0x1c8] sm:$0xff]   ;;  %v6830_v62 = vld [vmem:[%s8895_s3 + $0x1d8] sm:$0xff]  }
 0x273   : > { %6375 = vmatmul.mubr.msk.bf16.gmra.mrb[188].mxu0 %vm2778_vm8, %v3449_v53  ;;  %v6809_v53 = vld [vmem:[#allocation2 + $0x30] sm:$0xff]  }
 0x274   : > { %6378 = vmatprep.mubr.msk.bf16.mxu0 %vm6862_vm0, %v6861_v18  ;;  %v3904_v34 = vshll.u32 %v6809_v53, 16  ;;  %v3908_v45 = vshrl.u32 %v6809_v53, 16 }
 0x277   : > { %6337 = vmatmul.mubr.msk.bf16.gmra.mrb[164].mxu1 %vm2778_vm8, %v3158_v1  ;;  %v6817_v1 = vld [vmem:[%s8895_s3 + $0x180] sm:$0xff]  }
 0x278   : > { %6396 = vmatprep.mubr.msk.bf16.mxu1 %vm6862_vm0, %v6861_v18 }
 0x27b   : > { %6379 = vmatmul.mubr.msk.bf16.gmra.mrb[192].mxu0 %vm2778_vm8, %v3448_v37  ;;  %v3898_v37 = vrot.slane %v3896_v58, 1  ;;  %v6828_v58 = vld [vmem:[%s8895_s3 + $0x1d0] sm:$0xff]  }
 0x27c   : > { %6438 = vmatprep.mubr.msk.bf16.mxu0 %vm6862_vm0, %v6861_v18 }
 0x27d   : > { %v3899_v41 = vsel %vm1567_vm4, %v3894_v3, %v3898_v37 }
 0x27f   : > { %6397 = vmatmul.mubr.msk.bf16.vlgmr.msra.gmra.mrb[168].mxu1 %vm2778_vm8, %v5366_v48  ;;  %v3902_v48 = vor.u32 %v3900_v57, %v3898_v37 }
 0x280   : > { %6467 = vmatpush3.bf16.msra.mxu1 %v6794_v61  ;;  %6400 = vmatprep.mubr.msk.bf16.mxu1 %vm6862_vm0, %v6861_v18  ;;  %v3906_v61 = vrot.slane %v3904_v34, 1  ;;  %v6832_v34 = vld [vmem:[%s8895_s3 + $0x1e0] sm:$0xff]  }
 0x281   : > { %6468 = vmatprep.subr.bf16.mxu1 %v6861_v18 }
 0x282   : > { %v3907_v4 = vsel %vm1567_vm4, %v3902_v48, %v3906_v61 }
 0x283   : > { %6439 = vmatmul.mubr.msk.bf16.vlgmr.msra.gmra.mrb[196].mxu0 %vm2778_vm8, %v3875_v26 }
 0x284   : > { %6469 = vmatpush3.bf16.msra.mxu1 %v6798_v35  ;;  %6442 = vmatprep.mubr.msk.bf16.mxu0 %vm6862_vm0, %v6861_v18  ;;  %v4083_v35 = vld [vmem:[#allocation2 + $0xc] sm:$0xf] }
 0x285   : > { %6470 = vmatprep.subr.bf16.mxu1 %v6861_v18  ;;  %6509 = vmatpush3.bf16.msra.mxu0 %v6808_v59  ;;  %v3910_v59 = vor.u32 %v3908_v45, %v3906_v61  ;;  %v5436_v26 = vcombine.low %v4083_v35, %v4084_v12  ;;  %v6835_v45 = vld [vmem:[%s8895_s3 + $0x1f0] sm:$0xff]  }
 0x286   : > { %6510 = vmatprep.subr.bf16.mxu0 %v6861_v18 }
 0x287   : > { %6401 = vmatmul.mubr.msk.bf16.gmra.mrb[172].mxu1 %vm2778_vm8, %v5367_v28  ;;  %v3915_v54 = vsel %vm1567_vm4, %v3910_v59, %v3914_v0  ;;  %v4150_v51 = vshll.u32 %v5436_v26, 16  ;;  %v4148_v38 = vshrl.u32 %v5436_v26, 16  ;;  %v8585_v26 = vld [vmem:[#allocation2 + $0x3c] sm:$0xf] }
 0x288   : > { %6404 = vmatprep.mubr.msk.bf16.mxu1 %vm6862_vm0, %v6861_v18  ;;  %6471 = vmatpush3.bf16.msra.mxu1 %v6801_v31  ;;  %v8480_v31 = vld [vmem:[#allocation2 + $0x14] sm:$0xff]  }
 0x289   : > { %6472 = vmatprep.subr.bf16.mxu1 %v6861_v18  ;;  %6511 = vmatpush3.bf16.msra.mxu0 %v6810_v32  ;;  %v4155_v28 = vshll.u32 %v8480_v31, 16  ;;  %v3916_v32 = vshrl.u32 %v6814_v29, 16  ;;  %v4152_v21 = vrot.slane %v4150_v51, 1  ;;  %v4159_v15 = vshrl.u32 %v8480_v31, 16  ;;  %v6834_v29 = vld [vmem:[%s8895_s3 + $0x1e8] sm:$0xff]  }
 0x28a   : > { %6512 = vmatprep.subr.bf16.mxu0 %v6861_v18 }
 0x28b   : > { %6443 = vmatmul.mubr.msk.bf16.gmra.mrb[200].mxu0 %vm2778_vm8, %v3883_v7  ;;  %v3918_v9 = vor.u32 %v3916_v32, %v3914_v0  ;;  %v4157_v8 = vrot.slane %v4155_v28, 1  ;;  %v4153_v56 = vor.u32 %v4152_v21, %v4148_v38  ;;  %v6823_v7 = vld [vmem:[%s8895_s3 + $0x1c0] sm:$0xff]  }
 0x28c   : > { %6446 = vmatprep.mubr.msk.bf16.mxu0 %vm6862_vm0, %v6861_v18  ;;  %6473 = vmatpush3.bf16.msra.mxu1 %v6804_v40  ;;  %v8493_v40 = vld [vmem:[#allocation2 + $0x1c] sm:$0xff]  }
 0x28d   : > { %6474 = vmatprep.subr.bf16.mxu1 %v6861_v18  ;;  %6513 = vmatpush3.bf16.msra.mxu0 %v6813_v6  ;;  %v4366_v6 = vld [vmem:[#allocation2 + $0xc] sm:$0xe]  ;;  %v4167_v53 = vshrl.u32 %v8493_v40, 16 }
 0x28e   : > { %6514 = vmatprep.subr.bf16.mxu0 %v6861_v18  ;;  %v8501_v60 = vcombine.low %v4366_v6, %v4084_v12 }
 0x28f   : > { %6405 = vmatmul.mubr.msk.bf16.gmra.mrb[176].mxu1 %vm2778_vm8, %v5368_v63  ;;  %v4386_v63 = vrot.slane %v8480_v31, 1 }
 0x290   : > { %6408 = vmatprep.mubr.msk.bf16.mxu1 %vm6862_vm0, %v6861_v18  ;;  %6475 = vmatpush3.bf16.msra.mxu1 %v6807_v25  ;;  %v4158_v25 = vsel %vm1567_vm4, %v4153_v56, %v4157_v8  ;;  %v4385_v14 = vrot.slane %v8501_v60, 1 }
 0x291   : > { %6476 = vmatprep.subr.bf16.mxu1 %v6861_v18  ;;  %6515 = vmatpush3.bf16.msra.mxu0 %v6815_v20  ;;  %v4163_v20 = vshll.u32 %v8493_v40, 16 }
 0x292   : > { %6516 = vmatprep.subr.bf16.mxu0 %v6861_v18  ;;  %v4387_v19 = vsel %vm2077_vm6, %v4385_v14, %v4386_v63 }
 0x293   : > { %6447 = vmatmul.mubr.msk.bf16.gmra.mrb[204].mxu0 %vm2778_vm8, %v3891_v16  ;;  %v4161_v16 = vor.u32 %v4159_v15, %v4157_v8 }
 0x294   : > { %6450 = vmatprep.mubr.msk.bf16.mxu0 %vm6862_vm0, %v6861_v18  ;;  %6477 = vmatpush3.bf16.msra.mxu1 %v6812_v39  ;;  %v4165_v39 = vrot.slane %v4163_v20, 1 }
 0x295   : > { %6478 = vmatprep.subr.bf16.mxu1 %v6861_v18  ;;  %6517 = vmatpush3.bf16.msra.mxu0 %v6818_v44  ;;  %v8518_v44 = vld [vmem:[#allocation2 + $0x24] sm:$0xff]  }
 0x296   : > { %6518 = vmatprep.subr.bf16.mxu0 %v6861_v18  ;;  %v4390_v57 = vrot.slane %v8518_v44, 1 }
 0x297   : > { %6409 = vmatmul.mubr.msk.bf16.gmra.mrb[180].mxu1 %vm2778_vm8, %v5369_v33  ;;  %v4388_v33 = vrot.slane %v8493_v40, 1 }
 0x298   : > { %6412 = vmatprep.mubr.msk.bf16.mxu1 %vm6862_vm0, %v6861_v18  ;;  %6479 = vmatpush3.bf16.msra.mxu1 %v6817_v1  ;;  %v4166_v1 = vsel %vm1567_vm4, %v4161_v16, %v4165_v39 }
 0x299   : > { %6519 = vmatpush3.bf16.msra.mxu0 %v6819_v27  ;;  %6550 = vmatprep.subr.bf16.mxu1 %v6861_v18  ;;  %v4171_v27 = vshll.u32 %v8518_v44, 16  ;;  %v4389_v37 = vsel %vm2077_vm6, %v4386_v63, %v4388_v33  ;;  %v4391_v48 = vsel %vm2077_vm6, %v4388_v33, %v4390_v57 }
 0x29a   : > { %6520 = vmatprep.subr.bf16.mxu0 %v6861_v18 }
 0x29b   : > { %6451 = vmatmul.mubr.msk.bf16.gmra.mrb[208].mxu0 %vm2778_vm8, %v3899_v41  ;;  %v4173_v3 = vrot.slane %v4171_v27, 1  ;;  %v4169_v41 = vor.u32 %v4167_v53, %v4165_v39 }
 0x29c   : > { %6454 = vmatprep.mubr.msk.bf16.mxu0 %vm6862_vm0, %v6861_v18 }
 0x29d   : > { %6521 = vmatpush3.bf16.msra.mxu0 %v6822_v47  ;;  %v8543_v47 = vld [vmem:[#allocation2 + $0x2c] sm:$0xff]  }
 0x29e   : > { %v4179_v61 = vshll.u32 %v8543_v47, 16  ;;  %v4392_v35 = vrot.slane %v8543_v47, 1 }
 0x29f   : > { %6413 = vmatmul.mubr.msk.bf16.gmra.mrb[184].mxu1 %vm2778_vm8, %v5370_v2  ;;  %v4174_v2 = vsel %vm1567_vm4, %v4169_v41, %v4173_v3 }
 0x2a0   : > { %6416 = vmatprep.mubr.msk.bf16.mxu1 %vm6862_vm0, %v6861_v18  ;;  %v4181_v55 = vrot.slane %v4179_v61, 1  ;;  %v4393_v51 = vsel %vm2077_vm6, %v4390_v57, %v4392_v35 }
 0x2a3   : > { %6455 = vmatmul.mubr.msk.bf16.gmra.mrb[212].mxu0 %vm2778_vm8, %v3907_v4  ;;  %v4175_v4 = vshrl.u32 %v8518_v44, 16 }
 0x2a4   : > { %6458 = vmatprep.mubr.msk.bf16.mxu0 %vm6862_vm0, %v6861_v18 }
 0x2a5   : > { %v4177_v12 = vor.u32 %v4175_v4, %v4173_v3  ;;  %v4585_v3 = vshll.u32 %v8501_v60, 16 }
 0x2a7   : > { %6417 = vmatmul.mubr.msk.bf16.gmra.mrb[188].mxu1 %vm2778_vm8, %v5371_v11  ;;  %v8568_v11 = vld [vmem:[#allocation2 + $0x34] sm:$0xff]   ;;  %v4182_v0 = vsel %vm1567_vm4, %v4177_v12, %v4181_v55 }
 0x2a8   : > { %6420 = vmatprep.mubr.msk.bf16.mxu1 %vm6862_vm0, %v6861_v18  ;;  %v4187_v59 = vshll.u32 %v8568_v11, 16  ;;  %v4394_v8 = vrot.slane %v8568_v11, 1  ;;  %v4191_v56 = vshrl.u32 %v8568_v11, 16 }
 0x2aa   : > { %v4189_v32 = vrot.slane %v4187_v59, 1 }
 0x2ab   : > { %6459 = vmatmul.mubr.msk.bf16.gmra.mrb[216].mxu0 %vm2778_vm8, %v3915_v54  ;;  %v4096_v54 = vld [vmem:[#allocation2 + $0x40] sm:$0x1] }
 0x2ac   : > { %6462 = vmatprep.mubr.msk.bf16.mxu0 %vm6862_vm0, %v6861_v18 }
 0x2af   : > { %6421 = vmatmul.mubr.msk.bf16.gmra.mrb[192].mxu1 %vm2778_vm8, %v5372_v23  ;;  %v4183_v23 = vshrl.u32 %v8543_v47, 16 }
 0x2b0   : > { %6480 = vmatprep.mubr.msk.bf16.mxu1 %vm6862_vm0, %v6861_v18 }
 0x2b1   : > { %v4185_v21 = vor.u32 %v4183_v23, %v4181_v55 }
 0x2b3   : > { %6463 = vmatmul.mubr.msk.bf16.gmra.mrb[220].mxu0 %vm2778_vm8, %v3918_v9  ;;  %v5442_v9 = vcombine.low %v8585_v26, %v4096_v54  ;;  %v4190_v38 = vsel %vm1567_vm4, %v4185_v21, %v4189_v32 }
 0x2b4   : > { %6522 = vmatprep.mubr.msk.bf16.mxu0 %vm6862_vm0, %v6861_v18 }
 0x2b5   : > { %v4195_v6 = vshll.u32 %v5442_v9, 16 }
 0x2b7   : > { %6481 = vmatmul.mubr.msk.bf16.vlgmr.msra.gmra.mrb[196].mxu1 %vm2778_vm8, %v4158_v25  ;;  %v4193_v25 = vor.u32 %v4191_v56, %v4189_v32  ;;  %v4197_v63 = vrot.slane %v4195_v6, 1 }
 0x2b8   : > { %6551 = vmatpush3.bf16.msra.mxu1 %v6823_v7  ;;  %6484 = vmatprep.mubr.msk.bf16.mxu1 %vm6862_vm0, %v6861_v18  ;;  %v4395_v7 = vsel %vm2077_vm6, %v4392_v35, %v4394_v8 }
 0x2b9   : > { %6552 = vmatprep.subr.bf16.mxu1 %v6861_v18  ;;  %v4198_v14 = vsel %vm1567_vm4, %v4193_v25, %v4197_v63 }
 0x2bb   : > { %6523 = vmatmul.mubr.msk.bf16.vlgmr.msra.gmra.mrb[224].mxu0 %vm2778_vm8, %v4387_v19  ;;  %v4199_v19 = vshrl.u32 %v5442_v9, 16 }
 0x2bc   : > { %6553 = vmatpush3.bf16.msra.mxu1 %v6826_v22  ;;  %6526 = vmatprep.mubr.msk.bf16.mxu0 %vm6862_vm0, %v6861_v18  ;;  %v4396_v22 = vrot.slane %v5442_v9, 1 }
 0x2bd   : > { %6554 = vmatprep.subr.bf16.mxu1 %v6861_v18  ;;  %v4201_v33 = vor.u32 %v4199_v19, %v4197_v63 }
 0x2bf   : > { %6485 = vmatmul.mubr.msk.bf16.gmra.mrb[200].mxu1 %vm2778_vm8, %v4166_v1 }
 0x2c0   : > { %6488 = vmatprep.mubr.msk.bf16.mxu1 %vm6862_vm0, %v6861_v18  ;;  %6555 = vmatpush3.bf16.msra.mxu1 %v6828_v58  ;;  %v4397_v58 = vsel %vm2077_vm6, %v4394_v8, %v4396_v22  ;;  %v4594_v8 = vrot.slane %v4163_v20, 2  ;;  %v4597_v20 = vrot.slane %v4175_v4, 1 }
 0x2c1   : > { %6556 = vmatprep.subr.bf16.mxu1 %v6861_v18 }
 0x2c3   : > { %6527 = vmatmul.mubr.msk.bf16.gmra.mrb[228].mxu0 %vm2778_vm8, %v4389_v37  ;;  %v4582_v37 = vshrl.u32 %v8501_v60, 16 }
 0x2c4   : > { %6530 = vmatprep.mubr.msk.bf16.mxu0 %vm6862_vm0, %v6861_v18  ;;  %6557 = vmatpush3.bf16.msra.mxu1 %v6830_v62 }
 0x2c5   : > { %6558 = vmatprep.subr.bf16.mxu1 %v6861_v18  ;;  %v4584_v60 = vrot.slane %v4582_v37, 1 }
 0x2c7   : > { %6489 = vmatmul.mubr.msk.bf16.gmra.mrb[204].mxu1 %vm2778_vm8, %v4174_v2 }
 0x2c8   : > { %6492 = vmatprep.mubr.msk.bf16.mxu1 %vm6862_vm0, %v6861_v18  ;;  %6559 = vmatpush3.bf16.msra.mxu1 %v6832_v34  ;;  %v4589_v34 = vrot.slane %v4159_v15, 1 }
 0x2c9   : > { %6560 = vmatprep.subr.bf16.mxu1 %v6861_v18 }
 0x2cb   : > { %6531 = vmatmul.mubr.msk.bf16.gmra.mrb[232].mxu0 %vm2778_vm8, %v4391_v48 }
 0x2cc   : > { %6534 = vmatprep.mubr.msk.bf16.mxu0 %vm6862_vm0, %v6861_v18  ;;  %6561 = vmatpush3.bf16.msra.mxu1 %v6834_v29  ;;  %v4590_v29 = vrot.slane %v4155_v28, 2 }
 0x2cd   : > { %6562 = vmatprep.subr.bf16.mxu1 %v6861_v18 }
 0x2ce   : > { %v4591_v15 = vor.u32 %v4590_v29, %v4589_v34 }
 0x2cf   : > { %6493 = vmatmul.mubr.msk.bf16.gmra.mrb[208].mxu1 %vm2778_vm8, %v4182_v0 }
 0x2d0   : > { %6496 = vmatprep.mubr.msk.bf16.mxu1 %vm6862_vm0, %v6861_v18  ;;  %6563 = vmatpush3.bf16.msra.mxu1 %v6835_v45  ;;  %v4587_v45 = vrot.slane %v4585_v3, 2 }
 0x2d2   : > { %v4588_v31 = vor.u32 %v4587_v45, %v4584_v60  ;;  %v4602_v60 = vrot.slane %v4179_v61, 2 }
 0x2d3   : > { %6535 = vmatmul.mubr.msk.bf16.gmra.mrb[236].mxu0 %vm2778_vm8, %v4393_v51 }
 0x2d4   : > { %6538 = vmatprep.mubr.msk.bf16.mxu0 %vm6862_vm0, %v6861_v18  ;;  %v4592_v9 = vsel %vm2268_vm7, %v4588_v31, %v4591_v15  ;;  %v4562_v31 = vld [vmem:[#allocation2 + $0x40] sm:$0x3] }
 0x2d7   : > { %6497 = vmatmul.mubr.msk.bf16.gmra.mrb[212].mxu1 %vm2778_vm8, %v4190_v38  ;;  %v4593_v38 = vrot.slane %v4167_v53, 1 }
 0x2d8   : > { %6500 = vmatprep.mubr.msk.bf16.mxu1 %vm6862_vm0, %v6861_v18 }
 0x2db   : > { %6539 = vmatmul.mubr.msk.bf16.gmra.mrb[240].mxu0 %vm2778_vm8, %v4395_v7 }
 0x2dc   : > { %6542 = vmatprep.mubr.msk.bf16.mxu0 %vm6862_vm0, %v6861_v18 }
 0x2df   : > { %6501 = vmatmul.mubr.msk.bf16.gmra.mrb[216].mxu1 %vm2778_vm8, %v4198_v14 }
 0x2e0   : > { %6504 = vmatprep.mubr.msk.bf16.mxu1 %vm6862_vm0, %v6861_v18  ;;  %v2834_v39 = vpop.f32.mrb[112].mxu1 }
 0x2e1   : > { %v6230_v16 = vpop.f32.mrb[113].mxu1 }
 0x2e2   : > { %v2837_v1 = vpop.f32.mrb[114].mxu1 }
 0x2e3   : > { %6543 = vmatmul.mubr.msk.bf16.gmra.mrb[244].mxu0 %vm2778_vm8, %v4397_v58  ;;  %v6231_v62 = vpop.f32.mrb[115].mxu1 }
 0x2e4   : > { %6546 = vmatprep.mubr.msk.bf16.mxu0 %vm6862_vm0, %v6861_v18 }
 0x2e5   : > { %v3050_v41 = vpop.f32.mrb[140].mxu0 }
 0x2e6   : > { %v8621_v2 = vadd.f32 %v3050_v41, %v2834_v39  ;;  %v6272_v57 = vpop.f32.mrb[141].mxu0 }
 0x2e7   : > { %6505 = vmatmul.mubr.msk.bf16.gmra.mrb[220].mxu1 %vm2778_vm8, %v4201_v33  ;;  %v3053_v48 = vpop.f32.mrb[142].mxu0 }
 0x2e8   : > { %v8626_v55 = vadd.f32 %v3053_v48, %v2837_v1  ;;  %v6273_v12 = vpop.f32.mrb[143].mxu0  ;;  %6564 = vmatprep.mubr.msk.bf16.mxu1 %vm6862_vm0, %v6861_v18  ;;  %v2842_v0 = vpop.f32.mrb[116].mxu1  ;;  %v4598_v1 = vrot.slane %v4171_v27, 2  ;;  %v4601_v27 = vrot.slane %v4183_v23, 1  ;;  %v5500_v23 = vcombine.low %v8585_v26, %v4562_v31 }
 0x2e9   : > { %v6234_v35 = vpop.f32.mrb[117].mxu1 }
 0x2ea   : > { %v2845_v54 = vpop.f32.mrb[118].mxu1  ;;  %v4599_v34 = vor.u32 %v4598_v1, %v4597_v20 }
 0x2eb   : > { %6547 = vmatmul.mubr.msk.bf16.gmra.mrb[248].mxu0 %vm2778_vm8, %v4396_v22  ;;  %v6235_v51 = vpop.f32.mrb[119].mxu1  ;;  %v4595_v22 = vor.u32 %v4594_v8, %v4593_v38  ;;  %v4605_v8 = vrot.slane %v4191_v56, 1 }
 0x2ec   : > { %v4603_v51 = vor.u32 %v4602_v60, %v4601_v27 }
 0x2ed   : > { %v3058_v28 = vpop.f32.mrb[144].mxu0  ;;  %v4596_v40 = vsel %vm2268_vm7, %v4591_v15, %v4595_v22  ;;  %v4600_v44 = vsel %vm2268_vm7, %v4595_v22, %v4599_v34 }
 0x2ee   : > { %v8631_v32 = vadd.f32 %v3058_v28, %v2842_v0  ;;  %v6276_v21 = vpop.f32.mrb[145].mxu0  ;;  %v4604_v38 = vsel %vm2268_vm7, %v4599_v34, %v4603_v51 }
 0x2ef   : > { %6565 = vmatmul.mubr.msk.bf16.vlgmr.msra.gmra.mrb[224].mxu1 %vm2778_vm8, %v4592_v9  ;;  %v3061_v6 = vpop.f32.mrb[146].mxu0 }
 0x2f0   : > { %v8639_v7 = vadd.f32 %v3061_v6, %v2845_v54  ;;  %v6277_v25 = vpop.f32.mrb[147].mxu0  ;;  %6568 = vmatprep.mubr.msk.bf16.mxu1 %vm6862_vm0, %v6861_v18  ;;  %v2850_v63 = vpop.f32.mrb[120].mxu1  ;;  %v4606_v6 = vrot.slane %v4187_v59, 2 }
 0x2f1   : > { %v6238_v14 = vpop.f32.mrb[121].mxu1 }
 0x2f2   : > { %v2853_v19 = vpop.f32.mrb[122].mxu1  ;;  %v4607_v22 = vor.u32 %v4606_v6, %v4605_v8 }
 0x2f3   : > { %v6239_v39 = vpop.f32.mrb[123].mxu1 }
 0x2f4   : > { %v4613_v39 = vshll.u32 %v5500_v23, 16  ;;  %v4608_v11 = vsel %vm2268_vm7, %v4603_v51, %v4607_v22 }
 0x2f5   : > { %v3066_v16 = vpop.f32.mrb[148].mxu0 }
 0x2f6   : > { %v8643_v58 = vadd.f32 %v3066_v16, %v2850_v63  ;;  %v6280_v53 = vpop.f32.mrb[149].mxu0  ;;  %v4615_v20 = vrot.slane %v4613_v39, 2 }
 0x2f7   : > { %6569 = vmatmul.mubr.msk.bf16.gmra.mrb[228].mxu1 %vm2778_vm8, %v4596_v40  ;;  %v3069_v33 = vpop.f32.mrb[150].mxu0 }
 0x2f8   : > { %v8651_v62 = vadd.f32 %v3069_v33, %v2853_v19  ;;  %v6281_v37 = vpop.f32.mrb[151].mxu0  ;;  %6572 = vmatprep.mubr.msk.bf16.mxu1 %vm6862_vm0, %v6861_v18  ;;  %v2858_v3 = vpop.f32.mrb[124].mxu1  ;;  %v4610_v19 = vshrl.u32 %v5500_v23, 16 }
 0x2f9   : > { %v6242_v41 = vpop.f32.mrb[125].mxu1 }
 0x2fa   : > { %v2861_v57 = vpop.f32.mrb[126].mxu1  ;;  %v4612_v59 = vrot.slane %v4610_v19, 1 }
 0x2fb   : > { %v6243_v29 = vpop.f32.mrb[127].mxu1 }
 0x2fd   : > { %v3074_v48 = vpop.f32.mrb[152].mxu0 }
 0x2fe   : > { %v8655_v12 = vadd.f32 %v3074_v48, %v2858_v3  ;;  %v6284_v4 = vpop.f32.mrb[153].mxu0 }
 0x2ff   : > { %6573 = vmatmul.mubr.msk.bf16.gmra.mrb[232].mxu1 %vm2778_vm8, %v4600_v44  ;;  %v3077_v45 = vpop.f32.mrb[154].mxu0 }
 0x300   : > { %v8663_v0 = vadd.f32 %v3077_v45, %v2861_v57  ;;  %v6285_v35 = vpop.f32.mrb[155].mxu0  ;;  %6576 = vmatprep.mubr.msk.bf16.mxu1 %vm6862_vm0, %v6861_v18  ;;  %v2866_v15 = vpop.f32.mrb[128].mxu1  ;;  %v4616_v57 = vor.u32 %v4615_v20, %v4612_v59 }
 0x301   : > { %v6246_v54 = vpop.f32.mrb[129].mxu1 }
 0x302   : > { %v2869_v28 = vpop.f32.mrb[130].mxu1  ;;  %v4617_v27 = vsel %vm2268_vm7, %v4607_v22, %v4616_v57 }
 0x303   : > { %v6247_v21 = vpop.f32.mrb[131].mxu1 }
 0x305   : > { %v3082_v9 = vpop.f32.mrb[156].mxu0 }
 0x306   : > { %v8668_v47 = vadd.f32 %v3082_v9, %v2866_v15  ;;  %v6288_v61 = vpop.f32.mrb[157].mxu0 }
 0x307   : > { %6577 = vmatmul.mubr.msk.bf16.gmra.mrb[236].mxu1 %vm2778_vm8, %v4604_v38  ;;  %v3085_v25 = vpop.f32.mrb[158].mxu0 }
 0x308   : > { %v8676_v63 = vadd.f32 %v3085_v25, %v2869_v28  ;;  %v6289_v14 = vpop.f32.mrb[159].mxu0  ;;  %6580 = vmatprep.mubr.msk.bf16.mxu1 %vm6862_vm0, %v6861_v18 }
 0x30a   : > { %v2874_v26 = vpop.f32.mrb[132].mxu1 }
 0x30b   : > { %v6250_v16 = vpop.f32.mrb[133].mxu1 }
 0x30c   : > { %v2877_v53 = vpop.f32.mrb[134].mxu1 }
 0x30d   : > { %v6251_v40 = vpop.f32.mrb[135].mxu1 }
 0x30e   : > { %v3090_v56 = vpop.f32.mrb[160].mxu0 }
 0x30f   : > { %v8681_v1 = vadd.f32 %v3090_v56, %v2874_v26  ;;  %v6292_v33 = vpop.f32.mrb[161].mxu0  ;;  %6581 = vmatmul.mubr.msk.bf16.gmra.mrb[240].mxu1 %vm2778_vm8, %v4608_v11 }
 0x310   : > { %v3093_v37 = vpop.f32.mrb[162].mxu0  ;;  %6584 = vmatprep.mubr.msk.bf16.mxu1 %vm6862_vm0, %v6861_v18 }
 0x311   : > { %v8686_v3 = vadd.f32 %v3093_v37, %v2877_v53  ;;  %v6293_v41 = vpop.f32.mrb[163].mxu0 }
 0x312   : > { %v2882_v34 = vpop.f32.mrb[136].mxu1 }
 0x313   : > { %v6254_v29 = vpop.f32.mrb[137].mxu1 }
 0x314   : > { %v2885_v48 = vpop.f32.mrb[138].mxu1 }
 0x315   : > { %v6255_v4 = vpop.f32.mrb[139].mxu1 }
 0x316   : > { %v3098_v44 = vpop.f32.mrb[164].mxu0 }
 0x317   : > { %v8689_v60 = vadd.f32 %v3098_v44, %v2882_v34  ;;  %v6296_v45 = vpop.f32.mrb[165].mxu0  ;;  %6585 = vmatmul.mubr.msk.bf16.gmra.mrb[244].mxu1 %vm2778_vm8, %v4617_v27 }
 0x318   : > { %v3101_v35 = vpop.f32.mrb[166].mxu0  ;;  %6588 = vmatprep.mubr.msk.bf16.mxu1 %vm6862_vm0, %v6861_v18 }
 0x319   : > { %v6297_v15 = vpop.f32.mrb[167].mxu0 }
 0x31a   : > { %v3257_v54 = vpop.f32.mrb[140].mxu1 }
 0x31b   : > { %v3311_v51 = vadd.f32 %v3257_v54, %v8621_v2  ;;  %v6314_v31 = vpop.f32.mrb[141].mxu1 }
 0x31c   : > { %v3260_v28 = vpop.f32.mrb[142].mxu1 }
 0x31d   : > { %v3312_v21 = vadd.f32 %v3260_v28, %v8626_v55  ;;  %v6315_v9 = vpop.f32.mrb[143].mxu1 }
 0x31e   : > { %v3547_v23 = vpop.f32.mrb[168].mxu0 }
 0x31f   : > { %v8696_v61 = vadd.f32 %v3547_v23, %v3311_v51  ;;  %v6356_v38 = vpop.f32.mrb[169].mxu0  ;;  %6589 = vmatmul.mubr.msk.bf16.gmra.mrb[248].mxu1 %vm2778_vm8, %v4616_v57 }
 0x320   : > { %v3550_v8 = vpop.f32.mrb[170].mxu0 }
 0x321   : > { %v8699_v6 = vadd.f32 %v3550_v8, %v3312_v21  ;;  %v6357_v25 = vpop.f32.mrb[171].mxu0 }
 0x322   : > { %v3265_v18 = vpop.f32.mrb[144].mxu1 }
 0x323   : > { %v3313_v14 = vadd.f32 %v3265_v18, %v8631_v32  ;;  %v6318_v26 = vpop.f32.mrb[145].mxu1 }
 0x324   : > { %v3268_v2 = vpop.f32.mrb[146].mxu1 }
 0x325   : > { %v3314_v22 = vadd.f32 %v3268_v2, %v8639_v7  ;;  %v6319_v19 = vpop.f32.mrb[147].mxu1 }
 0x326   : > { %v3555_v55 = vpop.f32.mrb[172].mxu0 }
 0x327   : > { %v8703_v39 = vadd.f32 %v3555_v55, %v3313_v14  ;;  %v6360_v16 = vpop.f32.mrb[173].mxu0 }
 0x328   : > { %v3558_v53 = vpop.f32.mrb[174].mxu0 }
 0x329   : > { %v8705_v40 = vadd.f32 %v3558_v53, %v3314_v22  ;;  %v6361_v56 = vpop.f32.mrb[175].mxu0 }
 0x32a   : > { %v3273_v11 = vpop.f32.mrb[148].mxu1 }
 0x32b   : > { %v3315_v59 = vadd.f32 %v3273_v11, %v8643_v58  ;;  %v6322_v20 = vpop.f32.mrb[149].mxu1 }
 0x32c   : > { %v3276_v33 = vpop.f32.mrb[150].mxu1 }
 0x32d   : > { %v3316_v32 = vadd.f32 %v3276_v33, %v8651_v62  ;;  %v6323_v37 = vpop.f32.mrb[151].mxu1 }
 0x32e   : > { %v3563_v41 = vpop.f32.mrb[176].mxu0 }
 0x32f   : > { %v8709_v34 = vadd.f32 %v3563_v41, %v3315_v59  ;;  %v6364_v7 = vpop.f32.mrb[177].mxu0 }
 0x330   : > { %v3566_v57 = vpop.f32.mrb[178].mxu0 }
 0x331   : > { %v8711_v29 = vadd.f32 %v3566_v57, %v3316_v32  ;;  %v6365_v48 = vpop.f32.mrb[179].mxu0 }
 0x332   : > { %v3281_v4 = vpop.f32.mrb[152].mxu1 }
 0x333   : > { %v3317_v44 = vadd.f32 %v3281_v4, %v8655_v12  ;;  %v6326_v27 = vpop.f32.mrb[153].mxu1 }
 0x334   : > { %v3284_v45 = vpop.f32.mrb[154].mxu1 }
 0x335   : > { %v3318_v58 = vadd.f32 %v3284_v45, %v8663_v0  ;;  %v6327_v35 = vpop.f32.mrb[155].mxu1 }
 0x336   : > { %v3571_v15 = vpop.f32.mrb[180].mxu0 }
 0x337   : > { %v8715_v54 = vadd.f32 %v3571_v15, %v3317_v44  ;;  %v6368_v62 = vpop.f32.mrb[181].mxu0 }
 0x338   : > { %v3574_v51 = vpop.f32.mrb[182].mxu0 }
 0x339   : > { %v8717_v31 = vadd.f32 %v3574_v51, %v3318_v58  ;;  %v6369_v28 = vpop.f32.mrb[183].mxu0 }
 0x33a   : > { %v3289_v21 = vpop.f32.mrb[156].mxu1 }
 0x33b   : > { %v3319_v9 = vadd.f32 %v3289_v21, %v8668_v47  ;;  %v6330_v23 = vpop.f32.mrb[157].mxu1 }
 0x33c   : > { %v3292_v38 = vpop.f32.mrb[158].mxu1 }
 0x33d   : > { %v3320_v12 = vadd.f32 %v3292_v38, %v8676_v63  ;;  %v6331_v8 = vpop.f32.mrb[159].mxu1 }
 0x33e   : > { %v3579_v25 = vpop.f32.mrb[184].mxu0 }
 0x33f   : > { %v8721_v18 = vadd.f32 %v3579_v25, %v3319_v9  ;;  %v6372_v0 = vpop.f32.mrb[185].mxu0 }
 0x340   : > { %v3582_v14 = vpop.f32.mrb[186].mxu0 }
 0x341   : > { %v8723_v26 = vadd.f32 %v3582_v14, %v3320_v12  ;;  %v6373_v2 = vpop.f32.mrb[187].mxu0 }
 0x342   : > { %v3297_v22 = vpop.f32.mrb[160].mxu1 }
 0x343   : > { %v3321_v19 = vadd.f32 %v3297_v22, %v8681_v1  ;;  %v6334_v55 = vpop.f32.mrb[161].mxu1 }
 0x344   : > { %v3300_v16 = vpop.f32.mrb[162].mxu1 }
 0x345   : > { %v3322_v47 = vadd.f32 %v3300_v16, %v8686_v3  ;;  %v6335_v53 = vpop.f32.mrb[163].mxu1 }
 0x346   : > { %v3587_v56 = vpop.f32.mrb[188].mxu0 }
 0x347   : > { %v8727_v11 = vadd.f32 %v3587_v56, %v3321_v19  ;;  %v6376_v63 = vpop.f32.mrb[189].mxu0 }
 0x348   : > { %v3590_v59 = vpop.f32.mrb[190].mxu0 }
 0x349   : > { %v8729_v20 = vadd.f32 %v3590_v59, %v3322_v47  ;;  %v6377_v33 = vpop.f32.mrb[191].mxu0 }
 0x34a   : > { %v3305_v32 = vpop.f32.mrb[164].mxu1 }
 0x34b   : > { %v3323_v37 = vadd.f32 %v3305_v32, %v8689_v60  ;;  %v6338_v41 = vpop.f32.mrb[165].mxu1 }
 0x34c   : > { %v3308_v7 = vpop.f32.mrb[166].mxu1 }
 0x34d   : > { %v6339_v57 = vpop.f32.mrb[167].mxu1 }
 0x34e   : > { %v3595_v1 = vpop.f32.mrb[192].mxu0 }
 0x34f   : > { %v8732_v48 = vadd.f32 %v3595_v1, %v3323_v37  ;;  %v6380_v4 = vpop.f32.mrb[193].mxu0 }
 0x350   : > { %v3598_v3 = vpop.f32.mrb[194].mxu0 }
 0x351   : > { %v6381_v44 = vpop.f32.mrb[195].mxu0 }
 0x352   : > { %v3733_v27 = vpop.f32.mrb[168].mxu1 }
 0x353   : > { %v3787_v45 = vadd.f32 %v3733_v27, %v8696_v61  ;;  %v6398_v58 = vpop.f32.mrb[169].mxu1 }
 0x354   : > { %v3736_v35 = vpop.f32.mrb[170].mxu1 }
 0x355   : > { %v3788_v15 = vadd.f32 %v3736_v35, %v8699_v6  ;;  %v6399_v62 = vpop.f32.mrb[171].mxu1 }
 0x356   : > { %v4016_v51 = vpop.f32.mrb[196].mxu0 }
 0x357   : > { %v8736_v28 = vadd.f32 %v4016_v51, %v3787_v45  ;;  %v6440_v60 = vpop.f32.mrb[197].mxu0 }
 0x358   : > { %v4019_v21 = vpop.f32.mrb[198].mxu0 }
 0x359   : > { %v8738_v9 = vadd.f32 %v4019_v21, %v3788_v15  ;;  %v6441_v23 = vpop.f32.mrb[199].mxu0 }
 0x35a   : > { %v3741_v38 = vpop.f32.mrb[172].mxu1 }
 0x35b   : > { %v3789_v12 = vadd.f32 %v3741_v38, %v8703_v39  ;;  %v6402_v8 = vpop.f32.mrb[173].mxu1 }
 0x35c   : > { %v3744_v25 = vpop.f32.mrb[174].mxu1 }
 0x35d   : > { %v3790_v61 = vadd.f32 %v3744_v25, %v8705_v40  ;;  %v6403_v0 = vpop.f32.mrb[175].mxu1 }
 0x35e   : > { %v4024_v14 = vpop.f32.mrb[200].mxu0 }
 0x35f   : > { %v8742_v2 = vadd.f32 %v4024_v14, %v3789_v12  ;;  %v6444_v6 = vpop.f32.mrb[201].mxu0 }
 0x360   : > { %v4027_v22 = vpop.f32.mrb[202].mxu0 }
 0x361   : > { %v8744_v19 = vadd.f32 %v4027_v22, %v3790_v61  ;;  %v6445_v55 = vpop.f32.mrb[203].mxu0 }
 0x362   : > { %v3749_v16 = vpop.f32.mrb[176].mxu1 }
 0x363   : > { %v3791_v47 = vadd.f32 %v3749_v16, %v8709_v34  ;;  %v6406_v53 = vpop.f32.mrb[177].mxu1 }
 0x364   : > { %v3752_v56 = vpop.f32.mrb[178].mxu1 }
 0x365   : > { %v3792_v39 = vadd.f32 %v3752_v56, %v8711_v29  ;;  %v6407_v63 = vpop.f32.mrb[179].mxu1 }
 0x366   : > { %v4032_v59 = vpop.f32.mrb[204].mxu0 }
 0x367   : > { %v8748_v33 = vadd.f32 %v4032_v59, %v3791_v47  ;;  %v6448_v40 = vpop.f32.mrb[205].mxu0 }
 0x368   : > { %v4035_v32 = vpop.f32.mrb[206].mxu0 }
 0x369   : > { %v8750_v37 = vadd.f32 %v4035_v32, %v3792_v39  ;;  %v6449_v41 = vpop.f32.mrb[207].mxu0 }
 0x36a   : > { %v3757_v7 = vpop.f32.mrb[180].mxu1 }
 0x36b   : > { %v3793_v57 = vadd.f32 %v3757_v7, %v8715_v54  ;;  %v6410_v1 = vpop.f32.mrb[181].mxu1 }
 0x36c   : > { %v3760_v4 = vpop.f32.mrb[182].mxu1 }
 0x36d   : > { %v3794_v34 = vadd.f32 %v3760_v4, %v8717_v31  ;;  %v6411_v3 = vpop.f32.mrb[183].mxu1 }
 0x36e   : > { %v4040_v44 = vpop.f32.mrb[208].mxu0 }
 0x36f   : > { %v8754_v27 = vadd.f32 %v4040_v44, %v3793_v57  ;;  %v6452_v29 = vpop.f32.mrb[209].mxu0 }
 0x370   : > { %v4043_v45 = vpop.f32.mrb[210].mxu0 }
 0x371   : > { %v8756_v58 = vadd.f32 %v4043_v45, %v3794_v34  ;;  %v6453_v35 = vpop.f32.mrb[211].mxu0 }
 0x372   : > { %v3765_v15 = vpop.f32.mrb[184].mxu1 }
 0x373   : > { %v3795_v62 = vadd.f32 %v3765_v15, %v8721_v18  ;;  %v6414_v51 = vpop.f32.mrb[185].mxu1 }
 0x374   : > { %v3768_v60 = vpop.f32.mrb[186].mxu1 }
 0x375   : > { %v3796_v54 = vadd.f32 %v3768_v60, %v8723_v26  ;;  %v6415_v21 = vpop.f32.mrb[187].mxu1 }
 0x376   : > { %v4048_v23 = vpop.f32.mrb[212].mxu0 }
 0x377   : > { %v8760_v38 = vadd.f32 %v4048_v23, %v3795_v62  ;;  %v6456_v31 = vpop.f32.mrb[213].mxu0 }
 0x378   : > { %v4051_v12 = vpop.f32.mrb[214].mxu0 }
 0x379   : > { %v8762_v8 = vadd.f32 %v4051_v12, %v3796_v54  ;;  %v6457_v25 = vpop.f32.mrb[215].mxu0 }
 0x37a   : > { %v3773_v61 = vpop.f32.mrb[188].mxu1 }
 0x37b   : > { %v3797_v0 = vadd.f32 %v3773_v61, %v8727_v11  ;;  %v6418_v14 = vpop.f32.mrb[189].mxu1 }
 0x37c   : > { %v3776_v6 = vpop.f32.mrb[190].mxu1 }
 0x37d   : > { %v3798_v18 = vadd.f32 %v3776_v6, %v8729_v20  ;;  %v6419_v22 = vpop.f32.mrb[191].mxu1 }
 0x37e   : > { %v4056_v55 = vpop.f32.mrb[216].mxu0 }
 0x37f   : > { %v8766_v16 = vadd.f32 %v4056_v55, %v3797_v0  ;;  %v6460_v26 = vpop.f32.mrb[217].mxu0 }
 0x380   : > { %v4059_v47 = vpop.f32.mrb[218].mxu0 }
 0x381   : > { %v8768_v53 = vadd.f32 %v4059_v47, %v3798_v18  ;;  %v6461_v56 = vpop.f32.mrb[219].mxu0 }
 0x382   : > { %v3781_v39 = vpop.f32.mrb[192].mxu1 }
 0x383   : > { %v3799_v63 = vadd.f32 %v3781_v39, %v8732_v48  ;;  %v6422_v59 = vpop.f32.mrb[193].mxu1 }
 0x384   : > { %v3784_v40 = vpop.f32.mrb[194].mxu1 }
 0x385   : > { %v6423_v32 = vpop.f32.mrb[195].mxu1 }
 0x386   : > { %v4064_v11 = vpop.f32.mrb[220].mxu0 }
 0x387   : > { %v8771_v41 = vadd.f32 %v4064_v11, %v3799_v63  ;;  %v6464_v7 = vpop.f32.mrb[221].mxu0 }
 0x388   : > { %v4067_v20 = vpop.f32.mrb[222].mxu0 }
 0x389   : > { %v6465_v57 = vpop.f32.mrb[223].mxu0 }
 0x38a   : > { %v4299_v1 = vpop.f32.mrb[196].mxu1 }
 0x38b   : > { %v4353_v4 = vadd.f32 %v4299_v1, %v8736_v28  ;;  %v6482_v34 = vpop.f32.mrb[197].mxu1 }
 0x38c   : > { %v4302_v3 = vpop.f32.mrb[198].mxu1 }
 0x38d   : > { %v4354_v44 = vadd.f32 %v4302_v3, %v8738_v9  ;;  %v6483_v29 = vpop.f32.mrb[199].mxu1 }
 0x38e   : > { %v4495_v45 = vpop.f32.mrb[224].mxu0 }
 0x38f   : > { %v8775_v35 = vadd.f32 %v4495_v45, %v4353_v4  ;;  %v6524_v48 = vpop.f32.mrb[225].mxu0 }
 0x390   : > { %v4498_v15 = vpop.f32.mrb[226].mxu0 }
 0x391   : > { %v8777_v62 = vadd.f32 %v4498_v15, %v4354_v44  ;;  %v6525_v51 = vpop.f32.mrb[227].mxu0 }
 0x392   : > { %v4307_v60 = vpop.f32.mrb[200].mxu1 }
 0x393   : > { %v4355_v54 = vadd.f32 %v4307_v60, %v8742_v2  ;;  %v6486_v21 = vpop.f32.mrb[201].mxu1 }
 0x394   : > { %v4310_v23 = vpop.f32.mrb[202].mxu1 }
 0x395   : > { %v4356_v28 = vadd.f32 %v4310_v23, %v8744_v19  ;;  %v6487_v31 = vpop.f32.mrb[203].mxu1 }
 0x396   : > { %v4503_v12 = vpop.f32.mrb[228].mxu0 }
 0x397   : > { %v8781_v25 = vadd.f32 %v4503_v12, %v4355_v54  ;;  %v6528_v9 = vpop.f32.mrb[229].mxu0 }
 0x398   : > { %v4506_v61 = vpop.f32.mrb[230].mxu0 }
 0x399   : > { %v8783_v0 = vadd.f32 %v4506_v61, %v4356_v28  ;;  %v6529_v14 = vpop.f32.mrb[231].mxu0 }
 0x39a   : > { %v4315_v6 = vpop.f32.mrb[204].mxu1 }
 0x39b   : > { %v4357_v18 = vadd.f32 %v4315_v6, %v8748_v33  ;;  %v6490_v22 = vpop.f32.mrb[205].mxu1 }
 0x39c   : > { %v4318_v55 = vpop.f32.mrb[206].mxu1 }
 0x39d   : > { %v4358_v2 = vadd.f32 %v4318_v55, %v8750_v37  ;;  %v6491_v26 = vpop.f32.mrb[207].mxu1 }
 0x39e   : > { %v4511_v47 = vpop.f32.mrb[232].mxu0 }
 0x39f   : > { %v8787_v56 = vadd.f32 %v4511_v47, %v4357_v18  ;;  %v6532_v19 = vpop.f32.mrb[233].mxu0 }
 0x3a0   : > { %v4514_v39 = vpop.f32.mrb[234].mxu0 }
 0x3a1   : > { %v8789_v63 = vadd.f32 %v4514_v39, %v4358_v2  ;;  %v6533_v59 = vpop.f32.mrb[235].mxu0 }
 0x3a2   : > { %v4323_v40 = vpop.f32.mrb[208].mxu1 }
 0x3a3   : > { %v4359_v32 = vadd.f32 %v4323_v40, %v8754_v27  ;;  %v6494_v11 = vpop.f32.mrb[209].mxu1 }
 0x3a4   : > { %v4326_v7 = vpop.f32.mrb[210].mxu1 }
 0x3a5   : > { %v4360_v33 = vadd.f32 %v4326_v7, %v8756_v58  ;;  %v6495_v20 = vpop.f32.mrb[211].mxu1  ;;  %v8815_v7 = vld [vmem:[%s8896_s4] ss:$0 sm:$0xff] }
 0x3a6   : > { %v4519_v57 = vpop.f32.mrb[236].mxu0 }
 0x3a7   : > { %v8793_v1 = vadd.f32 %v4519_v57, %v4359_v32  ;;  %v6536_v37 = vpop.f32.mrb[237].mxu0 }
 0x3a8   : > { %v4522_v4 = vpop.f32.mrb[238].mxu0 }
 0x3a9   : > { %v8795_v34 = vadd.f32 %v4522_v4, %v4360_v33  ;;  %v6537_v3 = vpop.f32.mrb[239].mxu0 }
 0x3aa   : > { %v4331_v44 = vpop.f32.mrb[212].mxu1 }
 0x3ab   : > { %v4361_v29 = vadd.f32 %v4331_v44, %v8760_v38  ;;  %v6498_v45 = vpop.f32.mrb[213].mxu1 }
 0x3ac   : > { %v4334_v48 = vpop.f32.mrb[214].mxu1 }
 0x3ad   : > { %v4362_v27 = vadd.f32 %v4334_v48, %v8762_v8  ;;  %v6499_v15 = vpop.f32.mrb[215].mxu1 }
 0x3ae   : > { %v4527_v51 = vpop.f32.mrb[240].mxu0 }
 0x3af   : > { %v8799_v60 = vadd.f32 %v4527_v51, %v4361_v29  ;;  %v6540_v58 = vpop.f32.mrb[241].mxu0 }
 0x3b0   : > { %v4530_v54 = vpop.f32.mrb[242].mxu0 }
 0x3b1   : > { %v8801_v21 = vadd.f32 %v4530_v54, %v4362_v27  ;;  %v6541_v23 = vpop.f32.mrb[243].mxu0 }
 0x3b2   : > { %v4339_v28 = vpop.f32.mrb[216].mxu1 }
 0x3b3   : > { %v4363_v31 = vadd.f32 %v4339_v28, %v8766_v16  ;;  %v6502_v12 = vpop.f32.mrb[217].mxu1 }
 0x3b4   : > { %v4342_v9 = vpop.f32.mrb[218].mxu1 }
 0x3b5   : > { %v4364_v38 = vadd.f32 %v4342_v9, %v8768_v53  ;;  %v6503_v61 = vpop.f32.mrb[219].mxu1 }
 0x3b6   : > { %v4535_v14 = vpop.f32.mrb[244].mxu0 }
 0x3b7   : > { %v8805_v6 = vadd.f32 %v4535_v14, %v4363_v31  ;;  %v6544_v8 = vpop.f32.mrb[245].mxu0 }
 0x3b8   : > { %v4538_v18 = vpop.f32.mrb[246].mxu0 }
 0x3b9   : > { %v8807_v22 = vadd.f32 %v4538_v18, %v4364_v38  ;;  %v6545_v55 = vpop.f32.mrb[247].mxu0 }
 0x3ba   : > { %v4347_v2 = vpop.f32.mrb[220].mxu1 }
 0x3bb   : > { %v4365_v26 = vadd.f32 %v4347_v2, %v8771_v41  ;;  %v6506_v47 = vpop.f32.mrb[221].mxu1 }
 0x3bc   : > { %v4350_v19 = vpop.f32.mrb[222].mxu1 }
 0x3bd   : > { %v6507_v39 = vpop.f32.mrb[223].mxu1 }
 0x3be   : > { %v4543_v16 = vpop.f32.mrb[248].mxu0 }
 0x3bf   : > { %v8810_v59 = vadd.f32 %v4543_v16, %v4365_v26  ;;  %v6548_v40 = vpop.f32.mrb[249].mxu0 }
 0x3c0   : > { %v4546_v53 = vpop.f32.mrb[250].mxu0 }
 0x3c1   : > { %v6549_v32 = vpop.f32.mrb[251].mxu0 }
 0x3c2   : > { %v4715_v11 = vpop.f32.mrb[224].mxu1 }
 0x3c3   : > { %v4769_v33 = vadd.f32 %v4715_v11, %v8775_v35  ;;  %v6566_v20 = vpop.f32.mrb[225].mxu1 }
 0x3c4   : > { %v4718_v41 = vpop.f32.mrb[226].mxu1 }
 0x3c5   : > { %v4789_v57 = vadd.f32 %v8815_v7, %v4769_v33  ;;  %v4770_v37 = vadd.f32 %v4718_v41, %v8777_v62  ;;  %v6567_v4 = vpop.f32.mrb[227].mxu1 }
 0x3c7   : > { %v4802_v3 = vmax.f32 %v4789_v57, 0.0  ;;  %v4790_v44 = vadd.f32 %v8815_v7, %v4770_v37 }
 0x3c9   : > { %v4815_v29 = vmul.f32 %v4802_v3, %v7964_v10  ;;  %v4803_v45 = vmax.f32 %v4790_v44, 0.0 }
 0x3ca   : > { %v4723_v48 = vpop.f32.mrb[228].mxu1 }
 0x3cb   : > { %v5544_v27 = vpack.c.bf16 %v4815_v29, %v4815_v29  ;;  %v4816_v15 = vmul.f32 %v4803_v45, %v7970_v13  ;;  %v4771_v35 = vadd.f32 %v4723_v48, %v8781_v25  ;;  %v6570_v51 = vpop.f32.mrb[229].mxu1 }
 0x3cc   : > { %v4726_v58 = vpop.f32.mrb[230].mxu1 }
 0x3cd   : > { %4883 = vst.msk [vmem:[%s7562_s24 + $0x8] sm:$0xf] %vm2573_vm5, %v5544_v27  ;;  %v5545_v62 = vpack.c.bf16 %v4816_v15, %v4816_v15  ;;  %v4791_v54 = vadd.f32 %v8815_v7, %v4771_v35  ;;  %v4772_v23 = vadd.f32 %v4726_v58, %v8783_v0  ;;  %v6571_v28 = vpop.f32.mrb[231].mxu1 }
 0x3cf   : > { %4884 = vst.msk [vmem:[%s7562_s24 + $0xc] sm:$0xf] %vm2573_vm5, %v5545_v62  ;;  %v4804_v10 = vmax.f32 %v4791_v54, 0.0  ;;  %v4792_v31 = vadd.f32 %v8815_v7, %v4772_v23 }
 0x3d1   : > { %v4817_v13 = vmul.f32 %v4804_v10, %v7974_v46  ;;  %v4805_v25 = vmax.f32 %v4792_v31, 0.0 }
 0x3d2   : > { %v4731_v12 = vpop.f32.mrb[232].mxu1 }
 0x3d3   : > { %v5546_v9 = vpack.c.bf16 %v4817_v13, %v4817_v13  ;;  %v4818_v38 = vmul.f32 %v4805_v25, %v7982_v50  ;;  %v4773_v61 = vadd.f32 %v4731_v12, %v8787_v56  ;;  %v6574_v14 = vpop.f32.mrb[233].mxu1 }
 0x3d4   : > { %v4734_v8 = vpop.f32.mrb[234].mxu1 }
 0x3d5   : > { %4885 = vst.msk [vmem:[%s7562_s24 + $0x10] sm:$0xf] %vm2573_vm5, %v5546_v9  ;;  %v5547_v0 = vpack.c.bf16 %v4818_v38, %v4818_v38  ;;  %v4793_v18 = vadd.f32 %v8815_v7, %v4773_v61  ;;  %v4774_v55 = vadd.f32 %v4734_v8, %v8789_v63  ;;  %v6575_v2 = vpop.f32.mrb[235].mxu1 }
 0x3d7   : > { %4886 = vst.msk [vmem:[%s7562_s24 + $0x14] sm:$0xf] %vm2573_vm5, %v5547_v0  ;;  %v4806_v46 = vmax.f32 %v4793_v18, 0.0  ;;  %v4794_v26 = vadd.f32 %v8815_v7, %v4774_v55 }
 0x3d9   : > { %v4819_v50 = vmul.f32 %v4806_v46, %v7996_v52  ;;  %v4807_v56 = vmax.f32 %v4794_v26, 0.0 }
 0x3da   : > { %v4739_v47 = vpop.f32.mrb[236].mxu1 }
 0x3db   : > { %v5548_v19 = vpack.c.bf16 %v4819_v50, %v4819_v50  ;;  %v4820_v39 = vmul.f32 %v4807_v56, %v8005_v30  ;;  %v4775_v16 = vadd.f32 %v4739_v47, %v8793_v1  ;;  %v6578_v40 = vpop.f32.mrb[237].mxu1 }
 0x3dc   : > { %v4742_v53 = vpop.f32.mrb[238].mxu1 }
 0x3dd   : > { %4887 = vst.msk [vmem:[%s7562_s24 + $0x18] sm:$0xf] %vm2573_vm5, %v5548_v19  ;;  %v5549_v63 = vpack.c.bf16 %v4820_v39, %v4820_v39  ;;  %v4795_v32 = vadd.f32 %v8815_v7, %v4775_v16  ;;  %v4776_v11 = vadd.f32 %v4742_v53, %v8795_v34  ;;  %v6579_v33 = vpop.f32.mrb[239].mxu1 }
 0x3df   : > { %4888 = vst.msk [vmem:[%s7562_s24 + $0x1c] sm:$0xf] %vm2573_vm5, %v5549_v63  ;;  %v4808_v52 = vmax.f32 %v4795_v32, 0.0  ;;  %v4796_v20 = vadd.f32 %v8815_v7, %v4776_v11 }
 0x3e1   : > { %v4821_v30 = vmul.f32 %v4808_v52, %v8033_v42  ;;  %v4809_v1 = vmax.f32 %v4796_v20, 0.0 }
 0x3e2   : > { %v4747_v41 = vpop.f32.mrb[240].mxu1 }
 0x3e3   : > { %v5550_v57 = vpack.c.bf16 %v4821_v30, %v4821_v30  ;;  %v4822_v37 = vmul.f32 %v4809_v1, %v8048_v43  ;;  %v4777_v4 = vadd.f32 %v4747_v41, %v8799_v60  ;;  %v6582_v3 = vpop.f32.mrb[241].mxu1 }
 0x3e4   : > { %v4750_v44 = vpop.f32.mrb[242].mxu1 }
 0x3e5   : > { %4889 = vst.msk [vmem:[%s7562_s24 + $0x20] sm:$0xf] %vm2573_vm5, %v5550_v57  ;;  %v5551_v34 = vpack.c.bf16 %v4822_v37, %v4822_v37  ;;  %v4797_v29 = vadd.f32 %v8815_v7, %v4777_v4  ;;  %v4778_v45 = vadd.f32 %v4750_v44, %v8801_v21  ;;  %v6583_v48 = vpop.f32.mrb[243].mxu1 }
 0x3e7   : > { %4890 = vst.msk [vmem:[%s7562_s24 + $0x24] sm:$0xf] %vm2573_vm5, %v5551_v34  ;;  %v4810_v42 = vmax.f32 %v4797_v29, 0.0  ;;  %v4798_v27 = vadd.f32 %v8815_v7, %v4778_v45 }
 0x3e9   : > { %v4823_v43 = vmul.f32 %v4810_v42, %v8078_v36  ;;  %v4811_v60 = vmax.f32 %v4798_v27, 0.0 }
 0x3ea   : > { %v4755_v15 = vpop.f32.mrb[244].mxu1 }
 0x3eb   : > { %v5552_v35 = vpack.c.bf16 %v4823_v43, %v4823_v43  ;;  %v4824_v51 = vmul.f32 %v4811_v60, %v8093_v24  ;;  %v4779_v58 = vadd.f32 %v4755_v15, %v8805_v6  ;;  %v6586_v62 = vpop.f32.mrb[245].mxu1 }
 0x3ec   : > { %v4758_v54 = vpop.f32.mrb[246].mxu1 }
 0x3ed   : > { %4891 = vst.msk [vmem:[%s7562_s24 + $0x28] sm:$0xf] %vm2573_vm5, %v5552_v35  ;;  %v5553_v21 = vpack.c.bf16 %v4824_v51, %v4824_v51  ;;  %v4799_v23 = vadd.f32 %v8815_v7, %v4779_v58  ;;  %v4780_v28 = vadd.f32 %v4758_v54, %v8807_v22  ;;  %v6587_v10 = vpop.f32.mrb[247].mxu1 }
 0x3ef   : > { %4892 = vst.msk [vmem:[%s7562_s24 + $0x2c] sm:$0xf] %vm2573_vm5, %v5553_v21  ;;  %v4812_v36 = vmax.f32 %v4799_v23, 0.0  ;;  %v4800_v31 = vadd.f32 %v8815_v7, %v4780_v28 }
 0x3f1   : > { %v4825_v24 = vmul.f32 %v4812_v36, %v8123_v5  ;;  %v4813_v6 = vmax.f32 %v4800_v31, 0.0 }
 0x3f2   : > { %v4763_v13 = vpop.f32.mrb[248].mxu1 }
 0x3f3   : > { %v5554_v25 = vpack.c.bf16 %v4825_v24, %v4825_v24  ;;  %v4826_v12 = vmul.f32 %v4813_v6, %v8138_v17  ;;  %v4781_v9 = vadd.f32 %v4763_v13, %v8810_v59  ;;  %v6590_v38 = vpop.f32.mrb[249].mxu1 }
 0x3f4   : > { %v4766_v61 = vpop.f32.mrb[250].mxu1 }
 0x3f5   : > { %4893 = vst.msk [vmem:[%s7562_s24 + $0x30] sm:$0xf] %vm2573_vm5, %v5554_v25  ;;  %v5555_v22 = vpack.c.bf16 %v4826_v12, %v4826_v12  ;;  %v4801_v14 = vadd.f32 %v8815_v7, %v4781_v9  ;;  %v6591_v8 = vpop.f32.mrb[251].mxu1 }
 0x3f7   : > { %4894 = vst.msk [vmem:[%s7562_s24 + $0x34] sm:$0xf] %vm2573_vm5, %v5555_v22  ;;  %v4814_v0 = vmax.f32 %v4801_v14, 0.0 }
 0x3f9   : > { %v4827_v5 = vmul.f32 %v4814_v0, %v8163_v49 }
 0x3fb   : > { %v5556_v18 = vpack.c.bf16 %v4827_v5, %v4827_v5 }
 0x3fd   : > { %4895 = vst.msk [vmem:[%s7562_s24 + $0x38] sm:$0xf] %vm2573_vm5, %v5556_v18 }
 0x3fe PF: > { %p13_p9 = scmp.ge.s32.totalorder %s6916_s25, 4   ;;  %s8900_s21 = smov %s6855_s22 }
 0x3ff   : > { %s8901_s22 = smov %s6925_s28  ;;  %s8902_s23 = smov %s6916_s25 }
 0x400   :  { %15 = sbr.rel (!%p13_p9) target bundleno = 2 (0x2), region = 136 }

</bundles_post_ra>
